<compile_context>
chip_gen: v6e
topology: v6e:2x2x1
jax: 0.10.0
libtpu: 0.0.40
codegen_flags: <defaults>
</compile_context>

<pallas_src>
import numpy as np
import jax
import jax.numpy as jnp
from jax import lax
from jax.experimental import pallas as pl
from jax.experimental.pallas import tpu as pltpu


def make_psa_kernel(S, H, W, cs, pad, Wp):
    """Builds the fused PSA kernel for one batch element (channel-major)."""
    HWp = H * Wp

    def kernel(xflat_ref, *refs):
        wflat_refs = refs[:S]                                   # S refs, (cs, k*k*cs)
        b_ref, w1t_ref, w2t_ref, mask_ref, out_ref, col_ref = refs[S:]

        inv_hw = 1.0 / float(H * W)
        mask = mask_ref[...]                                    # (1, HWp), 1.0 on valid cols

        conv_outs = []
        sig_cols = []
        for s in range(S):
            k = 2 * (s + 1) + 1                                 # 3, 5, 7, 9
            off = pad - (s + 1)                                 # offset inside pad-`pad` image
            K = k * k * cs

            # ---- im2col: stage k*k shifted lane-slices into the VMEM scratch ----
            for dy in range(k):
                for dx in range(k):
                    base = (off + dy) * Wp + (off + dx)
                    r = (dy * k + dx) * cs                      # 8-row aligned
                    col_ref[r:r + cs, :] = xflat_ref[0, s, :, base:base + HWp]

            # ---- one big-K matmul per scale: (cs, K) @ (K, HWp) -> (cs, HWp) ----
            acc = jnp.dot(wflat_refs[s][...], col_ref[0:K, :],
                          preferred_element_type=jnp.float32)
            acc = acc + b_ref[s]                                # bias, (cs, 1)

            # ---- SE block (f32, tiny) ----
            pool = jnp.sum(acc * mask, axis=1, keepdims=True) * inv_hw          # (cs, 1)
            h1 = jnp.maximum(
                jnp.sum(w1t_ref[s] * pool, axis=0, keepdims=True), 0.0)          # (1, cr)
            h2 = jnp.sum(w2t_ref[s] * h1, axis=1, keepdims=True)                 # (cs, 1)
            sig = pl.reciprocal(1.0 + jnp.exp(-h2), approx=True)                 # sigmoid

            conv_outs.append(acc)
            sig_cols.append(sig)

        # ---- softmax across the S scale groups (per channel) ----
        se = jnp.concatenate(sig_cols, axis=1)                                   # (cs, S)
        m = jnp.max(se, axis=1, keepdims=True)
        e = jnp.exp(se - m)
        soft = e * pl.reciprocal(jnp.sum(e, axis=1, keepdims=True), approx=True)

        # ---- re-weight and write out (lane-dense (cs, HWp) stores) ----
        for s in range(S):
            out_ref[0, s] = (conv_outs[s] * soft[:, s:s + 1]).astype(out_ref.dtype)

    return kernel


def psa_pallas(x, conv_ws, conv_b, w1, w2, *, S=4):
    """x: (B, C, H, W) NCHW float32. Returns (B, C, H, W)."""
    B, C, H, W = x.shape
    cs = C // S
    cr = w1.shape[1]
    pad = S                                     # max padding (largest kernel is 2S+1)
    Hp, Wp = H + 2 * pad, W + 2 * pad
    HWp = H * Wp

    # NCHW -> channel-major per-group; zero-pad spatial; flatten spatial.
    # (reshapes are free; only the pads touch memory — no HBM transposes)
    spc = x.reshape(B, S, cs, H, W)
    xpad = jnp.pad(spc, ((0, 0), (0, 0), (0, 0), (pad, pad), (pad, pad)))
    xflat = xpad.reshape(B, S, cs, Hp * Wp)
    max_base = 2 * pad * Wp + 2 * pad           # largest tap offset
    L = -(-max(Hp * Wp, max_base + HWp) // 128) * 128        # lane-dense length
    xflat = jnp.pad(xflat, ((0, 0), (0, 0), (0, 0), (0, L - Hp * Wp)))

    # Matmul-ready, lane-dense conv weights: (cs_out, k*k*cs_in) per scale.
    wflats = []
    for s in range(S):
        k = 2 * (s + 1) + 1
        wflats.append(conv_ws[s].reshape(k * k * cs, cs).T)    # (cs, k*k*cs)
    bias = conv_b.reshape(S, cs, 1)
    w1t = jnp.transpose(w1, (0, 2, 1))          # (S, cs, cr)
    w2t = jnp.transpose(w2, (0, 2, 1))          # (S, cs, cr)

    # Valid-column mask over the padded-width flattened spatial axis.
    col_idx = np.arange(HWp) % Wp
    mask = jnp.asarray((col_idx < W).astype(np.float32)).reshape(1, HWp)

    kernel = make_psa_kernel(S, H, W, cs, pad, Wp)
    kmax = 2 * S + 1

    in_specs = [pl.BlockSpec((1, S, cs, L), lambda b: (b, 0, 0, 0))]
    for s in range(S):
        in_specs.append(pl.BlockSpec(wflats[s].shape, lambda b: (0, 0)))
    in_specs.append(pl.BlockSpec((S, cs, 1), lambda b: (0, 0, 0)))
    in_specs.append(pl.BlockSpec((S, cs, cr), lambda b: (0, 0, 0)))
    in_specs.append(pl.BlockSpec((S, cs, cr), lambda b: (0, 0, 0)))
    in_specs.append(pl.BlockSpec((1, HWp), lambda b: (0, 0)))
    out_spec = pl.BlockSpec((1, S, cs, HWp), lambda b: (b, 0, 0, 0))

    # TODO(synk): for production sizes (H=W=56, C>=256) add a spatial tile axis
    # to the grid (grid=(B, H//th)) sized so blocks + im2col scratch stay under
    # ~32 MiB on v7x (64 MiB VMEM, 2 TCs); not needed at these toy shapes.
    out = pl.pallas_call(
        kernel,
        out_shape=jax.ShapeDtypeStruct((B, S, cs, HWp), x.dtype),
        grid_spec=pltpu.PrefetchScalarGridSpec(
            num_scalar_prefetch=0,
            grid=(B,),
            in_specs=in_specs,
            out_specs=out_spec,
            scratch_shapes=[pltpu.VMEM((kmax * kmax * cs, HWp), jnp.float32)]),
        compiler_params=pltpu.CompilerParams(
            dimension_semantics=("parallel",)),
    )(xflat, *wflats, bias, w1t, w2t, mask)

    # Drop the padded-width garbage columns and restore NCHW (reshapes free;
    # the slice is one cheap pass over the small output).
    out = out.reshape(B, S, cs, H, Wp)[:, :, :, :, :W]
    return out.reshape(B, C, H, W)


def psa_ref(x, conv_ws, conv_b, w1, w2, *, S=4):
    """Pure-JAX reference mirroring the PyTorch forward."""
    B, C, H, W = x.shape
    cs = C // S
    spc = x.reshape(B, S, cs, H, W)
    convs, sigs = [], []
    for s in range(S):
        p = s + 1
        w_oihw = jnp.transpose(conv_ws[s], (3, 2, 0, 1))            # (co, ci, kh, kw)
        y = lax.conv_general_dilated(
            spc[:, s], w_oihw, (1, 1), [(p, p), (p, p)],
            dimension_numbers=('NCHW', 'OIHW', 'NCHW'),
            precision=lax.Precision.HIGHEST)
        y = y + conv_b[s].reshape(1, cs, 1, 1)
        pool = y.mean(axis=(2, 3))                                  # (B, cs)
        h1 = jnp.maximum(pool @ w1[s].T, 0.0)                       # (B, cr)
        h2 = h1 @ w2[s]                                             # (B, cs)
        sigs.append(jax.nn.sigmoid(h2))
        convs.append(y)
    se = jnp.stack(sigs, axis=1)                                    # (B, S, cs)
    soft = jax.nn.softmax(se, axis=1)
    out = jnp.stack(convs, axis=1) * soft[:, :, :, None, None]
    return out.reshape(B, C, H, W)


if __name__ == "__main__":
    S, reduction = 4, 4
    B, C, H, W = 2, 32, 16, 16
    cs = C // S
    cr = C // (S * reduction)

    key = jax.random.PRNGKey(0)
    keys = jax.random.split(key, 4 + S)

    x = jax.random.normal(keys[0], (B, C, H, W), jnp.float32)

    # Deterministic synthetic parameters (kaiming-like scaling).
    conv_ws = []
    for s in range(S):
        k = 2 * (s + 1) + 1
        fan_in = k * k * cs
        conv_ws.append(
            jax.random.normal(keys[1 + s], (k, k, cs, cs), jnp.float32)
            / np.sqrt(fan_in))
    conv_b = 0.1 * jax.random.normal(keys[1 + S], (S, cs), jnp.float32)
    w1 = jax.random.normal(keys[2 + S], (S, cr, cs), jnp.float32) / np.sqrt(cs)
    w2 = jax.random.normal(keys[3 + S], (S, cr, cs), jnp.float32) / np.sqrt(cr)

    out = psa_pallas(x, conv_ws, conv_b, w1, w2, S=S)
    out = jax.block_until_ready(out)

    ref = jax.block_until_ready(psa_ref(x, conv_ws, conv_b, w1, w2, S=S))

    assert out.shape == (B, C, H, W)
    if not np.allclose(np.asarray(out), np.asarray(ref), atol=1e-2, rtol=1e-2):
        raise AssertionError("Pallas PSA output does not match reference")

    print("KERNEL_OK")
</pallas_src>

<mosaic_0001>
module attributes {stable_mosaic.version = 11 : i64} {
  func.func @kernel(%arg0: i32, %arg1: memref<1x4x8x640xf32, #tpu.memory_space<vmem>>, %arg2: memref<8x72xf32, #tpu.memory_space<vmem>>, %arg3: memref<8x200xf32, #tpu.memory_space<vmem>>, %arg4: memref<8x392xf32, #tpu.memory_space<vmem>>, %arg5: memref<8x648xf32, #tpu.memory_space<vmem>>, %arg6: memref<4x8x1xf32, #tpu.memory_space<vmem>>, %arg7: memref<4x8x2xf32, #tpu.memory_space<vmem>>, %arg8: memref<4x8x2xf32, #tpu.memory_space<vmem>>, %arg9: memref<1x384xf32, #tpu.memory_space<vmem>>, %arg10: memref<1x4x8x384xf32, #tpu.memory_space<vmem>>, %arg11: memref<648x384xf32, #tpu.memory_space<vmem>>) attributes {dimension_semantics = [#tpu.dimension_semantics<parallel>], iteration_bounds = array<i64: 2>, scalar_prefetch = 0 : i64, scratch_operands = 1 : i64, tpu.core_type = #tpu.core_type<tc>, window_params = [{transform_indices = @transform_0, window_bounds = array<i64: 1, 4, 8, 640>}, {pipeline_mode = #tpu.pipeline_mode<synchronous>, transform_indices = @transform_1, window_bounds = array<i64: 8, 72>}, {pipeline_mode = #tpu.pipeline_mode<synchronous>, transform_indices = @transform_2, window_bounds = array<i64: 8, 200>}, {pipeline_mode = #tpu.pipeline_mode<synchronous>, transform_indices = @transform_3, window_bounds = array<i64: 8, 392>}, {pipeline_mode = #tpu.pipeline_mode<synchronous>, transform_indices = @transform_4, window_bounds = array<i64: 8, 648>}, {pipeline_mode = #tpu.pipeline_mode<synchronous>, transform_indices = @transform_5, window_bounds = array<i64: 4, 8, 1>}, {pipeline_mode = #tpu.pipeline_mode<synchronous>, transform_indices = @transform_6, window_bounds = array<i64: 4, 8, 2>}, {pipeline_mode = #tpu.pipeline_mode<synchronous>, transform_indices = @transform_7, window_bounds = array<i64: 4, 8, 2>}, {pipeline_mode = #tpu.pipeline_mode<synchronous>, transform_indices = @transform_8, window_bounds = array<i64: 1, 384>}, {transform_indices = @transform_9, window_bounds = array<i64: 1, 4, 8, 384>}]} {
    %c0 = arith.constant 0 : index
    %c0_0 = arith.constant 0 : index
    %0 = vector.load %arg9[%c0, %c0_0] : memref<1x384xf32, #tpu.memory_space<vmem>>, vector<1x384xf32>
    %c0_1 = arith.constant 0 : index
    %c0_2 = arith.constant 0 : index
    %c0_3 = arith.constant 0 : index
    %c75 = arith.constant 75 : index
    %1 = vector.load %arg1[%c0_1, %c0_2, %c0_3, %c75] : memref<1x4x8x640xf32, #tpu.memory_space<vmem>>, vector<1x1x8x384xf32>
    %2 = vector.shape_cast %1 : vector<1x1x8x384xf32> to vector<8x384xf32>
    %c0_4 = arith.constant 0 : index
    %c0_5 = arith.constant 0 : index
    %3 = vector.load %arg11[%c0_4, %c0_5] : memref<648x384xf32, #tpu.memory_space<vmem>>, vector<8x384xf32>
    tpu.vector_store %arg11[%c0_4, %c0_5], %2 {strides = array<i32>} : memref<648x384xf32, #tpu.memory_space<vmem>>, vector<8x384xf32>,
    %c0_6 = arith.constant 0 : index
    %c0_7 = arith.constant 0 : index
    %c0_8 = arith.constant 0 : index
    %c76 = arith.constant 76 : index
    %4 = vector.load %arg1[%c0_6, %c0_7, %c0_8, %c76] : memref<1x4x8x640xf32, #tpu.memory_space<vmem>>, vector<1x1x8x384xf32>
    %5 = vector.shape_cast %4 : vector<1x1x8x384xf32> to vector<8x384xf32>
    %c8 = arith.constant 8 : index
    %c0_9 = arith.constant 0 : index
    %6 = vector.load %arg11[%c8, %c0_9] : memref<648x384xf32, #tpu.memory_space<vmem>>, vector<8x384xf32>
    tpu.vector_store %arg11[%c8, %c0_9], %5 {strides = array<i32>} : memref<648x384xf32, #tpu.memory_space<vmem>>, vector<8x384xf32>,
    %c0_10 = arith.constant 0 : index
    %c0_11 = arith.constant 0 : index
    %c0_12 = arith.constant 0 : index
    %c77 = arith.constant 77 : index
    %7 = vector.load %arg1[%c0_10, %c0_11, %c0_12, %c77] : memref<1x4x8x640xf32, #tpu.memory_space<vmem>>, vector<1x1x8x384xf32>
    %8 = vector.shape_cast %7 : vector<1x1x8x384xf32> to vector<8x384xf32>
    %c16 = arith.constant 16 : index
    %c0_13 = arith.constant 0 : index
    %9 = vector.load %arg11[%c16, %c0_13] : memref<648x384xf32, #tpu.memory_space<vmem>>, vector<8x384xf32>
    tpu.vector_store %arg11[%c16, %c0_13], %8 {strides = array<i32>} : memref<648x384xf32, #tpu.memory_space<vmem>>, vector<8x384xf32>,
    %c0_14 = arith.constant 0 : index
    %c0_15 = arith.constant 0 : index
    %c0_16 = arith.constant 0 : index
    %c99 = arith.constant 99 : index
    %10 = vector.load %arg1[%c0_14, %c0_15, %c0_16, %c99] : memref<1x4x8x640xf32, #tpu.memory_space<vmem>>, vector<1x1x8x384xf32>
    %11 = vector.shape_cast %10 : vector<1x1x8x384xf32> to vector<8x384xf32>
    %c24 = arith.constant 24 : index
    %c0_17 = arith.constant 0 : index
    %12 = vector.load %arg11[%c24, %c0_17] : memref<648x384xf32, #tpu.memory_space<vmem>>, vector<8x384xf32>
    tpu.vector_store %arg11[%c24, %c0_17], %11 {strides = array<i32>} : memref<648x384xf32, #tpu.memory_space<vmem>>, vector<8x384xf32>,
    %c0_18 = arith.constant 0 : index
    %c0_19 = arith.constant 0 : index
    %c0_20 = arith.constant 0 : index
    %c100 = arith.constant 100 : index
    %13 = vector.load %arg1[%c0_18, %c0_19, %c0_20, %c100] : memref<1x4x8x640xf32, #tpu.memory_space<vmem>>, vector<1x1x8x384xf32>
    %14 = vector.shape_cast %13 : vector<1x1x8x384xf32> to vector<8x384xf32>
    %c32 = arith.constant 32 : index
    %c0_21 = arith.constant 0 : index
    %15 = vector.load %arg11[%c32, %c0_21] : memref<648x384xf32, #tpu.memory_space<vmem>>, vector<8x384xf32>
    tpu.vector_store %arg11[%c32, %c0_21], %14 {strides = array<i32>} : memref<648x384xf32, #tpu.memory_space<vmem>>, vector<8x384xf32>,
    %c0_22 = arith.constant 0 : index
    %c0_23 = arith.constant 0 : index
    %c0_24 = arith.constant 0 : index
    %c101 = arith.constant 101 : index
    %16 = vector.load %arg1[%c0_22, %c0_23, %c0_24, %c101] : memref<1x4x8x640xf32, #tpu.memory_space<vmem>>, vector<1x1x8x384xf32>
    %17 = vector.shape_cast %16 : vector<1x1x8x384xf32> to vector<8x384xf32>
    %c40 = arith.constant 40 : index
    %c0_25 = arith.constant 0 : index
    %18 = vector.load %arg11[%c40, %c0_25] : memref<648x384xf32, #tpu.memory_space<vmem>>, vector<8x384xf32>
    tpu.vector_store %arg11[%c40, %c0_25], %17 {strides = array<i32>} : memref<648x384xf32, #tpu.memory_space<vmem>>, vector<8x384xf32>,
    %c0_26 = arith.constant 0 : index
    %c0_27 = arith.constant 0 : index
    %c0_28 = arith.constant 0 : index
    %c123 = arith.constant 123 : index
    %19 = vector.load %arg1[%c0_26, %c0_27, %c0_28, %c123] : memref<1x4x8x640xf32, #tpu.memory_space<vmem>>, vector<1x1x8x384xf32>
    %20 = vector.shape_cast %19 : vector<1x1x8x384xf32> to vector<8x384xf32>
    %c48 = arith.constant 48 : index
    %c0_29 = arith.constant 0 : index
    %21 = vector.load %arg11[%c48, %c0_29] : memref<648x384xf32, #tpu.memory_space<vmem>>, vector<8x384xf32>
    tpu.vector_store %arg11[%c48, %c0_29], %20 {strides = array<i32>} : memref<648x384xf32, #tpu.memory_space<vmem>>, vector<8x384xf32>,
    %c0_30 = arith.constant 0 : index
    %c0_31 = arith.constant 0 : index
    %c0_32 = arith.constant 0 : index
    %c124 = arith.constant 124 : index
    %22 = vector.load %arg1[%c0_30, %c0_31, %c0_32, %c124] : memref<1x4x8x640xf32, #tpu.memory_space<vmem>>, vector<1x1x8x384xf32>
    %23 = vector.shape_cast %22 : vector<1x1x8x384xf32> to vector<8x384xf32>
    %c56 = arith.constant 56 : index
    %c0_33 = arith.constant 0 : index
    %24 = vector.load %arg11[%c56, %c0_33] : memref<648x384xf32, #tpu.memory_space<vmem>>, vector<8x384xf32>
    tpu.vector_store %arg11[%c56, %c0_33], %23 {strides = array<i32>} : memref<648x384xf32, #tpu.memory_space<vmem>>, vector<8x384xf32>,
    %c0_34 = arith.constant 0 : index
    %c0_35 = arith.constant 0 : index
    %c0_36 = arith.constant 0 : index
    %c125 = arith.constant 125 : index
    %25 = vector.load %arg1[%c0_34, %c0_35, %c0_36, %c125] : memref<1x4x8x640xf32, #tpu.memory_space<vmem>>, vector<1x1x8x384xf32>
    %26 = vector.shape_cast %25 : vector<1x1x8x384xf32> to vector<8x384xf32>
    %c64 = arith.constant 64 : index
    %c0_37 = arith.constant 0 : index
    %27 = vector.load %arg11[%c64, %c0_37] : memref<648x384xf32, #tpu.memory_space<vmem>>, vector<8x384xf32>
    tpu.vector_store %arg11[%c64, %c0_37], %26 {strides = array<i32>} : memref<648x384xf32, #tpu.memory_space<vmem>>, vector<8x384xf32>,
    %c0_38 = arith.constant 0 : index
    %c0_39 = arith.constant 0 : index
    %28 = vector.load %arg2[%c0_38, %c0_39] : memref<8x72xf32, #tpu.memory_space<vmem>>, vector<8x72xf32>
    %c0_40 = arith.constant 0 : index
    %c0_41 = arith.constant 0 : index
    %29 = vector.load %arg11[%c0_40, %c0_41] : memref<648x384xf32, #tpu.memory_space<vmem>>, vector<72x384xf32>
    %cst = arith.constant dense<0.000000e+00> : vector<8x384xf32>
    %30 = tpu.matmul %28, %29, %cst {dimension_numbers = #tpu.dot_dimension_numbers<[1], [0], [0], [1], [0, 0, 1, 1], [], []>} : vector<8x72xf32>, vector<72x384xf32>, vector<8x384xf32> -> vector<8x384xf32>
    %c0_42 = arith.constant 0 : index
    %c0_43 = arith.constant 0 : index
    %c0_44 = arith.constant 0 : index
    %31 = vector.load %arg6[%c0_42, %c0_43, %c0_44] : memref<4x8x1xf32, #tpu.memory_space<vmem>>, vector<1x8x1xf32>
    %32 = vector.shape_cast %31 : vector<1x8x1xf32> to vector<8x1xf32>
    %33 = vector.broadcast %32 : vector<8x1xf32> to vector<8x384xf32>
    %34 = arith.addf %30, %33 : vector<8x384xf32>
    %35 = vector.broadcast %0 : vector<1x384xf32> to vector<8x384xf32>
    %36 = arith.mulf %34, %35 : vector<8x384xf32>
    %cst_45 = arith.constant dense<0.000000e+00> : vector<8xf32>
    %37 = vector.multi_reduction <add>, %36, %cst_45 [1] : vector<8x384xf32> to vector<8xf32>
    %38 = vector.shape_cast %37 : vector<8xf32> to vector<8x1xf32>
    %cst_46 = arith.constant 3.906250e-03 : f32
    %39 = vector.broadcast %cst_46 : f32 to vector<8x1xf32>
    %40 = arith.mulf %38, %39 : vector<8x1xf32>
    %c0_47 = arith.constant 0 : index
    %c0_48 = arith.constant 0 : index
    %c0_49 = arith.constant 0 : index
    %41 = vector.load %arg7[%c0_47, %c0_48, %c0_49] : memref<4x8x2xf32, #tpu.memory_space<vmem>>, vector<1x8x2xf32>
    %42 = vector.shape_cast %41 : vector<1x8x2xf32> to vector<8x2xf32>
    %43 = vector.broadcast %40 : vector<8x1xf32> to vector<8x2xf32>
    %44 = arith.mulf %42, %43 : vector<8x2xf32>
    %cst_50 = arith.constant dense<0.000000e+00> : vector<2xf32>
    %45 = vector.multi_reduction <add>, %44, %cst_50 [0] : vector<8x2xf32> to vector<2xf32>
    %46 = vector.shape_cast %45 : vector<2xf32> to vector<1x2xf32>
    %cst_51 = arith.constant 0.000000e+00 : f32
    %47 = vector.broadcast %cst_51 : f32 to vector<1x2xf32>
    %48 = arith.maximumf %46, %47 : vector<1x2xf32>
    %c0_52 = arith.constant 0 : index
    %c0_53 = arith.constant 0 : index
    %c0_54 = arith.constant 0 : index
    %49 = vector.load %arg8[%c0_52, %c0_53, %c0_54] : memref<4x8x2xf32, #tpu.memory_space<vmem>>, vector<1x8x2xf32>
    %50 = vector.shape_cast %49 : vector<1x8x2xf32> to vector<8x2xf32>
    %51 = vector.broadcast %48 : vector<1x2xf32> to vector<8x2xf32>
    %52 = arith.mulf %50, %51 : vector<8x2xf32>
    %cst_55 = arith.constant dense<0.000000e+00> : vector<8xf32>
    %53 = vector.multi_reduction <add>, %52, %cst_55 [1] : vector<8x2xf32> to vector<8xf32>
    %54 = vector.shape_cast %53 : vector<8xf32> to vector<8x1xf32>
    %cst_56 = arith.constant 0.000000e+00 : f32
    %55 = vector.broadcast %cst_56 : f32 to vector<8x1xf32>
    %56 = arith.subf %55, %54 : vector<8x1xf32>
    %57 = math.exp %56 : vector<8x1xf32>
    %cst_57 = arith.constant 1.000000e+00 : f32
    %58 = vector.broadcast %cst_57 : f32 to vector<8x1xf32>
    %59 = arith.addf %58, %57 : vector<8x1xf32>
    %60 = tpu.reciprocal %59 {approx = true} : vector<8x1xf32> -> vector<8x1xf32>
    %c0_58 = arith.constant 0 : index
    %c1 = arith.constant 1 : index
    %c0_59 = arith.constant 0 : index
    %c50 = arith.constant 50 : index
    %61 = vector.load %arg1[%c0_58, %c1, %c0_59, %c50] : memref<1x4x8x640xf32, #tpu.memory_space<vmem>>, vector<1x1x8x384xf32>
    %62 = vector.shape_cast %61 : vector<1x1x8x384xf32> to vector<8x384xf32>
    %c0_60 = arith.constant 0 : index
    %c0_61 = arith.constant 0 : index
    %63 = vector.load %arg11[%c0_60, %c0_61] : memref<648x384xf32, #tpu.memory_space<vmem>>, vector<8x384xf32>
    tpu.vector_store %arg11[%c0_60, %c0_61], %62 {strides = array<i32>} : memref<648x384xf32, #tpu.memory_space<vmem>>, vector<8x384xf32>,
    %c0_62 = arith.constant 0 : index
    %c1_63 = arith.constant 1 : index
    %c0_64 = arith.constant 0 : index
    %c51 = arith.constant 51 : index
    %64 = vector.load %arg1[%c0_62, %c1_63, %c0_64, %c51] : memref<1x4x8x640xf32, #tpu.memory_space<vmem>>, vector<1x1x8x384xf32>
    %65 = vector.shape_cast %64 : vector<1x1x8x384xf32> to vector<8x384xf32>
    %c8_65 = arith.constant 8 : index
    %c0_66 = arith.constant 0 : index
    %66 = vector.load %arg11[%c8_65, %c0_66] : memref<648x384xf32, #tpu.memory_space<vmem>>, vector<8x384xf32>
    tpu.vector_store %arg11[%c8_65, %c0_66], %65 {strides = array<i32>} : memref<648x384xf32, #tpu.memory_space<vmem>>, vector<8x384xf32>,
    %c0_67 = arith.constant 0 : index
    %c1_68 = arith.constant 1 : index
    %c0_69 = arith.constant 0 : index
    %c52 = arith.constant 52 : index
    %67 = vector.load %arg1[%c0_67, %c1_68, %c0_69, %c52] : memref<1x4x8x640xf32, #tpu.memory_space<vmem>>, vector<1x1x8x384xf32>
    %68 = vector.shape_cast %67 : vector<1x1x8x384xf32> to vector<8x384xf32>
    %c16_70 = arith.constant 16 : index
    %c0_71 = arith.constant 0 : index
    %69 = vector.load %arg11[%c16_70, %c0_71] : memref<648x384xf32, #tpu.memory_space<vmem>>, vector<8x384xf32>
    tpu.vector_store %arg11[%c16_70, %c0_71], %68 {strides = array<i32>} : memref<648x384xf32, #tpu.memory_space<vmem>>, vector<8x384xf32>,
    %c0_72 = arith.constant 0 : index
    %c1_73 = arith.constant 1 : index
    %c0_74 = arith.constant 0 : index
    %c53 = arith.constant 53 : index
    %70 = vector.load %arg1[%c0_72, %c1_73, %c0_74, %c53] : memref<1x4x8x640xf32, #tpu.memory_space<vmem>>, vector<1x1x8x384xf32>
    %71 = vector.shape_cast %70 : vector<1x1x8x384xf32> to vector<8x384xf32>
    %c24_75 = arith.constant 24 : index
    %c0_76 = arith.constant 0 : index
    %72 = vector.load %arg11[%c24_75, %c0_76] : memref<648x384xf32, #tpu.memory_space<vmem>>, vector<8x384xf32>
    tpu.vector_store %arg11[%c24_75, %c0_76], %71 {strides = array<i32>} : memref<648x384xf32, #tpu.memory_space<vmem>>, vector<8x384xf32>,
    %c0_77 = arith.constant 0 : index
    %c1_78 = arith.constant 1 : index
    %c0_79 = arith.constant 0 : index
    %c54 = arith.constant 54 : index
    %73 = vector.load %arg1[%c0_77, %c1_78, %c0_79, %c54] : memref<1x4x8x640xf32, #tpu.memory_space<vmem>>, vector<1x1x8x384xf32>
    %74 = vector.shape_cast %73 : vector<1x1x8x384xf32> to vector<8x384xf32>
    %c32_80 = arith.constant 32 : index
    %c0_81 = arith.constant 0 : index
    %75 = vector.load %arg11[%c32_80, %c0_81] : memref<648x384xf32, #tpu.memory_space<vmem>>, vector<8x384xf32>
    tpu.vector_store %arg11[%c32_80, %c0_81], %74 {strides = array<i32>} : memref<648x384xf32, #tpu.memory_space<vmem>>, vector<8x384xf32>,
    %c0_82 = arith.constant 0 : index
    %c1_83 = arith.constant 1 : index
    %c0_84 = arith.constant 0 : index
    %c74 = arith.constant 74 : index
    %76 = vector.load %arg1[%c0_82, %c1_83, %c0_84, %c74] : memref<1x4x8x640xf32, #tpu.memory_space<vmem>>, vector<1x1x8x384xf32>
    %77 = vector.shape_cast %76 : vector<1x1x8x384xf32> to vector<8x384xf32>
    %c40_85 = arith.constant 40 : index
    %c0_86 = arith.constant 0 : index
    %78 = vector.load %arg11[%c40_85, %c0_86] : memref<648x384xf32, #tpu.memory_space<vmem>>, vector<8x384xf32>
    tpu.vector_store %arg11[%c40_85, %c0_86], %77 {strides = array<i32>} : memref<648x384xf32, #tpu.memory_space<vmem>>, vector<8x384xf32>,
    %c0_87 = arith.constant 0 : index
    %c1_88 = arith.constant 1 : index
    %c0_89 = arith.constant 0 : index
    %c75_90 = arith.constant 75 : index
    %79 = vector.load %arg1[%c0_87, %c1_88, %c0_89, %c75_90] : memref<1x4x8x640xf32, #tpu.memory_space<vmem>>, vector<1x1x8x384xf32>
    %80 = vector.shape_cast %79 : vector<1x1x8x384xf32> to vector<8x384xf32>
    %c48_91 = arith.constant 48 : index
    %c0_92 = arith.constant 0 : index
    %81 = vector.load %arg11[%c48_91, %c0_92] : memref<648x384xf32, #tpu.memory_space<vmem>>, vector<8x384xf32>
    tpu.vector_store %arg11[%c48_91, %c0_92], %80 {strides = array<i32>} : memref<648x384xf32, #tpu.memory_space<vmem>>, vector<8x384xf32>,
    %c0_93 = arith.constant 0 : index
    %c1_94 = arith.constant 1 : index
    %c0_95 = arith.constant 0 : index
    %c76_96 = arith.constant 76 : index
    %82 = vector.load %arg1[%c0_93, %c1_94, %c0_95, %c76_96] : memref<1x4x8x640xf32, #tpu.memory_space<vmem>>, vector<1x1x8x384xf32>
    %83 = vector.shape_cast %82 : vector<1x1x8x384xf32> to vector<8x384xf32>
    %c56_97 = arith.constant 56 : index
    %c0_98 = arith.constant 0 : index
    %84 = vector.load %arg11[%c56_97, %c0_98] : memref<648x384xf32, #tpu.memory_space<vmem>>, vector<8x384xf32>
    tpu.vector_store %arg11[%c56_97, %c0_98], %83 {strides = array<i32>} : memref<648x384xf32, #tpu.memory_space<vmem>>, vector<8x384xf32>,
    %c0_99 = arith.constant 0 : index
    %c1_100 = arith.constant 1 : index
    %c0_101 = arith.constant 0 : index
    %c77_102 = arith.constant 77 : index
    %85 = vector.load %arg1[%c0_99, %c1_100, %c0_101, %c77_102] : memref<1x4x8x640xf32, #tpu.memory_space<vmem>>, vector<1x1x8x384xf32>
    %86 = vector.shape_cast %85 : vector<1x1x8x384xf32> to vector<8x384xf32>
    %c64_103 = arith.constant 64 : index
    %c0_104 = arith.constant 0 : index
    %87 = vector.load %arg11[%c64_103, %c0_104] : memref<648x384xf32, #tpu.memory_space<vmem>>, vector<8x384xf32>
    tpu.vector_store %arg11[%c64_103, %c0_104], %86 {strides = array<i32>} : memref<648x384xf32, #tpu.memory_space<vmem>>, vector<8x384xf32>,
    %c0_105 = arith.constant 0 : index
    %c1_106 = arith.constant 1 : index
    %c0_107 = arith.constant 0 : index
    %c78 = arith.constant 78 : index
    %88 = vector.load %arg1[%c0_105, %c1_106, %c0_107, %c78] : memref<1x4x8x640xf32, #tpu.memory_space<vmem>>, vector<1x1x8x384xf32>
    %89 = vector.shape_cast %88 : vector<1x1x8x384xf32> to vector<8x384xf32>
    %c72 = arith.constant 72 : index
    %c0_108 = arith.constant 0 : index
    %90 = vector.load %arg11[%c72, %c0_108] : memref<648x384xf32, #tpu.memory_space<vmem>>, vector<8x384xf32>
    tpu.vector_store %arg11[%c72, %c0_108], %89 {strides = array<i32>} : memref<648x384xf32, #tpu.memory_space<vmem>>, vector<8x384xf32>,
    %c0_109 = arith.constant 0 : index
    %c1_110 = arith.constant 1 : index
    %c0_111 = arith.constant 0 : index
    %c98 = arith.constant 98 : index
    %91 = vector.load %arg1[%c0_109, %c1_110, %c0_111, %c98] : memref<1x4x8x640xf32, #tpu.memory_space<vmem>>, vector<1x1x8x384xf32>
    %92 = vector.shape_cast %91 : vector<1x1x8x384xf32> to vector<8x384xf32>
    %c80 = arith.constant 80 : index
    %c0_112 = arith.constant 0 : index
    %93 = vector.load %arg11[%c80, %c0_112] : memref<648x384xf32, #tpu.memory_space<vmem>>, vector<8x384xf32>
    tpu.vector_store %arg11[%c80, %c0_112], %92 {strides = array<i32>} : memref<648x384xf32, #tpu.memory_space<vmem>>, vector<8x384xf32>,
    %c0_113 = arith.constant 0 : index
    %c1_114 = arith.constant 1 : index
    %c0_115 = arith.constant 0 : index
    %c99_116 = arith.constant 99 : index
    %94 = vector.load %arg1[%c0_113, %c1_114, %c0_115, %c99_116] : memref<1x4x8x640xf32, #tpu.memory_space<vmem>>, vector<1x1x8x384xf32>
    %95 = vector.shape_cast %94 : vector<1x1x8x384xf32> to vector<8x384xf32>
    %c88 = arith.constant 88 : index
    %c0_117 = arith.constant 0 : index
    %96 = vector.load %arg11[%c88, %c0_117] : memref<648x384xf32, #tpu.memory_space<vmem>>, vector<8x384xf32>
    tpu.vector_store %arg11[%c88, %c0_117], %95 {strides = array<i32>} : memref<648x384xf32, #tpu.memory_space<vmem>>, vector<8x384xf32>,
    %c0_118 = arith.constant 0 : index
    %c1_119 = arith.constant 1 : index
    %c0_120 = arith.constant 0 : index
    %c100_121 = arith.constant 100 : index
    %97 = vector.load %arg1[%c0_118, %c1_119, %c0_120, %c100_121] : memref<1x4x8x640xf32, #tpu.memory_space<vmem>>, vector<1x1x8x384xf32>
    %98 = vector.shape_cast %97 : vector<1x1x8x384xf32> to vector<8x384xf32>
    %c96 = arith.constant 96 : index
    %c0_122 = arith.constant 0 : index
    %99 = vector.load %arg11[%c96, %c0_122] : memref<648x384xf32, #tpu.memory_space<vmem>>, vector<8x384xf32>
    tpu.vector_store %arg11[%c96, %c0_122], %98 {strides = array<i32>} : memref<648x384xf32, #tpu.memory_space<vmem>>, vector<8x384xf32>,
    %c0_123 = arith.constant 0 : index
    %c1_124 = arith.constant 1 : index
    %c0_125 = arith.constant 0 : index
    %c101_126 = arith.constant 101 : index
    %100 = vector.load %arg1[%c0_123, %c1_124, %c0_125, %c101_126] : memref<1x4x8x640xf32, #tpu.memory_space<vmem>>, vector<1x1x8x384xf32>
    %101 = vector.shape_cast %100 : vector<1x1x8x384xf32> to vector<8x384xf32>
    %c104 = arith.constant 104 : index
    %c0_127 = arith.constant 0 : index
    %102 = vector.load %arg11[%c104, %c0_127] : memref<648x384xf32, #tpu.memory_space<vmem>>, vector<8x384xf32>
    tpu.vector_store %arg11[%c104, %c0_127], %101 {strides = array<i32>} : memref<648x384xf32, #tpu.memory_space<vmem>>, vector<8x384xf32>,
    %c0_128 = arith.constant 0 : index
    %c1_129 = arith.constant 1 : index
    %c0_130 = arith.constant 0 : index
    %c102 = arith.constant 102 : index
    %103 = vector.load %arg1[%c0_128, %c1_129, %c0_130, %c102] : memref<1x4x8x640xf32, #tpu.memory_space<vmem>>, vector<1x1x8x384xf32>
    %104 = vector.shape_cast %103 : vector<1x1x8x384xf32> to vector<8x384xf32>
    %c112 = arith.constant 112 : index
    %c0_131 = arith.constant 0 : index
    %105 = vector.load %arg11[%c112, %c0_131] : memref<648x384xf32, #tpu.memory_space<vmem>>, vector<8x384xf32>
    tpu.vector_store %arg11[%c112, %c0_131], %104 {strides = array<i32>} : memref<648x384xf32, #tpu.memory_space<vmem>>, vector<8x384xf32>,
    %c0_132 = arith.constant 0 : index
    %c1_133 = arith.constant 1 : index
    %c0_134 = arith.constant 0 : index
    %c122 = arith.constant 122 : index
    %106 = vector.load %arg1[%c0_132, %c1_133, %c0_134, %c122] : memref<1x4x8x640xf32, #tpu.memory_space<vmem>>, vector<1x1x8x384xf32>
    %107 = vector.shape_cast %106 : vector<1x1x8x384xf32> to vector<8x384xf32>
    %c120 = arith.constant 120 : index
    %c0_135 = arith.constant 0 : index
    %108 = vector.load %arg11[%c120, %c0_135] : memref<648x384xf32, #tpu.memory_space<vmem>>, vector<8x384xf32>
    tpu.vector_store %arg11[%c120, %c0_135], %107 {strides = array<i32>} : memref<648x384xf32, #tpu.memory_space<vmem>>, vector<8x384xf32>,
    %c0_136 = arith.constant 0 : index
    %c1_137 = arith.constant 1 : index
    %c0_138 = arith.constant 0 : index
    %c123_139 = arith.constant 123 : index
    %109 = vector.load %arg1[%c0_136, %c1_137, %c0_138, %c123_139] : memref<1x4x8x640xf32, #tpu.memory_space<vmem>>, vector<1x1x8x384xf32>
    %110 = vector.shape_cast %109 : vector<1x1x8x384xf32> to vector<8x384xf32>
    %c128 = arith.constant 128 : index
    %c0_140 = arith.constant 0 : index
    %111 = vector.load %arg11[%c128, %c0_140] : memref<648x384xf32, #tpu.memory_space<vmem>>, vector<8x384xf32>
    tpu.vector_store %arg11[%c128, %c0_140], %110 {strides = array<i32>} : memref<648x384xf32, #tpu.memory_space<vmem>>, vector<8x384xf32>,
    %c0_141 = arith.constant 0 : index
    %c1_142 = arith.constant 1 : index
    %c0_143 = arith.constant 0 : index
    %c124_144 = arith.constant 124 : index
    %112 = vector.load %arg1[%c0_141, %c1_142, %c0_143, %c124_144] : memref<1x4x8x640xf32, #tpu.memory_space<vmem>>, vector<1x1x8x384xf32>
    %113 = vector.shape_cast %112 : vector<1x1x8x384xf32> to vector<8x384xf32>
    %c136 = arith.constant 136 : index
    %c0_145 = arith.constant 0 : index
    %114 = vector.load %arg11[%c136, %c0_145] : memref<648x384xf32, #tpu.memory_space<vmem>>, vector<8x384xf32>
    tpu.vector_store %arg11[%c136, %c0_145], %113 {strides = array<i32>} : memref<648x384xf32, #tpu.memory_space<vmem>>, vector<8x384xf32>,
    %c0_146 = arith.constant 0 : index
    %c1_147 = arith.constant 1 : index
    %c0_148 = arith.constant 0 : index
    %c125_149 = arith.constant 125 : index
    %115 = vector.load %arg1[%c0_146, %c1_147, %c0_148, %c125_149] : memref<1x4x8x640xf32, #tpu.memory_space<vmem>>, vector<1x1x8x384xf32>
    %116 = vector.shape_cast %115 : vector<1x1x8x384xf32> to vector<8x384xf32>
    %c144 = arith.constant 144 : index
    %c0_150 = arith.constant 0 : index
    %117 = vector.load %arg11[%c144, %c0_150] : memref<648x384xf32, #tpu.memory_space<vmem>>, vector<8x384xf32>
    tpu.vector_store %arg11[%c144, %c0_150], %116 {strides = array<i32>} : memref<648x384xf32, #tpu.memory_space<vmem>>, vector<8x384xf32>,
    %c0_151 = arith.constant 0 : index
    %c1_152 = arith.constant 1 : index
    %c0_153 = arith.constant 0 : index
    %c126 = arith.constant 126 : index
    %118 = vector.load %arg1[%c0_151, %c1_152, %c0_153, %c126] : memref<1x4x8x640xf32, #tpu.memory_space<vmem>>, vector<1x1x8x384xf32>
    %119 = vector.shape_cast %118 : vector<1x1x8x384xf32> to vector<8x384xf32>
    %c152 = arith.constant 152 : index
    %c0_154 = arith.constant 0 : index
    %120 = vector.load %arg11[%c152, %c0_154] : memref<648x384xf32, #tpu.memory_space<vmem>>, vector<8x384xf32>
    tpu.vector_store %arg11[%c152, %c0_154], %119 {strides = array<i32>} : memref<648x384xf32, #tpu.memory_space<vmem>>, vector<8x384xf32>,
    %c0_155 = arith.constant 0 : index
    %c1_156 = arith.constant 1 : index
    %c0_157 = arith.constant 0 : index
    %c146 = arith.constant 146 : index
    %121 = vector.load %arg1[%c0_155, %c1_156, %c0_157, %c146] : memref<1x4x8x640xf32, #tpu.memory_space<vmem>>, vector<1x1x8x384xf32>
    %122 = vector.shape_cast %121 : vector<1x1x8x384xf32> to vector<8x384xf32>
    %c160 = arith.constant 160 : index
    %c0_158 = arith.constant 0 : index
    %123 = vector.load %arg11[%c160, %c0_158] : memref<648x384xf32, #tpu.memory_space<vmem>>, vector<8x384xf32>
    tpu.vector_store %arg11[%c160, %c0_158], %122 {strides = array<i32>} : memref<648x384xf32, #tpu.memory_space<vmem>>, vector<8x384xf32>,
    %c0_159 = arith.constant 0 : index
    %c1_160 = arith.constant 1 : index
    %c0_161 = arith.constant 0 : index
    %c147 = arith.constant 147 : index
    %124 = vector.load %arg1[%c0_159, %c1_160, %c0_161, %c147] : memref<1x4x8x640xf32, #tpu.memory_space<vmem>>, vector<1x1x8x384xf32>
    %125 = vector.shape_cast %124 : vector<1x1x8x384xf32> to vector<8x384xf32>
    %c168 = arith.constant 168 : index
    %c0_162 = arith.constant 0 : index
    %126 = vector.load %arg11[%c168, %c0_162] : memref<648x384xf32, #tpu.memory_space<vmem>>, vector<8x384xf32>
    tpu.vector_store %arg11[%c168, %c0_162], %125 {strides = array<i32>} : memref<648x384xf32, #tpu.memory_space<vmem>>, vector<8x384xf32>,
    %c0_163 = arith.constant 0 : index
    %c1_164 = arith.constant 1 : index
    %c0_165 = arith.constant 0 : index
    %c148 = arith.constant 148 : index
    %127 = vector.load %arg1[%c0_163, %c1_164, %c0_165, %c148] : memref<1x4x8x640xf32, #tpu.memory_space<vmem>>, vector<1x1x8x384xf32>
    %128 = vector.shape_cast %127 : vector<1x1x8x384xf32> to vector<8x384xf32>
    %c176 = arith.constant 176 : index
    %c0_166 = arith.constant 0 : index
    %129 = vector.load %arg11[%c176, %c0_166] : memref<648x384xf32, #tpu.memory_space<vmem>>, vector<8x384xf32>
    tpu.vector_store %arg11[%c176, %c0_166], %128 {strides = array<i32>} : memref<648x384xf32, #tpu.memory_space<vmem>>, vector<8x384xf32>,
    %c0_167 = arith.constant 0 : index
    %c1_168 = arith.constant 1 : index
    %c0_169 = arith.constant 0 : index
    %c149 = arith.constant 149 : index
    %130 = vector.load %arg1[%c0_167, %c1_168, %c0_169, %c149] : memref<1x4x8x640xf32, #tpu.memory_space<vmem>>, vector<1x1x8x384xf32>
    %131 = vector.shape_cast %130 : vector<1x1x8x384xf32> to vector<8x384xf32>
    %c184 = arith.constant 184 : index
    %c0_170 = arith.constant 0 : index
    %132 = vector.load %arg11[%c184, %c0_170] : memref<648x384xf32, #tpu.memory_space<vmem>>, vector<8x384xf32>
    tpu.vector_store %arg11[%c184, %c0_170], %131 {strides = array<i32>} : memref<648x384xf32, #tpu.memory_space<vmem>>, vector<8x384xf32>,
    %c0_171 = arith.constant 0 : index
    %c1_172 = arith.constant 1 : index
    %c0_173 = arith.constant 0 : index
    %c150 = arith.constant 150 : index
    %133 = vector.load %arg1[%c0_171, %c1_172, %c0_173, %c150] : memref<1x4x8x640xf32, #tpu.memory_space<vmem>>, vector<1x1x8x384xf32>
    %134 = vector.shape_cast %133 : vector<1x1x8x384xf32> to vector<8x384xf32>
    %c192 = arith.constant 192 : index
    %c0_174 = arith.constant 0 : index
    %135 = vector.load %arg11[%c192, %c0_174] : memref<648x384xf32, #tpu.memory_space<vmem>>, vector<8x384xf32>
    tpu.vector_store %arg11[%c192, %c0_174], %134 {strides = array<i32>} : memref<648x384xf32, #tpu.memory_space<vmem>>, vector<8x384xf32>,
    %c0_175 = arith.constant 0 : index
    %c0_176 = arith.constant 0 : index
    %136 = vector.load %arg3[%c0_175, %c0_176] : memref<8x200xf32, #tpu.memory_space<vmem>>, vector<8x200xf32>
    %c0_177 = arith.constant 0 : index
    %c0_178 = arith.constant 0 : index
    %137 = vector.load %arg11[%c0_177, %c0_178] : memref<648x384xf32, #tpu.memory_space<vmem>>, vector<200x384xf32>
    %cst_179 = arith.constant dense<0.000000e+00> : vector<8x384xf32>
    %138 = tpu.matmul %136, %137, %cst_179 {dimension_numbers = #tpu.dot_dimension_numbers<[1], [0], [0], [1], [0, 0, 1, 1], [], []>} : vector<8x200xf32>, vector<200x384xf32>, vector<8x384xf32> -> vector<8x384xf32>
    %c1_180 = arith.constant 1 : index
    %c0_181 = arith.constant 0 : index
    %c0_182 = arith.constant 0 : index
    %139 = vector.load %arg6[%c1_180, %c0_181, %c0_182] : memref<4x8x1xf32, #tpu.memory_space<vmem>>, vector<1x8x1xf32>
    %140 = vector.shape_cast %139 : vector<1x8x1xf32> to vector<8x1xf32>
    %141 = vector.broadcast %140 : vector<8x1xf32> to vector<8x384xf32>
    %142 = arith.addf %138, %141 : vector<8x384xf32>
    %143 = vector.broadcast %0 : vector<1x384xf32> to vector<8x384xf32>
    %144 = arith.mulf %142, %143 : vector<8x384xf32>
    %cst_183 = arith.constant dense<0.000000e+00> : vector<8xf32>
    %145 = vector.multi_reduction <add>, %144, %cst_183 [1] : vector<8x384xf32> to vector<8xf32>
    %146 = vector.shape_cast %145 : vector<8xf32> to vector<8x1xf32>
    %cst_184 = arith.constant 3.906250e-03 : f32
    %147 = vector.broadcast %cst_184 : f32 to vector<8x1xf32>
    %148 = arith.mulf %146, %147 : vector<8x1xf32>
    %c1_185 = arith.constant 1 : index
    %c0_186 = arith.constant 0 : index
    %c0_187 = arith.constant 0 : index
    %149 = vector.load %arg7[%c1_185, %c0_186, %c0_187] : memref<4x8x2xf32, #tpu.memory_space<vmem>>, vector<1x8x2xf32>
    %150 = vector.shape_cast %149 : vector<1x8x2xf32> to vector<8x2xf32>
    %151 = vector.broadcast %148 : vector<8x1xf32> to vector<8x2xf32>
    %152 = arith.mulf %150, %151 : vector<8x2xf32>
    %cst_188 = arith.constant dense<0.000000e+00> : vector<2xf32>
    %153 = vector.multi_reduction <add>, %152, %cst_188 [0] : vector<8x2xf32> to vector<2xf32>
    %154 = vector.shape_cast %153 : vector<2xf32> to vector<1x2xf32>
    %cst_189 = arith.constant 0.000000e+00 : f32
    %155 = vector.broadcast %cst_189 : f32 to vector<1x2xf32>
    %156 = arith.maximumf %154, %155 : vector<1x2xf32>
    %c1_190 = arith.constant 1 : index
    %c0_191 = arith.constant 0 : index
    %c0_192 = arith.constant 0 : index
    %157 = vector.load %arg8[%c1_190, %c0_191, %c0_192] : memref<4x8x2xf32, #tpu.memory_space<vmem>>, vector<1x8x2xf32>
    %158 = vector.shape_cast %157 : vector<1x8x2xf32> to vector<8x2xf32>
    %159 = vector.broadcast %156 : vector<1x2xf32> to vector<8x2xf32>
    %160 = arith.mulf %158, %159 : vector<8x2xf32>
    %cst_193 = arith.constant dense<0.000000e+00> : vector<8xf32>
    %161 = vector.multi_reduction <add>, %160, %cst_193 [1] : vector<8x2xf32> to vector<8xf32>
    %162 = vector.shape_cast %161 : vector<8xf32> to vector<8x1xf32>
    %cst_194 = arith.constant 0.000000e+00 : f32
    %163 = vector.broadcast %cst_194 : f32 to vector<8x1xf32>
    %164 = arith.subf %163, %162 : vector<8x1xf32>
    %165 = math.exp %164 : vector<8x1xf32>
    %cst_195 = arith.constant 1.000000e+00 : f32
    %166 = vector.broadcast %cst_195 : f32 to vector<8x1xf32>
    %167 = arith.addf %166, %165 : vector<8x1xf32>
    %168 = tpu.reciprocal %167 {approx = true} : vector<8x1xf32> -> vector<8x1xf32>
    %c0_196 = arith.constant 0 : index
    %c2 = arith.constant 2 : index
    %c0_197 = arith.constant 0 : index
    %c25 = arith.constant 25 : index
    %169 = vector.load %arg1[%c0_196, %c2, %c0_197, %c25] : memref<1x4x8x640xf32, #tpu.memory_space<vmem>>, vector<1x1x8x384xf32>
    %170 = vector.shape_cast %169 : vector<1x1x8x384xf32> to vector<8x384xf32>
    %c0_198 = arith.constant 0 : index
    %c0_199 = arith.constant 0 : index
    %171 = vector.load %arg11[%c0_198, %c0_199] : memref<648x384xf32, #tpu.memory_space<vmem>>, vector<8x384xf32>
    tpu.vector_store %arg11[%c0_198, %c0_199], %170 {strides = array<i32>} : memref<648x384xf32, #tpu.memory_space<vmem>>, vector<8x384xf32>,
    %c0_200 = arith.constant 0 : index
    %c2_201 = arith.constant 2 : index
    %c0_202 = arith.constant 0 : index
    %c26 = arith.constant 26 : index
    %172 = vector.load %arg1[%c0_200, %c2_201, %c0_202, %c26] : memref<1x4x8x640xf32, #tpu.memory_space<vmem>>, vector<1x1x8x384xf32>
    %173 = vector.shape_cast %172 : vector<1x1x8x384xf32> to vector<8x384xf32>
    %c8_203 = arith.constant 8 : index
    %c0_204 = arith.constant 0 : index
    %174 = vector.load %arg11[%c8_203, %c0_204] : memref<648x384xf32, #tpu.memory_space<vmem>>, vector<8x384xf32>
    tpu.vector_store %arg11[%c8_203, %c0_204], %173 {strides = array<i32>} : memref<648x384xf32, #tpu.memory_space<vmem>>, vector<8x384xf32>,
    %c0_205 = arith.constant 0 : index
    %c2_206 = arith.constant 2 : index
    %c0_207 = arith.constant 0 : index
    %c27 = arith.constant 27 : index
    %175 = vector.load %arg1[%c0_205, %c2_206, %c0_207, %c27] : memref<1x4x8x640xf32, #tpu.memory_space<vmem>>, vector<1x1x8x384xf32>
    %176 = vector.shape_cast %175 : vector<1x1x8x384xf32> to vector<8x384xf32>
    %c16_208 = arith.constant 16 : index
    %c0_209 = arith.constant 0 : index
    %177 = vector.load %arg11[%c16_208, %c0_209] : memref<648x384xf32, #tpu.memory_space<vmem>>, vector<8x384xf32>
    tpu.vector_store %arg11[%c16_208, %c0_209], %176 {strides = array<i32>} : memref<648x384xf32, #tpu.memory_space<vmem>>, vector<8x384xf32>,
    %c0_210 = arith.constant 0 : index
    %c2_211 = arith.constant 2 : index
    %c0_212 = arith.constant 0 : index
    %c28 = arith.constant 28 : index
    %178 = vector.load %arg1[%c0_210, %c2_211, %c0_212, %c28] : memref<1x4x8x640xf32, #tpu.memory_space<vmem>>, vector<1x1x8x384xf32>
    %179 = vector.shape_cast %178 : vector<1x1x8x384xf32> to vector<8x384xf32>
    %c24_213 = arith.constant 24 : index
    %c0_214 = arith.constant 0 : index
    %180 = vector.load %arg11[%c24_213, %c0_214] : memref<648x384xf32, #tpu.memory_space<vmem>>, vector<8x384xf32>
    tpu.vector_store %arg11[%c24_213, %c0_214], %179 {strides = array<i32>} : memref<648x384xf32, #tpu.memory_space<vmem>>, vector<8x384xf32>,
    %c0_215 = arith.constant 0 : index
    %c2_216 = arith.constant 2 : index
    %c0_217 = arith.constant 0 : index
    %c29 = arith.constant 29 : index
    %181 = vector.load %arg1[%c0_215, %c2_216, %c0_217, %c29] : memref<1x4x8x640xf32, #tpu.memory_space<vmem>>, vector<1x1x8x384xf32>
    %182 = vector.shape_cast %181 : vector<1x1x8x384xf32> to vector<8x384xf32>
    %c32_218 = arith.constant 32 : index
    %c0_219 = arith.constant 0 : index
    %183 = vector.load %arg11[%c32_218, %c0_219] : memref<648x384xf32, #tpu.memory_space<vmem>>, vector<8x384xf32>
    tpu.vector_store %arg11[%c32_218, %c0_219], %182 {strides = array<i32>} : memref<648x384xf32, #tpu.memory_space<vmem>>, vector<8x384xf32>,
    %c0_220 = arith.constant 0 : index
    %c2_221 = arith.constant 2 : index
    %c0_222 = arith.constant 0 : index
    %c30 = arith.constant 30 : index
    %184 = vector.load %arg1[%c0_220, %c2_221, %c0_222, %c30] : memref<1x4x8x640xf32, #tpu.memory_space<vmem>>, vector<1x1x8x384xf32>
    %185 = vector.shape_cast %184 : vector<1x1x8x384xf32> to vector<8x384xf32>
    %c40_223 = arith.constant 40 : index
    %c0_224 = arith.constant 0 : index
    %186 = vector.load %arg11[%c40_223, %c0_224] : memref<648x384xf32, #tpu.memory_space<vmem>>, vector<8x384xf32>
    tpu.vector_store %arg11[%c40_223, %c0_224], %185 {strides = array<i32>} : memref<648x384xf32, #tpu.memory_space<vmem>>, vector<8x384xf32>,
    %c0_225 = arith.constant 0 : index
    %c2_226 = arith.constant 2 : index
    %c0_227 = arith.constant 0 : index
    %c31 = arith.constant 31 : index
    %187 = vector.load %arg1[%c0_225, %c2_226, %c0_227, %c31] : memref<1x4x8x640xf32, #tpu.memory_space<vmem>>, vector<1x1x8x384xf32>
    %188 = vector.shape_cast %187 : vector<1x1x8x384xf32> to vector<8x384xf32>
    %c48_228 = arith.constant 48 : index
    %c0_229 = arith.constant 0 : index
    %189 = vector.load %arg11[%c48_228, %c0_229] : memref<648x384xf32, #tpu.memory_space<vmem>>, vector<8x384xf32>
    tpu.vector_store %arg11[%c48_228, %c0_229], %188 {strides = array<i32>} : memref<648x384xf32, #tpu.memory_space<vmem>>, vector<8x384xf32>,
    %c0_230 = arith.constant 0 : index
    %c2_231 = arith.constant 2 : index
    %c0_232 = arith.constant 0 : index
    %c49 = arith.constant 49 : index
    %190 = vector.load %arg1[%c0_230, %c2_231, %c0_232, %c49] : memref<1x4x8x640xf32, #tpu.memory_space<vmem>>, vector<1x1x8x384xf32>
    %191 = vector.shape_cast %190 : vector<1x1x8x384xf32> to vector<8x384xf32>
    %c56_233 = arith.constant 56 : index
    %c0_234 = arith.constant 0 : index
    %192 = vector.load %arg11[%c56_233, %c0_234] : memref<648x384xf32, #tpu.memory_space<vmem>>, vector<8x384xf32>
    tpu.vector_store %arg11[%c56_233, %c0_234], %191 {strides = array<i32>} : memref<648x384xf32, #tpu.memory_space<vmem>>, vector<8x384xf32>,
    %c0_235 = arith.constant 0 : index
    %c2_236 = arith.constant 2 : index
    %c0_237 = arith.constant 0 : index
    %c50_238 = arith.constant 50 : index
    %193 = vector.load %arg1[%c0_235, %c2_236, %c0_237, %c50_238] : memref<1x4x8x640xf32, #tpu.memory_space<vmem>>, vector<1x1x8x384xf32>
    %194 = vector.shape_cast %193 : vector<1x1x8x384xf32> to vector<8x384xf32>
    %c64_239 = arith.constant 64 : index
    %c0_240 = arith.constant 0 : index
    %195 = vector.load %arg11[%c64_239, %c0_240] : memref<648x384xf32, #tpu.memory_space<vmem>>, vector<8x384xf32>
    tpu.vector_store %arg11[%c64_239, %c0_240], %194 {strides = array<i32>} : memref<648x384xf32, #tpu.memory_space<vmem>>, vector<8x384xf32>,
    %c0_241 = arith.constant 0 : index
    %c2_242 = arith.constant 2 : index
    %c0_243 = arith.constant 0 : index
    %c51_244 = arith.constant 51 : index
    %196 = vector.load %arg1[%c0_241, %c2_242, %c0_243, %c51_244] : memref<1x4x8x640xf32, #tpu.memory_space<vmem>>, vector<1x1x8x384xf32>
    %197 = vector.shape_cast %196 : vector<1x1x8x384xf32> to vector<8x384xf32>
    %c72_245 = arith.constant 72 : index
    %c0_246 = arith.constant 0 : index
    %198 = vector.load %arg11[%c72_245, %c0_246] : memref<648x384xf32, #tpu.memory_space<vmem>>, vector<8x384xf32>
    tpu.vector_store %arg11[%c72_245, %c0_246], %197 {strides = array<i32>} : memref<648x384xf32, #tpu.memory_space<vmem>>, vector<8x384xf32>,
    %c0_247 = arith.constant 0 : index
    %c2_248 = arith.constant 2 : index
    %c0_249 = arith.constant 0 : index
    %c52_250 = arith.constant 52 : index
    %199 = vector.load %arg1[%c0_247, %c2_248, %c0_249, %c52_250] : memref<1x4x8x640xf32, #tpu.memory_space<vmem>>, vector<1x1x8x384xf32>
    %200 = vector.shape_cast %199 : vector<1x1x8x384xf32> to vector<8x384xf32>
    %c80_251 = arith.constant 80 : index
    %c0_252 = arith.constant 0 : index
    %201 = vector.load %arg11[%c80_251, %c0_252] : memref<648x384xf32, #tpu.memory_space<vmem>>, vector<8x384xf32>
    tpu.vector_store %arg11[%c80_251, %c0_252], %200 {strides = array<i32>} : memref<648x384xf32, #tpu.memory_space<vmem>>, vector<8x384xf32>,
    %c0_253 = arith.constant 0 : index
    %c2_254 = arith.constant 2 : index
    %c0_255 = arith.constant 0 : index
    %c53_256 = arith.constant 53 : index
    %202 = vector.load %arg1[%c0_253, %c2_254, %c0_255, %c53_256] : memref<1x4x8x640xf32, #tpu.memory_space<vmem>>, vector<1x1x8x384xf32>
    %203 = vector.shape_cast %202 : vector<1x1x8x384xf32> to vector<8x384xf32>
    %c88_257 = arith.constant 88 : index
    %c0_258 = arith.constant 0 : index
    %204 = vector.load %arg11[%c88_257, %c0_258] : memref<648x384xf32, #tpu.memory_space<vmem>>, vector<8x384xf32>
    tpu.vector_store %arg11[%c88_257, %c0_258], %203 {strides = array<i32>} : memref<648x384xf32, #tpu.memory_space<vmem>>, vector<8x384xf32>,
    %c0_259 = arith.constant 0 : index
    %c2_260 = arith.constant 2 : index
    %c0_261 = arith.constant 0 : index
    %c54_262 = arith.constant 54 : index
    %205 = vector.load %arg1[%c0_259, %c2_260, %c0_261, %c54_262] : memref<1x4x8x640xf32, #tpu.memory_space<vmem>>, vector<1x1x8x384xf32>
    %206 = vector.shape_cast %205 : vector<1x1x8x384xf32> to vector<8x384xf32>
    %c96_263 = arith.constant 96 : index
    %c0_264 = arith.constant 0 : index
    %207 = vector.load %arg11[%c96_263, %c0_264] : memref<648x384xf32, #tpu.memory_space<vmem>>, vector<8x384xf32>
    tpu.vector_store %arg11[%c96_263, %c0_264], %206 {strides = array<i32>} : memref<648x384xf32, #tpu.memory_space<vmem>>, vector<8x384xf32>,
    %c0_265 = arith.constant 0 : index
    %c2_266 = arith.constant 2 : index
    %c0_267 = arith.constant 0 : index
    %c55 = arith.constant 55 : index
    %208 = vector.load %arg1[%c0_265, %c2_266, %c0_267, %c55] : memref<1x4x8x640xf32, #tpu.memory_space<vmem>>, vector<1x1x8x384xf32>
    %209 = vector.shape_cast %208 : vector<1x1x8x384xf32> to vector<8x384xf32>
    %c104_268 = arith.constant 104 : index
    %c0_269 = arith.constant 0 : index
    %210 = vector.load %arg11[%c104_268, %c0_269] : memref<648x384xf32, #tpu.memory_space<vmem>>, vector<8x384xf32>
    tpu.vector_store %arg11[%c104_268, %c0_269], %209 {strides = array<i32>} : memref<648x384xf32, #tpu.memory_space<vmem>>, vector<8x384xf32>,
    %c0_270 = arith.constant 0 : index
    %c2_271 = arith.constant 2 : index
    %c0_272 = arith.constant 0 : index
    %c73 = arith.constant 73 : index
    %211 = vector.load %arg1[%c0_270, %c2_271, %c0_272, %c73] : memref<1x4x8x640xf32, #tpu.memory_space<vmem>>, vector<1x1x8x384xf32>
    %212 = vector.shape_cast %211 : vector<1x1x8x384xf32> to vector<8x384xf32>
    %c112_273 = arith.constant 112 : index
    %c0_274 = arith.constant 0 : index
    %213 = vector.load %arg11[%c112_273, %c0_274] : memref<648x384xf32, #tpu.memory_space<vmem>>, vector<8x384xf32>
    tpu.vector_store %arg11[%c112_273, %c0_274], %212 {strides = array<i32>} : memref<648x384xf32, #tpu.memory_space<vmem>>, vector<8x384xf32>,
    %c0_275 = arith.constant 0 : index
    %c2_276 = arith.constant 2 : index
    %c0_277 = arith.constant 0 : index
    %c74_278 = arith.constant 74 : index
    %214 = vector.load %arg1[%c0_275, %c2_276, %c0_277, %c74_278] : memref<1x4x8x640xf32, #tpu.memory_space<vmem>>, vector<1x1x8x384xf32>
    %215 = vector.shape_cast %214 : vector<1x1x8x384xf32> to vector<8x384xf32>
    %c120_279 = arith.constant 120 : index
    %c0_280 = arith.constant 0 : index
    %216 = vector.load %arg11[%c120_279, %c0_280] : memref<648x384xf32, #tpu.memory_space<vmem>>, vector<8x384xf32>
    tpu.vector_store %arg11[%c120_279, %c0_280], %215 {strides = array<i32>} : memref<648x384xf32, #tpu.memory_space<vmem>>, vector<8x384xf32>,
    %c0_281 = arith.constant 0 : index
    %c2_282 = arith.constant 2 : index
    %c0_283 = arith.constant 0 : index
    %c75_284 = arith.constant 75 : index
    %217 = vector.load %arg1[%c0_281, %c2_282, %c0_283, %c75_284] : memref<1x4x8x640xf32, #tpu.memory_space<vmem>>, vector<1x1x8x384xf32>
    %218 = vector.shape_cast %217 : vector<1x1x8x384xf32> to vector<8x384xf32>
    %c128_285 = arith.constant 128 : index
    %c0_286 = arith.constant 0 : index
    %219 = vector.load %arg11[%c128_285, %c0_286] : memref<648x384xf32, #tpu.memory_space<vmem>>, vector<8x384xf32>
    tpu.vector_store %arg11[%c128_285, %c0_286], %218 {strides = array<i32>} : memref<648x384xf32, #tpu.memory_space<vmem>>, vector<8x384xf32>,
    %c0_287 = arith.constant 0 : index
    %c2_288 = arith.constant 2 : index
    %c0_289 = arith.constant 0 : index
    %c76_290 = arith.constant 76 : index
    %220 = vector.load %arg1[%c0_287, %c2_288, %c0_289, %c76_290] : memref<1x4x8x640xf32, #tpu.memory_space<vmem>>, vector<1x1x8x384xf32>
    %221 = vector.shape_cast %220 : vector<1x1x8x384xf32> to vector<8x384xf32>
    %c136_291 = arith.constant 136 : index
    %c0_292 = arith.constant 0 : index
    %222 = vector.load %arg11[%c136_291, %c0_292] : memref<648x384xf32, #tpu.memory_space<vmem>>, vector<8x384xf32>
    tpu.vector_store %arg11[%c136_291, %c0_292], %221 {strides = array<i32>} : memref<648x384xf32, #tpu.memory_space<vmem>>, vector<8x384xf32>,
    %c0_293 = arith.constant 0 : index
    %c2_294 = arith.constant 2 : index
    %c0_295 = arith.constant 0 : index
    %c77_296 = arith.constant 77 : index
    %223 = vector.load %arg1[%c0_293, %c2_294, %c0_295, %c77_296] : memref<1x4x8x640xf32, #tpu.memory_space<vmem>>, vector<1x1x8x384xf32>
    %224 = vector.shape_cast %223 : vector<1x1x8x384xf32> to vector<8x384xf32>
    %c144_297 = arith.constant 144 : index
    %c0_298 = arith.constant 0 : index
    %225 = vector.load %arg11[%c144_297, %c0_298] : memref<648x384xf32, #tpu.memory_space<vmem>>, vector<8x384xf32>
    tpu.vector_store %arg11[%c144_297, %c0_298], %224 {strides = array<i32>} : memref<648x384xf32, #tpu.memory_space<vmem>>, vector<8x384xf32>,
    %c0_299 = arith.constant 0 : index
    %c2_300 = arith.constant 2 : index
    %c0_301 = arith.constant 0 : index
    %c78_302 = arith.constant 78 : index
    %226 = vector.load %arg1[%c0_299, %c2_300, %c0_301, %c78_302] : memref<1x4x8x640xf32, #tpu.memory_space<vmem>>, vector<1x1x8x384xf32>
    %227 = vector.shape_cast %226 : vector<1x1x8x384xf32> to vector<8x384xf32>
    %c152_303 = arith.constant 152 : index
    %c0_304 = arith.constant 0 : index
    %228 = vector.load %arg11[%c152_303, %c0_304] : memref<648x384xf32, #tpu.memory_space<vmem>>, vector<8x384xf32>
    tpu.vector_store %arg11[%c152_303, %c0_304], %227 {strides = array<i32>} : memref<648x384xf32, #tpu.memory_space<vmem>>, vector<8x384xf32>,
    %c0_305 = arith.constant 0 : index
    %c2_306 = arith.constant 2 : index
    %c0_307 = arith.constant 0 : index
    %c79 = arith.constant 79 : index
    %229 = vector.load %arg1[%c0_305, %c2_306, %c0_307, %c79] : memref<1x4x8x640xf32, #tpu.memory_space<vmem>>, vector<1x1x8x384xf32>
    %230 = vector.shape_cast %229 : vector<1x1x8x384xf32> to vector<8x384xf32>
    %c160_308 = arith.constant 160 : index
    %c0_309 = arith.constant 0 : index
    %231 = vector.load %arg11[%c160_308, %c0_309] : memref<648x384xf32, #tpu.memory_space<vmem>>, vector<8x384xf32>
    tpu.vector_store %arg11[%c160_308, %c0_309], %230 {strides = array<i32>} : memref<648x384xf32, #tpu.memory_space<vmem>>, vector<8x384xf32>,
    %c0_310 = arith.constant 0 : index
    %c2_311 = arith.constant 2 : index
    %c0_312 = arith.constant 0 : index
    %c97 = arith.constant 97 : index
    %232 = vector.load %arg1[%c0_310, %c2_311, %c0_312, %c97] : memref<1x4x8x640xf32, #tpu.memory_space<vmem>>, vector<1x1x8x384xf32>
    %233 = vector.shape_cast %232 : vector<1x1x8x384xf32> to vector<8x384xf32>
    %c168_313 = arith.constant 168 : index
    %c0_314 = arith.constant 0 : index
    %234 = vector.load %arg11[%c168_313, %c0_314] : memref<648x384xf32, #tpu.memory_space<vmem>>, vector<8x384xf32>
    tpu.vector_store %arg11[%c168_313, %c0_314], %233 {strides = array<i32>} : memref<648x384xf32, #tpu.memory_space<vmem>>, vector<8x384xf32>,
    %c0_315 = arith.constant 0 : index
    %c2_316 = arith.constant 2 : index
    %c0_317 = arith.constant 0 : index
    %c98_318 = arith.constant 98 : index
    %235 = vector.load %arg1[%c0_315, %c2_316, %c0_317, %c98_318] : memref<1x4x8x640xf32, #tpu.memory_space<vmem>>, vector<1x1x8x384xf32>
    %236 = vector.shape_cast %235 : vector<1x1x8x384xf32> to vector<8x384xf32>
    %c176_319 = arith.constant 176 : index
    %c0_320 = arith.constant 0 : index
    %237 = vector.load %arg11[%c176_319, %c0_320] : memref<648x384xf32, #tpu.memory_space<vmem>>, vector<8x384xf32>
    tpu.vector_store %arg11[%c176_319, %c0_320], %236 {strides = array<i32>} : memref<648x384xf32, #tpu.memory_space<vmem>>, vector<8x384xf32>,
    %c0_321 = arith.constant 0 : index
    %c2_322 = arith.constant 2 : index
    %c0_323 = arith.constant 0 : index
    %c99_324 = arith.constant 99 : index
    %238 = vector.load %arg1[%c0_321, %c2_322, %c0_323, %c99_324] : memref<1x4x8x640xf32, #tpu.memory_space<vmem>>, vector<1x1x8x384xf32>
    %239 = vector.shape_cast %238 : vector<1x1x8x384xf32> to vector<8x384xf32>
    %c184_325 = arith.constant 184 : index
    %c0_326 = arith.constant 0 : index
    %240 = vector.load %arg11[%c184_325, %c0_326] : memref<648x384xf32, #tpu.memory_space<vmem>>, vector<8x384xf32>
    tpu.vector_store %arg11[%c184_325, %c0_326], %239 {strides = array<i32>} : memref<648x384xf32, #tpu.memory_space<vmem>>, vector<8x384xf32>,
    %c0_327 = arith.constant 0 : index
    %c2_328 = arith.constant 2 : index
    %c0_329 = arith.constant 0 : index
    %c100_330 = arith.constant 100 : index
    %241 = vector.load %arg1[%c0_327, %c2_328, %c0_329, %c100_330] : memref<1x4x8x640xf32, #tpu.memory_space<vmem>>, vector<1x1x8x384xf32>
    %242 = vector.shape_cast %241 : vector<1x1x8x384xf32> to vector<8x384xf32>
    %c192_331 = arith.constant 192 : index
    %c0_332 = arith.constant 0 : index
    %243 = vector.load %arg11[%c192_331, %c0_332] : memref<648x384xf32, #tpu.memory_space<vmem>>, vector<8x384xf32>
    tpu.vector_store %arg11[%c192_331, %c0_332], %242 {strides = array<i32>} : memref<648x384xf32, #tpu.memory_space<vmem>>, vector<8x384xf32>,
    %c0_333 = arith.constant 0 : index
    %c2_334 = arith.constant 2 : index
    %c0_335 = arith.constant 0 : index
    %c101_336 = arith.constant 101 : index
    %244 = vector.load %arg1[%c0_333, %c2_334, %c0_335, %c101_336] : memref<1x4x8x640xf32, #tpu.memory_space<vmem>>, vector<1x1x8x384xf32>
    %245 = vector.shape_cast %244 : vector<1x1x8x384xf32> to vector<8x384xf32>
    %c200 = arith.constant 200 : index
    %c0_337 = arith.constant 0 : index
    %246 = vector.load %arg11[%c200, %c0_337] : memref<648x384xf32, #tpu.memory_space<vmem>>, vector<8x384xf32>
    tpu.vector_store %arg11[%c200, %c0_337], %245 {strides = array<i32>} : memref<648x384xf32, #tpu.memory_space<vmem>>, vector<8x384xf32>,
    %c0_338 = arith.constant 0 : index
    %c2_339 = arith.constant 2 : index
    %c0_340 = arith.constant 0 : index
    %c102_341 = arith.constant 102 : index
    %247 = vector.load %arg1[%c0_338, %c2_339, %c0_340, %c102_341] : memref<1x4x8x640xf32, #tpu.memory_space<vmem>>, vector<1x1x8x384xf32>
    %248 = vector.shape_cast %247 : vector<1x1x8x384xf32> to vector<8x384xf32>
    %c208 = arith.constant 208 : index
    %c0_342 = arith.constant 0 : index
    %249 = vector.load %arg11[%c208, %c0_342] : memref<648x384xf32, #tpu.memory_space<vmem>>, vector<8x384xf32>
    tpu.vector_store %arg11[%c208, %c0_342], %248 {strides = array<i32>} : memref<648x384xf32, #tpu.memory_space<vmem>>, vector<8x384xf32>,
    %c0_343 = arith.constant 0 : index
    %c2_344 = arith.constant 2 : index
    %c0_345 = arith.constant 0 : index
    %c103 = arith.constant 103 : index
    %250 = vector.load %arg1[%c0_343, %c2_344, %c0_345, %c103] : memref<1x4x8x640xf32, #tpu.memory_space<vmem>>, vector<1x1x8x384xf32>
    %251 = vector.shape_cast %250 : vector<1x1x8x384xf32> to vector<8x384xf32>
    %c216 = arith.constant 216 : index
    %c0_346 = arith.constant 0 : index
    %252 = vector.load %arg11[%c216, %c0_346] : memref<648x384xf32, #tpu.memory_space<vmem>>, vector<8x384xf32>
    tpu.vector_store %arg11[%c216, %c0_346], %251 {strides = array<i32>} : memref<648x384xf32, #tpu.memory_space<vmem>>, vector<8x384xf32>,
    %c0_347 = arith.constant 0 : index
    %c2_348 = arith.constant 2 : index
    %c0_349 = arith.constant 0 : index
    %c121 = arith.constant 121 : index
    %253 = vector.load %arg1[%c0_347, %c2_348, %c0_349, %c121] : memref<1x4x8x640xf32, #tpu.memory_space<vmem>>, vector<1x1x8x384xf32>
    %254 = vector.shape_cast %253 : vector<1x1x8x384xf32> to vector<8x384xf32>
    %c224 = arith.constant 224 : index
    %c0_350 = arith.constant 0 : index
    %255 = vector.load %arg11[%c224, %c0_350] : memref<648x384xf32, #tpu.memory_space<vmem>>, vector<8x384xf32>
    tpu.vector_store %arg11[%c224, %c0_350], %254 {strides = array<i32>} : memref<648x384xf32, #tpu.memory_space<vmem>>, vector<8x384xf32>,
    %c0_351 = arith.constant 0 : index
    %c2_352 = arith.constant 2 : index
    %c0_353 = arith.constant 0 : index
    %c122_354 = arith.constant 122 : index
    %256 = vector.load %arg1[%c0_351, %c2_352, %c0_353, %c122_354] : memref<1x4x8x640xf32, #tpu.memory_space<vmem>>, vector<1x1x8x384xf32>
    %257 = vector.shape_cast %256 : vector<1x1x8x384xf32> to vector<8x384xf32>
    %c232 = arith.constant 232 : index
    %c0_355 = arith.constant 0 : index
    %258 = vector.load %arg11[%c232, %c0_355] : memref<648x384xf32, #tpu.memory_space<vmem>>, vector<8x384xf32>
    tpu.vector_store %arg11[%c232, %c0_355], %257 {strides = array<i32>} : memref<648x384xf32, #tpu.memory_space<vmem>>, vector<8x384xf32>,
    %c0_356 = arith.constant 0 : index
    %c2_357 = arith.constant 2 : index
    %c0_358 = arith.constant 0 : index
    %c123_359 = arith.constant 123 : index
    %259 = vector.load %arg1[%c0_356, %c2_357, %c0_358, %c123_359] : memref<1x4x8x640xf32, #tpu.memory_space<vmem>>, vector<1x1x8x384xf32>
    %260 = vector.shape_cast %259 : vector<1x1x8x384xf32> to vector<8x384xf32>
    %c240 = arith.constant 240 : index
    %c0_360 = arith.constant 0 : index
    %261 = vector.load %arg11[%c240, %c0_360] : memref<648x384xf32, #tpu.memory_space<vmem>>, vector<8x384xf32>
    tpu.vector_store %arg11[%c240, %c0_360], %260 {strides = array<i32>} : memref<648x384xf32, #tpu.memory_space<vmem>>, vector<8x384xf32>,
    %c0_361 = arith.constant 0 : index
    %c2_362 = arith.constant 2 : index
    %c0_363 = arith.constant 0 : index
    %c124_364 = arith.constant 124 : index
    %262 = vector.load %arg1[%c0_361, %c2_362, %c0_363, %c124_364] : memref<1x4x8x640xf32, #tpu.memory_space<vmem>>, vector<1x1x8x384xf32>
    %263 = vector.shape_cast %262 : vector<1x1x8x384xf32> to vector<8x384xf32>
    %c248 = arith.constant 248 : index
    %c0_365 = arith.constant 0 : index
    %264 = vector.load %arg11[%c248, %c0_365] : memref<648x384xf32, #tpu.memory_space<vmem>>, vector<8x384xf32>
    tpu.vector_store %arg11[%c248, %c0_365], %263 {strides = array<i32>} : memref<648x384xf32, #tpu.memory_space<vmem>>, vector<8x384xf32>,
    %c0_366 = arith.constant 0 : index
    %c2_367 = arith.constant 2 : index
    %c0_368 = arith.constant 0 : index
    %c125_369 = arith.constant 125 : index
    %265 = vector.load %arg1[%c0_366, %c2_367, %c0_368, %c125_369] : memref<1x4x8x640xf32, #tpu.memory_space<vmem>>, vector<1x1x8x384xf32>
    %266 = vector.shape_cast %265 : vector<1x1x8x384xf32> to vector<8x384xf32>
    %c256 = arith.constant 256 : index
    %c0_370 = arith.constant 0 : index
    %267 = vector.load %arg11[%c256, %c0_370] : memref<648x384xf32, #tpu.memory_space<vmem>>, vector<8x384xf32>
    tpu.vector_store %arg11[%c256, %c0_370], %266 {strides = array<i32>} : memref<648x384xf32, #tpu.memory_space<vmem>>, vector<8x384xf32>,
    %c0_371 = arith.constant 0 : index
    %c2_372 = arith.constant 2 : index
    %c0_373 = arith.constant 0 : index
    %c126_374 = arith.constant 126 : index
    %268 = vector.load %arg1[%c0_371, %c2_372, %c0_373, %c126_374] : memref<1x4x8x640xf32, #tpu.memory_space<vmem>>, vector<1x1x8x384xf32>
    %269 = vector.shape_cast %268 : vector<1x1x8x384xf32> to vector<8x384xf32>
    %c264 = arith.constant 264 : index
    %c0_375 = arith.constant 0 : index
    %270 = vector.load %arg11[%c264, %c0_375] : memref<648x384xf32, #tpu.memory_space<vmem>>, vector<8x384xf32>
    tpu.vector_store %arg11[%c264, %c0_375], %269 {strides = array<i32>} : memref<648x384xf32, #tpu.memory_space<vmem>>, vector<8x384xf32>,
    %c0_376 = arith.constant 0 : index
    %c2_377 = arith.constant 2 : index
    %c0_378 = arith.constant 0 : index
    %c127 = arith.constant 127 : index
    %271 = vector.load %arg1[%c0_376, %c2_377, %c0_378, %c127] : memref<1x4x8x640xf32, #tpu.memory_space<vmem>>, vector<1x1x8x384xf32>
    %272 = vector.shape_cast %271 : vector<1x1x8x384xf32> to vector<8x384xf32>
    %c272 = arith.constant 272 : index
    %c0_379 = arith.constant 0 : index
    %273 = vector.load %arg11[%c272, %c0_379] : memref<648x384xf32, #tpu.memory_space<vmem>>, vector<8x384xf32>
    tpu.vector_store %arg11[%c272, %c0_379], %272 {strides = array<i32>} : memref<648x384xf32, #tpu.memory_space<vmem>>, vector<8x384xf32>,
    %c0_380 = arith.constant 0 : index
    %c2_381 = arith.constant 2 : index
    %c0_382 = arith.constant 0 : index
    %c145 = arith.constant 145 : index
    %274 = vector.load %arg1[%c0_380, %c2_381, %c0_382, %c145] : memref<1x4x8x640xf32, #tpu.memory_space<vmem>>, vector<1x1x8x384xf32>
    %275 = vector.shape_cast %274 : vector<1x1x8x384xf32> to vector<8x384xf32>
    %c280 = arith.constant 280 : index
    %c0_383 = arith.constant 0 : index
    %276 = vector.load %arg11[%c280, %c0_383] : memref<648x384xf32, #tpu.memory_space<vmem>>, vector<8x384xf32>
    tpu.vector_store %arg11[%c280, %c0_383], %275 {strides = array<i32>} : memref<648x384xf32, #tpu.memory_space<vmem>>, vector<8x384xf32>,
    %c0_384 = arith.constant 0 : index
    %c2_385 = arith.constant 2 : index
    %c0_386 = arith.constant 0 : index
    %c146_387 = arith.constant 146 : index
    %277 = vector.load %arg1[%c0_384, %c2_385, %c0_386, %c146_387] : memref<1x4x8x640xf32, #tpu.memory_space<vmem>>, vector<1x1x8x384xf32>
    %278 = vector.shape_cast %277 : vector<1x1x8x384xf32> to vector<8x384xf32>
    %c288 = arith.constant 288 : index
    %c0_388 = arith.constant 0 : index
    %279 = vector.load %arg11[%c288, %c0_388] : memref<648x384xf32, #tpu.memory_space<vmem>>, vector<8x384xf32>
    tpu.vector_store %arg11[%c288, %c0_388], %278 {strides = array<i32>} : memref<648x384xf32, #tpu.memory_space<vmem>>, vector<8x384xf32>,
    %c0_389 = arith.constant 0 : index
    %c2_390 = arith.constant 2 : index
    %c0_391 = arith.constant 0 : index
    %c147_392 = arith.constant 147 : index
    %280 = vector.load %arg1[%c0_389, %c2_390, %c0_391, %c147_392] : memref<1x4x8x640xf32, #tpu.memory_space<vmem>>, vector<1x1x8x384xf32>
    %281 = vector.shape_cast %280 : vector<1x1x8x384xf32> to vector<8x384xf32>
    %c296 = arith.constant 296 : index
    %c0_393 = arith.constant 0 : index
    %282 = vector.load %arg11[%c296, %c0_393] : memref<648x384xf32, #tpu.memory_space<vmem>>, vector<8x384xf32>
    tpu.vector_store %arg11[%c296, %c0_393], %281 {strides = array<i32>} : memref<648x384xf32, #tpu.memory_space<vmem>>, vector<8x384xf32>,
    %c0_394 = arith.constant 0 : index
    %c2_395 = arith.constant 2 : index
    %c0_396 = arith.constant 0 : index
    %c148_397 = arith.constant 148 : index
    %283 = vector.load %arg1[%c0_394, %c2_395, %c0_396, %c148_397] : memref<1x4x8x640xf32, #tpu.memory_space<vmem>>, vector<1x1x8x384xf32>
    %284 = vector.shape_cast %283 : vector<1x1x8x384xf32> to vector<8x384xf32>
    %c304 = arith.constant 304 : index
    %c0_398 = arith.constant 0 : index
    %285 = vector.load %arg11[%c304, %c0_398] : memref<648x384xf32, #tpu.memory_space<vmem>>, vector<8x384xf32>
    tpu.vector_store %arg11[%c304, %c0_398], %284 {strides = array<i32>} : memref<648x384xf32, #tpu.memory_space<vmem>>, vector<8x384xf32>,
    %c0_399 = arith.constant 0 : index
    %c2_400 = arith.constant 2 : index
    %c0_401 = arith.constant 0 : index
    %c149_402 = arith.constant 149 : index
    %286 = vector.load %arg1[%c0_399, %c2_400, %c0_401, %c149_402] : memref<1x4x8x640xf32, #tpu.memory_space<vmem>>, vector<1x1x8x384xf32>
    %287 = vector.shape_cast %286 : vector<1x1x8x384xf32> to vector<8x384xf32>
    %c312 = arith.constant 312 : index
    %c0_403 = arith.constant 0 : index
    %288 = vector.load %arg11[%c312, %c0_403] : memref<648x384xf32, #tpu.memory_space<vmem>>, vector<8x384xf32>
    tpu.vector_store %arg11[%c312, %c0_403], %287 {strides = array<i32>} : memref<648x384xf32, #tpu.memory_space<vmem>>, vector<8x384xf32>,
    %c0_404 = arith.constant 0 : index
    %c2_405 = arith.constant 2 : index
    %c0_406 = arith.constant 0 : index
    %c150_407 = arith.constant 150 : index
    %289 = vector.load %arg1[%c0_404, %c2_405, %c0_406, %c150_407] : memref<1x4x8x640xf32, #tpu.memory_space<vmem>>, vector<1x1x8x384xf32>
    %290 = vector.shape_cast %289 : vector<1x1x8x384xf32> to vector<8x384xf32>
    %c320 = arith.constant 320 : index
    %c0_408 = arith.constant 0 : index
    %291 = vector.load %arg11[%c320, %c0_408] : memref<648x384xf32, #tpu.memory_space<vmem>>, vector<8x384xf32>
    tpu.vector_store %arg11[%c320, %c0_408], %290 {strides = array<i32>} : memref<648x384xf32, #tpu.memory_space<vmem>>, vector<8x384xf32>,
    %c0_409 = arith.constant 0 : index
    %c2_410 = arith.constant 2 : index
    %c0_411 = arith.constant 0 : index
    %c151 = arith.constant 151 : index
    %292 = vector.load %arg1[%c0_409, %c2_410, %c0_411, %c151] : memref<1x4x8x640xf32, #tpu.memory_space<vmem>>, vector<1x1x8x384xf32>
    %293 = vector.shape_cast %292 : vector<1x1x8x384xf32> to vector<8x384xf32>
    %c328 = arith.constant 328 : index
    %c0_412 = arith.constant 0 : index
    %294 = vector.load %arg11[%c328, %c0_412] : memref<648x384xf32, #tpu.memory_space<vmem>>, vector<8x384xf32>
    tpu.vector_store %arg11[%c328, %c0_412], %293 {strides = array<i32>} : memref<648x384xf32, #tpu.memory_space<vmem>>, vector<8x384xf32>,
    %c0_413 = arith.constant 0 : index
    %c2_414 = arith.constant 2 : index
    %c0_415 = arith.constant 0 : index
    %c169 = arith.constant 169 : index
    %295 = vector.load %arg1[%c0_413, %c2_414, %c0_415, %c169] : memref<1x4x8x640xf32, #tpu.memory_space<vmem>>, vector<1x1x8x384xf32>
    %296 = vector.shape_cast %295 : vector<1x1x8x384xf32> to vector<8x384xf32>
    %c336 = arith.constant 336 : index
    %c0_416 = arith.constant 0 : index
    %297 = vector.load %arg11[%c336, %c0_416] : memref<648x384xf32, #tpu.memory_space<vmem>>, vector<8x384xf32>
    tpu.vector_store %arg11[%c336, %c0_416], %296 {strides = array<i32>} : memref<648x384xf32, #tpu.memory_space<vmem>>, vector<8x384xf32>,
    %c0_417 = arith.constant 0 : index
    %c2_418 = arith.constant 2 : index
    %c0_419 = arith.constant 0 : index
    %c170 = arith.constant 170 : index
    %298 = vector.load %arg1[%c0_417, %c2_418, %c0_419, %c170] : memref<1x4x8x640xf32, #tpu.memory_space<vmem>>, vector<1x1x8x384xf32>
    %299 = vector.shape_cast %298 : vector<1x1x8x384xf32> to vector<8x384xf32>
    %c344 = arith.constant 344 : index
    %c0_420 = arith.constant 0 : index
    %300 = vector.load %arg11[%c344, %c0_420] : memref<648x384xf32, #tpu.memory_space<vmem>>, vector<8x384xf32>
    tpu.vector_store %arg11[%c344, %c0_420], %299 {strides = array<i32>} : memref<648x384xf32, #tpu.memory_space<vmem>>, vector<8x384xf32>,
    %c0_421 = arith.constant 0 : index
    %c2_422 = arith.constant 2 : index
    %c0_423 = arith.constant 0 : index
    %c171 = arith.constant 171 : index
    %301 = vector.load %arg1[%c0_421, %c2_422, %c0_423, %c171] : memref<1x4x8x640xf32, #tpu.memory_space<vmem>>, vector<1x1x8x384xf32>
    %302 = vector.shape_cast %301 : vector<1x1x8x384xf32> to vector<8x384xf32>
    %c352 = arith.constant 352 : index
    %c0_424 = arith.constant 0 : index
    %303 = vector.load %arg11[%c352, %c0_424] : memref<648x384xf32, #tpu.memory_space<vmem>>, vector<8x384xf32>
    tpu.vector_store %arg11[%c352, %c0_424], %302 {strides = array<i32>} : memref<648x384xf32, #tpu.memory_space<vmem>>, vector<8x384xf32>,
    %c0_425 = arith.constant 0 : index
    %c2_426 = arith.constant 2 : index
    %c0_427 = arith.constant 0 : index
    %c172 = arith.constant 172 : index
    %304 = vector.load %arg1[%c0_425, %c2_426, %c0_427, %c172] : memref<1x4x8x640xf32, #tpu.memory_space<vmem>>, vector<1x1x8x384xf32>
    %305 = vector.shape_cast %304 : vector<1x1x8x384xf32> to vector<8x384xf32>
    %c360 = arith.constant 360 : index
    %c0_428 = arith.constant 0 : index
    %306 = vector.load %arg11[%c360, %c0_428] : memref<648x384xf32, #tpu.memory_space<vmem>>, vector<8x384xf32>
    tpu.vector_store %arg11[%c360, %c0_428], %305 {strides = array<i32>} : memref<648x384xf32, #tpu.memory_space<vmem>>, vector<8x384xf32>,
    %c0_429 = arith.constant 0 : index
    %c2_430 = arith.constant 2 : index
    %c0_431 = arith.constant 0 : index
    %c173 = arith.constant 173 : index
    %307 = vector.load %arg1[%c0_429, %c2_430, %c0_431, %c173] : memref<1x4x8x640xf32, #tpu.memory_space<vmem>>, vector<1x1x8x384xf32>
    %308 = vector.shape_cast %307 : vector<1x1x8x384xf32> to vector<8x384xf32>
    %c368 = arith.constant 368 : index
    %c0_432 = arith.constant 0 : index
    %309 = vector.load %arg11[%c368, %c0_432] : memref<648x384xf32, #tpu.memory_space<vmem>>, vector<8x384xf32>
    tpu.vector_store %arg11[%c368, %c0_432], %308 {strides = array<i32>} : memref<648x384xf32, #tpu.memory_space<vmem>>, vector<8x384xf32>,
    %c0_433 = arith.constant 0 : index
    %c2_434 = arith.constant 2 : index
    %c0_435 = arith.constant 0 : index
    %c174 = arith.constant 174 : index
    %310 = vector.load %arg1[%c0_433, %c2_434, %c0_435, %c174] : memref<1x4x8x640xf32, #tpu.memory_space<vmem>>, vector<1x1x8x384xf32>
    %311 = vector.shape_cast %310 : vector<1x1x8x384xf32> to vector<8x384xf32>
    %c376 = arith.constant 376 : index
    %c0_436 = arith.constant 0 : index
    %312 = vector.load %arg11[%c376, %c0_436] : memref<648x384xf32, #tpu.memory_space<vmem>>, vector<8x384xf32>
    tpu.vector_store %arg11[%c376, %c0_436], %311 {strides = array<i32>} : memref<648x384xf32, #tpu.memory_space<vmem>>, vector<8x384xf32>,
    %c0_437 = arith.constant 0 : index
    %c2_438 = arith.constant 2 : index
    %c0_439 = arith.constant 0 : index
    %c175 = arith.constant 175 : index
    %313 = vector.load %arg1[%c0_437, %c2_438, %c0_439, %c175] : memref<1x4x8x640xf32, #tpu.memory_space<vmem>>, vector<1x1x8x384xf32>
    %314 = vector.shape_cast %313 : vector<1x1x8x384xf32> to vector<8x384xf32>
    %c384 = arith.constant 384 : index
    %c0_440 = arith.constant 0 : index
    %315 = vector.load %arg11[%c384, %c0_440] : memref<648x384xf32, #tpu.memory_space<vmem>>, vector<8x384xf32>
    tpu.vector_store %arg11[%c384, %c0_440], %314 {strides = array<i32>} : memref<648x384xf32, #tpu.memory_space<vmem>>, vector<8x384xf32>,
    %c0_441 = arith.constant 0 : index
    %c0_442 = arith.constant 0 : index
    %316 = vector.load %arg4[%c0_441, %c0_442] : memref<8x392xf32, #tpu.memory_space<vmem>>, vector<8x392xf32>
    %c0_443 = arith.constant 0 : index
    %c0_444 = arith.constant 0 : index
    %317 = vector.load %arg11[%c0_443, %c0_444] : memref<648x384xf32, #tpu.memory_space<vmem>>, vector<392x384xf32>
    %cst_445 = arith.constant dense<0.000000e+00> : vector<8x384xf32>
    %318 = tpu.matmul %316, %317, %cst_445 {dimension_numbers = #tpu.dot_dimension_numbers<[1], [0], [0], [1], [0, 0, 1, 1], [], []>} : vector<8x392xf32>, vector<392x384xf32>, vector<8x384xf32> -> vector<8x384xf32>
    %c2_446 = arith.constant 2 : index
    %c0_447 = arith.constant 0 : index
    %c0_448 = arith.constant 0 : index
    %319 = vector.load %arg6[%c2_446, %c0_447, %c0_448] : memref<4x8x1xf32, #tpu.memory_space<vmem>>, vector<1x8x1xf32>
    %320 = vector.shape_cast %319 : vector<1x8x1xf32> to vector<8x1xf32>
    %321 = vector.broadcast %320 : vector<8x1xf32> to vector<8x384xf32>
    %322 = arith.addf %318, %321 : vector<8x384xf32>
    %323 = vector.broadcast %0 : vector<1x384xf32> to vector<8x384xf32>
    %324 = arith.mulf %322, %323 : vector<8x384xf32>
    %cst_449 = arith.constant dense<0.000000e+00> : vector<8xf32>
    %325 = vector.multi_reduction <add>, %324, %cst_449 [1] : vector<8x384xf32> to vector<8xf32>
    %326 = vector.shape_cast %325 : vector<8xf32> to vector<8x1xf32>
    %cst_450 = arith.constant 3.906250e-03 : f32
    %327 = vector.broadcast %cst_450 : f32 to vector<8x1xf32>
    %328 = arith.mulf %326, %327 : vector<8x1xf32>
    %c2_451 = arith.constant 2 : index
    %c0_452 = arith.constant 0 : index
    %c0_453 = arith.constant 0 : index
    %329 = vector.load %arg7[%c2_451, %c0_452, %c0_453] : memref<4x8x2xf32, #tpu.memory_space<vmem>>, vector<1x8x2xf32>
    %330 = vector.shape_cast %329 : vector<1x8x2xf32> to vector<8x2xf32>
    %331 = vector.broadcast %328 : vector<8x1xf32> to vector<8x2xf32>
    %332 = arith.mulf %330, %331 : vector<8x2xf32>
    %cst_454 = arith.constant dense<0.000000e+00> : vector<2xf32>
    %333 = vector.multi_reduction <add>, %332, %cst_454 [0] : vector<8x2xf32> to vector<2xf32>
    %334 = vector.shape_cast %333 : vector<2xf32> to vector<1x2xf32>
    %cst_455 = arith.constant 0.000000e+00 : f32
    %335 = vector.broadcast %cst_455 : f32 to vector<1x2xf32>
    %336 = arith.maximumf %334, %335 : vector<1x2xf32>
    %c2_456 = arith.constant 2 : index
    %c0_457 = arith.constant 0 : index
    %c0_458 = arith.constant 0 : index
    %337 = vector.load %arg8[%c2_456, %c0_457, %c0_458] : memref<4x8x2xf32, #tpu.memory_space<vmem>>, vector<1x8x2xf32>
    %338 = vector.shape_cast %337 : vector<1x8x2xf32> to vector<8x2xf32>
    %339 = vector.broadcast %336 : vector<1x2xf32> to vector<8x2xf32>
    %340 = arith.mulf %338, %339 : vector<8x2xf32>
    %cst_459 = arith.constant dense<0.000000e+00> : vector<8xf32>
    %341 = vector.multi_reduction <add>, %340, %cst_459 [1] : vector<8x2xf32> to vector<8xf32>
    %342 = vector.shape_cast %341 : vector<8xf32> to vector<8x1xf32>
    %cst_460 = arith.constant 0.000000e+00 : f32
    %343 = vector.broadcast %cst_460 : f32 to vector<8x1xf32>
    %344 = arith.subf %343, %342 : vector<8x1xf32>
    %345 = math.exp %344 : vector<8x1xf32>
    %cst_461 = arith.constant 1.000000e+00 : f32
    %346 = vector.broadcast %cst_461 : f32 to vector<8x1xf32>
    %347 = arith.addf %346, %345 : vector<8x1xf32>
    %348 = tpu.reciprocal %347 {approx = true} : vector<8x1xf32> -> vector<8x1xf32>
    %c0_462 = arith.constant 0 : index
    %c3 = arith.constant 3 : index
    %c0_463 = arith.constant 0 : index
    %c0_464 = arith.constant 0 : index
    %349 = vector.load %arg1[%c0_462, %c3, %c0_463, %c0_464] : memref<1x4x8x640xf32, #tpu.memory_space<vmem>>, vector<1x1x8x384xf32>
    %350 = vector.shape_cast %349 : vector<1x1x8x384xf32> to vector<8x384xf32>
    %c0_465 = arith.constant 0 : index
    %c0_466 = arith.constant 0 : index
    %351 = vector.load %arg11[%c0_465, %c0_466] : memref<648x384xf32, #tpu.memory_space<vmem>>, vector<8x384xf32>
    tpu.vector_store %arg11[%c0_465, %c0_466], %350 {strides = array<i32>} : memref<648x384xf32, #tpu.memory_space<vmem>>, vector<8x384xf32>,
    %c0_467 = arith.constant 0 : index
    %c3_468 = arith.constant 3 : index
    %c0_469 = arith.constant 0 : index
    %c1_470 = arith.constant 1 : index
    %352 = vector.load %arg1[%c0_467, %c3_468, %c0_469, %c1_470] : memref<1x4x8x640xf32, #tpu.memory_space<vmem>>, vector<1x1x8x384xf32>
    %353 = vector.shape_cast %352 : vector<1x1x8x384xf32> to vector<8x384xf32>
    %c8_471 = arith.constant 8 : index
    %c0_472 = arith.constant 0 : index
    %354 = vector.load %arg11[%c8_471, %c0_472] : memref<648x384xf32, #tpu.memory_space<vmem>>, vector<8x384xf32>
    tpu.vector_store %arg11[%c8_471, %c0_472], %353 {strides = array<i32>} : memref<648x384xf32, #tpu.memory_space<vmem>>, vector<8x384xf32>,
    %c0_473 = arith.constant 0 : index
    %c3_474 = arith.constant 3 : index
    %c0_475 = arith.constant 0 : index
    %c2_476 = arith.constant 2 : index
    %355 = vector.load %arg1[%c0_473, %c3_474, %c0_475, %c2_476] : memref<1x4x8x640xf32, #tpu.memory_space<vmem>>, vector<1x1x8x384xf32>
    %356 = vector.shape_cast %355 : vector<1x1x8x384xf32> to vector<8x384xf32>
    %c16_477 = arith.constant 16 : index
    %c0_478 = arith.constant 0 : index
    %357 = vector.load %arg11[%c16_477, %c0_478] : memref<648x384xf32, #tpu.memory_space<vmem>>, vector<8x384xf32>
    tpu.vector_store %arg11[%c16_477, %c0_478], %356 {strides = array<i32>} : memref<648x384xf32, #tpu.memory_space<vmem>>, vector<8x384xf32>,
    %c0_479 = arith.constant 0 : index
    %c3_480 = arith.constant 3 : index
    %c0_481 = arith.constant 0 : index
    %c3_482 = arith.constant 3 : index
    %358 = vector.load %arg1[%c0_479, %c3_480, %c0_481, %c3_482] : memref<1x4x8x640xf32, #tpu.memory_space<vmem>>, vector<1x1x8x384xf32>
    %359 = vector.shape_cast %358 : vector<1x1x8x384xf32> to vector<8x384xf32>
    %c24_483 = arith.constant 24 : index
    %c0_484 = arith.constant 0 : index
    %360 = vector.load %arg11[%c24_483, %c0_484] : memref<648x384xf32, #tpu.memory_space<vmem>>, vector<8x384xf32>
    tpu.vector_store %arg11[%c24_483, %c0_484], %359 {strides = array<i32>} : memref<648x384xf32, #tpu.memory_space<vmem>>, vector<8x384xf32>,
    %c0_485 = arith.constant 0 : index
    %c3_486 = arith.constant 3 : index
    %c0_487 = arith.constant 0 : index
    %c4 = arith.constant 4 : index
    %361 = vector.load %arg1[%c0_485, %c3_486, %c0_487, %c4] : memref<1x4x8x640xf32, #tpu.memory_space<vmem>>, vector<1x1x8x384xf32>
    %362 = vector.shape_cast %361 : vector<1x1x8x384xf32> to vector<8x384xf32>
    %c32_488 = arith.constant 32 : index
    %c0_489 = arith.constant 0 : index
    %363 = vector.load %arg11[%c32_488, %c0_489] : memref<648x384xf32, #tpu.memory_space<vmem>>, vector<8x384xf32>
    tpu.vector_store %arg11[%c32_488, %c0_489], %362 {strides = array<i32>} : memref<648x384xf32, #tpu.memory_space<vmem>>, vector<8x384xf32>,
    %c0_490 = arith.constant 0 : index
    %c3_491 = arith.constant 3 : index
    %c0_492 = arith.constant 0 : index
    %c5 = arith.constant 5 : index
    %364 = vector.load %arg1[%c0_490, %c3_491, %c0_492, %c5] : memref<1x4x8x640xf32, #tpu.memory_space<vmem>>, vector<1x1x8x384xf32>
    %365 = vector.shape_cast %364 : vector<1x1x8x384xf32> to vector<8x384xf32>
    %c40_493 = arith.constant 40 : index
    %c0_494 = arith.constant 0 : index
    %366 = vector.load %arg11[%c40_493, %c0_494] : memref<648x384xf32, #tpu.memory_space<vmem>>, vector<8x384xf32>
    tpu.vector_store %arg11[%c40_493, %c0_494], %365 {strides = array<i32>} : memref<648x384xf32, #tpu.memory_space<vmem>>, vector<8x384xf32>,
    %c0_495 = arith.constant 0 : index
    %c3_496 = arith.constant 3 : index
    %c0_497 = arith.constant 0 : index
    %c6 = arith.constant 6 : index
    %367 = vector.load %arg1[%c0_495, %c3_496, %c0_497, %c6] : memref<1x4x8x640xf32, #tpu.memory_space<vmem>>, vector<1x1x8x384xf32>
    %368 = vector.shape_cast %367 : vector<1x1x8x384xf32> to vector<8x384xf32>
    %c48_498 = arith.constant 48 : index
    %c0_499 = arith.constant 0 : index
    %369 = vector.load %arg11[%c48_498, %c0_499] : memref<648x384xf32, #tpu.memory_space<vmem>>, vector<8x384xf32>
    tpu.vector_store %arg11[%c48_498, %c0_499], %368 {strides = array<i32>} : memref<648x384xf32, #tpu.memory_space<vmem>>, vector<8x384xf32>,
    %c0_500 = arith.constant 0 : index
    %c3_501 = arith.constant 3 : index
    %c0_502 = arith.constant 0 : index
    %c7 = arith.constant 7 : index
    %370 = vector.load %arg1[%c0_500, %c3_501, %c0_502, %c7] : memref<1x4x8x640xf32, #tpu.memory_space<vmem>>, vector<1x1x8x384xf32>
    %371 = vector.shape_cast %370 : vector<1x1x8x384xf32> to vector<8x384xf32>
    %c56_503 = arith.constant 56 : index
    %c0_504 = arith.constant 0 : index
    %372 = vector.load %arg11[%c56_503, %c0_504] : memref<648x384xf32, #tpu.memory_space<vmem>>, vector<8x384xf32>
    tpu.vector_store %arg11[%c56_503, %c0_504], %371 {strides = array<i32>} : memref<648x384xf32, #tpu.memory_space<vmem>>, vector<8x384xf32>,
    %c0_505 = arith.constant 0 : index
    %c3_506 = arith.constant 3 : index
    %c0_507 = arith.constant 0 : index
    %c8_508 = arith.constant 8 : index
    %373 = vector.load %arg1[%c0_505, %c3_506, %c0_507, %c8_508] : memref<1x4x8x640xf32, #tpu.memory_space<vmem>>, vector<1x1x8x384xf32>
    %374 = vector.shape_cast %373 : vector<1x1x8x384xf32> to vector<8x384xf32>
    %c64_509 = arith.constant 64 : index
    %c0_510 = arith.constant 0 : index
    %375 = vector.load %arg11[%c64_509, %c0_510] : memref<648x384xf32, #tpu.memory_space<vmem>>, vector<8x384xf32>
    tpu.vector_store %arg11[%c64_509, %c0_510], %374 {strides = array<i32>} : memref<648x384xf32, #tpu.memory_space<vmem>>, vector<8x384xf32>,
    %c0_511 = arith.constant 0 : index
    %c3_512 = arith.constant 3 : index
    %c0_513 = arith.constant 0 : index
    %c24_514 = arith.constant 24 : index
    %376 = vector.load %arg1[%c0_511, %c3_512, %c0_513, %c24_514] : memref<1x4x8x640xf32, #tpu.memory_space<vmem>>, vector<1x1x8x384xf32>
    %377 = vector.shape_cast %376 : vector<1x1x8x384xf32> to vector<8x384xf32>
    %c72_515 = arith.constant 72 : index
    %c0_516 = arith.constant 0 : index
    %378 = vector.load %arg11[%c72_515, %c0_516] : memref<648x384xf32, #tpu.memory_space<vmem>>, vector<8x384xf32>
    tpu.vector_store %arg11[%c72_515, %c0_516], %377 {strides = array<i32>} : memref<648x384xf32, #tpu.memory_space<vmem>>, vector<8x384xf32>,
    %c0_517 = arith.constant 0 : index
    %c3_518 = arith.constant 3 : index
    %c0_519 = arith.constant 0 : index
    %c25_520 = arith.constant 25 : index
    %379 = vector.load %arg1[%c0_517, %c3_518, %c0_519, %c25_520] : memref<1x4x8x640xf32, #tpu.memory_space<vmem>>, vector<1x1x8x384xf32>
    %380 = vector.shape_cast %379 : vector<1x1x8x384xf32> to vector<8x384xf32>
    %c80_521 = arith.constant 80 : index
    %c0_522 = arith.constant 0 : index
    %381 = vector.load %arg11[%c80_521, %c0_522] : memref<648x384xf32, #tpu.memory_space<vmem>>, vector<8x384xf32>
    tpu.vector_store %arg11[%c80_521, %c0_522], %380 {strides = array<i32>} : memref<648x384xf32, #tpu.memory_space<vmem>>, vector<8x384xf32>,
    %c0_523 = arith.constant 0 : index
    %c3_524 = arith.constant 3 : index
    %c0_525 = arith.constant 0 : index
    %c26_526 = arith.constant 26 : index
    %382 = vector.load %arg1[%c0_523, %c3_524, %c0_525, %c26_526] : memref<1x4x8x640xf32, #tpu.memory_space<vmem>>, vector<1x1x8x384xf32>
    %383 = vector.shape_cast %382 : vector<1x1x8x384xf32> to vector<8x384xf32>
    %c88_527 = arith.constant 88 : index
    %c0_528 = arith.constant 0 : index
    %384 = vector.load %arg11[%c88_527, %c0_528] : memref<648x384xf32, #tpu.memory_space<vmem>>, vector<8x384xf32>
    tpu.vector_store %arg11[%c88_527, %c0_528], %383 {strides = array<i32>} : memref<648x384xf32, #tpu.memory_space<vmem>>, vector<8x384xf32>,
    %c0_529 = arith.constant 0 : index
    %c3_530 = arith.constant 3 : index
    %c0_531 = arith.constant 0 : index
    %c27_532 = arith.constant 27 : index
    %385 = vector.load %arg1[%c0_529, %c3_530, %c0_531, %c27_532] : memref<1x4x8x640xf32, #tpu.memory_space<vmem>>, vector<1x1x8x384xf32>
    %386 = vector.shape_cast %385 : vector<1x1x8x384xf32> to vector<8x384xf32>
    %c96_533 = arith.constant 96 : index
    %c0_534 = arith.constant 0 : index
    %387 = vector.load %arg11[%c96_533, %c0_534] : memref<648x384xf32, #tpu.memory_space<vmem>>, vector<8x384xf32>
    tpu.vector_store %arg11[%c96_533, %c0_534], %386 {strides = array<i32>} : memref<648x384xf32, #tpu.memory_space<vmem>>, vector<8x384xf32>,
    %c0_535 = arith.constant 0 : index
    %c3_536 = arith.constant 3 : index
    %c0_537 = arith.constant 0 : index
    %c28_538 = arith.constant 28 : index
    %388 = vector.load %arg1[%c0_535, %c3_536, %c0_537, %c28_538] : memref<1x4x8x640xf32, #tpu.memory_space<vmem>>, vector<1x1x8x384xf32>
    %389 = vector.shape_cast %388 : vector<1x1x8x384xf32> to vector<8x384xf32>
    %c104_539 = arith.constant 104 : index
    %c0_540 = arith.constant 0 : index
    %390 = vector.load %arg11[%c104_539, %c0_540] : memref<648x384xf32, #tpu.memory_space<vmem>>, vector<8x384xf32>
    tpu.vector_store %arg11[%c104_539, %c0_540], %389 {strides = array<i32>} : memref<648x384xf32, #tpu.memory_space<vmem>>, vector<8x384xf32>,
    %c0_541 = arith.constant 0 : index
    %c3_542 = arith.constant 3 : index
    %c0_543 = arith.constant 0 : index
    %c29_544 = arith.constant 29 : index
    %391 = vector.load %arg1[%c0_541, %c3_542, %c0_543, %c29_544] : memref<1x4x8x640xf32, #tpu.memory_space<vmem>>, vector<1x1x8x384xf32>
    %392 = vector.shape_cast %391 : vector<1x1x8x384xf32> to vector<8x384xf32>
    %c112_545 = arith.constant 112 : index
    %c0_546 = arith.constant 0 : index
    %393 = vector.load %arg11[%c112_545, %c0_546] : memref<648x384xf32, #tpu.memory_space<vmem>>, vector<8x384xf32>
    tpu.vector_store %arg11[%c112_545, %c0_546], %392 {strides = array<i32>} : memref<648x384xf32, #tpu.memory_space<vmem>>, vector<8x384xf32>,
    %c0_547 = arith.constant 0 : index
    %c3_548 = arith.constant 3 : index
    %c0_549 = arith.constant 0 : index
    %c30_550 = arith.constant 30 : index
    %394 = vector.load %arg1[%c0_547, %c3_548, %c0_549, %c30_550] : memref<1x4x8x640xf32, #tpu.memory_space<vmem>>, vector<1x1x8x384xf32>
    %395 = vector.shape_cast %394 : vector<1x1x8x384xf32> to vector<8x384xf32>
    %c120_551 = arith.constant 120 : index
    %c0_552 = arith.constant 0 : index
    %396 = vector.load %arg11[%c120_551, %c0_552] : memref<648x384xf32, #tpu.memory_space<vmem>>, vector<8x384xf32>
    tpu.vector_store %arg11[%c120_551, %c0_552], %395 {strides = array<i32>} : memref<648x384xf32, #tpu.memory_space<vmem>>, vector<8x384xf32>,
    %c0_553 = arith.constant 0 : index
    %c3_554 = arith.constant 3 : index
    %c0_555 = arith.constant 0 : index
    %c31_556 = arith.constant 31 : index
    %397 = vector.load %arg1[%c0_553, %c3_554, %c0_555, %c31_556] : memref<1x4x8x640xf32, #tpu.memory_space<vmem>>, vector<1x1x8x384xf32>
    %398 = vector.shape_cast %397 : vector<1x1x8x384xf32> to vector<8x384xf32>
    %c128_557 = arith.constant 128 : index
    %c0_558 = arith.constant 0 : index
    %399 = vector.load %arg11[%c128_557, %c0_558] : memref<648x384xf32, #tpu.memory_space<vmem>>, vector<8x384xf32>
    tpu.vector_store %arg11[%c128_557, %c0_558], %398 {strides = array<i32>} : memref<648x384xf32, #tpu.memory_space<vmem>>, vector<8x384xf32>,
    %c0_559 = arith.constant 0 : index
    %c3_560 = arith.constant 3 : index
    %c0_561 = arith.constant 0 : index
    %c32_562 = arith.constant 32 : index
    %400 = vector.load %arg1[%c0_559, %c3_560, %c0_561, %c32_562] : memref<1x4x8x640xf32, #tpu.memory_space<vmem>>, vector<1x1x8x384xf32>
    %401 = vector.shape_cast %400 : vector<1x1x8x384xf32> to vector<8x384xf32>
    %c136_563 = arith.constant 136 : index
    %c0_564 = arith.constant 0 : index
    %402 = vector.load %arg11[%c136_563, %c0_564] : memref<648x384xf32, #tpu.memory_space<vmem>>, vector<8x384xf32>
    tpu.vector_store %arg11[%c136_563, %c0_564], %401 {strides = array<i32>} : memref<648x384xf32, #tpu.memory_space<vmem>>, vector<8x384xf32>,
    %c0_565 = arith.constant 0 : index
    %c3_566 = arith.constant 3 : index
    %c0_567 = arith.constant 0 : index
    %c48_568 = arith.constant 48 : index
    %403 = vector.load %arg1[%c0_565, %c3_566, %c0_567, %c48_568] : memref<1x4x8x640xf32, #tpu.memory_space<vmem>>, vector<1x1x8x384xf32>
    %404 = vector.shape_cast %403 : vector<1x1x8x384xf32> to vector<8x384xf32>
    %c144_569 = arith.constant 144 : index
    %c0_570 = arith.constant 0 : index
    %405 = vector.load %arg11[%c144_569, %c0_570] : memref<648x384xf32, #tpu.memory_space<vmem>>, vector<8x384xf32>
    tpu.vector_store %arg11[%c144_569, %c0_570], %404 {strides = array<i32>} : memref<648x384xf32, #tpu.memory_space<vmem>>, vector<8x384xf32>,
    %c0_571 = arith.constant 0 : index
    %c3_572 = arith.constant 3 : index
    %c0_573 = arith.constant 0 : index
    %c49_574 = arith.constant 49 : index
    %406 = vector.load %arg1[%c0_571, %c3_572, %c0_573, %c49_574] : memref<1x4x8x640xf32, #tpu.memory_space<vmem>>, vector<1x1x8x384xf32>
    %407 = vector.shape_cast %406 : vector<1x1x8x384xf32> to vector<8x384xf32>
    %c152_575 = arith.constant 152 : index
    %c0_576 = arith.constant 0 : index
    %408 = vector.load %arg11[%c152_575, %c0_576] : memref<648x384xf32, #tpu.memory_space<vmem>>, vector<8x384xf32>
    tpu.vector_store %arg11[%c152_575, %c0_576], %407 {strides = array<i32>} : memref<648x384xf32, #tpu.memory_space<vmem>>, vector<8x384xf32>,
    %c0_577 = arith.constant 0 : index
    %c3_578 = arith.constant 3 : index
    %c0_579 = arith.constant 0 : index
    %c50_580 = arith.constant 50 : index
    %409 = vector.load %arg1[%c0_577, %c3_578, %c0_579, %c50_580] : memref<1x4x8x640xf32, #tpu.memory_space<vmem>>, vector<1x1x8x384xf32>
    %410 = vector.shape_cast %409 : vector<1x1x8x384xf32> to vector<8x384xf32>
    %c160_581 = arith.constant 160 : index
    %c0_582 = arith.constant 0 : index
    %411 = vector.load %arg11[%c160_581, %c0_582] : memref<648x384xf32, #tpu.memory_space<vmem>>, vector<8x384xf32>
    tpu.vector_store %arg11[%c160_581, %c0_582], %410 {strides = array<i32>} : memref<648x384xf32, #tpu.memory_space<vmem>>, vector<8x384xf32>,
    %c0_583 = arith.constant 0 : index
    %c3_584 = arith.constant 3 : index
    %c0_585 = arith.constant 0 : index
    %c51_586 = arith.constant 51 : index
    %412 = vector.load %arg1[%c0_583, %c3_584, %c0_585, %c51_586] : memref<1x4x8x640xf32, #tpu.memory_space<vmem>>, vector<1x1x8x384xf32>
    %413 = vector.shape_cast %412 : vector<1x1x8x384xf32> to vector<8x384xf32>
    %c168_587 = arith.constant 168 : index
    %c0_588 = arith.constant 0 : index
    %414 = vector.load %arg11[%c168_587, %c0_588] : memref<648x384xf32, #tpu.memory_space<vmem>>, vector<8x384xf32>
    tpu.vector_store %arg11[%c168_587, %c0_588], %413 {strides = array<i32>} : memref<648x384xf32, #tpu.memory_space<vmem>>, vector<8x384xf32>,
    %c0_589 = arith.constant 0 : index
    %c3_590 = arith.constant 3 : index
    %c0_591 = arith.constant 0 : index
    %c52_592 = arith.constant 52 : index
    %415 = vector.load %arg1[%c0_589, %c3_590, %c0_591, %c52_592] : memref<1x4x8x640xf32, #tpu.memory_space<vmem>>, vector<1x1x8x384xf32>
    %416 = vector.shape_cast %415 : vector<1x1x8x384xf32> to vector<8x384xf32>
    %c176_593 = arith.constant 176 : index
    %c0_594 = arith.constant 0 : index
    %417 = vector.load %arg11[%c176_593, %c0_594] : memref<648x384xf32, #tpu.memory_space<vmem>>, vector<8x384xf32>
    tpu.vector_store %arg11[%c176_593, %c0_594], %416 {strides = array<i32>} : memref<648x384xf32, #tpu.memory_space<vmem>>, vector<8x384xf32>,
    %c0_595 = arith.constant 0 : index
    %c3_596 = arith.constant 3 : index
    %c0_597 = arith.constant 0 : index
    %c53_598 = arith.constant 53 : index
    %418 = vector.load %arg1[%c0_595, %c3_596, %c0_597, %c53_598] : memref<1x4x8x640xf32, #tpu.memory_space<vmem>>, vector<1x1x8x384xf32>
    %419 = vector.shape_cast %418 : vector<1x1x8x384xf32> to vector<8x384xf32>
    %c184_599 = arith.constant 184 : index
    %c0_600 = arith.constant 0 : index
    %420 = vector.load %arg11[%c184_599, %c0_600] : memref<648x384xf32, #tpu.memory_space<vmem>>, vector<8x384xf32>
    tpu.vector_store %arg11[%c184_599, %c0_600], %419 {strides = array<i32>} : memref<648x384xf32, #tpu.memory_space<vmem>>, vector<8x384xf32>,
    %c0_601 = arith.constant 0 : index
    %c3_602 = arith.constant 3 : index
    %c0_603 = arith.constant 0 : index
    %c54_604 = arith.constant 54 : index
    %421 = vector.load %arg1[%c0_601, %c3_602, %c0_603, %c54_604] : memref<1x4x8x640xf32, #tpu.memory_space<vmem>>, vector<1x1x8x384xf32>
    %422 = vector.shape_cast %421 : vector<1x1x8x384xf32> to vector<8x384xf32>
    %c192_605 = arith.constant 192 : index
    %c0_606 = arith.constant 0 : index
    %423 = vector.load %arg11[%c192_605, %c0_606] : memref<648x384xf32, #tpu.memory_space<vmem>>, vector<8x384xf32>
    tpu.vector_store %arg11[%c192_605, %c0_606], %422 {strides = array<i32>} : memref<648x384xf32, #tpu.memory_space<vmem>>, vector<8x384xf32>,
    %c0_607 = arith.constant 0 : index
    %c3_608 = arith.constant 3 : index
    %c0_609 = arith.constant 0 : index
    %c55_610 = arith.constant 55 : index
    %424 = vector.load %arg1[%c0_607, %c3_608, %c0_609, %c55_610] : memref<1x4x8x640xf32, #tpu.memory_space<vmem>>, vector<1x1x8x384xf32>
    %425 = vector.shape_cast %424 : vector<1x1x8x384xf32> to vector<8x384xf32>
    %c200_611 = arith.constant 200 : index
    %c0_612 = arith.constant 0 : index
    %426 = vector.load %arg11[%c200_611, %c0_612] : memref<648x384xf32, #tpu.memory_space<vmem>>, vector<8x384xf32>
    tpu.vector_store %arg11[%c200_611, %c0_612], %425 {strides = array<i32>} : memref<648x384xf32, #tpu.memory_space<vmem>>, vector<8x384xf32>,
    %c0_613 = arith.constant 0 : index
    %c3_614 = arith.constant 3 : index
    %c0_615 = arith.constant 0 : index
    %c56_616 = arith.constant 56 : index
    %427 = vector.load %arg1[%c0_613, %c3_614, %c0_615, %c56_616] : memref<1x4x8x640xf32, #tpu.memory_space<vmem>>, vector<1x1x8x384xf32>
    %428 = vector.shape_cast %427 : vector<1x1x8x384xf32> to vector<8x384xf32>
    %c208_617 = arith.constant 208 : index
    %c0_618 = arith.constant 0 : index
    %429 = vector.load %arg11[%c208_617, %c0_618] : memref<648x384xf32, #tpu.memory_space<vmem>>, vector<8x384xf32>
    tpu.vector_store %arg11[%c208_617, %c0_618], %428 {strides = array<i32>} : memref<648x384xf32, #tpu.memory_space<vmem>>, vector<8x384xf32>,
    %c0_619 = arith.constant 0 : index
    %c3_620 = arith.constant 3 : index
    %c0_621 = arith.constant 0 : index
    %c72_622 = arith.constant 72 : index
    %430 = vector.load %arg1[%c0_619, %c3_620, %c0_621, %c72_622] : memref<1x4x8x640xf32, #tpu.memory_space<vmem>>, vector<1x1x8x384xf32>
    %431 = vector.shape_cast %430 : vector<1x1x8x384xf32> to vector<8x384xf32>
    %c216_623 = arith.constant 216 : index
    %c0_624 = arith.constant 0 : index
    %432 = vector.load %arg11[%c216_623, %c0_624] : memref<648x384xf32, #tpu.memory_space<vmem>>, vector<8x384xf32>
    tpu.vector_store %arg11[%c216_623, %c0_624], %431 {strides = array<i32>} : memref<648x384xf32, #tpu.memory_space<vmem>>, vector<8x384xf32>,
    %c0_625 = arith.constant 0 : index
    %c3_626 = arith.constant 3 : index
    %c0_627 = arith.constant 0 : index
    %c73_628 = arith.constant 73 : index
    %433 = vector.load %arg1[%c0_625, %c3_626, %c0_627, %c73_628] : memref<1x4x8x640xf32, #tpu.memory_space<vmem>>, vector<1x1x8x384xf32>
    %434 = vector.shape_cast %433 : vector<1x1x8x384xf32> to vector<8x384xf32>
    %c224_629 = arith.constant 224 : index
    %c0_630 = arith.constant 0 : index
    %435 = vector.load %arg11[%c224_629, %c0_630] : memref<648x384xf32, #tpu.memory_space<vmem>>, vector<8x384xf32>
    tpu.vector_store %arg11[%c224_629, %c0_630], %434 {strides = array<i32>} : memref<648x384xf32, #tpu.memory_space<vmem>>, vector<8x384xf32>,
    %c0_631 = arith.constant 0 : index
    %c3_632 = arith.constant 3 : index
    %c0_633 = arith.constant 0 : index
    %c74_634 = arith.constant 74 : index
    %436 = vector.load %arg1[%c0_631, %c3_632, %c0_633, %c74_634] : memref<1x4x8x640xf32, #tpu.memory_space<vmem>>, vector<1x1x8x384xf32>
    %437 = vector.shape_cast %436 : vector<1x1x8x384xf32> to vector<8x384xf32>
    %c232_635 = arith.constant 232 : index
    %c0_636 = arith.constant 0 : index
    %438 = vector.load %arg11[%c232_635, %c0_636] : memref<648x384xf32, #tpu.memory_space<vmem>>, vector<8x384xf32>
    tpu.vector_store %arg11[%c232_635, %c0_636], %437 {strides = array<i32>} : memref<648x384xf32, #tpu.memory_space<vmem>>, vector<8x384xf32>,
    %c0_637 = arith.constant 0 : index
    %c3_638 = arith.constant 3 : index
    %c0_639 = arith.constant 0 : index
    %c75_640 = arith.constant 75 : index
    %439 = vector.load %arg1[%c0_637, %c3_638, %c0_639, %c75_640] : memref<1x4x8x640xf32, #tpu.memory_space<vmem>>, vector<1x1x8x384xf32>
    %440 = vector.shape_cast %439 : vector<1x1x8x384xf32> to vector<8x384xf32>
    %c240_641 = arith.constant 240 : index
    %c0_642 = arith.constant 0 : index
    %441 = vector.load %arg11[%c240_641, %c0_642] : memref<648x384xf32, #tpu.memory_space<vmem>>, vector<8x384xf32>
    tpu.vector_store %arg11[%c240_641, %c0_642], %440 {strides = array<i32>} : memref<648x384xf32, #tpu.memory_space<vmem>>, vector<8x384xf32>,
    %c0_643 = arith.constant 0 : index
    %c3_644 = arith.constant 3 : index
    %c0_645 = arith.constant 0 : index
    %c76_646 = arith.constant 76 : index
    %442 = vector.load %arg1[%c0_643, %c3_644, %c0_645, %c76_646] : memref<1x4x8x640xf32, #tpu.memory_space<vmem>>, vector<1x1x8x384xf32>
    %443 = vector.shape_cast %442 : vector<1x1x8x384xf32> to vector<8x384xf32>
    %c248_647 = arith.constant 248 : index
    %c0_648 = arith.constant 0 : index
    %444 = vector.load %arg11[%c248_647, %c0_648] : memref<648x384xf32, #tpu.memory_space<vmem>>, vector<8x384xf32>
    tpu.vector_store %arg11[%c248_647, %c0_648], %443 {strides = array<i32>} : memref<648x384xf32, #tpu.memory_space<vmem>>, vector<8x384xf32>,
    %c0_649 = arith.constant 0 : index
    %c3_650 = arith.constant 3 : index
    %c0_651 = arith.constant 0 : index
    %c77_652 = arith.constant 77 : index
    %445 = vector.load %arg1[%c0_649, %c3_650, %c0_651, %c77_652] : memref<1x4x8x640xf32, #tpu.memory_space<vmem>>, vector<1x1x8x384xf32>
    %446 = vector.shape_cast %445 : vector<1x1x8x384xf32> to vector<8x384xf32>
    %c256_653 = arith.constant 256 : index
    %c0_654 = arith.constant 0 : index
    %447 = vector.load %arg11[%c256_653, %c0_654] : memref<648x384xf32, #tpu.memory_space<vmem>>, vector<8x384xf32>
    tpu.vector_store %arg11[%c256_653, %c0_654], %446 {strides = array<i32>} : memref<648x384xf32, #tpu.memory_space<vmem>>, vector<8x384xf32>,
    %c0_655 = arith.constant 0 : index
    %c3_656 = arith.constant 3 : index
    %c0_657 = arith.constant 0 : index
    %c78_658 = arith.constant 78 : index
    %448 = vector.load %arg1[%c0_655, %c3_656, %c0_657, %c78_658] : memref<1x4x8x640xf32, #tpu.memory_space<vmem>>, vector<1x1x8x384xf32>
    %449 = vector.shape_cast %448 : vector<1x1x8x384xf32> to vector<8x384xf32>
    %c264_659 = arith.constant 264 : index
    %c0_660 = arith.constant 0 : index
    %450 = vector.load %arg11[%c264_659, %c0_660] : memref<648x384xf32, #tpu.memory_space<vmem>>, vector<8x384xf32>
    tpu.vector_store %arg11[%c264_659, %c0_660], %449 {strides = array<i32>} : memref<648x384xf32, #tpu.memory_space<vmem>>, vector<8x384xf32>,
    %c0_661 = arith.constant 0 : index
    %c3_662 = arith.constant 3 : index
    %c0_663 = arith.constant 0 : index
    %c79_664 = arith.constant 79 : index
    %451 = vector.load %arg1[%c0_661, %c3_662, %c0_663, %c79_664] : memref<1x4x8x640xf32, #tpu.memory_space<vmem>>, vector<1x1x8x384xf32>
    %452 = vector.shape_cast %451 : vector<1x1x8x384xf32> to vector<8x384xf32>
    %c272_665 = arith.constant 272 : index
    %c0_666 = arith.constant 0 : index
    %453 = vector.load %arg11[%c272_665, %c0_666] : memref<648x384xf32, #tpu.memory_space<vmem>>, vector<8x384xf32>
    tpu.vector_store %arg11[%c272_665, %c0_666], %452 {strides = array<i32>} : memref<648x384xf32, #tpu.memory_space<vmem>>, vector<8x384xf32>,
    %c0_667 = arith.constant 0 : index
    %c3_668 = arith.constant 3 : index
    %c0_669 = arith.constant 0 : index
    %c80_670 = arith.constant 80 : index
    %454 = vector.load %arg1[%c0_667, %c3_668, %c0_669, %c80_670] : memref<1x4x8x640xf32, #tpu.memory_space<vmem>>, vector<1x1x8x384xf32>
    %455 = vector.shape_cast %454 : vector<1x1x8x384xf32> to vector<8x384xf32>
    %c280_671 = arith.constant 280 : index
    %c0_672 = arith.constant 0 : index
    %456 = vector.load %arg11[%c280_671, %c0_672] : memref<648x384xf32, #tpu.memory_space<vmem>>, vector<8x384xf32>
    tpu.vector_store %arg11[%c280_671, %c0_672], %455 {strides = array<i32>} : memref<648x384xf32, #tpu.memory_space<vmem>>, vector<8x384xf32>,
    %c0_673 = arith.constant 0 : index
    %c3_674 = arith.constant 3 : index
    %c0_675 = arith.constant 0 : index
    %c96_676 = arith.constant 96 : index
    %457 = vector.load %arg1[%c0_673, %c3_674, %c0_675, %c96_676] : memref<1x4x8x640xf32, #tpu.memory_space<vmem>>, vector<1x1x8x384xf32>
    %458 = vector.shape_cast %457 : vector<1x1x8x384xf32> to vector<8x384xf32>
    %c288_677 = arith.constant 288 : index
    %c0_678 = arith.constant 0 : index
    %459 = vector.load %arg11[%c288_677, %c0_678] : memref<648x384xf32, #tpu.memory_space<vmem>>, vector<8x384xf32>
    tpu.vector_store %arg11[%c288_677, %c0_678], %458 {strides = array<i32>} : memref<648x384xf32, #tpu.memory_space<vmem>>, vector<8x384xf32>,
    %c0_679 = arith.constant 0 : index
    %c3_680 = arith.constant 3 : index
    %c0_681 = arith.constant 0 : index
    %c97_682 = arith.constant 97 : index
    %460 = vector.load %arg1[%c0_679, %c3_680, %c0_681, %c97_682] : memref<1x4x8x640xf32, #tpu.memory_space<vmem>>, vector<1x1x8x384xf32>
    %461 = vector.shape_cast %460 : vector<1x1x8x384xf32> to vector<8x384xf32>
    %c296_683 = arith.constant 296 : index
    %c0_684 = arith.constant 0 : index
    %462 = vector.load %arg11[%c296_683, %c0_684] : memref<648x384xf32, #tpu.memory_space<vmem>>, vector<8x384xf32>
    tpu.vector_store %arg11[%c296_683, %c0_684], %461 {strides = array<i32>} : memref<648x384xf32, #tpu.memory_space<vmem>>, vector<8x384xf32>,
    %c0_685 = arith.constant 0 : index
    %c3_686 = arith.constant 3 : index
    %c0_687 = arith.constant 0 : index
    %c98_688 = arith.constant 98 : index
    %463 = vector.load %arg1[%c0_685, %c3_686, %c0_687, %c98_688] : memref<1x4x8x640xf32, #tpu.memory_space<vmem>>, vector<1x1x8x384xf32>
    %464 = vector.shape_cast %463 : vector<1x1x8x384xf32> to vector<8x384xf32>
    %c304_689 = arith.constant 304 : index
    %c0_690 = arith.constant 0 : index
    %465 = vector.load %arg11[%c304_689, %c0_690] : memref<648x384xf32, #tpu.memory_space<vmem>>, vector<8x384xf32>
    tpu.vector_store %arg11[%c304_689, %c0_690], %464 {strides = array<i32>} : memref<648x384xf32, #tpu.memory_space<vmem>>, vector<8x384xf32>,
    %c0_691 = arith.constant 0 : index
    %c3_692 = arith.constant 3 : index
    %c0_693 = arith.constant 0 : index
    %c99_694 = arith.constant 99 : index
    %466 = vector.load %arg1[%c0_691, %c3_692, %c0_693, %c99_694] : memref<1x4x8x640xf32, #tpu.memory_space<vmem>>, vector<1x1x8x384xf32>
    %467 = vector.shape_cast %466 : vector<1x1x8x384xf32> to vector<8x384xf32>
    %c312_695 = arith.constant 312 : index
    %c0_696 = arith.constant 0 : index
    %468 = vector.load %arg11[%c312_695, %c0_696] : memref<648x384xf32, #tpu.memory_space<vmem>>, vector<8x384xf32>
    tpu.vector_store %arg11[%c312_695, %c0_696], %467 {strides = array<i32>} : memref<648x384xf32, #tpu.memory_space<vmem>>, vector<8x384xf32>,
    %c0_697 = arith.constant 0 : index
    %c3_698 = arith.constant 3 : index
    %c0_699 = arith.constant 0 : index
    %c100_700 = arith.constant 100 : index
    %469 = vector.load %arg1[%c0_697, %c3_698, %c0_699, %c100_700] : memref<1x4x8x640xf32, #tpu.memory_space<vmem>>, vector<1x1x8x384xf32>
    %470 = vector.shape_cast %469 : vector<1x1x8x384xf32> to vector<8x384xf32>
    %c320_701 = arith.constant 320 : index
    %c0_702 = arith.constant 0 : index
    %471 = vector.load %arg11[%c320_701, %c0_702] : memref<648x384xf32, #tpu.memory_space<vmem>>, vector<8x384xf32>
    tpu.vector_store %arg11[%c320_701, %c0_702], %470 {strides = array<i32>} : memref<648x384xf32, #tpu.memory_space<vmem>>, vector<8x384xf32>,
    %c0_703 = arith.constant 0 : index
    %c3_704 = arith.constant 3 : index
    %c0_705 = arith.constant 0 : index
    %c101_706 = arith.constant 101 : index
    %472 = vector.load %arg1[%c0_703, %c3_704, %c0_705, %c101_706] : memref<1x4x8x640xf32, #tpu.memory_space<vmem>>, vector<1x1x8x384xf32>
    %473 = vector.shape_cast %472 : vector<1x1x8x384xf32> to vector<8x384xf32>
    %c328_707 = arith.constant 328 : index
    %c0_708 = arith.constant 0 : index
    %474 = vector.load %arg11[%c328_707, %c0_708] : memref<648x384xf32, #tpu.memory_space<vmem>>, vector<8x384xf32>
    tpu.vector_store %arg11[%c328_707, %c0_708], %473 {strides = array<i32>} : memref<648x384xf32, #tpu.memory_space<vmem>>, vector<8x384xf32>,
    %c0_709 = arith.constant 0 : index
    %c3_710 = arith.constant 3 : index
    %c0_711 = arith.constant 0 : index
    %c102_712 = arith.constant 102 : index
    %475 = vector.load %arg1[%c0_709, %c3_710, %c0_711, %c102_712] : memref<1x4x8x640xf32, #tpu.memory_space<vmem>>, vector<1x1x8x384xf32>
    %476 = vector.shape_cast %475 : vector<1x1x8x384xf32> to vector<8x384xf32>
    %c336_713 = arith.constant 336 : index
    %c0_714 = arith.constant 0 : index
    %477 = vector.load %arg11[%c336_713, %c0_714] : memref<648x384xf32, #tpu.memory_space<vmem>>, vector<8x384xf32>
    tpu.vector_store %arg11[%c336_713, %c0_714], %476 {strides = array<i32>} : memref<648x384xf32, #tpu.memory_space<vmem>>, vector<8x384xf32>,
    %c0_715 = arith.constant 0 : index
    %c3_716 = arith.constant 3 : index
    %c0_717 = arith.constant 0 : index
    %c103_718 = arith.constant 103 : index
    %478 = vector.load %arg1[%c0_715, %c3_716, %c0_717, %c103_718] : memref<1x4x8x640xf32, #tpu.memory_space<vmem>>, vector<1x1x8x384xf32>
    %479 = vector.shape_cast %478 : vector<1x1x8x384xf32> to vector<8x384xf32>
    %c344_719 = arith.constant 344 : index
    %c0_720 = arith.constant 0 : index
    %480 = vector.load %arg11[%c344_719, %c0_720] : memref<648x384xf32, #tpu.memory_space<vmem>>, vector<8x384xf32>
    tpu.vector_store %arg11[%c344_719, %c0_720], %479 {strides = array<i32>} : memref<648x384xf32, #tpu.memory_space<vmem>>, vector<8x384xf32>,
    %c0_721 = arith.constant 0 : index
    %c3_722 = arith.constant 3 : index
    %c0_723 = arith.constant 0 : index
    %c104_724 = arith.constant 104 : index
    %481 = vector.load %arg1[%c0_721, %c3_722, %c0_723, %c104_724] : memref<1x4x8x640xf32, #tpu.memory_space<vmem>>, vector<1x1x8x384xf32>
    %482 = vector.shape_cast %481 : vector<1x1x8x384xf32> to vector<8x384xf32>
    %c352_725 = arith.constant 352 : index
    %c0_726 = arith.constant 0 : index
    %483 = vector.load %arg11[%c352_725, %c0_726] : memref<648x384xf32, #tpu.memory_space<vmem>>, vector<8x384xf32>
    tpu.vector_store %arg11[%c352_725, %c0_726], %482 {strides = array<i32>} : memref<648x384xf32, #tpu.memory_space<vmem>>, vector<8x384xf32>,
    %c0_727 = arith.constant 0 : index
    %c3_728 = arith.constant 3 : index
    %c0_729 = arith.constant 0 : index
    %c120_730 = arith.constant 120 : index
    %484 = vector.load %arg1[%c0_727, %c3_728, %c0_729, %c120_730] : memref<1x4x8x640xf32, #tpu.memory_space<vmem>>, vector<1x1x8x384xf32>
    %485 = vector.shape_cast %484 : vector<1x1x8x384xf32> to vector<8x384xf32>
    %c360_731 = arith.constant 360 : index
    %c0_732 = arith.constant 0 : index
    %486 = vector.load %arg11[%c360_731, %c0_732] : memref<648x384xf32, #tpu.memory_space<vmem>>, vector<8x384xf32>
    tpu.vector_store %arg11[%c360_731, %c0_732], %485 {strides = array<i32>} : memref<648x384xf32, #tpu.memory_space<vmem>>, vector<8x384xf32>,
    %c0_733 = arith.constant 0 : index
    %c3_734 = arith.constant 3 : index
    %c0_735 = arith.constant 0 : index
    %c121_736 = arith.constant 121 : index
    %487 = vector.load %arg1[%c0_733, %c3_734, %c0_735, %c121_736] : memref<1x4x8x640xf32, #tpu.memory_space<vmem>>, vector<1x1x8x384xf32>
    %488 = vector.shape_cast %487 : vector<1x1x8x384xf32> to vector<8x384xf32>
    %c368_737 = arith.constant 368 : index
    %c0_738 = arith.constant 0 : index
    %489 = vector.load %arg11[%c368_737, %c0_738] : memref<648x384xf32, #tpu.memory_space<vmem>>, vector<8x384xf32>
    tpu.vector_store %arg11[%c368_737, %c0_738], %488 {strides = array<i32>} : memref<648x384xf32, #tpu.memory_space<vmem>>, vector<8x384xf32>,
    %c0_739 = arith.constant 0 : index
    %c3_740 = arith.constant 3 : index
    %c0_741 = arith.constant 0 : index
    %c122_742 = arith.constant 122 : index
    %490 = vector.load %arg1[%c0_739, %c3_740, %c0_741, %c122_742] : memref<1x4x8x640xf32, #tpu.memory_space<vmem>>, vector<1x1x8x384xf32>
    %491 = vector.shape_cast %490 : vector<1x1x8x384xf32> to vector<8x384xf32>
    %c376_743 = arith.constant 376 : index
    %c0_744 = arith.constant 0 : index
    %492 = vector.load %arg11[%c376_743, %c0_744] : memref<648x384xf32, #tpu.memory_space<vmem>>, vector<8x384xf32>
    tpu.vector_store %arg11[%c376_743, %c0_744], %491 {strides = array<i32>} : memref<648x384xf32, #tpu.memory_space<vmem>>, vector<8x384xf32>,
    %c0_745 = arith.constant 0 : index
    %c3_746 = arith.constant 3 : index
    %c0_747 = arith.constant 0 : index
    %c123_748 = arith.constant 123 : index
    %493 = vector.load %arg1[%c0_745, %c3_746, %c0_747, %c123_748] : memref<1x4x8x640xf32, #tpu.memory_space<vmem>>, vector<1x1x8x384xf32>
    %494 = vector.shape_cast %493 : vector<1x1x8x384xf32> to vector<8x384xf32>
    %c384_749 = arith.constant 384 : index
    %c0_750 = arith.constant 0 : index
    %495 = vector.load %arg11[%c384_749, %c0_750] : memref<648x384xf32, #tpu.memory_space<vmem>>, vector<8x384xf32>
    tpu.vector_store %arg11[%c384_749, %c0_750], %494 {strides = array<i32>} : memref<648x384xf32, #tpu.memory_space<vmem>>, vector<8x384xf32>,
    %c0_751 = arith.constant 0 : index
    %c3_752 = arith.constant 3 : index
    %c0_753 = arith.constant 0 : index
    %c124_754 = arith.constant 124 : index
    %496 = vector.load %arg1[%c0_751, %c3_752, %c0_753, %c124_754] : memref<1x4x8x640xf32, #tpu.memory_space<vmem>>, vector<1x1x8x384xf32>
    %497 = vector.shape_cast %496 : vector<1x1x8x384xf32> to vector<8x384xf32>
    %c392 = arith.constant 392 : index
    %c0_755 = arith.constant 0 : index
    %498 = vector.load %arg11[%c392, %c0_755] : memref<648x384xf32, #tpu.memory_space<vmem>>, vector<8x384xf32>
    tpu.vector_store %arg11[%c392, %c0_755], %497 {strides = array<i32>} : memref<648x384xf32, #tpu.memory_space<vmem>>, vector<8x384xf32>,
    %c0_756 = arith.constant 0 : index
    %c3_757 = arith.constant 3 : index
    %c0_758 = arith.constant 0 : index
    %c125_759 = arith.constant 125 : index
    %499 = vector.load %arg1[%c0_756, %c3_757, %c0_758, %c125_759] : memref<1x4x8x640xf32, #tpu.memory_space<vmem>>, vector<1x1x8x384xf32>
    %500 = vector.shape_cast %499 : vector<1x1x8x384xf32> to vector<8x384xf32>
    %c400 = arith.constant 400 : index
    %c0_760 = arith.constant 0 : index
    %501 = vector.load %arg11[%c400, %c0_760] : memref<648x384xf32, #tpu.memory_space<vmem>>, vector<8x384xf32>
    tpu.vector_store %arg11[%c400, %c0_760], %500 {strides = array<i32>} : memref<648x384xf32, #tpu.memory_space<vmem>>, vector<8x384xf32>,
    %c0_761 = arith.constant 0 : index
    %c3_762 = arith.constant 3 : index
    %c0_763 = arith.constant 0 : index
    %c126_764 = arith.constant 126 : index
    %502 = vector.load %arg1[%c0_761, %c3_762, %c0_763, %c126_764] : memref<1x4x8x640xf32, #tpu.memory_space<vmem>>, vector<1x1x8x384xf32>
    %503 = vector.shape_cast %502 : vector<1x1x8x384xf32> to vector<8x384xf32>
    %c408 = arith.constant 408 : index
    %c0_765 = arith.constant 0 : index
    %504 = vector.load %arg11[%c408, %c0_765] : memref<648x384xf32, #tpu.memory_space<vmem>>, vector<8x384xf32>
    tpu.vector_store %arg11[%c408, %c0_765], %503 {strides = array<i32>} : memref<648x384xf32, #tpu.memory_space<vmem>>, vector<8x384xf32>,
    %c0_766 = arith.constant 0 : index
    %c3_767 = arith.constant 3 : index
    %c0_768 = arith.constant 0 : index
    %c127_769 = arith.constant 127 : index
    %505 = vector.load %arg1[%c0_766, %c3_767, %c0_768, %c127_769] : memref<1x4x8x640xf32, #tpu.memory_space<vmem>>, vector<1x1x8x384xf32>
    %506 = vector.shape_cast %505 : vector<1x1x8x384xf32> to vector<8x384xf32>
    %c416 = arith.constant 416 : index
    %c0_770 = arith.constant 0 : index
    %507 = vector.load %arg11[%c416, %c0_770] : memref<648x384xf32, #tpu.memory_space<vmem>>, vector<8x384xf32>
    tpu.vector_store %arg11[%c416, %c0_770], %506 {strides = array<i32>} : memref<648x384xf32, #tpu.memory_space<vmem>>, vector<8x384xf32>,
    %c0_771 = arith.constant 0 : index
    %c3_772 = arith.constant 3 : index
    %c0_773 = arith.constant 0 : index
    %c128_774 = arith.constant 128 : index
    %508 = vector.load %arg1[%c0_771, %c3_772, %c0_773, %c128_774] : memref<1x4x8x640xf32, #tpu.memory_space<vmem>>, vector<1x1x8x384xf32>
    %509 = vector.shape_cast %508 : vector<1x1x8x384xf32> to vector<8x384xf32>
    %c424 = arith.constant 424 : index
    %c0_775 = arith.constant 0 : index
    %510 = vector.load %arg11[%c424, %c0_775] : memref<648x384xf32, #tpu.memory_space<vmem>>, vector<8x384xf32>
    tpu.vector_store %arg11[%c424, %c0_775], %509 {strides = array<i32>} : memref<648x384xf32, #tpu.memory_space<vmem>>, vector<8x384xf32>,
    %c0_776 = arith.constant 0 : index
    %c3_777 = arith.constant 3 : index
    %c0_778 = arith.constant 0 : index
    %c144_779 = arith.constant 144 : index
    %511 = vector.load %arg1[%c0_776, %c3_777, %c0_778, %c144_779] : memref<1x4x8x640xf32, #tpu.memory_space<vmem>>, vector<1x1x8x384xf32>
    %512 = vector.shape_cast %511 : vector<1x1x8x384xf32> to vector<8x384xf32>
    %c432 = arith.constant 432 : index
    %c0_780 = arith.constant 0 : index
    %513 = vector.load %arg11[%c432, %c0_780] : memref<648x384xf32, #tpu.memory_space<vmem>>, vector<8x384xf32>
    tpu.vector_store %arg11[%c432, %c0_780], %512 {strides = array<i32>} : memref<648x384xf32, #tpu.memory_space<vmem>>, vector<8x384xf32>,
    %c0_781 = arith.constant 0 : index
    %c3_782 = arith.constant 3 : index
    %c0_783 = arith.constant 0 : index
    %c145_784 = arith.constant 145 : index
    %514 = vector.load %arg1[%c0_781, %c3_782, %c0_783, %c145_784] : memref<1x4x8x640xf32, #tpu.memory_space<vmem>>, vector<1x1x8x384xf32>
    %515 = vector.shape_cast %514 : vector<1x1x8x384xf32> to vector<8x384xf32>
    %c440 = arith.constant 440 : index
    %c0_785 = arith.constant 0 : index
    %516 = vector.load %arg11[%c440, %c0_785] : memref<648x384xf32, #tpu.memory_space<vmem>>, vector<8x384xf32>
    tpu.vector_store %arg11[%c440, %c0_785], %515 {strides = array<i32>} : memref<648x384xf32, #tpu.memory_space<vmem>>, vector<8x384xf32>,
    %c0_786 = arith.constant 0 : index
    %c3_787 = arith.constant 3 : index
    %c0_788 = arith.constant 0 : index
    %c146_789 = arith.constant 146 : index
    %517 = vector.load %arg1[%c0_786, %c3_787, %c0_788, %c146_789] : memref<1x4x8x640xf32, #tpu.memory_space<vmem>>, vector<1x1x8x384xf32>
    %518 = vector.shape_cast %517 : vector<1x1x8x384xf32> to vector<8x384xf32>
    %c448 = arith.constant 448 : index
    %c0_790 = arith.constant 0 : index
    %519 = vector.load %arg11[%c448, %c0_790] : memref<648x384xf32, #tpu.memory_space<vmem>>, vector<8x384xf32>
    tpu.vector_store %arg11[%c448, %c0_790], %518 {strides = array<i32>} : memref<648x384xf32, #tpu.memory_space<vmem>>, vector<8x384xf32>,
    %c0_791 = arith.constant 0 : index
    %c3_792 = arith.constant 3 : index
    %c0_793 = arith.constant 0 : index
    %c147_794 = arith.constant 147 : index
    %520 = vector.load %arg1[%c0_791, %c3_792, %c0_793, %c147_794] : memref<1x4x8x640xf32, #tpu.memory_space<vmem>>, vector<1x1x8x384xf32>
    %521 = vector.shape_cast %520 : vector<1x1x8x384xf32> to vector<8x384xf32>
    %c456 = arith.constant 456 : index
    %c0_795 = arith.constant 0 : index
    %522 = vector.load %arg11[%c456, %c0_795] : memref<648x384xf32, #tpu.memory_space<vmem>>, vector<8x384xf32>
    tpu.vector_store %arg11[%c456, %c0_795], %521 {strides = array<i32>} : memref<648x384xf32, #tpu.memory_space<vmem>>, vector<8x384xf32>,
    %c0_796 = arith.constant 0 : index
    %c3_797 = arith.constant 3 : index
    %c0_798 = arith.constant 0 : index
    %c148_799 = arith.constant 148 : index
    %523 = vector.load %arg1[%c0_796, %c3_797, %c0_798, %c148_799] : memref<1x4x8x640xf32, #tpu.memory_space<vmem>>, vector<1x1x8x384xf32>
    %524 = vector.shape_cast %523 : vector<1x1x8x384xf32> to vector<8x384xf32>
    %c464 = arith.constant 464 : index
    %c0_800 = arith.constant 0 : index
    %525 = vector.load %arg11[%c464, %c0_800] : memref<648x384xf32, #tpu.memory_space<vmem>>, vector<8x384xf32>
    tpu.vector_store %arg11[%c464, %c0_800], %524 {strides = array<i32>} : memref<648x384xf32, #tpu.memory_space<vmem>>, vector<8x384xf32>,
    %c0_801 = arith.constant 0 : index
    %c3_802 = arith.constant 3 : index
    %c0_803 = arith.constant 0 : index
    %c149_804 = arith.constant 149 : index
    %526 = vector.load %arg1[%c0_801, %c3_802, %c0_803, %c149_804] : memref<1x4x8x640xf32, #tpu.memory_space<vmem>>, vector<1x1x8x384xf32>
    %527 = vector.shape_cast %526 : vector<1x1x8x384xf32> to vector<8x384xf32>
    %c472 = arith.constant 472 : index
    %c0_805 = arith.constant 0 : index
    %528 = vector.load %arg11[%c472, %c0_805] : memref<648x384xf32, #tpu.memory_space<vmem>>, vector<8x384xf32>
    tpu.vector_store %arg11[%c472, %c0_805], %527 {strides = array<i32>} : memref<648x384xf32, #tpu.memory_space<vmem>>, vector<8x384xf32>,
    %c0_806 = arith.constant 0 : index
    %c3_807 = arith.constant 3 : index
    %c0_808 = arith.constant 0 : index
    %c150_809 = arith.constant 150 : index
    %529 = vector.load %arg1[%c0_806, %c3_807, %c0_808, %c150_809] : memref<1x4x8x640xf32, #tpu.memory_space<vmem>>, vector<1x1x8x384xf32>
    %530 = vector.shape_cast %529 : vector<1x1x8x384xf32> to vector<8x384xf32>
    %c480 = arith.constant 480 : index
    %c0_810 = arith.constant 0 : index
    %531 = vector.load %arg11[%c480, %c0_810] : memref<648x384xf32, #tpu.memory_space<vmem>>, vector<8x384xf32>
    tpu.vector_store %arg11[%c480, %c0_810], %530 {strides = array<i32>} : memref<648x384xf32, #tpu.memory_space<vmem>>, vector<8x384xf32>,
    %c0_811 = arith.constant 0 : index
    %c3_812 = arith.constant 3 : index
    %c0_813 = arith.constant 0 : index
    %c151_814 = arith.constant 151 : index
    %532 = vector.load %arg1[%c0_811, %c3_812, %c0_813, %c151_814] : memref<1x4x8x640xf32, #tpu.memory_space<vmem>>, vector<1x1x8x384xf32>
    %533 = vector.shape_cast %532 : vector<1x1x8x384xf32> to vector<8x384xf32>
    %c488 = arith.constant 488 : index
    %c0_815 = arith.constant 0 : index
    %534 = vector.load %arg11[%c488, %c0_815] : memref<648x384xf32, #tpu.memory_space<vmem>>, vector<8x384xf32>
    tpu.vector_store %arg11[%c488, %c0_815], %533 {strides = array<i32>} : memref<648x384xf32, #tpu.memory_space<vmem>>, vector<8x384xf32>,
    %c0_816 = arith.constant 0 : index
    %c3_817 = arith.constant 3 : index
    %c0_818 = arith.constant 0 : index
    %c152_819 = arith.constant 152 : index
    %535 = vector.load %arg1[%c0_816, %c3_817, %c0_818, %c152_819] : memref<1x4x8x640xf32, #tpu.memory_space<vmem>>, vector<1x1x8x384xf32>
    %536 = vector.shape_cast %535 : vector<1x1x8x384xf32> to vector<8x384xf32>
    %c496 = arith.constant 496 : index
    %c0_820 = arith.constant 0 : index
    %537 = vector.load %arg11[%c496, %c0_820] : memref<648x384xf32, #tpu.memory_space<vmem>>, vector<8x384xf32>
    tpu.vector_store %arg11[%c496, %c0_820], %536 {strides = array<i32>} : memref<648x384xf32, #tpu.memory_space<vmem>>, vector<8x384xf32>,
    %c0_821 = arith.constant 0 : index
    %c3_822 = arith.constant 3 : index
    %c0_823 = arith.constant 0 : index
    %c168_824 = arith.constant 168 : index
    %538 = vector.load %arg1[%c0_821, %c3_822, %c0_823, %c168_824] : memref<1x4x8x640xf32, #tpu.memory_space<vmem>>, vector<1x1x8x384xf32>
    %539 = vector.shape_cast %538 : vector<1x1x8x384xf32> to vector<8x384xf32>
    %c504 = arith.constant 504 : index
    %c0_825 = arith.constant 0 : index
    %540 = vector.load %arg11[%c504, %c0_825] : memref<648x384xf32, #tpu.memory_space<vmem>>, vector<8x384xf32>
    tpu.vector_store %arg11[%c504, %c0_825], %539 {strides = array<i32>} : memref<648x384xf32, #tpu.memory_space<vmem>>, vector<8x384xf32>,
    %c0_826 = arith.constant 0 : index
    %c3_827 = arith.constant 3 : index
    %c0_828 = arith.constant 0 : index
    %c169_829 = arith.constant 169 : index
    %541 = vector.load %arg1[%c0_826, %c3_827, %c0_828, %c169_829] : memref<1x4x8x640xf32, #tpu.memory_space<vmem>>, vector<1x1x8x384xf32>
    %542 = vector.shape_cast %541 : vector<1x1x8x384xf32> to vector<8x384xf32>
    %c512 = arith.constant 512 : index
    %c0_830 = arith.constant 0 : index
    %543 = vector.load %arg11[%c512, %c0_830] : memref<648x384xf32, #tpu.memory_space<vmem>>, vector<8x384xf32>
    tpu.vector_store %arg11[%c512, %c0_830], %542 {strides = array<i32>} : memref<648x384xf32, #tpu.memory_space<vmem>>, vector<8x384xf32>,
    %c0_831 = arith.constant 0 : index
    %c3_832 = arith.constant 3 : index
    %c0_833 = arith.constant 0 : index
    %c170_834 = arith.constant 170 : index
    %544 = vector.load %arg1[%c0_831, %c3_832, %c0_833, %c170_834] : memref<1x4x8x640xf32, #tpu.memory_space<vmem>>, vector<1x1x8x384xf32>
    %545 = vector.shape_cast %544 : vector<1x1x8x384xf32> to vector<8x384xf32>
    %c520 = arith.constant 520 : index
    %c0_835 = arith.constant 0 : index
    %546 = vector.load %arg11[%c520, %c0_835] : memref<648x384xf32, #tpu.memory_space<vmem>>, vector<8x384xf32>
    tpu.vector_store %arg11[%c520, %c0_835], %545 {strides = array<i32>} : memref<648x384xf32, #tpu.memory_space<vmem>>, vector<8x384xf32>,
    %c0_836 = arith.constant 0 : index
    %c3_837 = arith.constant 3 : index
    %c0_838 = arith.constant 0 : index
    %c171_839 = arith.constant 171 : index
    %547 = vector.load %arg1[%c0_836, %c3_837, %c0_838, %c171_839] : memref<1x4x8x640xf32, #tpu.memory_space<vmem>>, vector<1x1x8x384xf32>
    %548 = vector.shape_cast %547 : vector<1x1x8x384xf32> to vector<8x384xf32>
    %c528 = arith.constant 528 : index
    %c0_840 = arith.constant 0 : index
    %549 = vector.load %arg11[%c528, %c0_840] : memref<648x384xf32, #tpu.memory_space<vmem>>, vector<8x384xf32>
    tpu.vector_store %arg11[%c528, %c0_840], %548 {strides = array<i32>} : memref<648x384xf32, #tpu.memory_space<vmem>>, vector<8x384xf32>,
    %c0_841 = arith.constant 0 : index
    %c3_842 = arith.constant 3 : index
    %c0_843 = arith.constant 0 : index
    %c172_844 = arith.constant 172 : index
    %550 = vector.load %arg1[%c0_841, %c3_842, %c0_843, %c172_844] : memref<1x4x8x640xf32, #tpu.memory_space<vmem>>, vector<1x1x8x384xf32>
    %551 = vector.shape_cast %550 : vector<1x1x8x384xf32> to vector<8x384xf32>
    %c536 = arith.constant 536 : index
    %c0_845 = arith.constant 0 : index
    %552 = vector.load %arg11[%c536, %c0_845] : memref<648x384xf32, #tpu.memory_space<vmem>>, vector<8x384xf32>
    tpu.vector_store %arg11[%c536, %c0_845], %551 {strides = array<i32>} : memref<648x384xf32, #tpu.memory_space<vmem>>, vector<8x384xf32>,
    %c0_846 = arith.constant 0 : index
    %c3_847 = arith.constant 3 : index
    %c0_848 = arith.constant 0 : index
    %c173_849 = arith.constant 173 : index
    %553 = vector.load %arg1[%c0_846, %c3_847, %c0_848, %c173_849] : memref<1x4x8x640xf32, #tpu.memory_space<vmem>>, vector<1x1x8x384xf32>
    %554 = vector.shape_cast %553 : vector<1x1x8x384xf32> to vector<8x384xf32>
    %c544 = arith.constant 544 : index
    %c0_850 = arith.constant 0 : index
    %555 = vector.load %arg11[%c544, %c0_850] : memref<648x384xf32, #tpu.memory_space<vmem>>, vector<8x384xf32>
    tpu.vector_store %arg11[%c544, %c0_850], %554 {strides = array<i32>} : memref<648x384xf32, #tpu.memory_space<vmem>>, vector<8x384xf32>,
    %c0_851 = arith.constant 0 : index
    %c3_852 = arith.constant 3 : index
    %c0_853 = arith.constant 0 : index
    %c174_854 = arith.constant 174 : index
    %556 = vector.load %arg1[%c0_851, %c3_852, %c0_853, %c174_854] : memref<1x4x8x640xf32, #tpu.memory_space<vmem>>, vector<1x1x8x384xf32>
    %557 = vector.shape_cast %556 : vector<1x1x8x384xf32> to vector<8x384xf32>
    %c552 = arith.constant 552 : index
    %c0_855 = arith.constant 0 : index
    %558 = vector.load %arg11[%c552, %c0_855] : memref<648x384xf32, #tpu.memory_space<vmem>>, vector<8x384xf32>
    tpu.vector_store %arg11[%c552, %c0_855], %557 {strides = array<i32>} : memref<648x384xf32, #tpu.memory_space<vmem>>, vector<8x384xf32>,
    %c0_856 = arith.constant 0 : index
    %c3_857 = arith.constant 3 : index
    %c0_858 = arith.constant 0 : index
    %c175_859 = arith.constant 175 : index
    %559 = vector.load %arg1[%c0_856, %c3_857, %c0_858, %c175_859] : memref<1x4x8x640xf32, #tpu.memory_space<vmem>>, vector<1x1x8x384xf32>
    %560 = vector.shape_cast %559 : vector<1x1x8x384xf32> to vector<8x384xf32>
    %c560 = arith.constant 560 : index
    %c0_860 = arith.constant 0 : index
    %561 = vector.load %arg11[%c560, %c0_860] : memref<648x384xf32, #tpu.memory_space<vmem>>, vector<8x384xf32>
    tpu.vector_store %arg11[%c560, %c0_860], %560 {strides = array<i32>} : memref<648x384xf32, #tpu.memory_space<vmem>>, vector<8x384xf32>,
    %c0_861 = arith.constant 0 : index
    %c3_862 = arith.constant 3 : index
    %c0_863 = arith.constant 0 : index
    %c176_864 = arith.constant 176 : index
    %562 = vector.load %arg1[%c0_861, %c3_862, %c0_863, %c176_864] : memref<1x4x8x640xf32, #tpu.memory_space<vmem>>, vector<1x1x8x384xf32>
    %563 = vector.shape_cast %562 : vector<1x1x8x384xf32> to vector<8x384xf32>
    %c568 = arith.constant 568 : index
    %c0_865 = arith.constant 0 : index
    %564 = vector.load %arg11[%c568, %c0_865] : memref<648x384xf32, #tpu.memory_space<vmem>>, vector<8x384xf32>
    tpu.vector_store %arg11[%c568, %c0_865], %563 {strides = array<i32>} : memref<648x384xf32, #tpu.memory_space<vmem>>, vector<8x384xf32>,
    %c0_866 = arith.constant 0 : index
    %c3_867 = arith.constant 3 : index
    %c0_868 = arith.constant 0 : index
    %c192_869 = arith.constant 192 : index
    %565 = vector.load %arg1[%c0_866, %c3_867, %c0_868, %c192_869] : memref<1x4x8x640xf32, #tpu.memory_space<vmem>>, vector<1x1x8x384xf32>
    %566 = vector.shape_cast %565 : vector<1x1x8x384xf32> to vector<8x384xf32>
    %c576 = arith.constant 576 : index
    %c0_870 = arith.constant 0 : index
    %567 = vector.load %arg11[%c576, %c0_870] : memref<648x384xf32, #tpu.memory_space<vmem>>, vector<8x384xf32>
    tpu.vector_store %arg11[%c576, %c0_870], %566 {strides = array<i32>} : memref<648x384xf32, #tpu.memory_space<vmem>>, vector<8x384xf32>,
    %c0_871 = arith.constant 0 : index
    %c3_872 = arith.constant 3 : index
    %c0_873 = arith.constant 0 : index
    %c193 = arith.constant 193 : index
    %568 = vector.load %arg1[%c0_871, %c3_872, %c0_873, %c193] : memref<1x4x8x640xf32, #tpu.memory_space<vmem>>, vector<1x1x8x384xf32>
    %569 = vector.shape_cast %568 : vector<1x1x8x384xf32> to vector<8x384xf32>
    %c584 = arith.constant 584 : index
    %c0_874 = arith.constant 0 : index
    %570 = vector.load %arg11[%c584, %c0_874] : memref<648x384xf32, #tpu.memory_space<vmem>>, vector<8x384xf32>
    tpu.vector_store %arg11[%c584, %c0_874], %569 {strides = array<i32>} : memref<648x384xf32, #tpu.memory_space<vmem>>, vector<8x384xf32>,
    %c0_875 = arith.constant 0 : index
    %c3_876 = arith.constant 3 : index
    %c0_877 = arith.constant 0 : index
    %c194 = arith.constant 194 : index
    %571 = vector.load %arg1[%c0_875, %c3_876, %c0_877, %c194] : memref<1x4x8x640xf32, #tpu.memory_space<vmem>>, vector<1x1x8x384xf32>
    %572 = vector.shape_cast %571 : vector<1x1x8x384xf32> to vector<8x384xf32>
    %c592 = arith.constant 592 : index
    %c0_878 = arith.constant 0 : index
    %573 = vector.load %arg11[%c592, %c0_878] : memref<648x384xf32, #tpu.memory_space<vmem>>, vector<8x384xf32>
    tpu.vector_store %arg11[%c592, %c0_878], %572 {strides = array<i32>} : memref<648x384xf32, #tpu.memory_space<vmem>>, vector<8x384xf32>,
    %c0_879 = arith.constant 0 : index
    %c3_880 = arith.constant 3 : index
    %c0_881 = arith.constant 0 : index
    %c195 = arith.constant 195 : index
    %574 = vector.load %arg1[%c0_879, %c3_880, %c0_881, %c195] : memref<1x4x8x640xf32, #tpu.memory_space<vmem>>, vector<1x1x8x384xf32>
    %575 = vector.shape_cast %574 : vector<1x1x8x384xf32> to vector<8x384xf32>
    %c600 = arith.constant 600 : index
    %c0_882 = arith.constant 0 : index
    %576 = vector.load %arg11[%c600, %c0_882] : memref<648x384xf32, #tpu.memory_space<vmem>>, vector<8x384xf32>
    tpu.vector_store %arg11[%c600, %c0_882], %575 {strides = array<i32>} : memref<648x384xf32, #tpu.memory_space<vmem>>, vector<8x384xf32>,
    %c0_883 = arith.constant 0 : index
    %c3_884 = arith.constant 3 : index
    %c0_885 = arith.constant 0 : index
    %c196 = arith.constant 196 : index
    %577 = vector.load %arg1[%c0_883, %c3_884, %c0_885, %c196] : memref<1x4x8x640xf32, #tpu.memory_space<vmem>>, vector<1x1x8x384xf32>
    %578 = vector.shape_cast %577 : vector<1x1x8x384xf32> to vector<8x384xf32>
    %c608 = arith.constant 608 : index
    %c0_886 = arith.constant 0 : index
    %579 = vector.load %arg11[%c608, %c0_886] : memref<648x384xf32, #tpu.memory_space<vmem>>, vector<8x384xf32>
    tpu.vector_store %arg11[%c608, %c0_886], %578 {strides = array<i32>} : memref<648x384xf32, #tpu.memory_space<vmem>>, vector<8x384xf32>,
    %c0_887 = arith.constant 0 : index
    %c3_888 = arith.constant 3 : index
    %c0_889 = arith.constant 0 : index
    %c197 = arith.constant 197 : index
    %580 = vector.load %arg1[%c0_887, %c3_888, %c0_889, %c197] : memref<1x4x8x640xf32, #tpu.memory_space<vmem>>, vector<1x1x8x384xf32>
    %581 = vector.shape_cast %580 : vector<1x1x8x384xf32> to vector<8x384xf32>
    %c616 = arith.constant 616 : index
    %c0_890 = arith.constant 0 : index
    %582 = vector.load %arg11[%c616, %c0_890] : memref<648x384xf32, #tpu.memory_space<vmem>>, vector<8x384xf32>
    tpu.vector_store %arg11[%c616, %c0_890], %581 {strides = array<i32>} : memref<648x384xf32, #tpu.memory_space<vmem>>, vector<8x384xf32>,
    %c0_891 = arith.constant 0 : index
    %c3_892 = arith.constant 3 : index
    %c0_893 = arith.constant 0 : index
    %c198 = arith.constant 198 : index
    %583 = vector.load %arg1[%c0_891, %c3_892, %c0_893, %c198] : memref<1x4x8x640xf32, #tpu.memory_space<vmem>>, vector<1x1x8x384xf32>
    %584 = vector.shape_cast %583 : vector<1x1x8x384xf32> to vector<8x384xf32>
    %c624 = arith.constant 624 : index
    %c0_894 = arith.constant 0 : index
    %585 = vector.load %arg11[%c624, %c0_894] : memref<648x384xf32, #tpu.memory_space<vmem>>, vector<8x384xf32>
    tpu.vector_store %arg11[%c624, %c0_894], %584 {strides = array<i32>} : memref<648x384xf32, #tpu.memory_space<vmem>>, vector<8x384xf32>,
    %c0_895 = arith.constant 0 : index
    %c3_896 = arith.constant 3 : index
    %c0_897 = arith.constant 0 : index
    %c199 = arith.constant 199 : index
    %586 = vector.load %arg1[%c0_895, %c3_896, %c0_897, %c199] : memref<1x4x8x640xf32, #tpu.memory_space<vmem>>, vector<1x1x8x384xf32>
    %587 = vector.shape_cast %586 : vector<1x1x8x384xf32> to vector<8x384xf32>
    %c632 = arith.constant 632 : index
    %c0_898 = arith.constant 0 : index
    %588 = vector.load %arg11[%c632, %c0_898] : memref<648x384xf32, #tpu.memory_space<vmem>>, vector<8x384xf32>
    tpu.vector_store %arg11[%c632, %c0_898], %587 {strides = array<i32>} : memref<648x384xf32, #tpu.memory_space<vmem>>, vector<8x384xf32>,
    %c0_899 = arith.constant 0 : index
    %c3_900 = arith.constant 3 : index
    %c0_901 = arith.constant 0 : index
    %c200_902 = arith.constant 200 : index
    %589 = vector.load %arg1[%c0_899, %c3_900, %c0_901, %c200_902] : memref<1x4x8x640xf32, #tpu.memory_space<vmem>>, vector<1x1x8x384xf32>
    %590 = vector.shape_cast %589 : vector<1x1x8x384xf32> to vector<8x384xf32>
    %c640 = arith.constant 640 : index
    %c0_903 = arith.constant 0 : index
    %591 = vector.load %arg11[%c640, %c0_903] : memref<648x384xf32, #tpu.memory_space<vmem>>, vector<8x384xf32>
    tpu.vector_store %arg11[%c640, %c0_903], %590 {strides = array<i32>} : memref<648x384xf32, #tpu.memory_space<vmem>>, vector<8x384xf32>,
    %c0_904 = arith.constant 0 : index
    %c0_905 = arith.constant 0 : index
    %592 = vector.load %arg5[%c0_904, %c0_905] : memref<8x648xf32, #tpu.memory_space<vmem>>, vector<8x648xf32>
    %c0_906 = arith.constant 0 : index
    %c0_907 = arith.constant 0 : index
    %593 = vector.load %arg11[%c0_906, %c0_907] : memref<648x384xf32, #tpu.memory_space<vmem>>, vector<648x384xf32>
    %cst_908 = arith.constant dense<0.000000e+00> : vector<8x384xf32>
    %594 = tpu.matmul %592, %593, %cst_908 {dimension_numbers = #tpu.dot_dimension_numbers<[1], [0], [0], [1], [0, 0, 1, 1], [], []>} : vector<8x648xf32>, vector<648x384xf32>, vector<8x384xf32> -> vector<8x384xf32>
    %c3_909 = arith.constant 3 : index
    %c0_910 = arith.constant 0 : index
    %c0_911 = arith.constant 0 : index
    %595 = vector.load %arg6[%c3_909, %c0_910, %c0_911] : memref<4x8x1xf32, #tpu.memory_space<vmem>>, vector<1x8x1xf32>
    %596 = vector.shape_cast %595 : vector<1x8x1xf32> to vector<8x1xf32>
    %597 = vector.broadcast %596 : vector<8x1xf32> to vector<8x384xf32>
    %598 = arith.addf %594, %597 : vector<8x384xf32>
    %599 = vector.broadcast %0 : vector<1x384xf32> to vector<8x384xf32>
    %600 = arith.mulf %598, %599 : vector<8x384xf32>
    %cst_912 = arith.constant dense<0.000000e+00> : vector<8xf32>
    %601 = vector.multi_reduction <add>, %600, %cst_912 [1] : vector<8x384xf32> to vector<8xf32>
    %602 = vector.shape_cast %601 : vector<8xf32> to vector<8x1xf32>
    %cst_913 = arith.constant 3.906250e-03 : f32
    %603 = vector.broadcast %cst_913 : f32 to vector<8x1xf32>
    %604 = arith.mulf %602, %603 : vector<8x1xf32>
    %c3_914 = arith.constant 3 : index
    %c0_915 = arith.constant 0 : index
    %c0_916 = arith.constant 0 : index
    %605 = vector.load %arg7[%c3_914, %c0_915, %c0_916] : memref<4x8x2xf32, #tpu.memory_space<vmem>>, vector<1x8x2xf32>
    %606 = vector.shape_cast %605 : vector<1x8x2xf32> to vector<8x2xf32>
    %607 = vector.broadcast %604 : vector<8x1xf32> to vector<8x2xf32>
    %608 = arith.mulf %606, %607 : vector<8x2xf32>
    %cst_917 = arith.constant dense<0.000000e+00> : vector<2xf32>
    %609 = vector.multi_reduction <add>, %608, %cst_917 [0] : vector<8x2xf32> to vector<2xf32>
    %610 = vector.shape_cast %609 : vector<2xf32> to vector<1x2xf32>
    %cst_918 = arith.constant 0.000000e+00 : f32
    %611 = vector.broadcast %cst_918 : f32 to vector<1x2xf32>
    %612 = arith.maximumf %610, %611 : vector<1x2xf32>
    %c3_919 = arith.constant 3 : index
    %c0_920 = arith.constant 0 : index
    %c0_921 = arith.constant 0 : index
    %613 = vector.load %arg8[%c3_919, %c0_920, %c0_921] : memref<4x8x2xf32, #tpu.memory_space<vmem>>, vector<1x8x2xf32>
    %614 = vector.shape_cast %613 : vector<1x8x2xf32> to vector<8x2xf32>
    %615 = vector.broadcast %612 : vector<1x2xf32> to vector<8x2xf32>
    %616 = arith.mulf %614, %615 : vector<8x2xf32>
    %cst_922 = arith.constant dense<0.000000e+00> : vector<8xf32>
    %617 = vector.multi_reduction <add>, %616, %cst_922 [1] : vector<8x2xf32> to vector<8xf32>
    %618 = vector.shape_cast %617 : vector<8xf32> to vector<8x1xf32>
    %cst_923 = arith.constant 0.000000e+00 : f32
    %619 = vector.broadcast %cst_923 : f32 to vector<8x1xf32>
    %620 = arith.subf %619, %618 : vector<8x1xf32>
    %621 = math.exp %620 : vector<8x1xf32>
    %cst_924 = arith.constant 1.000000e+00 : f32
    %622 = vector.broadcast %cst_924 : f32 to vector<8x1xf32>
    %623 = arith.addf %622, %621 : vector<8x1xf32>
    %624 = tpu.reciprocal %623 {approx = true} : vector<8x1xf32> -> vector<8x1xf32>
    %625 = tpu.concatenate %60, %168, %348, %624 in 1 : vector<8x1xf32>, vector<8x1xf32>, vector<8x1xf32>, vector<8x1xf32> -> vector<8x4xf32>
    %cst_925 = arith.constant dense<0xFF800000> : vector<8xf32>
    %626 = vector.multi_reduction <maximumf>, %625, %cst_925 [1] : vector<8x4xf32> to vector<8xf32>
    %627 = vector.shape_cast %626 : vector<8xf32> to vector<8x1xf32>
    %628 = vector.broadcast %627 : vector<8x1xf32> to vector<8x4xf32>
    %629 = arith.subf %625, %628 : vector<8x4xf32>
    %630 = math.exp %629 : vector<8x4xf32>
    %cst_926 = arith.constant dense<0.000000e+00> : vector<8xf32>
    %631 = vector.multi_reduction <add>, %630, %cst_926 [1] : vector<8x4xf32> to vector<8xf32>
    %632 = vector.shape_cast %631 : vector<8xf32> to vector<8x1xf32>
    %633 = tpu.reciprocal %632 {approx = true} : vector<8x1xf32> -> vector<8x1xf32>
    %634 = vector.broadcast %633 : vector<8x1xf32> to vector<8x4xf32>
    %635 = arith.mulf %630, %634 : vector<8x4xf32>
    %636 = vector.extract_strided_slice %635 {offsets = [0, 0], sizes = [8, 1], strides = [1, 1]} : vector<8x4xf32> to vector<8x1xf32>
    %637 = vector.broadcast %636 : vector<8x1xf32> to vector<8x384xf32>
    %638 = arith.mulf %34, %637 : vector<8x384xf32>
    %c0_927 = arith.constant 0 : index
    %c0_928 = arith.constant 0 : index
    %c0_929 = arith.constant 0 : index
    %c0_930 = arith.constant 0 : index
    %639 = vector.load %arg10[%c0_927, %c0_928, %c0_929, %c0_930] : memref<1x4x8x384xf32, #tpu.memory_space<vmem>>, vector<1x1x8x384xf32>
    %640 = vector.shape_cast %639 : vector<1x1x8x384xf32> to vector<8x384xf32>
    %641 = vector.shape_cast %638 : vector<8x384xf32> to vector<1x1x8x384xf32>
    tpu.vector_store %arg10[%c0_927, %c0_928, %c0_929, %c0_930], %641 {strides = array<i32>} : memref<1x4x8x384xf32, #tpu.memory_space<vmem>>, vector<1x1x8x384xf32>,
    %642 = vector.extract_strided_slice %635 {offsets = [0, 1], sizes = [8, 1], strides = [1, 1]} : vector<8x4xf32> to vector<8x1xf32>
    %643 = vector.broadcast %642 : vector<8x1xf32> to vector<8x384xf32>
    %644 = arith.mulf %142, %643 : vector<8x384xf32>
    %c0_931 = arith.constant 0 : index
    %c1_932 = arith.constant 1 : index
    %c0_933 = arith.constant 0 : index
    %c0_934 = arith.constant 0 : index
    %645 = vector.load %arg10[%c0_931, %c1_932, %c0_933, %c0_934] : memref<1x4x8x384xf32, #tpu.memory_space<vmem>>, vector<1x1x8x384xf32>
    %646 = vector.shape_cast %645 : vector<1x1x8x384xf32> to vector<8x384xf32>
    %647 = vector.shape_cast %644 : vector<8x384xf32> to vector<1x1x8x384xf32>
    tpu.vector_store %arg10[%c0_931, %c1_932, %c0_933, %c0_934], %647 {strides = array<i32>} : memref<1x4x8x384xf32, #tpu.memory_space<vmem>>, vector<1x1x8x384xf32>,
    %648 = vector.extract_strided_slice %635 {offsets = [0, 2], sizes = [8, 1], strides = [1, 1]} : vector<8x4xf32> to vector<8x1xf32>
    %649 = vector.broadcast %648 : vector<8x1xf32> to vector<8x384xf32>
    %650 = arith.mulf %322, %649 : vector<8x384xf32>
    %c0_935 = arith.constant 0 : index
    %c2_936 = arith.constant 2 : index
    %c0_937 = arith.constant 0 : index
    %c0_938 = arith.constant 0 : index
    %651 = vector.load %arg10[%c0_935, %c2_936, %c0_937, %c0_938] : memref<1x4x8x384xf32, #tpu.memory_space<vmem>>, vector<1x1x8x384xf32>
    %652 = vector.shape_cast %651 : vector<1x1x8x384xf32> to vector<8x384xf32>
    %653 = vector.shape_cast %650 : vector<8x384xf32> to vector<1x1x8x384xf32>
    tpu.vector_store %arg10[%c0_935, %c2_936, %c0_937, %c0_938], %653 {strides = array<i32>} : memref<1x4x8x384xf32, #tpu.memory_space<vmem>>, vector<1x1x8x384xf32>,
    %654 = vector.extract_strided_slice %635 {offsets = [0, 3], sizes = [8, 1], strides = [1, 1]} : vector<8x4xf32> to vector<8x1xf32>
    %655 = vector.broadcast %654 : vector<8x1xf32> to vector<8x384xf32>
    %656 = arith.mulf %598, %655 : vector<8x384xf32>
    %c0_939 = arith.constant 0 : index
    %c3_940 = arith.constant 3 : index
    %c0_941 = arith.constant 0 : index
    %c0_942 = arith.constant 0 : index
    %657 = vector.load %arg10[%c0_939, %c3_940, %c0_941, %c0_942] : memref<1x4x8x384xf32, #tpu.memory_space<vmem>>, vector<1x1x8x384xf32>
    %658 = vector.shape_cast %657 : vector<1x1x8x384xf32> to vector<8x384xf32>
    %659 = vector.shape_cast %656 : vector<8x384xf32> to vector<1x1x8x384xf32>
    tpu.vector_store %arg10[%c0_939, %c3_940, %c0_941, %c0_942], %659 {strides = array<i32>} : memref<1x4x8x384xf32, #tpu.memory_space<vmem>>, vector<1x1x8x384xf32>,
    return
  }
  func.func @transform_0(%arg0: i32) -> (i32, i32, i32, i32) {
    %c0_i32 = arith.constant 0 : i32
    %c0_i32_0 = arith.constant 0 : i32
    %c0_i32_1 = arith.constant 0 : i32
    %c0_i32_2 = arith.constant 0 : i32
    return %arg0, %c0_i32, %c0_i32_0, %c0_i32_1 : i32, i32, i32, i32
  }
  func.func @transform_1(%arg0: i32) -> (i32, i32) {
    %c0_i32 = arith.constant 0 : i32
    %c0_i32_0 = arith.constant 0 : i32
    %c0_i32_1 = arith.constant 0 : i32
    return %c0_i32, %c0_i32_0 : i32, i32
  }
  func.func @transform_2(%arg0: i32) -> (i32, i32) {
    %c0_i32 = arith.constant 0 : i32
    %c0_i32_0 = arith.constant 0 : i32
    %c0_i32_1 = arith.constant 0 : i32
    return %c0_i32, %c0_i32_0 : i32, i32
  }
  func.func @transform_3(%arg0: i32) -> (i32, i32) {
    %c0_i32 = arith.constant 0 : i32
    %c0_i32_0 = arith.constant 0 : i32
    %c0_i32_1 = arith.constant 0 : i32
    return %c0_i32, %c0_i32_0 : i32, i32
  }
  func.func @transform_4(%arg0: i32) -> (i32, i32) {
    %c0_i32 = arith.constant 0 : i32
    %c0_i32_0 = arith.constant 0 : i32
    %c0_i32_1 = arith.constant 0 : i32
    return %c0_i32, %c0_i32_0 : i32, i32
  }
  func.func @transform_5(%arg0: i32) -> (i32, i32, i32) {
    %c0_i32 = arith.constant 0 : i32
    %c0_i32_0 = arith.constant 0 : i32
    %c0_i32_1 = arith.constant 0 : i32
    %c0_i32_2 = arith.constant 0 : i32
    return %c0_i32, %c0_i32_0, %c0_i32_1 : i32, i32, i32
  }
  func.func @transform_6(%arg0: i32) -> (i32, i32, i32) {
    %c0_i32 = arith.constant 0 : i32
    %c0_i32_0 = arith.constant 0 : i32
    %c0_i32_1 = arith.constant 0 : i32
    %c0_i32_2 = arith.constant 0 : i32
    return %c0_i32, %c0_i32_0, %c0_i32_1 : i32, i32, i32
  }
  func.func @transform_7(%arg0: i32) -> (i32, i32, i32) {
    %c0_i32 = arith.constant 0 : i32
    %c0_i32_0 = arith.constant 0 : i32
    %c0_i32_1 = arith.constant 0 : i32
    %c0_i32_2 = arith.constant 0 : i32
    return %c0_i32, %c0_i32_0, %c0_i32_1 : i32, i32, i32
  }
  func.func @transform_8(%arg0: i32) -> (i32, i32) {
    %c0_i32 = arith.constant 0 : i32
    %c0_i32_0 = arith.constant 0 : i32
    %c0_i32_1 = arith.constant 0 : i32
    return %c0_i32, %c0_i32_0 : i32, i32
  }
  func.func @transform_9(%arg0: i32) -> (i32, i32, i32, i32) {
    %c0_i32 = arith.constant 0 : i32
    %c0_i32_0 = arith.constant 0 : i32
    %c0_i32_1 = arith.constant 0 : i32
    %c0_i32_2 = arith.constant 0 : i32
    return %arg0, %c0_i32, %c0_i32_0, %c0_i32_1 : i32, i32, i32, i32
  }
}

</mosaic_0001>

<bundles_post_ra>
// kernel: tpu_custom_call.1
= control target key start
LH: loop header
LB: loop body
LE: loop exit
PB: predicated region body
PF: predicated region fallthrough
CT: control target
= control target key end

     0   :  { %s10957_s0 = inlined_call_operand.hbm [shape: f32[2,4,8,640], index: 0, kind: input, shape index: {}]   ;;  %s10958_s1 = inlined_call_operand.hbm [shape: f32[8,72], index: 1, kind: input, shape index: {}]   ;;  %s10959_s2 = inlined_call_operand.vmem [shape: f32[8,200], index: 2, kind: input, shape index: {}]   ;;  %s10960_s3 = inlined_call_operand.vmem [shape: f32[8,392], index: 3, kind: input, shape index: {}]   ;;  %s10961_s4 = inlined_call_operand.vmem [shape: f32[8,648], index: 4, kind: input, shape index: {}]   ;;  %s10962_s5 = inlined_call_operand.vmem [shape: f32[4,8,1], index: 5, kind: input, shape index: {}]   ;;  %s10963_s6 = inlined_call_operand.vmem [shape: f32[4,8,2], index: 6, kind: input, shape index: {}]   ;;  %s10964_s7 = inlined_call_operand.vmem [shape: f32[4,8,2], index: 7, kind: input, shape index: {}]   ;;  %s10965_s8 = inlined_call_operand.vmem [shape: f32[1,384], index: 8, kind: input, shape index: {}]   ;;  %s10966_s9 = inlined_call_operand.hbm [shape: f32[2,4,8,384], index: 9, kind: output, shape index: {}]  }
   0x1   :  { %11258 = sst [smem:[#allocation74_spill]] %s10957_s0 }
   0x2   :  { %11259 = sst [smem:[#allocation75_spill]] %s10958_s1 }
   0x3   :  { %11260 = sst [smem:[#allocation76_spill]] %s10959_s2 }
   0x4   :  { %11261 = sst [smem:[#allocation77_spill]] %s10960_s3 }
   0x5   :  { %11262 = sst [smem:[#allocation78_spill]] %s10961_s4 }
   0x6   :  { %11263 = sst [smem:[#allocation79_spill]] %s10962_s5 }
   0x7   :  { %11264 = sst [smem:[#allocation80_spill]] %s10963_s6 }
   0x8   :  { %11265 = sst [smem:[#allocation81_spill]] %s10964_s7 }
   0x9   :  { %11266 = sst [smem:[#allocation82_spill]] %s10965_s8 }
   0xa   :  { %11267 = sst [smem:[#allocation83_spill]] %s10966_s9 }
   0xb   :  { %14 = vsyncpa [#allocation4], 0 }
   0xc   :  { %16 = vsyncpa [#allocation4 + $0x1], 0 }
   0xd   :  { %17 = vsyncpa [#allocation7], 0 }
   0xe   :  { %18 = vsyncpa [#allocation5], 0 }
   0xf   :  { %20 = vsyncpa [#allocation5 + $0x1], 0  ;;  %s7552_s30 = smov 0   ;;  %s7554_s10 = smov 0  }
  0x10   :  { %s7556_s11 = smov 0   ;;  %s7558_s12 = smov 0  }
  0x11 LB: > { %11268 = sst [smem:[#allocation12_spill]] %s7400_s30  ;;  %s7573_s13 = sadd.s32 4294967295, %s7412_s12   ;;  %s7412_s12 = sphi %s7558_s12, %s11786_s12   ;;  %s7408_s11 = sphi %s7556_s11, %s11789_s11   ;;  %s7404_s10 = sphi %s7554_s10, %s11788_s10   ;;  %s7400_s30 = sphi %s7552_s30, %s11787_s30  }
  0x12   : > { %11269 = sst [smem:[#allocation13_spill]] %s7404_s10  ;;  %s6326_s14 = sadd.s32 4294967294, %s7412_s12  }
  0x13   : > { %11270 = sst [smem:[#allocation14_spill]] %s7408_s11  ;;  %s7577_s15 = sadd.s32 1, %s7412_s12  }
  0x14   : > { %11271 = sst [smem:[#allocation15_spill]] %s7412_s12  ;;  %s33_s16 = sadd.s32 1, %s7408_s11 }
  0x15   : > { %11272 = sst [smem:[#allocation16_spill]] %s7573_s13  ;;  %s30_s17 = ssub.s32 %s7412_s12, %s7577_s15 }
  0x16   : > { %11273 = sst [smem:[#allocation17_spill]] %s7577_s15  ;;  %p40_p0 = scmp.ne.s32.totalorder %s7408_s11, %s7404_s10 }
  0x17   : > { %p31_p1 = scmp.eq.s32.totalorder %s30_s17, 0  ;;  %p41_p2 = scmp.eq.s32.totalorder %s7412_s12, 0 }
  0x18   : > { %p46_p3 = scmp.ne.s32.totalorder %s7404_s10, %s7400_s30  ;;  %p10967_p4 = scmp.eq.s32.totalorder %s7573_s13, 0 }
  0x19   : > { %s7589_s18 = scalar_select %p31_p1, %s7408_s11, %s33_s16  }
  0x1a   : > { %p7591_p5 = por %p41_p2, %p40_p0  ;;  %p7597_p6 = por %p10967_p4, %p46_p3 }
  0x1b   : > { %11274 = sst [smem:[#allocation18_spill]] %s7589_s18  ;;  %p238_p7 = scmp.eq.s32.totalorder %s7573_s13, 1 }
  0x1c   : > { %s11276_s20 = scalar_select %p7597_p6, 1, 0 }
  0x1d   : > { %p244_p8 = scmp.eq.s32.totalorder %s6326_s14, 1  ;;  %p6327_p9 = scmp.ge.s32.totalorder %s7412_s12, 1 }
  0x1e   : > { %p251_p10 = scmp.lt.s32.totalorder %s7412_s12, 3  ;;  %p7604_p11 = por %p238_p7, %p40_p0 }
  0x1f   : > { %p7608_p12 = por %p244_p8, %p46_p3  ;;  %s7414_s24 = smov [#allocation6]  }
  0x20   : > { %s11277_s21 = scalar_select %p7604_p11, 1, 0 }
  0x21   : > { %s11279_s22 = scalar_select %p7608_p12, 1, 0 }
  0x22   : > { %11278 = sst [smem:[#allocation19_spill]] %s11277_s21  ;;  %p7612_p13 = pnand %p6327_p9, %p251_p10 }
  0x23   : > { %11280 = sst [smem:[#allocation20_spill]] %s11279_s22  ;;  %s264_s25 = sshll.u32 %s7414_s24, 4  ;;  %s265_s25 = int_to_ptr.vmem [resolvable:$true] %s264_s25 }
  0x24   : > { %s11281_s23 = scalar_select %p7612_p13, 1, 0 }
  0x25   : > { %p7129_p2 = pneg %p7612_p13  ;;  %p7142_p4 = scmp.lt.s32.totalorder %s7412_s12, 2 }
  0x26   : > { %p11282_p0 = scmp.eq.s32.totalorder %s7573_s13, 0  ;;  %s296_s27 = sand.u32 1, %s7408_s11  }
  0x27   : > { %p7629_p3 = pnand %p7142_p4, %p7591_p5  ;;  %s7116_s29 = smul.u32 160, %s296_s27 }
  0x28   : > { %p7622_p7 = pnand %p7129_p2, %p11282_p0  ;;  %s7301_s14 = scalar_lea.vmem %s265_s25, 128 }
  0x29   : > { %p7302_p9 = scmp.ne.s32.totalorder %s265_s25, %s7301_s14  ;;  %p7309_p12 = scmp.lt.s32.totalorder %s265_s25, %s265_s25 }
  0x2a   : > { %p7292_p8 = pneg %p7622_p7  ;;  %p7310_p11 = scmp.lt.s32.totalorder %s7301_s14, %s7301_s14 }
  0x2c   : > { %p7304_p10 = pnand %p7302_p9, %p7292_p8  ;;  %p7311_p2 = por %p7310_p11, %p7309_p12 }
  0x2e   : > { %p7305_p1 = pneg %p7304_p10 }
  0x30   : > { %p7312_p0 = pnand %p7311_p2, %p7305_p1 }
  0x32   : > { %7315 = shalt.err (!%p7312_p0)
}
  0x33   : > { %s11285_s1 = sld [smem:[#allocation75_spill]]  ;;  %s7117_s19 = smul.u32 2560, %s7412_s12 }
  0x34   : > { %s300_s24 = scalar_lea.vmem [#allocation3], %s7116_s29  ;;  %s11286_s0 = sld [smem:[#allocation74_spill]] }
  0x35   : > { %s307_s18 = sshll.u32 %s300_s24, 4  ;;  %s7648_s26 = scalar_lea.sflag [#allocation4], %s296_s27  ;;  %s7641_s18 = int_to_ptr.vmem [resolvable:$true] %s307_s18 }
  0x36   : > { %p7318_p5 = pneg %p7629_p3 }
  0x39   : > { %7132 = dma.hbm_to_vmem [thread:$0]  (!%p7622_p7), %s11285_s1, 128, %s265_s25, [#allocation7]  }
  0x3a   : > { %s7646_s14 = scalar_lea.hbm %s11286_s0, %s7117_s19  ;;  %s7321_s16 = scalar_lea.hbm %s11286_s0, 5120 }
  0x3b   : > { %s7316_s22 = scalar_lea.hbm %s7646_s14, 2560  ;;  %p7322_p1 = scmp.lt.s32.totalorder %s7646_s14, %s11286_s0 }
  0x3c   : > { %p7317_p4 = scmp.ne.s32.totalorder %s7646_s14, %s7316_s22  ;;  %p7323_p7 = scmp.lt.s32.totalorder %s7321_s16, %s7316_s22 }
  0x3e   : > { %p7319_p11 = pnand %p7318_p5, %p7317_p4  ;;  %p7324_p8 = por %p7323_p7, %p7322_p1 }
  0x40   : > { %p7320_p12 = pneg %p7319_p11 }
  0x42   : > { %p7325_p9 = pnand %p7324_p8, %p7320_p12 }
  0x44   : > { %7328 = shalt.err (!%p7325_p9)
}
  0x45   : > { %s7329_s11 = scalar_lea.vmem %s7641_s18, 2560  ;;  %s7415_s15 = smov [#allocation3]  }
  0x46   : > { %p7330_p10 = scmp.ne.s32.totalorder %s7641_s18, %s7329_s11  ;;  %s7334_s27 = sshll.u32 %s7415_s15, 4  ;;  %s7335_s27 = int_to_ptr.vmem [resolvable:$false] %s7334_s27 }
  0x47   : > { %s7336_s19 = scalar_lea.vmem %s7335_s27, 5120  ;;  %p7337_p4 = scmp.lt.s32.totalorder %s7641_s18, %s7335_s27 }
  0x48   : > { %p7332_p2 = pnand %p7330_p10, %p7318_p5  ;;  %p7338_p11 = scmp.lt.s32.totalorder %s7336_s19, %s7329_s11 }
  0x4a   : > { %p7333_p0 = pneg %p7332_p2  ;;  %p7339_p6 = por %p7338_p11, %p7337_p4 }
  0x4c   : > { %p7340_p13 = pnand %p7339_p6, %p7333_p0 }
  0x4e   : > { %7343 = shalt.err (!%p7340_p13)
}
  0x4f   : > { %s7416_s22 = smov 640   ;;  %s7417_s25 = smov 40  }
  0x50   : > { %7136 = dma.hbm_to_vmem [thread:$0]  (!%p7629_p3), %s7646_s14, 2560, %s7641_s18, %s7648_s26, %s7416_s22, %s7416_s22, %s7417_s25  }
  0x51   : > { %p11287_p5 = scmp.ne.s32.totalorder %s11281_s23, 0 }
  0x53   : > { %319 = sbr.rel (%p11287_p5) target bundleno = 2836 (0xb14), region = 56 }
  0x58   : > { %s7672_s29 = sand.u32 1, %s7404_s10   ;;  %p11289_p6 = scmp.ne.s32.totalorder %s11276_s20, 0 }
  0x59   : > { %11288 = sst [smem:[#allocation21_spill]] %s7672_s29  ;;  %s7118_s16 = smul.u32 160, %s7672_s29 }
  0x5a   : > { %s322_s17 = scalar_lea.sflag [#allocation4], %s7672_s29 }
  0x5b   : > { %s7676_s24 = scalar_lea.vmem [#allocation3], %s7118_s16 }
  0x5c   : > { %7387 = dma.done.wait (%p11289_p6), %s322_s17, 2560  }
  0x5d   : > { %7389 = vsyncadd (%p11289_p6), %s322_s17, 4294964736  ;;  %p11290_p13 = scmp.eq.s32.totalorder %s7573_s13, 0 }
  0x5f   : > { %7391 = dma.done.wait (%p11290_p13), [#allocation7], 128   ;;  %p11291_p3 = pmov %p11290_p13 }
  0x60   : > { %v7418_v0 = vmov 0   ;;  %v367_v1 = vld [vmem:[%s7676_s24 + $0x10] sm:$0xff]  ;;  %v365_v2 = vld [vmem:[%s7676_s24] sm:$0xff]  ;;  %s10977_s18 = smov 53   ;;  %v368_v3 = vld [vmem:[%s7676_s24 + $0x18] sm:$0xff]  ;;  %s10979_s20 = smov 52  }
  0x61   : > { %7393 = vsyncadd (%p11291_p3), [#allocation7], 4294967168  ;;  %7263 = vset.pattern.permute.xlu0 %v7418_v0  ;;  %7264 = vset.pattern.permute.xlu1 %v7418_v0  ;;  %v366_v4 = vld [vmem:[%s7676_s24 + $0x8] sm:$0xff]  ;;  %s11057_s23 = smov 51   ;;  %s10981_s28 = smov 29   ;;  %v7735_v7 = vld [vmem:[%s7676_s24 + $0x30] sm:$0xff] }
  0x62   : > { %377 = vrot.lane.b32.xlu1 %v367_v1, %s10977_s18  ;;  %373 = vrot.lane.b32.xlu0 %v365_v2, %s10977_s18  ;;  %s11031_s14 = smov 28   ;;  %s10983_s26 = smov 27   ;;  %v7730_v6 = vld [vmem:[%s7676_s24 + $0x28] sm:$0xff]  ;;  %v7738_v8 = vld [vmem:[%s7676_s24 + $0x38] sm:$0xff]  ;;  %v11005_v9 = vmov 0.0   ;;  %vm11092_vm0 = vcmask 23552  }
  0x63   : > { %s10987_s11 = smov 5   ;;  %s10999_s15 = smov 4   ;;  %701 = vmatprep.mubr.f32.mxu1 %v11005_v9  ;;  %v7746_v10 = vld [vmem:[%s7676_s24 + $0x40] sm:$0xff]  ;;  %vm11251_vm1 = vcmask 31744   ;;  %vm11186_vm2 = vcmask 39936   ;;  %vm11169_vm3 = vcmask 220160  }
  0x64   : > { %s10989_s27 = smov 3   ;;  %s11292_s5 = sld [smem:[#allocation79_spill]]  ;;  %vm11036_vm4 = vcmask 228352   ;;  %vm11035_vm5 = vcmask 236544   ;;  %vm11026_vm6 = vcmask 416768   ;;  %vm11025_vm7 = vcmask 424960  }
  0x65   : > { %s11041_s25 = smov 78   ;;  %s11039_s16 = smov 77   ;;  %vm11024_vm8 = vcmask 433152   ;;  %vm11023_vm9 = vcmask 588800   ;;  %vm7439_vm10 = vmmov 0   ;;  %vm11194_vm11 = vcmask 48128  }
  0x66   : > { %379 = vrot.lane.b32.xlu1 %v368_v3, %s10977_s18  ;;  %375 = vrot.lane.b32.xlu0 %v366_v4, %s10977_s18  ;;  %s10975_s17 = smov 76   ;;  %s11063_s19 = smov 75   ;;  %vm11168_vm12 = vcmask 211968   ;;  %vm11034_vm13 = vcmask 244736   ;;  %vm11033_vm14 = vcmask 408576   ;;  %vm970_vm15 = vcmask 441344  }
  0x67   : > { %s11045_s22 = smov 74   ;;  %s11305_s2 = sld [smem:[#allocation76_spill]] }
  0x68   : > { %s11318_s8 = sld [smem:[#allocation82_spill]]  ;;  %s11366_s1 = smov 30  }
  0x69   : > { %s11334_s6 = sld [smem:[#allocation80_spill]]  ;;  %s11369_s0 = smov 28  }
  0x6a   : > { %401 = vrot.lane.b32.xlu1 %v366_v4, %s10979_s20  ;;  %399 = vrot.lane.b32.xlu0 %v365_v2, %s10979_s20  ;;  %v627_v5 = vld [vmem:[%s11292_s5] sm:$0xff]  ;;  %s11335_s7 = sld [smem:[#allocation81_spill]]  ;;  %s11094_s10 = smov 83  }
  0x6b   : > { %s11090_s12 = smov 84   ;;  %s11099_s30 = smov 85  }
  0x6c   : > { %s11383_s9 = smov 7   ;;  %s11120_s21 = smov 25  }
  0x6d   : > { %s11385_s13 = smov 106   ;;  %s11389_s29 = smov 108  }
  0x6e   : > { %405 = vrot.lane.b32.xlu1 %v368_v3, %s10979_s20  ;;  %403 = vrot.lane.b32.xlu0 %v367_v1, %s10979_s20  ;;  %s11396_s4 = smov 2   ;;  %s11399_s3 = sld [smem:[#allocation77_spill]] }
  0x72   : > { %427 = vrot.lane.b32.xlu1 %v366_v4, %s11057_s23  ;;  %425 = vrot.lane.b32.xlu0 %v365_v2, %s11057_s23 }
  0x76   : > { %431 = vrot.lane.b32.xlu1 %v368_v3, %s11057_s23  ;;  %429 = vrot.lane.b32.xlu0 %v367_v1, %s11057_s23 }
  0x7a   : > { %453 = vrot.lane.b32.xlu1 %v366_v4, %s10981_s28  ;;  %451 = vrot.lane.b32.xlu0 %v365_v2, %s10981_s28 }
  0x7e   : > { %457 = vrot.lane.b32.xlu1 %v368_v3, %s10981_s28  ;;  %455 = vrot.lane.b32.xlu0 %v367_v1, %s10981_s28 }
  0x82   : > { %479 = vrot.lane.b32.xlu1 %v366_v4, %s11031_s14  ;;  %477 = vrot.lane.b32.xlu0 %v365_v2, %s11031_s14 }
  0x86   : > { %483 = vrot.lane.b32.xlu1 %v368_v3, %s11031_s14  ;;  %481 = vrot.lane.b32.xlu0 %v367_v1, %s11031_s14 }
  0x8a   : > { %505 = vrot.lane.b32.xlu1 %v366_v4, %s10983_s26  ;;  %503 = vrot.lane.b32.xlu0 %v365_v2, %s10983_s26 }
  0x8e   : > { %509 = vrot.lane.b32.xlu1 %v368_v3, %s10983_s26  ;;  %507 = vrot.lane.b32.xlu0 %v367_v1, %s10983_s26 }
  0x92   : > { %531 = vrot.lane.b32.xlu1 %v366_v4, %s10987_s11  ;;  %529 = vrot.lane.b32.xlu0 %v365_v2, %s10987_s11 }
  0x96   : > { %535 = vrot.lane.b32.xlu1 %v368_v3, %s10987_s11  ;;  %533 = vrot.lane.b32.xlu0 %v367_v1, %s10987_s11 }
  0x9a   : > { %557 = vrot.lane.b32.xlu1 %v366_v4, %s10999_s15  ;;  %555 = vrot.lane.b32.xlu0 %v365_v2, %s10999_s15 }
  0x9e   : > { %561 = vrot.lane.b32.xlu1 %v368_v3, %s10999_s15  ;;  %559 = vrot.lane.b32.xlu0 %v367_v1, %s10999_s15 }
  0xa2   : > { %583 = vrot.lane.b32.xlu1 %v366_v4, %s10989_s27  ;;  %581 = vrot.lane.b32.xlu0 %v365_v2, %s10989_s27 }
  0xa6   : > { %587 = vrot.lane.b32.xlu1 %v368_v3, %s10989_s27  ;;  %585 = vrot.lane.b32.xlu0 %v367_v1, %s10989_s27 }
  0xaa   : > { %630 = vperm.xlu0 %7263, %v627_v5   ;;  %832 = vrot.lane.b32.xlu1 %v7730_v6, %s11041_s25 }
  0xae   : > { %834 = vrot.lane.b32.xlu0 %v7735_v7, %s11041_s25  ;;  %836 = vrot.lane.b32.xlu1 %v7738_v8, %s11041_s25 }
  0xb2   : > { %858 = vrot.lane.b32.xlu0 %v7730_v6, %s11039_s16  ;;  %838 = vrot.lane.b32.xlu1 %v7746_v10, %s11041_s25 }
  0xb6   : > { %862 = vrot.lane.b32.xlu0 %v7738_v8, %s11039_s16  ;;  %860 = vrot.lane.b32.xlu1 %v7735_v7, %s11039_s16 }
  0xba   : > { %884 = vrot.lane.b32.xlu0 %v7730_v6, %s10975_s17  ;;  %864 = vrot.lane.b32.xlu1 %v7746_v10, %s11039_s16 }
  0xbe   : > { %888 = vrot.lane.b32.xlu0 %v7738_v8, %s10975_s17  ;;  %886 = vrot.lane.b32.xlu1 %v7735_v7, %s10975_s17 }
  0xc2   : > { %910 = vrot.lane.b32.xlu0 %v7730_v6, %s11063_s19  ;;  %890 = vrot.lane.b32.xlu1 %v7746_v10, %s10975_s17  ;;  %s11049_s17 = smov 54  }
  0xc6   : > { %914 = vrot.lane.b32.xlu0 %v7738_v8, %s11063_s19  ;;  %912 = vrot.lane.b32.xlu1 %v7735_v7, %s11063_s19 }
  0xca   : > { %936 = vrot.lane.b32.xlu0 %v7730_v6, %s11045_s22  ;;  %916 = vrot.lane.b32.xlu1 %v7746_v10, %s11063_s19 }
  0xce   : > { %940 = vrot.lane.b32.xlu0 %v7738_v8, %s11045_s22  ;;  %938 = vrot.lane.b32.xlu1 %v7735_v7, %s11045_s22 }
  0xd2   : > { %962 = vrot.lane.b32.xlu0 %v7730_v6, %s11049_s17  ;;  %942 = vrot.lane.b32.xlu1 %v7746_v10, %s11045_s22 }
  0xd4   : > { %v7784_v11 = vpop.permute.xlu1 %377  ;;  %v7786_v12 = vpop.permute.xlu0 %373 }
  0xd6   : > { %966 = vrot.lane.b32.xlu0 %v7738_v8, %s11049_s17  ;;  %964 = vrot.lane.b32.xlu1 %v7735_v7, %s11049_s17 }
  0xd8   : > { %v7792_v13 = vpop.permute.xlu1 %379  ;;  %v7794_v14 = vpop.permute.xlu0 %375 }
  0xd9   : > { %v383_v5 = vsel %vm11024_vm8, %v7794_v14, %v7784_v11 }
  0xda   : > { %988 = vrot.lane.b32.xlu0 %v7730_v6, %s10977_s18  ;;  %968 = vrot.lane.b32.xlu1 %v7746_v10, %s11049_s17 }
  0xdc   : > { %v7800_v15 = vpop.permute.xlu1 %401  ;;  %v7802_v16 = vpop.permute.xlu0 %399 }
  0xdd   : > { %v408_v2 = vsel %vm11025_vm7, %v7802_v16, %v7800_v15 }
  0xde   : > { %992 = vrot.lane.b32.xlu0 %v7738_v8, %s10977_s18  ;;  %990 = vrot.lane.b32.xlu1 %v7735_v7, %s10977_s18 }
  0xe0   : > { %v7808_v17 = vpop.permute.xlu1 %405  ;;  %v7810_v18 = vpop.permute.xlu0 %403 }
  0xe1   : > { %v409_v1 = vsel %vm11025_vm7, %v7800_v15, %v7810_v18 }
  0xe2   : > { %1013 = vrot.lane.b32.xlu0 %v7730_v6, %s10979_s20  ;;  %994 = vrot.lane.b32.xlu1 %v7746_v10, %s10977_s18  ;;  %s11053_s18 = smov 50  }
  0xe4   : > { %v7816_v19 = vpop.permute.xlu1 %427  ;;  %v7818_v20 = vpop.permute.xlu0 %425 }
  0xe5   : > { %v434_v0 = vsel %vm11026_vm6, %v7818_v20, %v7816_v19  ;;  %v382_v20 = vsel %vm11024_vm8, %v7786_v12, %v7794_v14 }
  0xe6   : > { %1017 = vrot.lane.b32.xlu0 %v7738_v8, %s10979_s20  ;;  %1015 = vrot.lane.b32.xlu1 %v7735_v7, %s10979_s20 }
  0xe8   : > { %v7824_v21 = vpop.permute.xlu1 %431  ;;  %v7826_v22 = vpop.permute.xlu0 %429 }
  0xe9   : > { %v435_v63 = vsel %vm11026_vm6, %v7816_v19, %v7826_v22  ;;  %v599_v19 = vld [vmem:[#allocation6] sm:$0xff] }
  0xea   : > { %1038 = vrot.lane.b32.xlu0 %v7730_v6, %s11057_s23  ;;  %1019 = vrot.lane.b32.xlu1 %v7746_v10, %s10979_s20  ;;  %s11071_s20 = smov 30  }
  0xec   : > { %v7832_v23 = vpop.permute.xlu1 %453  ;;  %v7834_v24 = vpop.permute.xlu0 %451 }
  0xed   : > { %v460_v60 = vsel %vm11035_vm5, %v7834_v24, %v7832_v23 }
  0xee   : > { %1042 = vrot.lane.b32.xlu0 %v7738_v8, %s11057_s23  ;;  %1040 = vrot.lane.b32.xlu1 %v7735_v7, %s11057_s23 }
  0xf0   : > { %v7840_v25 = vpop.permute.xlu1 %457  ;;  %v7842_v26 = vpop.permute.xlu0 %455 }
  0xf1   : > { %v461_v59 = vsel %vm11035_vm5, %v7832_v23, %v7842_v26 }
  0xf2   : > { %1063 = vrot.lane.b32.xlu0 %v7730_v6, %s11053_s18  ;;  %1044 = vrot.lane.b32.xlu1 %v7746_v10, %s11057_s23 }
  0xf4   : > { %v7848_v27 = vpop.permute.xlu1 %479  ;;  %v7850_v28 = vpop.permute.xlu0 %477 }
  0xf5   : > { %v486_v58 = vsel %vm11036_vm4, %v7850_v28, %v7848_v27 }
  0xf6   : > { %1067 = vrot.lane.b32.xlu0 %v7738_v8, %s11053_s18  ;;  %1065 = vrot.lane.b32.xlu1 %v7735_v7, %s11053_s18 }
  0xf8   : > { %v7856_v29 = vpop.permute.xlu1 %483  ;;  %v7858_v30 = vpop.permute.xlu0 %481 }
  0xf9   : > { %v487_v57 = vsel %vm11036_vm4, %v7848_v27, %v7858_v30 }
  0xfa   : > { %1089 = vrot.lane.b32.xlu0 %v7730_v6, %s11071_s20  ;;  %1069 = vrot.lane.b32.xlu1 %v7746_v10, %s11053_s18 }
  0xfc   : > { %v506_v31 = vpop.permute.xlu1 %505  ;;  %v504_v32 = vpop.permute.xlu0 %503 }
  0xfd   : > { %v512_v55 = vsel %vm11169_vm3, %v504_v32, %v506_v31 }
  0xfe   : > { %1093 = vrot.lane.b32.xlu0 %v7738_v8, %s11071_s20  ;;  %1091 = vrot.lane.b32.xlu1 %v7735_v7, %s11071_s20 }
 0x100   : > { %v7868_v33 = vpop.permute.xlu1 %509  ;;  %v7870_v34 = vpop.permute.xlu0 %507 }
 0x101   : > { %v513_v54 = vsel %vm11169_vm3, %v506_v31, %v7870_v34  ;;  %v514_v28 = vsel %vm11169_vm3, %v7870_v34, %v7868_v33  ;;  %v488_v31 = vsel %vm11036_vm4, %v7858_v30, %v7856_v29  ;;  %v462_v33 = vsel %vm11035_vm5, %v7842_v26, %v7840_v25 }
 0x102   : > { %1115 = vrot.lane.b32.xlu0 %v7730_v6, %s10981_s28  ;;  %1095 = vrot.lane.b32.xlu1 %v7746_v10, %s11071_s20  ;;  %v436_v29 = vsel %vm11026_vm6, %v7826_v22, %v7824_v21  ;;  %v410_v25 = vsel %vm11025_vm7, %v7810_v18, %v7808_v17  ;;  %v384_v21 = vsel %vm11024_vm8, %v7784_v11, %v7792_v13 }
 0x104   : > { %v532_v35 = vpop.permute.xlu1 %531  ;;  %v530_v36 = vpop.permute.xlu0 %529 }
 0x105   : > { %v538_v53 = vsel %vm11186_vm2, %v530_v36, %v532_v35 }
 0x106   : > { %1119 = vrot.lane.b32.xlu0 %v7738_v8, %s10981_s28  ;;  %1117 = vrot.lane.b32.xlu1 %v7735_v7, %s10981_s28 }
 0x108   : > { %v7880_v37 = vpop.permute.xlu1 %535  ;;  %v7882_v38 = vpop.permute.xlu0 %533 }
 0x109   : > { %v539_v52 = vsel %vm11186_vm2, %v532_v35, %v7882_v38  ;;  %v540_v14 = vsel %vm11186_vm2, %v7882_v38, %v7880_v37 }
 0x10a   : > { %1140 = vrot.lane.b32.xlu0 %v7730_v6, %s11031_s14  ;;  %1121 = vrot.lane.b32.xlu1 %v7746_v10, %s10981_s28  ;;  %s11029_s28 = smov 26  }
 0x10c   : > { %v558_v39 = vpop.permute.xlu1 %557  ;;  %v556_v40 = vpop.permute.xlu0 %555 }
 0x10d   : > { %v564_v50 = vsel %vm11251_vm1, %v556_v40, %v558_v39  ;;  %v6418_v40 = vld [vmem:[%s7676_s24 + $0x48] sm:$0xff] }
 0x10e   : > { %1144 = vrot.lane.b32.xlu0 %v7738_v8, %s11031_s14  ;;  %1142 = vrot.lane.b32.xlu1 %v7735_v7, %s11031_s14 }
 0x110   : > { %v7892_v41 = vpop.permute.xlu1 %561  ;;  %v7894_v42 = vpop.permute.xlu0 %559 }
 0x111   : > { %v565_v49 = vsel %vm11251_vm1, %v558_v39, %v7894_v42  ;;  %v566_v12 = vsel %vm11251_vm1, %v7894_v42, %v7892_v41 }
 0x112   : > { %1165 = vrot.lane.b32.xlu0 %v7730_v6, %s10983_s26  ;;  %1146 = vrot.lane.b32.xlu1 %v7746_v10, %s11031_s14  ;;  %s11317_s14 = smov 76  }
 0x114   : > { %v584_v43 = vpop.permute.xlu1 %583  ;;  %v582_v44 = vpop.permute.xlu0 %581 }
 0x115   : > { %v590_v48 = vsel %vm11092_vm0, %v582_v44, %v584_v43 }
 0x116   : > { %1169 = vrot.lane.b32.xlu0 %v7738_v8, %s10983_s26  ;;  %1167 = vrot.lane.b32.xlu1 %v7735_v7, %s10983_s26 }
 0x118   : > { %v7904_v45 = vpop.permute.xlu1 %587  ;;  %v7906_v46 = vpop.permute.xlu0 %585 }
 0x119   : > { %v591_v47 = vsel %vm11092_vm0, %v584_v43, %v7906_v46  ;;  %v592_v15 = vsel %vm11092_vm0, %v7906_v46, %v7904_v45 }
 0x11a   : > { %1190 = vrot.lane.b32.xlu0 %v7730_v6, %s11029_s28  ;;  %651 = vmatprep.subr.mxu1 %v591_v47 }
 0x11b   : > { %652 = vmatpush1.msra.mxu1 %v590_v48  ;;  %1171 = vrot.lane.b32.xlu1 %v7746_v10, %s10983_s26  ;;  %s10985_s26 = smov 6  }
 0x11c   : > { %653 = vmatprep.subr.mxu1 %v565_v49  ;;  %v7918_v51 = vpop.permute.xlu1 %832 }
 0x11d   : > { %11293 = vst [vmem:[#allocation22_spill] sm:$0xff] %v7918_v51  ;;  %654 = vmatpush1.msra.mxu1 %v564_v50 }
 0x11e   : > { %1194 = vrot.lane.b32.xlu0 %v7738_v8, %s11029_s28  ;;  %655 = vmatprep.subr.mxu1 %v539_v52 }
 0x11f   : > { %656 = vmatpush1.msra.mxu1 %v538_v53  ;;  %1192 = vrot.lane.b32.xlu1 %v7735_v7, %s11029_s28 }
 0x120   : > { %657 = vmatprep.subr.mxu1 %v513_v54  ;;  %v7930_v56 = vpop.permute.xlu1 %836 }
 0x121   : > { %11294 = vst [vmem:[#allocation23_spill] sm:$0xff] %v7930_v56  ;;  %658 = vmatpush1.msra.mxu1 %v512_v55 }
 0x122   : > { %1216 = vrot.lane.b32.xlu0 %v7730_v6, %s10985_s26  ;;  %659 = vmatprep.subr.mxu1 %v487_v57 }
 0x123   : > { %660 = vmatpush1.msra.mxu1 %v486_v58  ;;  %1196 = vrot.lane.b32.xlu1 %v7746_v10, %s11029_s28  ;;  %v6435_v58 = vld [vmem:[%s11292_s5 + $0x8] sm:$0xff]  ;;  %s11061_s28 = smov 79   ;;  %s11136_s5 = smov 1  }
 0x124   : > { %661 = vmatprep.subr.mxu1 %v461_v59  ;;  %v7948_v61 = vpop.permute.xlu1 %838 }
 0x125   : > { %11295 = vst [vmem:[#allocation24_spill] sm:$0xff] %v7948_v61  ;;  %662 = vmatpush1.msra.mxu1 %v460_v60  ;;  %v7950_v62 = vpop.permute.xlu0 %630 }
 0x126   : > { %11296 = vst [vmem:[#allocation25_spill] sm:$0xff] %v7950_v62  ;;  %1220 = vrot.lane.b32.xlu0 %v7738_v8, %s10985_s26  ;;  %663 = vmatprep.subr.mxu1 %v435_v63  ;;  %v8166_v63 = vld [vmem:[%s7676_s24 + $0x58] sm:$0xff] }
 0x127   : > { %664 = vmatpush1.msra.mxu1 %v434_v0  ;;  %1218 = vrot.lane.b32.xlu1 %v7735_v7, %s10985_s26  ;;  %11302 = vst [vmem:[#allocation31_spill] sm:$0xff] %v8166_v63  ;;  %v8171_v0 = vld [vmem:[%s7676_s24 + $0x50] sm:$0xff] }
 0x128   : > { %665 = vmatprep.subr.mxu1 %v409_v1  ;;  %v7968_v3 = vpop.permute.xlu1 %860  ;;  %11303 = vst [vmem:[#allocation32_spill] sm:$0xff] %v8171_v0 }
 0x129   : > { %11297 = vst [vmem:[#allocation26_spill] sm:$0xff] %v7968_v3  ;;  %666 = vmatpush1.msra.mxu1 %v408_v2  ;;  %v7970_v4 = vpop.permute.xlu0 %834  ;;  %v8183_v2 = vld [vmem:[%s7676_s24 + $0x60] sm:$0xff]  ;;  %v11307_v3 = vmov 0.0  }
 0x12a   : > { %11298 = vst [vmem:[#allocation27_spill] sm:$0xff] %v7970_v4  ;;  %1242 = vrot.lane.b32.xlu0 %v7730_v6, %s10987_s11  ;;  %667 = vmatprep.subr.mxu1 %v383_v5  ;;  %11304 = vst [vmem:[#allocation33_spill] sm:$0xff] %v8183_v2 }
 0x12b   : > { %668 = vmatpush1.msra.mxu1 %v382_v20  ;;  %1222 = vrot.lane.b32.xlu1 %v7746_v10, %s10985_s26  ;;  %s10991_s26 = smov 2  }
 0x12c   : > { %6333 = vmatmul.mubr.msk.f32.vlgmr.msra.gmra.mxu1 %vm11023_vm9, %v599_v19  ;;  %7095 = vmatprep.subr.mxu1 %v11005_v9  ;;  %v7987_v16 = vpop.permute.xlu1 %864 }
 0x12d   : > { %11299 = vst [vmem:[#allocation28_spill] sm:$0xff] %v7987_v16  ;;  %7096 = vmatpush3.msra.mxu1 %v592_v15  ;;  %v7989_v23 = vpop.permute.xlu0 %858  ;;  %7113 = vmatprep.mubr.msk.f32.mxu1 %vm7439_vm10, %v11005_v9  ;;  %vm11161_vm10 = vcmask 605184  }
 0x12e   : > { %11300 = vst [vmem:[#allocation29_spill] sm:$0xff] %v7989_v23  ;;  %1246 = vrot.lane.b32.xlu0 %v7738_v8, %s10987_s11  ;;  %7097 = vmatprep.subr.mxu1 %v11005_v9 }
 0x12f   : > { %7098 = vmatpush3.msra.mxu1 %v566_v12  ;;  %1244 = vrot.lane.b32.xlu1 %v7735_v7, %s10987_s11 }
 0x130   : > { %7099 = vmatprep.subr.mxu1 %v11005_v9  ;;  %v8004_v24 = vpop.permute.xlu1 %886 }
 0x131   : > { %7100 = vmatpush3.msra.mxu1 %v540_v14  ;;  %v8006_v27 = vpop.permute.xlu0 %862 }
 0x132   : > { %11301 = vst [vmem:[#allocation30_spill] sm:$0xff] %v8006_v27  ;;  %1267 = vrot.lane.b32.xlu0 %v7730_v6, %s10999_s15  ;;  %7101 = vmatprep.subr.mxu1 %v11005_v9 }
 0x133   : > { %7102 = vmatpush3.msra.mxu1 %v514_v28  ;;  %1248 = vrot.lane.b32.xlu1 %v7746_v10, %s10987_s11  ;;  %s10993_s11 = smov 110  }
 0x134   : > { %7103 = vmatprep.subr.mxu1 %v11005_v9  ;;  %v8020_v32 = vpop.permute.xlu1 %890 }
 0x135   : > { %7104 = vmatpush3.msra.mxu1 %v488_v31  ;;  %v8022_v35 = vpop.permute.xlu0 %884 }
 0x136   : > { %1271 = vrot.lane.b32.xlu0 %v7738_v8, %s10999_s15  ;;  %7105 = vmatprep.subr.mxu1 %v11005_v9 }
 0x137   : > { %7106 = vmatpush3.msra.mxu1 %v462_v33  ;;  %1269 = vrot.lane.b32.xlu1 %v7735_v7, %s10999_s15 }
 0x138   : > { %7107 = vmatprep.subr.mxu1 %v11005_v9  ;;  %v8036_v30 = vpop.permute.xlu1 %912 }
 0x139   : > { %7108 = vmatpush3.msra.mxu1 %v436_v29  ;;  %v8038_v34 = vpop.permute.xlu0 %888 }
 0x13a   : > { %1292 = vrot.lane.b32.xlu0 %v7730_v6, %s10989_s27  ;;  %7109 = vmatprep.subr.mxu1 %v11005_v9 }
 0x13b   : > { %7110 = vmatpush3.msra.mxu1 %v410_v25  ;;  %1273 = vrot.lane.b32.xlu1 %v7746_v10, %s10999_s15  ;;  %s11047_s15 = smov 100  }
 0x13c   : > { %7111 = vmatprep.subr.mxu1 %v11005_v9  ;;  %v8052_v22 = vpop.permute.xlu1 %916 }
 0x13d   : > { %7112 = vmatpush3.msra.mxu1 %v384_v21  ;;  %v8054_v26 = vpop.permute.xlu0 %910 }
 0x13e   : > { %1296 = vrot.lane.b32.xlu0 %v7738_v8, %s10989_s27  ;;  %7114 = vmatmul.mubr.msk.f32.vlgmr.msra.gmra.mxu1 %vm11023_vm9, %v599_v19  ;;  %v1465_v19 = vld [vmem:[%s11305_s2 + $0x8] sm:$0xff] }
 0x13f   : > { %1294 = vrot.lane.b32.xlu1 %v7735_v7, %s10989_s27  ;;  %1622 = vmatprep.subr.mxu1 %v11005_v9 }
 0x140   : > { %v8062_v17 = vpop.permute.xlu1 %938  ;;  %6437 = vmatprep.mubr.msk.f32.mxu1 %vm11023_vm9, %v1465_v19  ;;  %6436 = vmatprep.mubr.msk.f32.mxu0 %vm11023_vm9, %v1465_v19  ;;  %vm11101_vm9 = vcmask 613376  }
 0x141   : > { %v8064_v11 = vpop.permute.xlu0 %914 }
 0x142   : > { %1317 = vrot.lane.b32.xlu0 %v7730_v6, %s10991_s26 }
 0x143   : > { %1298 = vrot.lane.b32.xlu1 %v7746_v10, %s10989_s27  ;;  %s10995_s27 = smov 109  }
 0x144   : > { %v8070_v13 = vpop.permute.xlu1 %942 }
 0x145   : > { %v8072_v18 = vpop.permute.xlu0 %936 }
 0x146   : > { %1321 = vrot.lane.b32.xlu0 %v7738_v8, %s10991_s26 }
 0x147   : > { %1319 = vrot.lane.b32.xlu1 %v7735_v7, %s10991_s26 }
 0x148   : > { %v8078_v36 = vpop.permute.xlu1 %964 }
 0x149   : > { %v8080_v37 = vpop.permute.xlu0 %940 }
 0x14a   : > { %1342 = vrot.lane.b32.xlu0 %v7735_v7, %s10993_s11 }
 0x14b   : > { %1323 = vrot.lane.b32.xlu1 %v7746_v10, %s10991_s26  ;;  %s10997_s26 = smov 108  }
 0x14c   : > { %v8086_v6 = vpop.permute.xlu1 %968 }
 0x14d   : > { %v8088_v38 = vpop.permute.xlu0 %962 }
 0x14e   : > { %1346 = vrot.lane.b32.xlu0 %v7746_v10, %s10993_s11 }
 0x14f   : > { %1344 = vrot.lane.b32.xlu1 %v7738_v8, %s10993_s11 }
 0x150   : > { %v8094_v39 = vpop.permute.xlu1 %990 }
 0x151   : > { %v8097_v41 = vpop.permute.xlu0 %966 }
 0x152   : > { %1368 = vrot.lane.b32.xlu0 %v7735_v7, %s10995_s27 }
 0x153   : > { %1348 = vrot.lane.b32.xlu1 %v6418_v40, %s10993_s11  ;;  %s11001_s11 = smov 107  }
 0x154   : > { %v8102_v42 = vpop.permute.xlu1 %994 }
 0x155   : > { %v8104_v43 = vpop.permute.xlu0 %988 }
 0x156   : > { %1372 = vrot.lane.b32.xlu0 %v7746_v10, %s10995_s27 }
 0x157   : > { %1370 = vrot.lane.b32.xlu1 %v7738_v8, %s10995_s27 }
 0x158   : > { %v8110_v44 = vpop.permute.xlu1 %1015 }
 0x159   : > { %v8112_v45 = vpop.permute.xlu0 %992 }
 0x15a   : > { %1394 = vrot.lane.b32.xlu0 %v7735_v7, %s10997_s26 }
 0x15b   : > { %1374 = vrot.lane.b32.xlu1 %v6418_v40, %s10995_s27  ;;  %s11003_s27 = smov 106  }
 0x15c   : > { %v8117_v46 = vpop.permute.xlu1 %1019 }
 0x15d   : > { %v8119_v47 = vpop.permute.xlu0 %1013 }
 0x15e   : > { %1398 = vrot.lane.b32.xlu0 %v7746_v10, %s10997_s26 }
 0x15f   : > { %1396 = vrot.lane.b32.xlu1 %v7738_v8, %s10997_s26 }
 0x160   : > { %v8125_v48 = vpop.permute.xlu1 %1040 }
 0x161   : > { %v8127_v49 = vpop.permute.xlu0 %1017 }
 0x162   : > { %1420 = vrot.lane.b32.xlu0 %v7735_v7, %s11001_s11 }
 0x163   : > { %1400 = vrot.lane.b32.xlu1 %v6418_v40, %s10997_s26  ;;  %s11007_s26 = smov 103  }
 0x164   : > { %v8132_v50 = vpop.permute.xlu1 %1044 }
 0x165   : > { %v8134_v52 = vpop.permute.xlu0 %1038 }
 0x166   : > { %1424 = vrot.lane.b32.xlu0 %v7746_v10, %s11001_s11 }
 0x167   : > { %1422 = vrot.lane.b32.xlu1 %v7738_v8, %s11001_s11 }
 0x168   : > { %v8140_v53 = vpop.permute.xlu1 %1065 }
 0x169   : > { %v8142_v54 = vpop.permute.xlu0 %1042 }
 0x16a   : > { %1446 = vrot.lane.b32.xlu0 %v7735_v7, %s11003_s27 }
 0x16b   : > { %1426 = vrot.lane.b32.xlu1 %v6418_v40, %s11001_s11  ;;  %s11027_s11 = smov 101  }
 0x16c   : > { %v8147_v55 = vpop.permute.xlu1 %1069 }
 0x16d   : > { %v8149_v57 = vpop.permute.xlu0 %1063 }
 0x16e   : > { %1450 = vrot.lane.b32.xlu0 %v7746_v10, %s11003_s27 }
 0x16f   : > { %1448 = vrot.lane.b32.xlu1 %v7738_v8, %s11003_s27  ;;  %v8178_v8 = vld [vmem:[%s7676_s24 + $0x68] sm:$0xff] }
 0x170   : > { %v8158_v59 = vpop.permute.xlu1 %1091 }
 0x171   : > { %v8160_v7 = vpop.permute.xlu0 %1067 }
 0x172   : > { %1545 = vperm.xlu0 %7263, %v6435_v58  }
 0x173   : > { %1452 = vrot.lane.b32.xlu1 %v6418_v40, %s11003_s27  ;;  %s11014_s27 = smov 102  }
 0x174   : > { %v8163_v60 = vpop.permute.xlu1 %1095 }
 0x175   : > { %v8168_v10 = vpop.permute.xlu0 %1089 }
 0x176   : > { %1731 = vrot.lane.b32.xlu0 %v8171_v0, %s11007_s26 }
 0x177   : > { %1733 = vrot.lane.b32.xlu1 %v8166_v63, %s11007_s26 }
 0x178   : > { %v8180_v1 = vpop.permute.xlu1 %1117 }
 0x179   : > { %v8185_v5 = vpop.permute.xlu0 %1093 }
 0x17a   : > { %1737 = vrot.lane.b32.xlu0 %v8178_v8, %s11007_s26 }
 0x17b   : > { %1735 = vrot.lane.b32.xlu1 %v8183_v2, %s11007_s26  ;;  %s11067_s26 = smov 99  }
 0x17c   : > { %v8195_v20 = vpop.permute.xlu1 %1121 }
 0x17d   : > { %v8198_v15 = vpop.permute.xlu0 %1115 }
 0x17e   : > { %1759 = vrot.lane.b32.xlu0 %v8166_v63, %s11014_s27 }
 0x17f   : > { %1757 = vrot.lane.b32.xlu1 %v8171_v0, %s11014_s27 }
 0x180   : > { %v8204_v12 = vpop.permute.xlu1 %1142 }
 0x181   : > { %v8206_v14 = vpop.permute.xlu0 %1119 }
 0x182   : > { %1763 = vrot.lane.b32.xlu0 %v8178_v8, %s11014_s27 }
 0x183   : > { %1761 = vrot.lane.b32.xlu1 %v8183_v2, %s11014_s27  ;;  %s11069_s27 = smov 98  }
 0x184   : > { %v1147_v28 = vpop.permute.xlu1 %1146 }
 0x185   : > { %v1141_v31 = vpop.permute.xlu0 %1140 }
 0x186   : > { %1785 = vrot.lane.b32.xlu0 %v8166_v63, %s11027_s11 }
 0x187   : > { %1783 = vrot.lane.b32.xlu1 %v8171_v0, %s11027_s11 }
 0x188   : > { %v1168_v33 = vpop.permute.xlu1 %1167 }
 0x189   : > { %v1145_v29 = vpop.permute.xlu0 %1144 }
 0x18a   : > { %1789 = vrot.lane.b32.xlu0 %v8178_v8, %s11027_s11 }
 0x18b   : > { %1787 = vrot.lane.b32.xlu1 %v8183_v2, %s11027_s11  ;;  %s11059_s11 = smov 97  }
 0x18d   : > { %v1166_v25 = vpop.permute.xlu0 %1165  ;;  %v1172_v21 = vpop.permute.xlu1 %1171 }
 0x18e   : > { %1811 = vrot.lane.b32.xlu0 %v8166_v63, %s11047_s15 }
 0x191   : > { %v1170_v40 = vpop.permute.xlu0 %1169  ;;  %v1193_v58 = vpop.permute.xlu1 %1192 }
 0x192   : > { %1815 = vrot.lane.b32.xlu0 %v8178_v8, %s11047_s15 }
 0x195   : > { %v1191_v19 = vpop.permute.xlu0 %1190  ;;  %v1197_v9 = vpop.permute.xlu1 %1196 }
 0x196   : > { %1837 = vrot.lane.b32.xlu0 %v8166_v63, %s11067_s26 }
 0x199   : > { %v1195_v0 = vpop.permute.xlu0 %1194  ;;  %v1219_v62 = vpop.permute.xlu1 %1218 }
 0x19a   : > { %1841 = vrot.lane.b32.xlu0 %v8178_v8, %s11067_s26  ;;  %v1201_v27 = vsel %vm11168_vm12, %v1195_v0, %v1197_v9  ;;  %v1149_v9 = vsel %vm11036_vm4, %v8204_v12, %v1145_v29 }
 0x19d   : > { %v1217_v2 = vpop.permute.xlu0 %1216  ;;  %v1223_v51 = vpop.permute.xlu1 %1222 }
 0x19e   : > { %1863 = vrot.lane.b32.xlu0 %v8166_v63, %s11069_s27  ;;  %v1225_v16 = vsel %vm11194_vm11, %v1217_v2, %v1219_v62  ;;  %v1200_v63 = vsel %vm11168_vm12, %v1193_v58, %v1195_v0  ;;  %v1124_v2 = vsel %vm11035_vm5, %v8180_v1, %v8206_v14 }
 0x1a1   : > { %v1221_v4 = vpop.permute.xlu0 %1220  ;;  %v8230_v56 = vpop.permute.xlu1 %1244 }
 0x1a2   : > { %11306 = vst [vmem:[#allocation34_spill] sm:$0xff] %v8230_v56  ;;  %v1226_v61 = vsel %vm11194_vm11, %v1219_v62, %v1221_v4  ;;  %v1227_v23 = vsel %vm11194_vm11, %v1221_v4, %v1223_v51  ;;  %1867 = vrot.lane.b32.xlu0 %v8178_v8, %s11069_s27  ;;  %v1199_v51 = vsel %vm11168_vm12, %v1191_v19, %v1193_v58  ;;  %v11314_v19 = vld [vmem:[#allocation27_spill] sm:$0xff] }
 0x1a3   : > { %1551 = vmatprep.subr.mxu0 %v1226_v61  ;;  %1623 = vmatpush1.msra.mxu1 %v1227_v23  ;;  %v1174_v61 = vsel %vm11169_vm3, %v1168_v33, %v1170_v40  ;;  %v1175_v62 = vsel %vm11169_vm3, %v1170_v40, %v1172_v21  ;;  %v1150_v23 = vsel %vm11036_vm4, %v1145_v29, %v1147_v28  ;;  %v11309_v29 = vld [vmem:[#allocation26_spill] sm:$0xff]  ;;  %v11311_v21 = vld [vmem:[#allocation29_spill] sm:$0xff] }
 0x1a4   : > { %1552 = vmatpush1.msra.mxu0 %v1225_v16  ;;  %1624 = vmatprep.subr.mxu1 %v11307_v3  ;;  %v1173_v16 = vsel %vm11169_vm3, %v1166_v25, %v1168_v33  ;;  %v1125_v28 = vsel %vm11035_vm5, %v8206_v14, %v8195_v20  ;;  %v1100_v33 = vsel %vm11034_vm13, %v8185_v5, %v8163_v60 }
 0x1a5   : > { %1553 = vmatprep.subr.mxu0 %v1200_v63  ;;  %1625 = vmatpush1.msra.mxu1 %v1201_v27  ;;  %v8240_v56 = vpop.permute.xlu0 %1242  ;;  %v8243_v4 = vpop.permute.xlu1 %1248  ;;  %v1148_v63 = vsel %vm11036_vm4, %v1141_v31, %v8204_v12  ;;  %v1123_v12 = vsel %vm11035_vm5, %v8198_v15, %v8180_v1  ;;  %v1099_v31 = vsel %vm11034_vm13, %v8158_v59, %v8185_v5  ;;  %vm11038_vm5 = vcmask 883712  }
 0x1a6   : > { %1554 = vmatpush1.msra.mxu0 %v1199_v51  ;;  %1626 = vmatprep.subr.mxu1 %v11307_v3  ;;  %v1098_v1 = vsel %vm11034_vm13, %v8168_v10, %v8158_v59  ;;  %v1073_v14 = vsel %vm11033_vm14, %v8140_v53, %v8160_v7  ;;  %v1074_v60 = vsel %vm11033_vm14, %v8160_v7, %v8147_v55  ;;  %vm11037_vm13 = vcmask 875520  }
 0x1a7   : > { %1555 = vmatprep.subr.mxu0 %v1174_v61  ;;  %1627 = vmatpush1.msra.mxu1 %v1175_v62  ;;  %v1072_v5 = vsel %vm11033_vm14, %v8149_v57, %v8140_v53  ;;  %v1047_v59 = vsel %vm11026_vm6, %v8125_v48, %v8142_v54  ;;  %v1048_v10 = vsel %vm11026_vm6, %v8142_v54, %v8132_v50  ;;  %v11315_v62 = vld [vmem:[#allocation22_spill] sm:$0xff]  ;;  %vm11166_vm14 = vcmask 867328  }
 0x1a8   : > { %1556 = vmatpush1.msra.mxu0 %v1173_v16  ;;  %1628 = vmatprep.subr.mxu1 %v11307_v3  ;;  %v1046_v7 = vsel %vm11026_vm6, %v8134_v52, %v8125_v48  ;;  %v1022_v57 = vsel %vm11025_vm7, %v8110_v44, %v8127_v49  ;;  %v1023_v50 = vsel %vm11025_vm7, %v8127_v49, %v8117_v46  ;;  %vm11102_vm6 = vcmask 637952  }
 0x1a9   : > { %1557 = vmatprep.subr.mxu0 %v1149_v9  ;;  %1629 = vmatpush1.msra.mxu1 %v1150_v23  ;;  %v8253_v27 = vpop.permute.xlu0 %1246  ;;  %v8257_v0 = vpop.permute.xlu1 %1269  ;;  %v1021_v54 = vsel %vm11025_vm7, %v8119_v47, %v8110_v44  ;;  %v997_v48 = vsel %vm11024_vm8, %v8094_v39, %v8112_v45  ;;  %v998_v52 = vsel %vm11024_vm8, %v8112_v45, %v8102_v42  ;;  %vm11103_vm7 = vcmask 629760   ;;  %v11316_v23 = vld [vmem:[#allocation31_spill] sm:$0xff] }
 0x1aa   : > { %1558 = vmatpush1.msra.mxu0 %v1148_v63  ;;  %1630 = vmatprep.subr.mxu1 %v11307_v3  ;;  %v996_v44 = vsel %vm11024_vm8, %v8104_v43, %v8094_v39  ;;  %v972_v49 = vsel %vm970_vm15, %v8078_v36, %v8097_v41  ;;  %v973_v42 = vsel %vm970_vm15, %v8097_v41, %v8086_v6  ;;  %vm11098_vm8 = vcmask 621568  }
 0x1ab   : > { %1559 = vmatprep.subr.mxu0 %v1124_v2  ;;  %1631 = vmatpush1.msra.mxu1 %v1125_v28  ;;  %v971_v39 = vsel %vm970_vm15, %v8088_v38, %v8078_v36  ;;  %v946_v43 = vsel %vm11161_vm10, %v8062_v17, %v8080_v37  ;;  %v947_v45 = vsel %vm11161_vm10, %v8080_v37, %v8070_v13  ;;  %vm11255_vm4 = vcmask 891904  }
 0x1ac   : > { %1560 = vmatpush1.msra.mxu0 %v1123_v12  ;;  %1632 = vmatprep.subr.mxu1 %v11307_v3  ;;  %v945_v36 = vsel %vm11161_vm10, %v8072_v18, %v8062_v17  ;;  %v920_v41 = vsel %vm11101_vm9, %v8036_v30, %v8064_v11  ;;  %v921_v13 = vsel %vm11101_vm9, %v8064_v11, %v8052_v22  ;;  %v11308_v11 = vld [vmem:[#allocation30_spill] sm:$0xff] }
 0x1ad   : > { %1561 = vmatprep.subr.mxu0 %v1099_v31  ;;  %1633 = vmatpush1.msra.mxu1 %v1100_v33  ;;  %v8276_v20 = vpop.permute.xlu0 %1267  ;;  %v8281_v15 = vpop.permute.xlu1 %1273  ;;  %v919_v17 = vsel %vm11101_vm9, %v8054_v26, %v8036_v30  ;;  %v894_v18 = vsel %vm11098_vm8, %v8004_v24, %v8038_v34  ;;  %v895_v37 = vsel %vm11098_vm8, %v8038_v34, %v8020_v32  ;;  %v11310_v32 = vld [vmem:[#allocation28_spill] sm:$0xff] }
 0x1ae   : > { %1562 = vmatpush1.msra.mxu0 %v1098_v1  ;;  %1634 = vmatprep.subr.mxu1 %v11307_v3  ;;  %v893_v30 = vsel %vm11098_vm8, %v8022_v35, %v8004_v24  ;;  %v868_v25 = vsel %vm11103_vm7, %v11309_v29, %v11308_v11  ;;  %v869_v34 = vsel %vm11103_vm7, %v11308_v11, %v11310_v32  ;;  %v11312_v24 = vld [vmem:[#allocation24_spill] sm:$0xff]  ;;  %v11313_v35 = vld [vmem:[#allocation23_spill] sm:$0xff] }
 0x1af   : > { %1563 = vmatprep.subr.mxu0 %v1073_v14  ;;  %1635 = vmatpush1.msra.mxu1 %v1074_v60  ;;  %v867_v40 = vsel %vm11103_vm7, %v11311_v21, %v11309_v29  ;;  %v843_v58 = vsel %vm11102_vm6, %v11313_v35, %v11312_v24  ;;  %v842_v51 = vsel %vm11102_vm6, %v11314_v19, %v11313_v35 }
 0x1b0   : > { %1564 = vmatpush1.msra.mxu0 %v1072_v5  ;;  %1636 = vmatprep.subr.mxu1 %v11307_v3  ;;  %v841_v16 = vsel %vm11102_vm6, %v11315_v62, %v11314_v19 }
 0x1b1   : > { %1565 = vmatprep.subr.mxu0 %v1047_v59  ;;  %1637 = vmatpush1.msra.mxu1 %v1048_v10  ;;  %v8300_v55 = vpop.permute.xlu0 %1271  ;;  %v8305_v53 = vpop.permute.xlu1 %1294 }
 0x1b2   : > { %1566 = vmatpush1.msra.mxu0 %v1046_v7  ;;  %1638 = vmatprep.subr.mxu1 %v11307_v3 }
 0x1b3   : > { %1567 = vmatprep.subr.mxu0 %v1022_v57  ;;  %1639 = vmatpush1.msra.mxu1 %v1023_v50 }
 0x1b4   : > { %1568 = vmatpush1.msra.mxu0 %v1021_v54  ;;  %1640 = vmatprep.subr.mxu1 %v11307_v3 }
 0x1b5   : > { %1569 = vmatprep.subr.mxu0 %v997_v48  ;;  %1641 = vmatpush1.msra.mxu1 %v998_v52  ;;  %v8324_v46 = vpop.permute.xlu0 %1292  ;;  %v8329_v47 = vpop.permute.xlu1 %1298 }
 0x1b6   : > { %1570 = vmatpush1.msra.mxu0 %v996_v44  ;;  %1642 = vmatprep.subr.mxu1 %v11307_v3 }
 0x1b7   : > { %1571 = vmatprep.subr.mxu0 %v972_v49  ;;  %1643 = vmatpush1.msra.mxu1 %v973_v42 }
 0x1b8   : > { %1572 = vmatpush1.msra.mxu0 %v971_v39  ;;  %1644 = vmatprep.subr.mxu1 %v11307_v3 }
 0x1b9   : > { %1573 = vmatprep.subr.mxu0 %v946_v43  ;;  %1645 = vmatpush1.msra.mxu1 %v947_v45  ;;  %v8348_v6 = vpop.permute.xlu0 %1296  ;;  %v8353_v38 = vpop.permute.xlu1 %1319 }
 0x1ba   : > { %1574 = vmatpush1.msra.mxu0 %v945_v36  ;;  %1646 = vmatprep.subr.mxu1 %v11307_v3  ;;  %v1302_v62 = vsel %vm11092_vm0, %v8348_v6, %v8329_v47  ;;  %v1277_v47 = vsel %vm11251_vm1, %v8300_v55, %v8281_v15  ;;  %v11322_v15 = vld [vmem:[#allocation34_spill] sm:$0xff] }
 0x1bb   : > { %1575 = vmatprep.subr.mxu0 %v920_v41  ;;  %1647 = vmatpush1.msra.mxu1 %v921_v13 }
 0x1bc   : > { %1576 = vmatpush1.msra.mxu0 %v919_v17  ;;  %1648 = vmatprep.subr.mxu1 %v11307_v3  ;;  %v779_v17 = vlaneseq }
 0x1bd   : > { %1577 = vmatprep.subr.mxu0 %v894_v18  ;;  %1649 = vmatpush1.msra.mxu1 %v895_v37  ;;  %v8372_v22 = vpop.permute.xlu0 %1317  ;;  %v8377_v26 = vpop.permute.xlu1 %1323 }
 0x1be   : > { %1578 = vmatpush1.msra.mxu0 %v893_v30  ;;  %1650 = vmatprep.subr.mxu1 %v11307_v3 }
 0x1bf   : > { %1579 = vmatprep.subr.mxu0 %v868_v25  ;;  %1651 = vmatpush1.msra.mxu1 %v869_v34  ;;  %v780_v34 = vshrl.u32 %v779_v17, 7 }
 0x1c0   : > { %1580 = vmatpush1.msra.mxu0 %v867_v40  ;;  %1652 = vmatprep.subr.mxu1 %v11307_v3 }
 0x1c1   : > { %1581 = vmatprep.subr.mxu0 %v842_v51  ;;  %1653 = vmatpush1.msra.mxu1 %v843_v58  ;;  %v8396_v61 = vpop.permute.xlu0 %1321  ;;  %v8401_v9 = vpop.permute.xlu1 %1344  ;;  %v785_v35 = vsub.s32 1, %v780_v34  ;;  %v1301_v51 = vsel %vm11092_vm0, %v8305_v53, %v8348_v6  ;;  %v11319_v6 = vld [vmem:[#allocation25_spill] sm:$0xff] }
 0x1c2   : > { %1582 = vmatpush1.msra.mxu0 %v841_v16  ;;  %1668 = vmatprep.subr.mxu1 %v11307_v3 }
 0x1c3   : > { %1889 = vrot.lane.b32.xlu0 %v11316_v23, %s11059_s11 }
 0x1c5   : > { %v8406_v63 = vpop.permute.xlu0 %1342  ;;  %v8408_v2 = vpop.permute.xlu1 %1348 }
 0x1c7   : > { %1893 = vrot.lane.b32.xlu0 %v8178_v8, %s11059_s11 }
 0x1c9   : > { %v8412_v28 = vpop.permute.xlu0 %1346  ;;  %v1371_v12 = vpop.permute.xlu1 %1370 }
 0x1cb   : > { %1915 = vrot.lane.b32.xlu0 %v11316_v23, %s11061_s28 }
 0x1cd   : > { %v1369_v31 = vpop.permute.xlu0 %1368  ;;  %v1375_v33 = vpop.permute.xlu1 %1374 }
 0x1ce   : > { %v1377_v11 = vsel %vm11255_vm4, %v1369_v31, %v1371_v12 }
 0x1cf   : > { %1919 = vrot.lane.b32.xlu0 %v8178_v8, %s11061_s28 }
 0x1d1   : > { %v1373_v1 = vpop.permute.xlu0 %1372  ;;  %v1397_v14 = vpop.permute.xlu1 %1396 }
 0x1d2   : > { %v1378_v37 = vsel %vm11255_vm4, %v1371_v12, %v1373_v1  ;;  %v1379_v30 = vsel %vm11255_vm4, %v1373_v1, %v1375_v33 }
 0x1d3   : > { %1941 = vrot.lane.b32.xlu0 %v11316_v23, %s11041_s25 }
 0x1d5   : > { %v1395_v60 = vpop.permute.xlu0 %1394  ;;  %v1401_v5 = vpop.permute.xlu1 %1400 }
 0x1d6   : > { %v1403_v18 = vsel %vm11038_vm5, %v1395_v60, %v1397_v14 }
 0x1d7   : > { %1945 = vrot.lane.b32.xlu0 %v8178_v8, %s11041_s25  ;;  %s11043_s25 = smov 73  }
 0x1d9   : > { %v1399_v59 = vpop.permute.xlu0 %1398  ;;  %v1423_v10 = vpop.permute.xlu1 %1422 }
 0x1da   : > { %v1404_v41 = vsel %vm11038_vm5, %v1397_v14, %v1399_v59  ;;  %v1405_v13 = vsel %vm11038_vm5, %v1399_v59, %v1401_v5  ;;  %vm11093_vm5 = vcmask 15360   ;;  %v11327_v5 = vld [vmem:[#allocation32_spill] sm:$0xff]  ;;  %v11328_v59 = vld [vmem:[#allocation33_spill] sm:$0xff] }
 0x1db   : > { %1966 = vrot.lane.b32.xlu0 %v11316_v23, %s11039_s16  ;;  %v1326_v40 = vsel %vm11093_vm5, %v8353_v38, %v8396_v61  ;;  %v1327_v24 = vsel %vm11093_vm5, %v8396_v61, %v8377_v26  ;;  %v1325_v58 = vsel %vm11093_vm5, %v8372_v22, %v8353_v38  ;;  %v781_v26 = vsub.s32 0, %v780_v34  ;;  %v364_v38 = vld [vmem:[%s11318_s8] sm:$0x7]  ;;  %s11087_s8 = smov 82  }
 0x1dc   : > { %v1300_v61 = vsel %vm11092_vm0, %v8324_v46, %v8305_v53  ;;  %v1276_v22 = vsel %vm11251_vm1, %v8257_v0, %v8300_v55  ;;  %v1275_v53 = vsel %vm11251_vm1, %v8276_v20, %v8257_v0  ;;  %v1464_v46 = vld [vmem:[%s11305_s2] sm:$0xff]  ;;  %v1251_v55 = vsel %vm11186_vm2, %v11322_v15, %v8253_v27  ;;  %s11373_s2 = smov 26  }
 0x1dd   : > { %v1421_v7 = vpop.permute.xlu0 %1420  ;;  %v1427_v57 = vpop.permute.xlu1 %1426  ;;  %v8506_v0 = vrot.slane %v364_v38, %v781_v26  ;;  %v1250_v20 = vsel %vm11186_vm2, %v8240_v56, %v11322_v15  ;;  %vm2098_vm0 = vcmask 449536  }
 0x1de   : > { %v1429_v36 = vsel %vm11037_vm13, %v1421_v7, %v1423_v10 }
 0x1df   : > { %1970 = vrot.lane.b32.xlu0 %v8178_v8, %s11039_s16  ;;  %11324 = vst [vmem:[#allocation29_spill] sm:$0xff] %v8506_v0  ;;  %s11065_s16 = smov 55  }
 0x1e1   : > { %v1425_v50 = vpop.permute.xlu0 %1424  ;;  %v1449_v54 = vpop.permute.xlu1 %1448 }
 0x1e2   : > { %v1430_v43 = vsel %vm11037_vm13, %v1423_v10, %v1425_v50  ;;  %v1431_v45 = vsel %vm11037_vm13, %v1425_v50, %v1427_v57  ;;  %vm11254_vm13 = vcmask 900096  }
 0x1e3   : > { %1991 = vrot.lane.b32.xlu0 %v11316_v23, %s11317_s14  ;;  %v1352_v25 = vsel %vm11254_vm13, %v8401_v9, %v8412_v28  ;;  %v1353_v32 = vsel %vm11254_vm13, %v8412_v28, %v8408_v2  ;;  %v1351_v21 = vsel %vm11254_vm13, %v8406_v63, %v8401_v9  ;;  %v8488_v9 = vrot.slane %v364_v38, %v785_v35 }
 0x1e4   : > { %v789_v63 = vsub.s32 2, %v780_v34  ;;  %v1252_v2 = vsel %vm11186_vm2, %v8253_v27, %v8243_v4 }
 0x1e5   : > { %v1447_v48 = vpop.permute.xlu0 %1446  ;;  %v1453_v52 = vpop.permute.xlu1 %1452  ;;  %11321 = vst [vmem:[#allocation26_spill] sm:$0xff] %v8488_v9 }
 0x1e6   : > { %v1455_v39 = vsel %vm11166_vm14, %v1447_v48, %v1449_v54  ;;  %v8513_v31 = vrot.slane %v364_v38, %v789_v63 }
 0x1e7   : > { %1995 = vrot.lane.b32.xlu0 %v8178_v8, %s11317_s14 }
 0x1e8   : > { %11325 = vst [vmem:[#allocation24_spill] sm:$0xff] %v8513_v31 }
 0x1e9   : > { %v1451_v44 = vpop.permute.xlu0 %1450  ;;  %v8572_v10 = vpop.permute.xlu1 %1733 }
 0x1ea   : > { %v1456_v49 = vsel %vm11166_vm14, %v1449_v54, %v1451_v44  ;;  %v1457_v42 = vsel %vm11166_vm14, %v1451_v44, %v1453_v52  ;;  %v802_v52 = vld [vmem:[%s11334_s6] sm:$0xff] }
 0x1eb   : > { %1597 = vmatprep.subr.mxu0 %v1456_v49  ;;  %1669 = vmatpush2.msra.mxu1 %v1457_v42 }
 0x1ec   : > { %1598 = vmatpush2.msra.mxu0 %v1455_v39  ;;  %1670 = vmatprep.subr.mxu1 %v11307_v3  ;;  %v703_v29 = vpop.f32.mrf.mxu1 }
 0x1ed   : > { %1599 = vmatprep.subr.mxu0 %v1430_v43  ;;  %1671 = vmatpush2.msra.mxu1 %v1431_v45  ;;  %v8504_v28 = vadd.f32 %v703_v29, %v11319_v6  ;;  %v8574_v7 = vpop.permute.xlu1 %1735 }
 0x1ee   : > { %1600 = vmatpush2.msra.mxu0 %v1429_v36  ;;  %1672 = vmatprep.subr.mxu1 %v11307_v3  ;;  %v705_v19 = vpop.f32.mrf.mxu1  ;;  %11331 = vst [vmem:[#allocation27_spill] sm:$0xff] %v8574_v7 }
 0x1ef   : > { %1601 = vmatprep.subr.mxu0 %v1404_v41  ;;  %1673 = vmatpush2.msra.mxu1 %v1405_v13  ;;  %v8486_v16 = vadd.f32 %v705_v19, %v11319_v6  ;;  %11323 = vst [vmem:[#allocation28_spill] sm:$0xff] %v8504_v28  ;;  %v794_v27 = vmul.f32 %v8506_v0, %v8504_v28 }
 0x1f0   : > { %1602 = vmatpush2.msra.mxu0 %v1403_v18  ;;  %1674 = vmatprep.subr.mxu1 %v11307_v3  ;;  %v813_v18 = vld [vmem:[%s11335_s7] sm:$0xff] }
 0x1f1   : > { %1603 = vmatprep.subr.mxu0 %v1378_v37  ;;  %1675 = vmatpush2.msra.mxu1 %v1379_v30  ;;  %11320 = vst [vmem:[#allocation30_spill] sm:$0xff] %v8486_v16  ;;  %v795_v12 = vmul.f32 %v8488_v9, %v8486_v16  ;;  %v8576_v57 = vpop.permute.xlu1 %1757 }
 0x1f2   : > { %1604 = vmatpush2.msra.mxu0 %v1377_v11  ;;  %1676 = vmatprep.subr.mxu1 %v11307_v3 }
 0x1f3   : > { %1605 = vmatprep.subr.mxu0 %v1352_v25  ;;  %1677 = vmatpush2.msra.mxu1 %v1353_v32  ;;  %v797_v56 = vadd.f32 %v795_v12, %v794_v27  ;;  %v1546_v25 = vpop.permute.xlu0 %1545 }
 0x1f4   : > { %1606 = vmatpush2.msra.mxu0 %v1351_v21  ;;  %1678 = vmatprep.subr.mxu1 %v11307_v3 }
 0x1f5   : > { %1607 = vmatprep.subr.mxu0 %v1326_v40  ;;  %1679 = vmatpush2.msra.mxu1 %v1327_v24  ;;  %v8578_v50 = vpop.permute.xlu1 %1761 }
 0x1f6   : > { %1608 = vmatpush2.msra.mxu0 %v1325_v58  ;;  %1680 = vmatprep.subr.mxu1 %v11307_v3  ;;  %11332 = vst [vmem:[#allocation22_spill] sm:$0xff] %v8578_v50 }
 0x1f7   : > { %1609 = vmatprep.subr.mxu0 %v1301_v51  ;;  %1681 = vmatpush2.msra.mxu1 %v1302_v62 }
 0x1f8   : > { %1610 = vmatpush2.msra.mxu0 %v1300_v61  ;;  %1682 = vmatprep.subr.mxu1 %v11307_v3  ;;  %v8612_v61 = vpop.permute.xlu0 %1731 }
 0x1f9   : > { %1611 = vmatprep.subr.mxu0 %v1276_v22  ;;  %1683 = vmatpush2.msra.mxu1 %v1277_v47  ;;  %v8580_v54 = vpop.permute.xlu1 %1783 }
 0x1fa   : > { %1612 = vmatpush2.msra.mxu0 %v1275_v53  ;;  %1684 = vmatprep.subr.mxu1 %v11307_v3 }
 0x1fb   : > { %1613 = vmatprep.subr.mxu0 %v1251_v55  ;;  %1685 = vmatpush2.msra.mxu1 %v1252_v2 }
 0x1fc   : > { %1614 = vmatpush2.msra.mxu0 %v1250_v20  ;;  %1687 = vmatmul.mubr.f32.vlgmr.msra.gmra.mxu1 %v1464_v46  ;;  %v8614_v38 = vpop.permute.xlu0 %1737 }
 0x1fd   : > { %1616 = vmatmul.mubr.f32.vlgmr.msra.gmra.mxu0 %v1464_v46  ;;  %2016 = vrot.lane.b32.xlu0 %v11316_v23, %s11063_s19  ;;  %v8582_v48 = vpop.permute.xlu1 %1787  ;;  %11340 = vst [vmem:[#allocation33_spill] sm:$0xff] %v8614_v38 }
 0x1fe   : > { %v774_v4 = vpop.f32.mrf.mxu1  ;;  %11333 = vst [vmem:[#allocation31_spill] sm:$0xff] %v8582_v48 }
 0x1ff   : > { %v8520_v33 = vadd.f32 %v774_v4, %v11319_v6 }
 0x200   : > { %v7115_v1 = vpop.f32.mrf.mxu1  ;;  %v8618_v22 = vpop.permute.xlu0 %1759 }
 0x201   : > { %11326 = vst [vmem:[#allocation23_spill] sm:$0xff] %v8520_v33  ;;  %v796_v14 = vmul.f32 %v8513_v31, %v8520_v33  ;;  %2020 = vrot.lane.b32.xlu0 %v8178_v8, %s11063_s19 }
 0x203   : > { %v798_v60 = vadd.f32 %v797_v56, %v796_v14 }
 0x204   : > { %v8622_v47 = vpop.permute.xlu0 %1763 }
 0x205   : > { %799 = vadd.xlane.f32.xlu1 %v798_v60  ;;  %2041 = vrot.lane.b32.xlu0 %v11316_v23, %s11045_s22  ;;  %11341 = vst [vmem:[#allocation35_spill] sm:$0xff] %v8622_v47 }
 0x208   : > { %v8628_v6 = vpop.permute.xlu0 %1785 }
 0x209   : > { %2045 = vrot.lane.b32.xlu0 %v8178_v8, %s11045_s22  ;;  %s11330_s22 = smov 52  }
 0x20c   : > { %v8632_v53 = vpop.permute.xlu0 %1789 }
 0x20d   : > { %2066 = vrot.lane.b32.xlu0 %v11316_v23, %s11043_s25  ;;  %11342 = vst [vmem:[#allocation36_spill] sm:$0xff] %v8632_v53  ;;  %v7288_v53 = vld [vmem:[%s7676_s24 + $0x58] sm:$0xff] }
 0x210   : > { %v8638_v46 = vpop.permute.xlu0 %1811 }
 0x211   : > { %2070 = vrot.lane.b32.xlu0 %v8178_v8, %s11043_s25  ;;  %s11329_s25 = smov 53  }
 0x214   : > { %v8642_v63 = vpop.permute.xlu0 %1815 }
 0x215   : > { %2092 = vrot.lane.b32.xlu0 %v11316_v23, %s11065_s16  ;;  %11344 = vst [vmem:[#allocation37_spill] sm:$0xff] %v8642_v63 }
 0x216   : > { %1809 = vrot.lane.b32.xlu1 %v11327_v5, %s11047_s15 }
 0x218   : > { %v8648_v15 = vpop.permute.xlu0 %1837 }
 0x219   : > { %2096 = vrot.lane.b32.xlu0 %v8178_v8, %s11065_s16 }
 0x21a   : > { %1813 = vrot.lane.b32.xlu1 %v11328_v59, %s11047_s15  ;;  %s11051_s15 = smov 49  }
 0x21c   : > { %v8652_v55 = vpop.permute.xlu0 %1841 }
 0x21d   : > { %2118 = vrot.lane.b32.xlu0 %v11316_v23, %s11049_s17  ;;  %11346 = vst [vmem:[#allocation38_spill] sm:$0xff] %v8652_v55 }
 0x21e   : > { %1835 = vrot.lane.b32.xlu1 %v11327_v5, %s11067_s26 }
 0x220   : > { %v8658_v2 = vpop.permute.xlu0 %1863 }
 0x221   : > { %2122 = vrot.lane.b32.xlu0 %v8178_v8, %s11049_s17  ;;  %s11055_s17 = smov 31  }
 0x224   : > { %v8662_v20 = vpop.permute.xlu0 %1867 }
 0x225   : > { %2143 = vrot.lane.b32.xlu0 %v11316_v23, %s11329_s25  ;;  %11347 = vst [vmem:[#allocation39_spill] sm:$0xff] %v8662_v20 }
 0x229   : > { %2147 = vrot.lane.b32.xlu0 %v8178_v8, %s11329_s25 }
 0x22d   : > { %2168 = vrot.lane.b32.xlu0 %v11316_v23, %s11330_s22 }
 0x231   : > { %2172 = vrot.lane.b32.xlu0 %v8178_v8, %s11330_s22 }
 0x235   : > { %2193 = vrot.lane.b32.xlu0 %v11316_v23, %s11057_s23  ;;  %v8668_v12 = vpop.permute.xlu0 %1889 }
 0x239   : > { %2197 = vrot.lane.b32.xlu0 %v8178_v8, %s11057_s23  ;;  %s11343_s23 = smov 78   ;;  %v8672_v4 = vpop.permute.xlu0 %1893 }
 0x23a   : > { %11349 = vst [vmem:[#allocation40_spill] sm:$0xff] %v8672_v4 }
 0x23d   : > { %2218 = vrot.lane.b32.xlu0 %v11316_v23, %s11053_s18  ;;  %v8678_v27 = vpop.permute.xlu0 %1915 }
 0x241   : > { %2222 = vrot.lane.b32.xlu0 %v8178_v8, %s11053_s18  ;;  %s11339_s18 = smov 29   ;;  %v8682_v1 = vpop.permute.xlu0 %1919 }
 0x242   : > { %11351 = vst [vmem:[#allocation41_spill] sm:$0xff] %v8682_v1 }
 0x245   : > { %2243 = vrot.lane.b32.xlu0 %v11316_v23, %s11051_s15  ;;  %v8688_v56 = vpop.permute.xlu0 %1941 }
 0x249   : > { %2247 = vrot.lane.b32.xlu0 %v8178_v8, %s11051_s15  ;;  %s11348_s15 = smov 74   ;;  %v8692_v14 = vpop.permute.xlu0 %1945 }
 0x24a   : > { %11353 = vst [vmem:[#allocation42_spill] sm:$0xff] %v8692_v14 }
 0x24d   : > { %2269 = vrot.lane.b32.xlu0 %v11316_v23, %s11055_s17  ;;  %v8698_v60 = vpop.permute.xlu0 %1966 }
 0x251   : > { %2273 = vrot.lane.b32.xlu0 %v8178_v8, %s11055_s17  ;;  %s11345_s17 = smov 77  }
 0x28e   : > { %v800_v44 = vpop.xlane.xlu1 %799 }
 0x28f   : > { %v801_v49 = vmul.f32 0.00390625, %v800_v44 }
 0x291   : > { %v803_v42 = vmul.f32 %v802_v52, %v801_v49  ;;  %v8702_v52 = vpop.permute.xlu0 %1970 }
 0x292   : > { %11354 = vst [vmem:[#allocation43_spill] sm:$0xff] %v8702_v52  ;;  %v8706_v44 = vpop.permute.xlu1 %1809 }
 0x293   : > { %v805_v39 = vsel %vm11093_vm5, %v803_v42, 0.0 }
 0x294   : > { %v806_v43 = vrot.slane %v805_v39, 4 }
 0x295   : > { %v8710_v49 = vpop.permute.xlu0 %1991 }
 0x296   : > { %v807_v45 = vadd.f32 %v806_v43, %v805_v39  ;;  %v8712_v42 = vpop.permute.xlu1 %1813 }
 0x297   : > { %11356 = vst [vmem:[#allocation44_spill] sm:$0xff] %v8712_v42 }
 0x298   : > { %v808_v36 = vrot.slane %v807_v45, 2 }
 0x299   : > { %v8716_v39 = vpop.permute.xlu0 %1995 }
 0x29a   : > { %v809_v41 = vadd.f32 %v808_v36, %v807_v45  ;;  %11357 = vst [vmem:[#allocation45_spill] sm:$0xff] %v8716_v39  ;;  %v8718_v43 = vpop.permute.xlu1 %1835  ;;  %v6438_v45 = vld [vmem:[%s11334_s6 + $0x8] sm:$0xff]  ;;  %s11132_s6 = smov 111  }
 0x29c   : > { %v810_v13 = vrot.slane %v809_v41, 1 }
 0x29e   : > { %v811_v17 = vadd.f32 %v810_v13, %v809_v41  ;;  %v8727_v13 = vpop.permute.xlu0 %2016 }
 0x2a0   : > { %v812_v37 = vmax.f32 %v811_v17, 0.0 }
 0x2a2   : > { %v814_v30 = vmul.f32 %v813_v18, %v812_v37 }
 0x2a4   : > { %v815_v11 = vsel %vm11093_vm5, %v814_v30, 0.0 }
 0x2a5   : > { %816 = vadd.xlane.f32.xlu0 %v815_v11  ;;  %v8734_v11 = vpop.permute.xlu0 %2020 }
 0x2a6   : > { %11361 = vst [vmem:[#allocation47_spill] sm:$0xff] %v8734_v11 }
 0x2bb   : > { %2295 = vrot.lane.b32.xlu0 %v11316_v23, %s11071_s20 }
 0x2bc   : > { %v1688_v29 = vpop.f32.mrf.mxu1 }
 0x2bd   : > { %v1617_v32 = vpop.f32.mrf.mxu0  ;;  %v8598_v24 = vadd.f32 %v1688_v29, %v1546_v25 }
 0x2be   : > { %v8594_v34 = vadd.f32 %v1617_v32, %v1546_v25  ;;  %v1690_v21 = vpop.f32.mrf.mxu1 }
 0x2bf   : > { %v1619_v40 = vpop.f32.mrf.mxu0  ;;  %2299 = vrot.lane.b32.xlu0 %v8178_v8, %s11071_s20  ;;  %11337 = vst [vmem:[#allocation34_spill] sm:$0xff] %v8598_v24  ;;  %v1694_v51 = vmul.f32 %v8598_v24, %v8513_v31  ;;  %s11360_s20 = smov 49  }
 0x2c0   : > { %11336 = vst [vmem:[#allocation25_spill] sm:$0xff] %v8594_v34  ;;  %v8600_v35 = vadd.f32 %v1619_v40, %v1546_v25  ;;  %v1692_v58 = vmul.f32 %v8594_v34, %v8506_v0 }
 0x2c2   : > { %11338 = vst [vmem:[#allocation32_spill] sm:$0xff] %v8600_v35  ;;  %v1693_v19 = vmul.f32 %v8600_v35, %v8488_v9 }
 0x2c3   : > { %2320 = vrot.lane.b32.xlu0 %v11316_v23, %s11339_s18 }
 0x2c4   : > { %v1695_v62 = vadd.f32 %v1693_v19, %v1692_v58  ;;  %v8744_v58 = vpop.permute.xlu0 %2041 }
 0x2c6   : > { %v1696_v26 = vadd.f32 %v1695_v62, %v1694_v51 }
 0x2c7   : > { %2324 = vrot.lane.b32.xlu0 %v8178_v8, %s11339_s18 }
 0x2c8   : > { %1697 = vadd.xlane.f32.xlu1 %v1696_v26  ;;  %v6439_v26 = vld [vmem:[%s11335_s7 + $0x8] sm:$0xff]  ;;  %s11392_s7 = smov 110  }
 0x2d9   : > { %1839 = vrot.lane.b32.xlu1 %v11328_v59, %s11067_s26  ;;  %s11371_s26 = smov 27  }
 0x2dd   : > { %1861 = vrot.lane.b32.xlu1 %v11327_v5, %s11069_s27 }
 0x2e1   : > { %1865 = vrot.lane.b32.xlu1 %v11328_v59, %s11069_s27  ;;  %s11363_s27 = smov 31  }
 0x2e5   : > { %1887 = vrot.lane.b32.xlu1 %v11327_v5, %s11059_s11 }
 0x2e9   : > { %1891 = vrot.lane.b32.xlu1 %v11328_v59, %s11059_s11  ;;  %s11350_s11 = smov 73  }
 0x2ed   : > { %1913 = vrot.lane.b32.xlu1 %v11327_v5, %s11061_s28 }
 0x2f1   : > { %1917 = vrot.lane.b32.xlu1 %v11328_v59, %s11061_s28  ;;  %s11352_s28 = smov 54  }
 0x2f5   : > { %1939 = vrot.lane.b32.xlu1 %v11327_v5, %s11343_s23 }
 0x2f9   : > { %1943 = vrot.lane.b32.xlu1 %v11328_v59, %s11343_s23  ;;  %s11397_s23 = smov 3  }
 0x2fd   : > { %1964 = vrot.lane.b32.xlu1 %v11327_v5, %s11345_s17 }
 0x301   : > { %1968 = vrot.lane.b32.xlu1 %v11328_v59, %s11345_s17  ;;  %s11402_s17 = smov 82  }
 0x305   : > { %1989 = vrot.lane.b32.xlu1 %v11327_v5, %s11317_s14 }
 0x309   : > { %1993 = vrot.lane.b32.xlu1 %v11328_v59, %s11317_s14 }
 0x30d   : > { %2014 = vrot.lane.b32.xlu1 %v11327_v5, %s11063_s19 }
 0x311   : > { %2018 = vrot.lane.b32.xlu1 %v11328_v59, %s11063_s19  ;;  %s11355_s19 = smov 51  }
 0x315   : > { %2039 = vrot.lane.b32.xlu1 %v11327_v5, %s11348_s15 }
 0x319   : > { %2043 = vrot.lane.b32.xlu1 %v11328_v59, %s11348_s15 }
 0x31d   : > { %2064 = vrot.lane.b32.xlu1 %v11327_v5, %s11350_s11 }
 0x321   : > { %2068 = vrot.lane.b32.xlu1 %v11328_v59, %s11350_s11 }
 0x325   : > { %2090 = vrot.lane.b32.xlu1 %v11327_v5, %s11065_s16 }
 0x329   : > { %2094 = vrot.lane.b32.xlu1 %v11328_v59, %s11065_s16  ;;  %s11358_s16 = smov 50  }
 0x32d   : > { %2116 = vrot.lane.b32.xlu1 %v11327_v5, %s11352_s28 }
 0x331   : > { %2120 = vrot.lane.b32.xlu1 %v11328_v59, %s11352_s28 }
 0x335   : > { %2141 = vrot.lane.b32.xlu1 %v11327_v5, %s11329_s25 }
 0x339   : > { %2145 = vrot.lane.b32.xlu1 %v11328_v59, %s11329_s25 }
 0x33d   : > { %2166 = vrot.lane.b32.xlu1 %v11327_v5, %s11330_s22 }
 0x341   : > { %2170 = vrot.lane.b32.xlu1 %v11328_v59, %s11330_s22 }
 0x345   : > { %2191 = vrot.lane.b32.xlu1 %v11327_v5, %s11355_s19 }
 0x349   : > { %2195 = vrot.lane.b32.xlu1 %v11328_v59, %s11355_s19 }
 0x34d   : > { %2216 = vrot.lane.b32.xlu1 %v11327_v5, %s11358_s16 }
 0x351   : > { %v1698_v36 = vpop.xlane.xlu1 %1697  ;;  %2220 = vrot.lane.b32.xlu1 %v11328_v59, %s11358_s16 }
 0x352   : > { %v1699_v41 = vmul.f32 0.00390625, %v1698_v36  ;;  %v8753_v36 = vpop.permute.xlu0 %2045 }
 0x353   : > { %11364 = vst [vmem:[#allocation49_spill] sm:$0xff] %v8753_v36 }
 0x354   : > { %v1702_v17 = vmul.f32 %v6438_v45, %v1699_v41 }
 0x355   : > { %v8729_v18 = vpop.permute.xlu1 %1839  ;;  %2241 = vrot.lane.b32.xlu1 %v11327_v5, %s11360_s20 }
 0x356   : > { %11359 = vst [vmem:[#allocation46_spill] sm:$0xff] %v8729_v18  ;;  %v1703_v37 = vsel %vm11093_vm5, %v1702_v17, 0.0 }
 0x357   : > { %v1704_v30 = vrot.slane %v1703_v37, 4 }
 0x359   : > { %v1705_v29 = vadd.f32 %v1704_v30, %v1703_v37  ;;  %v8736_v25 = vpop.permute.xlu1 %1861  ;;  %2245 = vrot.lane.b32.xlu1 %v11328_v59, %s11360_s20 }
 0x35b   : > { %v1706_v32 = vrot.slane %v1705_v29, 2 }
 0x35d   : > { %v8740_v21 = vpop.permute.xlu1 %1865  ;;  %2267 = vrot.lane.b32.xlu1 %v11327_v5, %s11363_s27  ;;  %v1707_v40 = vadd.f32 %v1706_v32, %v1705_v29  ;;  %v8764_v29 = vpop.permute.xlu0 %2066 }
 0x35e   : > { %11362 = vst [vmem:[#allocation48_spill] sm:$0xff] %v8740_v21 }
 0x35f   : > { %v1708_v19 = vrot.slane %v1707_v40, 1 }
 0x361   : > { %v8746_v51 = vpop.permute.xlu1 %1887  ;;  %v1709_v62 = vadd.f32 %v1708_v19, %v1707_v40  ;;  %2271 = vrot.lane.b32.xlu1 %v11328_v59, %s11363_s27  ;;  %v8770_v40 = vpop.permute.xlu0 %2070 }
 0x363   : > { %v1710_v45 = vmax.f32 %v1709_v62, 0.0 }
 0x365   : > { %v8755_v41 = vpop.permute.xlu1 %1891  ;;  %v1713_v17 = vmul.f32 %v6439_v26, %v1710_v45  ;;  %2293 = vrot.lane.b32.xlu1 %v11327_v5, %s11366_s1  ;;  %v8780_v26 = vpop.permute.xlu0 %2092 }
 0x366   : > { %11365 = vst [vmem:[#allocation50_spill] sm:$0xff] %v8755_v41 }
 0x367   : > { %v1714_v37 = vsel %vm11093_vm5, %v1713_v17, 0.0  ;;  %vm2072_vm5 = vcmask 596992  }
 0x368   : > { %1715 = vadd.xlane.f32.xlu0 %v1714_v37 }
 0x369   : > { %v8760_v30 = vpop.permute.xlu1 %1913  ;;  %2297 = vrot.lane.b32.xlu1 %v11328_v59, %s11366_s1  ;;  %v8786_v17 = vpop.permute.xlu0 %2096 }
 0x36d   : > { %v8766_v32 = vpop.permute.xlu1 %1917  ;;  %2318 = vrot.lane.b32.xlu1 %v11327_v5, %s11339_s18  ;;  %v2119_v16 = vpop.permute.xlu0 %2118 }
 0x36e   : > { %11367 = vst [vmem:[#allocation51_spill] sm:$0xff] %v8766_v32 }
 0x371   : > { %v8772_v19 = vpop.permute.xlu1 %1939  ;;  %2322 = vrot.lane.b32.xlu1 %v11328_v59, %s11339_s18  ;;  %v8806_v24 = vpop.permute.xlu0 %2122 }
 0x375   : > { %v8776_v62 = vpop.permute.xlu1 %1943  ;;  %2343 = vrot.lane.b32.xlu1 %v11327_v5, %s11369_s0 }
 0x376   : > { %11368 = vst [vmem:[#allocation52_spill] sm:$0xff] %v8776_v62 }
 0x379   : > { %v8782_v45 = vpop.permute.xlu1 %1964  ;;  %2347 = vrot.lane.b32.xlu1 %v11328_v59, %s11369_s0 }
 0x37d   : > { %v8788_v37 = vpop.permute.xlu1 %1968  ;;  %2368 = vrot.lane.b32.xlu1 %v11327_v5, %s11371_s26 }
 0x37e   : > { %11370 = vst [vmem:[#allocation53_spill] sm:$0xff] %v8788_v37  ;;  %2345 = vrot.lane.b32.xlu0 %v11316_v23, %s11369_s0 }
 0x381   : > { %v8794_v33 = vpop.permute.xlu1 %1989  ;;  %2372 = vrot.lane.b32.xlu1 %v11328_v59, %s11371_s26 }
 0x382   : > { %2349 = vrot.lane.b32.xlu0 %v8178_v8, %s11369_s0 }
 0x385   : > { %v8800_v28 = vpop.permute.xlu1 %1993  ;;  %2393 = vrot.lane.b32.xlu1 %v11327_v5, %s11373_s2  ;;  %v8820_v5 = vpop.permute.xlu0 %2143 }
 0x386   : > { %11372 = vst [vmem:[#allocation54_spill] sm:$0xff] %v8800_v28  ;;  %2370 = vrot.lane.b32.xlu0 %v11316_v23, %s11371_s26 }
 0x389   : > { %v8808_v35 = vpop.permute.xlu1 %2014  ;;  %2397 = vrot.lane.b32.xlu1 %v11328_v59, %s11373_s2  ;;  %v8826_v9 = vpop.permute.xlu0 %2147 }
 0x38a   : > { %2374 = vrot.lane.b32.xlu0 %v8178_v8, %s11371_s26  ;;  %11375 = vst [vmem:[#allocation56_spill] sm:$0xff] %v8826_v9 }
 0x38d   : > { %v8814_v34 = vpop.permute.xlu1 %2018  ;;  %2930 = vrot.lane.b32.xlu1 %v11328_v59, %s11087_s8  ;;  %v8841_v9 = vpop.permute.xlu0 %2168 }
 0x38e   : > { %11374 = vst [vmem:[#allocation55_spill] sm:$0xff] %v8814_v34  ;;  %2395 = vrot.lane.b32.xlu0 %v11316_v23, %s11373_s2 }
 0x391   : > { %v2040_v31 = vpop.permute.xlu1 %2039  ;;  %2928 = vrot.lane.b32.xlu1 %v11316_v23, %s11087_s8  ;;  %v8839_v23 = vld [vmem:[%s7676_s24 + $0x58] sm:$0xff]  ;;  %v8852_v63 = vpop.permute.xlu0 %2172 }
 0x392   : > { %2399 = vrot.lane.b32.xlu0 %v8178_v8, %s11373_s2  ;;  %11376 = vst [vmem:[#allocation57_spill] sm:$0xff] %v8852_v63  ;;  %v8869_v63 = vld [vmem:[%s7676_s24 + $0x50] sm:$0xff] }
 0x395   : > { %v8828_v0 = vpop.permute.xlu1 %2043  ;;  %2906 = vrot.lane.b32.xlu1 %v8178_v8, %s11094_s10  ;;  %v8862_v4 = vpop.permute.xlu0 %2193 }
 0x396   : > { %2932 = vrot.lane.b32.xlu0 %v8178_v8, %s11087_s8  ;;  %v8850_v8 = vld [vmem:[%s7676_s24 + $0x60] sm:$0xff]  ;;  %s11377_s8 = smov 4  }
 0x399   : > { %v2065_v38 = vpop.permute.xlu1 %2064  ;;  %2878 = vrot.lane.b32.xlu1 %v11328_v59, %s11090_s12  ;;  %v8871_v14 = vpop.permute.xlu0 %2197 }
 0x39a   : > { %2904 = vrot.lane.b32.xlu0 %v11328_v59, %s11094_s10  ;;  %v7289_v59 = vld [vmem:[%s7676_s24 + $0x68] sm:$0xff]  ;;  %11378 = vst [vmem:[#allocation58_spill] sm:$0xff] %v8871_v14 }
 0x39d   : > { %v8843_v47 = vpop.permute.xlu1 %2068  ;;  %2876 = vrot.lane.b32.xlu1 %v8839_v23, %s11090_s12 }
 0x39e   : > { %2902 = vrot.lane.b32.xlu0 %v7288_v53, %s11094_s10  ;;  %s11096_s10 = smov 86  }
 0x3a1   : > { %v2091_v55 = vpop.permute.xlu1 %2090  ;;  %2524 = vrot.lane.b32.xlu1 %v8850_v8, %s11377_s8 }
 0x3a2   : > { %2880 = vrot.lane.b32.xlu0 %v7289_v59, %s11090_s12  ;;  %s11379_s12 = smov 5   ;;  %v2099_v11 = vsel %vm2098_vm0, %v2091_v55, %v8780_v26  ;;  %v2073_v55 = vsel %vm2072_vm5, %v2065_v38, %v8764_v29  ;;  %v2023_v38 = vsel %vm11101_vm9, %v8727_v13, %v8814_v34 }
 0x3a5   : > { %v8858_v20 = vpop.permute.xlu1 %2094  ;;  %2854 = vrot.lane.b32.xlu1 %v7289_v59, %s11099_s30  ;;  %v8882_v59 = vld [vmem:[%s7676_s24 + $0x68] sm:$0xff] }
 0x3a6   : > { %2522 = vrot.lane.b32.xlu0 %v7288_v53, %s11377_s8  ;;  %v2100_v14 = vsel %vm2098_vm0, %v8780_v26, %v8858_v20  ;;  %v1997_v26 = vsel %vm11098_vm8, %v8794_v33, %v8710_v49  ;;  %v1948_v33 = vsel %vm11102_vm6, %v8688_v56, %v8776_v62 }
 0x3a9   : > { %v2117_v1 = vpop.permute.xlu1 %2116  ;;  %2850 = vrot.lane.b32.xlu1 %v8839_v23, %s11099_s30 }
 0x3aa   : > { %2852 = vrot.lane.b32.xlu0 %v8850_v8, %s11099_s30  ;;  %v2124_v39 = vsel %vm970_vm15, %v2117_v1, %v2119_v16  ;;  %v8899_v1 = vpop.permute.xlu0 %2218  ;;  %s11105_s30 = smov 87  }
 0x3ad   : > { %v8873_v52 = vpop.permute.xlu1 %2120  ;;  %2499 = vrot.lane.b32.xlu1 %v8850_v8, %s11379_s12 }
 0x3ae   : > { %2520 = vrot.lane.b32.xlu0 %v8869_v63, %s11377_s8  ;;  %v2125_v53 = vsel %vm970_vm15, %v2119_v16, %v8873_v52  ;;  %v2074_v16 = vsel %vm2072_vm5, %v8764_v29, %v8843_v47  ;;  %v2022_v29 = vsel %vm11101_vm9, %v8808_v35, %v8727_v13  ;;  %v1973_v35 = vsel %vm11103_vm7, %v8698_v60, %v8788_v37 }
 0x3af   : > { %3134 = vmatprep.subr.mxu0 %v2125_v53  ;;  %v1972_v13 = vsel %vm11103_vm7, %v8782_v45, %v8698_v60  ;;  %vm11109_vm9 = vcmask 793600   ;;  %vm11108_vm7 = vcmask 809984  }
 0x3b0   : > { %3135 = vmatpush1.msra.mxu0 %v2124_v39  ;;  %v2047_v39 = vsel %vm11161_vm10, %v2040_v31, %v8744_v58  ;;  %v1998_v31 = vsel %vm11098_vm8, %v8710_v49, %v8800_v28  ;;  %vm11104_vm8 = vcmask 646144   ;;  %v1947_v49 = vsel %vm11102_vm6, %v8772_v19, %v8688_v56 }
 0x3b1   : > { %3136 = vmatprep.subr.mxu0 %v2100_v14  ;;  %v8890_v36 = vpop.permute.xlu1 %2141  ;;  %2828 = vrot.lane.b32.xlu1 %v8882_v59, %s11096_s10  ;;  %v2048_v14 = vsel %vm11161_vm10, %v8744_v58, %v8828_v0  ;;  %v8923_v58 = vpop.permute.xlu0 %2222  ;;  %v1923_v60 = vsel %vm11104_vm8, %v8678_v27, %v8766_v32  ;;  %v1922_v56 = vsel %vm11104_vm8, %v8760_v30, %v8678_v27  ;;  %vm11107_vm6 = vcmask 801792  }
 0x3b2   : > { %2497 = vrot.lane.b32.xlu0 %v8839_v23, %s11379_s12  ;;  %3137 = vmatpush1.msra.mxu0 %v2099_v11  ;;  %11380 = vst [vmem:[#allocation59_spill] sm:$0xff] %v8923_v58  ;;  %v1897_v19 = vsel %vm11109_vm9, %v8668_v12, %v8755_v41  ;;  %v1871_v27 = vsel %vm11107_vm6, %v8658_v2, %v8740_v21  ;;  %vm11141_vm8 = vcmask 818176   ;;  %vm11171_vm10 = vcmask 203776  }
 0x3b3   : > { %3138 = vmatprep.subr.mxu0 %v2074_v16  ;;  %v1844_v30 = vsel %vm11108_vm7, %v8718_v43, %v8648_v15 }
 0x3b4   : > { %3139 = vmatpush1.msra.mxu0 %v2073_v55  ;;  %v1896_v55 = vsel %vm11109_vm9, %v8746_v51, %v8668_v12  ;;  %v1870_v12 = vsel %vm11107_vm6, %v8736_v25, %v8658_v2  ;;  %v1845_v51 = vsel %vm11108_vm7, %v8648_v15, %v8729_v18  ;;  %vm11139_vm6 = vcmask 826368  }
 0x3b5   : > { %3140 = vmatprep.subr.mxu0 %v2048_v14  ;;  %v8908_v11 = vpop.permute.xlu1 %2145  ;;  %2824 = vrot.lane.b32.xlu1 %v8839_v23, %s11096_s10  ;;  %v8955_v45 = vpop.permute.xlu0 %2243  ;;  %v1819_v2 = vsel %vm11141_vm8, %v8638_v46, %v8712_v42  ;;  %v1818_v15 = vsel %vm11141_vm8, %v8706_v44, %v8638_v46  ;;  %vm11135_vm7 = vcmask 834560   ;;  %v1793_v43 = vsel %vm11139_vm6, %v8628_v6, %v8582_v48 }
 0x3b6   : > { %2826 = vrot.lane.b32.xlu0 %v8850_v8, %s11096_s10  ;;  %3141 = vmatpush1.msra.mxu0 %v2047_v39  ;;  %s11381_s10 = smov 6   ;;  %vm11129_vm9 = vcmask 842752   ;;  %v1767_v46 = vsel %vm11135_vm7, %v8618_v22, %v8578_v50  ;;  %vm11150_vm8 = vcmask 687104  }
 0x3b7   : > { %3142 = vmatprep.subr.mxu0 %v2023_v38 }
 0x3b8   : > { %3143 = vmatpush1.msra.mxu0 %v2022_v29  ;;  %v1792_v29 = vsel %vm11139_vm6, %v8580_v54, %v8628_v6  ;;  %v1741_v54 = vsel %vm11129_vm9, %v8572_v10, %v8574_v7  ;;  %v1740_v6 = vsel %vm11129_vm9, %v8612_v61, %v8572_v10  ;;  %vm11185_vm9 = vcmask 670720  }
 0x3b9   : > { %3144 = vmatprep.subr.mxu0 %v1998_v31  ;;  %v8928_v53 = vpop.permute.xlu1 %2166  ;;  %2474 = vrot.lane.b32.xlu1 %v8850_v8, %s11381_s10  ;;  %v8984_v39 = vpop.permute.xlu0 %2247  ;;  %v1766_v31 = vsel %vm11135_vm7, %v8576_v57, %v8618_v22  ;;  %vm11143_vm7 = vcmask 678912   ;;  %vm11177_vm6 = vcmask 64512  }
 0x3ba   : > { %2495 = vrot.lane.b32.xlu0 %v8869_v63, %s11379_s12  ;;  %3145 = vmatpush1.msra.mxu0 %v1997_v26  ;;  %11382 = vst [vmem:[#allocation60_spill] sm:$0xff] %v8984_v39 }
 0x3bb   : > { %3146 = vmatprep.subr.mxu0 %v1973_v35 }
 0x3bc   : > { %3147 = vmatpush1.msra.mxu0 %v1972_v13 }
 0x3bd   : > { %3148 = vmatprep.subr.mxu0 %v1948_v33  ;;  %v8946_v16 = vpop.permute.xlu1 %2170  ;;  %2802 = vrot.lane.b32.xlu1 %v8882_v59, %s11105_s30  ;;  %v9013_v44 = vpop.permute.xlu0 %2269 }
 0x3be   : > { %2472 = vrot.lane.b32.xlu0 %v8839_v23, %s11381_s10  ;;  %3149 = vmatpush1.msra.mxu0 %v1947_v49 }
 0x3bf   : > { %3150 = vmatprep.subr.mxu0 %v1923_v60 }
 0x3c0   : > { %3151 = vmatpush1.msra.mxu0 %v1922_v56 }
 0x3c1   : > { %3152 = vmatprep.subr.mxu0 %v1897_v19  ;;  %v8966_v14 = vpop.permute.xlu1 %2191  ;;  %2798 = vrot.lane.b32.xlu1 %v8839_v23, %s11105_s30  ;;  %v9030_v57 = vpop.permute.xlu0 %2273 }
 0x3c2   : > { %2800 = vrot.lane.b32.xlu0 %v8850_v8, %s11105_s30  ;;  %3153 = vmatpush1.msra.mxu0 %v1896_v55  ;;  %s11110_s30 = smov 7   ;;  %11384 = vst [vmem:[#allocation61_spill] sm:$0xff] %v9030_v57 }
 0x3c3   : > { %3154 = vmatprep.subr.mxu0 %v1871_v27 }
 0x3c4   : > { %3155 = vmatpush1.msra.mxu0 %v1870_v12 }
 0x3c5   : > { %3156 = vmatprep.subr.mxu0 %v1845_v51  ;;  %v8986_v38 = vpop.permute.xlu1 %2195  ;;  %2448 = vrot.lane.b32.xlu1 %v8850_v8, %s11110_s30  ;;  %s11116_s30 = smov 105   ;;  %v9044_v61 = vpop.xlane.xlu0 %816 }
 0x3c6   : > { %2470 = vrot.lane.b32.xlu0 %v8869_v63, %s11381_s10  ;;  %3157 = vmatpush1.msra.mxu0 %v1844_v30  ;;  %11386 = vst [vmem:[#allocation62_spill] sm:$0xff] %v9044_v61 }
 0x3c7   : > { %3158 = vmatprep.subr.mxu0 %v1819_v2 }
 0x3c8   : > { %3159 = vmatpush1.msra.mxu0 %v1818_v15 }
 0x3c9   : > { %3160 = vmatprep.subr.mxu0 %v1793_v43  ;;  %v9001_v25 = vpop.permute.xlu1 %2216  ;;  %2776 = vrot.lane.b32.xlu1 %v8882_v59, %s11116_s30  ;;  %v9052_v13 = vpop.permute.xlu0 %2295 }
 0x3ca   : > { %2446 = vrot.lane.b32.xlu0 %v8839_v23, %s11383_s9  ;;  %3161 = vmatpush1.msra.mxu0 %v1792_v29 }
 0x3cb   : > { %3162 = vmatprep.subr.mxu0 %v1767_v46 }
 0x3cc   : > { %3163 = vmatpush1.msra.mxu0 %v1766_v31 }
 0x3cd   : > { %3164 = vmatprep.subr.mxu0 %v1741_v54  ;;  %v9024_v26 = vpop.permute.xlu1 %2220  ;;  %2772 = vrot.lane.b32.xlu1 %v8839_v23, %s11116_s30  ;;  %v9060_v49 = vpop.permute.xlu0 %2299 }
 0x3ce   : > { %2774 = vrot.lane.b32.xlu0 %v8850_v8, %s11116_s30  ;;  %3165 = vmatpush1.msra.mxu0 %v1740_v6  ;;  %s11387_s30 = smov 107   ;;  %11388 = vst [vmem:[#allocation63_spill] sm:$0xff] %v9060_v49 }
 0x3d1   : > { %v9032_v22 = vpop.permute.xlu1 %2241  ;;  %2422 = vrot.lane.b32.xlu1 %v8850_v8, %s11120_s21  ;;  %v9074_v19 = vpop.permute.xlu0 %2320 }
 0x3d2   : > { %2444 = vrot.lane.b32.xlu0 %v8869_v63, %s11383_s9 }
 0x3d5   : > { %v9038_v10 = vpop.permute.xlu1 %2245  ;;  %2751 = vrot.lane.b32.xlu1 %v8882_v59, %s11385_s13  ;;  %v9082_v27 = vpop.permute.xlu0 %2324 }
 0x3d6   : > { %2420 = vrot.lane.b32.xlu0 %v8839_v23, %s11120_s21  ;;  %11391 = vst [vmem:[#allocation64_spill] sm:$0xff] %v9082_v27 }
 0x3d9   : > { %v9046_v35 = vpop.permute.xlu1 %2267  ;;  %2747 = vrot.lane.b32.xlu1 %v8839_v23, %s11385_s13 }
 0x3da   : > { %2749 = vrot.lane.b32.xlu0 %v8850_v8, %s11385_s13 }
 0x3dd   : > { %v9054_v33 = vpop.permute.xlu1 %2271  ;;  %2726 = vrot.lane.b32.xlu1 %v8882_v59, %s11387_s30 }
 0x3de   : > { %2418 = vrot.lane.b32.xlu0 %v8869_v63, %s11120_s21  ;;  %s11390_s21 = smov 109  }
 0x3e1   : > { %v9062_v60 = vpop.permute.xlu1 %2293  ;;  %2699 = vrot.lane.b32.xlu1 %v8850_v8, %s11389_s29 }
 0x3e2   : > { %2724 = vrot.lane.b32.xlu0 %v8850_v8, %s11387_s30 }
 0x3e5   : > { %v9068_v56 = vpop.permute.xlu1 %2297  ;;  %2697 = vrot.lane.b32.xlu1 %v8839_v23, %s11389_s29 }
 0x3e6   : > { %2722 = vrot.lane.b32.xlu0 %v8839_v23, %s11387_s30 }
 0x3e9   : > { %v9076_v55 = vpop.permute.xlu1 %2318  ;;  %2676 = vrot.lane.b32.xlu1 %v8882_v59, %s11390_s21 }
 0x3ea   : > { %2701 = vrot.lane.b32.xlu0 %v8882_v59, %s11389_s29 }
 0x3ed   : > { %v9084_v12 = vpop.permute.xlu1 %2322  ;;  %2649 = vrot.lane.b32.xlu1 %v8850_v8, %s11392_s7 }
 0x3ee   : > { %2674 = vrot.lane.b32.xlu0 %v8850_v8, %s11390_s21 }
 0x3f1   : > { %v9090_v51 = vpop.xlane.xlu0 %1715  ;;  %v9092_v30 = vpop.permute.xlu1 %2343  ;;  %2647 = vrot.lane.b32.xlu1 %v8839_v23, %s11392_s7 }
 0x3f2   : > { %11393 = vst [vmem:[#allocation65_spill] sm:$0xff] %v9090_v51  ;;  %2672 = vrot.lane.b32.xlu0 %v8839_v23, %s11390_s21 }
 0x3f5   : > { %v9098_v2 = vpop.permute.xlu0 %2345  ;;  %v9100_v15 = vpop.permute.xlu1 %2347  ;;  %2625 = vrot.lane.b32.xlu1 %v8882_v59, %s11132_s6 }
 0x3f6   : > { %2651 = vrot.lane.b32.xlu0 %v8882_v59, %s11392_s7 }
 0x3f9   : > { %v9106_v43 = vpop.permute.xlu0 %2349  ;;  %v9108_v29 = vpop.permute.xlu1 %2368  ;;  %2597 = vrot.lane.b32.xlu1 %v8839_v23, %s11136_s5 }
 0x3fa   : > { %11394 = vst [vmem:[#allocation66_spill] sm:$0xff] %v9106_v43  ;;  %2623 = vrot.lane.b32.xlu0 %v8850_v8, %s11132_s6 }
 0x3fd   : > { %v9114_v46 = vpop.permute.xlu0 %2370  ;;  %v9116_v31 = vpop.permute.xlu1 %2372  ;;  %2595 = vrot.lane.b32.xlu1 %v8869_v63, %s11136_s5 }
 0x3fe   : > { %2621 = vrot.lane.b32.xlu0 %v8839_v23, %s11132_s6  ;;  %s11144_s6 = smov 81  }
 0x401   : > { %v9122_v54 = vpop.permute.xlu0 %2374  ;;  %v9124_v6 = vpop.permute.xlu1 %2393  ;;  %2574 = vrot.lane.b32.xlu1 %v8850_v8, %s11396_s4 }
 0x402   : > { %11395 = vst [vmem:[#allocation67_spill] sm:$0xff] %v9122_v54  ;;  %2599 = vrot.lane.b32.xlu0 %v8850_v8, %s11136_s5  ;;  %s11401_s5 = smov 25  }
 0x405   : > { %v9130_v61 = vpop.permute.xlu0 %2395  ;;  %v9132_v51 = vpop.permute.xlu1 %2397  ;;  %2547 = vrot.lane.b32.xlu1 %v8839_v23, %s11397_s23 }
 0x406   : > { %2572 = vrot.lane.b32.xlu0 %v8839_v23, %s11396_s4 }
 0x409   : > { %v9138_v7 = vpop.permute.xlu0 %2399  ;;  %v2931_v50 = vpop.permute.xlu1 %2930  ;;  %2545 = vrot.lane.b32.xlu1 %v8869_v63, %s11397_s23 }
 0x40a   : > { %11398 = vst [vmem:[#allocation68_spill] sm:$0xff] %v9138_v7  ;;  %2570 = vrot.lane.b32.xlu0 %v8869_v63, %s11396_s4  ;;  %v9156_v63 = vld [vmem:[%s11399_s3 + $0x18] sm:$0xff] }
 0x40b   : > { %6637 = vmatprep.mubr.msk.f32.mxu1 %vm11177_vm6, %v9156_v63 }
 0x40d   : > { %v9144_v48 = vpop.permute.xlu0 %2932  ;;  %v2929_v42 = vpop.permute.xlu1 %2928  ;;  %2958 = vrot.lane.b32.xlu1 %v8882_v59, %s11144_s6 }
 0x40e   : > { %v2937_v58 = vsel %vm11185_vm9, %v2929_v42, %v2931_v50  ;;  %2549 = vrot.lane.b32.xlu0 %v8850_v8, %s11397_s23  ;;  %v2938_v18 = vsel %vm11185_vm9, %v2931_v50, %v9144_v48 }
 0x40f   : > { %3205 = vmatprep.subr.mxu1 %v2938_v18 }
 0x410   : > { %3206 = vmatpush1.msra.mxu1 %v2937_v58  ;;  %v9173_v58 = vld [vmem:[%s11399_s3 + $0x8] sm:$0xff] }
 0x411   : > { %v2905_v39 = vpop.permute.xlu0 %2904  ;;  %v9160_v42 = vpop.permute.xlu1 %2906  ;;  %2526 = vrot.lane.b32.xlu1 %v8882_v59, %s11377_s8  ;;  %3198 = vmatprep.mubr.f32.mxu0 %v9173_v58  ;;  %s11407_s8 = smov 84  }
 0x412   : > { %2956 = vrot.lane.b32.xlu0 %v8850_v8, %s11144_s6  ;;  %v2912_v50 = vsel %vm11143_vm7, %v2905_v39, %v9160_v42 }
 0x413   : > { %3207 = vmatprep.subr.mxu1 %v2912_v50 }
 0x415   : > { %v2903_v18 = vpop.permute.xlu0 %2902  ;;  %v2879_v21 = vpop.permute.xlu1 %2878  ;;  %2476 = vrot.lane.b32.xlu1 %v8882_v59, %s11381_s10 }
 0x416   : > { %v2911_v57 = vsel %vm11143_vm7, %v2903_v18, %v2905_v39  ;;  %2954 = vrot.lane.b32.xlu0 %v8839_v23, %s11144_s6  ;;  %v9189_v23 = vld [vmem:[%s7676_s24 + $0x70] sm:$0xff]  ;;  %vm11156_vm7 = vcmask 695296   ;;  %s11404_s6 = smov 85  }
 0x417   : > { %3208 = vmatpush1.msra.mxu1 %v2911_v57 }
 0x419   : > { %v9179_v8 = vpop.permute.xlu0 %2880  ;;  %v2877_v50 = vpop.permute.xlu1 %2876  ;;  %2450 = vrot.lane.b32.xlu1 %v8882_v59, %s11383_s9 }
 0x41a   : > { %11400 = vst [vmem:[#allocation69_spill] sm:$0xff] %v9179_v8  ;;  %v2885_v41 = vsel %vm11150_vm8, %v2877_v50, %v2879_v21  ;;  %2501 = vrot.lane.b32.xlu0 %v8882_v59, %s11379_s12  ;;  %v2886_v39 = vsel %vm11150_vm8, %v2879_v21, %v9179_v8  ;;  %s11405_s12 = smov 83   ;;  %vm11153_vm8 = vcmask 703488  }
 0x41b   : > { %3209 = vmatprep.subr.mxu1 %v2886_v39 }
 0x41c   : > { %3210 = vmatpush1.msra.mxu1 %v2885_v41 }
 0x41d   : > { %v2523_v57 = vpop.permute.xlu0 %2522  ;;  %v9191_v18 = vpop.permute.xlu1 %2524  ;;  %2424 = vrot.lane.b32.xlu1 %v8882_v59, %s11401_s5 }
 0x41e   : > { %2934 = vrot.lane.b32.xlu0 %v9189_v23, %s11402_s17  ;;  %v2529_v50 = vsel %vm11251_vm1, %v2523_v57, %v9191_v18  ;;  %s11406_s17 = smov 87  }
 0x41f   : > { %3166 = vmatprep.subr.mxu0 %v2529_v50 }
 0x421   : > { %v2853_v49 = vpop.permute.xlu0 %2852  ;;  %v9199_v21 = vpop.permute.xlu1 %2854  ;;  %2856 = vrot.lane.b32.xlu1 %v9189_v23, %s11404_s6  ;;  %s11408_s6 = smov 86  }
 0x422   : > { %11403 = vst [vmem:[#allocation70_spill] sm:$0xff] %v9199_v21  ;;  %2908 = vrot.lane.b32.xlu0 %v9189_v23, %s11405_s12  ;;  %v2860_v41 = vsel %vm11156_vm7, %v2853_v49, %v9199_v21  ;;  %s11414_s12 = smov 111  }
 0x423   : > { %3211 = vmatprep.subr.mxu1 %v2860_v41 }
 0x425   : > { %v2521_v39 = vpop.permute.xlu0 %2520  ;;  %v2851_v32 = vpop.permute.xlu1 %2850  ;;  %2804 = vrot.lane.b32.xlu1 %v9189_v23, %s11406_s17  ;;  %s11410_s17 = smov 105  }
 0x426   : > { %v2528_v50 = vsel %vm11251_vm1, %v2521_v39, %v2523_v57  ;;  %v2859_v27 = vsel %vm11156_vm7, %v2851_v32, %v2853_v49  ;;  %2882 = vrot.lane.b32.xlu0 %v9189_v23, %s11407_s8  ;;  %s11413_s8 = smov 98   ;;  %vm11172_vm7 = vcmask 56320  }
 0x427   : > { %3167 = vmatpush2.msra.mxu0 %v2528_v50  ;;  %3212 = vmatpush1.msra.mxu1 %v2859_v27 }
 0x429   : > { %v2498_v62 = vpop.permute.xlu0 %2497  ;;  %v9213_v43 = vpop.permute.xlu1 %2499  ;;  %2753 = vrot.lane.b32.xlu1 %v9189_v23, %s11385_s13 }
 0x42a   : > { %2830 = vrot.lane.b32.xlu0 %v9189_v23, %s11408_s6  ;;  %v2504_v41 = vsel %vm11186_vm2, %v2498_v62, %v9213_v43  ;;  %s11411_s6 = smov 1  }
 0x42b   : > { %3168 = vmatprep.subr.mxu0 %v2504_v41 }
 0x42d   : > { %v2827_v32 = vpop.permute.xlu0 %2826  ;;  %v9221_v49 = vpop.permute.xlu1 %2828  ;;  %2703 = vrot.lane.b32.xlu1 %v9189_v23, %s11389_s29 }
 0x42e   : > { %11409 = vst [vmem:[#allocation71_spill] sm:$0xff] %v9221_v49  ;;  %2778 = vrot.lane.b32.xlu0 %v9189_v23, %s11410_s17  ;;  %v2834_v27 = vsel %vm11153_vm8, %v2827_v32, %v9221_v49 }
 0x42f   : > { %3213 = vmatprep.subr.mxu1 %v2834_v27 }
 0x431   : > { %v2496_v57 = vpop.permute.xlu0 %2495  ;;  %v2825_v39 = vpop.permute.xlu1 %2824  ;;  %2653 = vrot.lane.b32.xlu1 %v9189_v23, %s11392_s7 }
 0x432   : > { %v2503_v50 = vsel %vm11186_vm2, %v2496_v57, %v2498_v62  ;;  %v2833_v41 = vsel %vm11153_vm8, %v2825_v39, %v2827_v32  ;;  %2728 = vrot.lane.b32.xlu0 %v9189_v23, %s11387_s30  ;;  %v9244_v32 = vld [vmem:[%s7676_s24 + $0x88] sm:$0xff]  ;;  %vm11159_vm8 = vcmask 711680  }
 0x433   : > { %3169 = vmatpush2.msra.mxu0 %v2503_v50  ;;  %3214 = vmatpush1.msra.mxu1 %v2833_v41  ;;  %v9255_v50 = vld [vmem:[%s7676_s24 + $0x78] sm:$0xff]  ;;  %v9258_v41 = vld [vmem:[%s7676_s24 + $0x80] sm:$0xff] }
 0x435   : > { %v2473_v21 = vpop.permute.xlu0 %2472  ;;  %v9235_v37 = vpop.permute.xlu1 %2474  ;;  %2601 = vrot.lane.b32.xlu1 %v8882_v59, %s11411_s6  ;;  %s11415_s6 = smov 99  }
 0x436   : > { %2678 = vrot.lane.b32.xlu0 %v9189_v23, %s11390_s21  ;;  %v2479_v62 = vsel %vm11194_vm11, %v2473_v21, %v9235_v37 }
 0x437   : > { %3170 = vmatprep.subr.mxu0 %v2479_v62 }
 0x439   : > { %v2801_v27 = vpop.permute.xlu0 %2800  ;;  %v9246_v57 = vpop.permute.xlu1 %2802  ;;  %3824 = vrot.lane.b32.xlu1 %v9244_v32, %s11413_s8 }
 0x43a   : > { %11412 = vst [vmem:[#allocation72_spill] sm:$0xff] %v9246_v57  ;;  %2627 = vrot.lane.b32.xlu0 %v9189_v23, %s11414_s12  ;;  %v2808_v39 = vsel %vm11159_vm8, %v2801_v27, %v9246_v57 }
 0x43b   : > { %3215 = vmatprep.subr.mxu1 %v2808_v39 }
 0x43d   : > { %v2471_v49 = vpop.permute.xlu0 %2470  ;;  %v2799_v62 = vpop.permute.xlu1 %2798  ;;  %3820 = vrot.lane.b32.xlu1 %v9255_v50, %s11413_s8 }
 0x43e   : > { %v2478_v54 = vsel %vm11194_vm11, %v2471_v49, %v2473_v21  ;;  %v2807_v8 = vsel %vm11159_vm8, %v2799_v62, %v2801_v27  ;;  %3822 = vrot.lane.b32.xlu0 %v9258_v41, %s11413_s8  ;;  %vm11167_vm8 = vcmask 859136   ;;  %s11416_s8 = smov 100  }
 0x43f   : > { %3171 = vmatpush2.msra.mxu0 %v2478_v54  ;;  %3216 = vmatpush1.msra.mxu1 %v2807_v8 }
 0x441   : > { %v2447_v57 = vpop.permute.xlu0 %2446  ;;  %v9266_v28 = vpop.permute.xlu1 %2448  ;;  %3799 = vrot.lane.b32.xlu1 %v9244_v32, %s11415_s6 }
 0x442   : > { %2576 = vrot.lane.b32.xlu0 %v8882_v59, %s11396_s4  ;;  %v2454_v21 = vsel %vm11172_vm7, %v2447_v57, %v9266_v28 }
 0x443   : > { %3172 = vmatprep.subr.mxu0 %v2454_v21 }
 0x445   : > { %v2775_v49 = vpop.permute.xlu0 %2774  ;;  %v9274_v27 = vpop.permute.xlu1 %2776  ;;  %3795 = vrot.lane.b32.xlu1 %v9255_v50, %s11415_s6 }
 0x446   : > { %3797 = vrot.lane.b32.xlu0 %v9258_v41, %s11415_s6  ;;  %v2782_v54 = vsel %vm11167_vm8, %v2775_v49, %v9274_v27  ;;  %s11418_s6 = smov 101  }
 0x447   : > { %3217 = vmatprep.subr.mxu1 %v2782_v54 }
 0x449   : > { %v2445_v8 = vpop.permute.xlu0 %2444  ;;  %v2773_v39 = vpop.permute.xlu1 %2772  ;;  %3774 = vrot.lane.b32.xlu1 %v9244_v32, %s11416_s8 }
 0x44a   : > { %v2453_v62 = vsel %vm11172_vm7, %v2445_v8, %v2447_v57  ;;  %v2781_v21 = vsel %vm11167_vm8, %v2773_v39, %v2775_v49  ;;  %2551 = vrot.lane.b32.xlu0 %v8882_v59, %s11397_s23  ;;  %s11419_s23 = smov 81   ;;  %vm11421_vm8 = vcmask 228352   ;;  %vm11211_vm7 = vcmask 400384  }
 0x44b   : > { %3173 = vmatpush2.msra.mxu0 %v2453_v62  ;;  %3218 = vmatpush1.msra.mxu1 %v2781_v21 }
 0x44d   : > { %v2421_v7 = vpop.permute.xlu0 %2420  ;;  %v9288_v34 = vpop.permute.xlu1 %2422  ;;  %3770 = vrot.lane.b32.xlu1 %v9255_v50, %s11416_s8 }
 0x44e   : > { %3772 = vrot.lane.b32.xlu0 %v9258_v41, %s11416_s8  ;;  %v2428_v57 = vsel %vm11171_vm10, %v2421_v7, %v9288_v34 }
 0x44f   : > { %3174 = vmatprep.subr.mxu0 %v2428_v57  ;;  %v2401_v57 = vsel %vm11168_vm12, %v9124_v6, %v9130_v61  ;;  %v2352_v6 = vsel %vm11421_vm8, %v9098_v2, %v9100_v15 }
 0x451   : > { %v2750_v49 = vpop.permute.xlu0 %2749  ;;  %v9296_v54 = vpop.permute.xlu1 %2751  ;;  %3749 = vrot.lane.b32.xlu1 %v9244_v32, %s11418_s6 }
 0x452   : > { %11417 = vst [vmem:[#allocation73_spill] sm:$0xff] %v9296_v54  ;;  %2960 = vrot.lane.b32.xlu0 %v9189_v23, %s11419_s23  ;;  %v2756_v59 = vsel %vm11166_vm14, %v2750_v49, %v9296_v54  ;;  %v2402_v23 = vsel %vm11168_vm12, %v9130_v61, %v9132_v51  ;;  %vm11422_vm12 = vmmov %vm11421_vm8  ;;  %vm11426_vm8 = vcmask 875520   ;;  %s11178_s23 = smov 24  }
 0x453   : > { %3219 = vmatprep.subr.mxu1 %v2756_v59 }
 0x455   : > { %v2419_v8 = vpop.permute.xlu0 %2418  ;;  %v2748_v39 = vpop.permute.xlu1 %2747  ;;  %4630 = vrot.lane.b32.xlu1 %v9244_v32, %s11381_s10 }
 0x456   : > { %v2427_v62 = vsel %vm11171_vm10, %v2419_v8, %v2421_v7  ;;  %v2755_v21 = vsel %vm11166_vm14, %v2748_v39, %v2750_v49  ;;  %3747 = vrot.lane.b32.xlu0 %v9258_v41, %s11418_s6  ;;  %v2377_v7 = vsel %vm11169_vm3, %v9114_v46, %v9116_v31  ;;  %v2376_v49 = vsel %vm11169_vm3, %v9108_v29, %v9114_v46 }
 0x457   : > { %3175 = vmatpush2.msra.mxu0 %v2427_v62  ;;  %3220 = vmatpush1.msra.mxu1 %v2755_v21  ;;  %vm11420_vm14 = vcmask 875520   ;;  %v2351_v8 = vsel %vm11422_vm12, %v9092_v30, %v9098_v2  ;;  %vm11423_vm3 = vcmask 236544   ;;  %vm11204_vm12 = vcmask 252928  }
 0x458   : > { %3176 = vmatprep.subr.mxu0 %v2402_v23  ;;  %v2327_v29 = vsel %vm11423_vm3, %v9074_v19, %v9084_v12  ;;  %vm11427_vm10 = vcmask 244736   ;;  %v2277_v23 = vsel %vm11204_vm12, %v9013_v44, %v9054_v33 }
 0x459   : > { %v2725_v59 = vpop.permute.xlu0 %2724  ;;  %3177 = vmatpush2.msra.mxu0 %v2401_v57  ;;  %v9316_v54 = vpop.permute.xlu1 %2726  ;;  %4626 = vrot.lane.b32.xlu1 %v9255_v50, %s11381_s10  ;;  %v2302_v30 = vsel %vm11427_vm10, %v9052_v13, %v9068_v56  ;;  %v2276_v57 = vsel %vm11204_vm12, %v9046_v35, %v9013_v44 }
 0x45a   : > { %4628 = vrot.lane.b32.xlu0 %v9258_v41, %s11381_s10  ;;  %3178 = vmatprep.subr.mxu0 %v2377_v7  ;;  %v2731_v61 = vsel %vm11420_vm14, %v2725_v59, %v9316_v54  ;;  %s11424_s10 = smov 102   ;;  %vm11425_vm14 = vmmov %vm11423_vm3  ;;  %v2250_v7 = vsel %vm11211_vm7, %v9032_v22, %v8955_v45 }
 0x45b   : > { %3179 = vmatpush2.msra.mxu0 %v2376_v49  ;;  %3221 = vmatprep.subr.mxu1 %v2731_v61  ;;  %v2326_v46 = vsel %vm11425_vm14, %v9076_v55, %v9074_v19  ;;  %vm11428_vm3 = vmmov %vm11427_vm10  ;;  %vm11429_vm10 = vcmask 883712  }
 0x45c   : > { %3180 = vmatprep.subr.mxu0 %v2352_v6  ;;  %v2301_v2 = vsel %vm11428_vm3, %v9062_v60, %v9052_v13  ;;  %vm11430_vm14 = vmmov %vm11429_vm10  ;;  %v2251_v60 = vsel %vm11211_vm7, %v8955_v45, %v9038_v10 }
 0x45d   : > { %v2723_v39 = vpop.permute.xlu0 %2722  ;;  %3181 = vmatpush2.msra.mxu0 %v2351_v8  ;;  %v2700_v62 = vpop.permute.xlu1 %2699  ;;  %3724 = vrot.lane.b32.xlu1 %v9244_v32, %s11424_s10 }
 0x45e   : > { %v2730_v21 = vsel %vm11426_vm8, %v2723_v39, %v2725_v59  ;;  %3745 = vrot.lane.b32.xlu0 %v9255_v50, %s11418_s6  ;;  %3182 = vmatprep.subr.mxu0 %v2327_v29  ;;  %vm11431_vm8 = vcmask 408576   ;;  %s11180_s6 = smov 104  }
 0x45f   : > { %3183 = vmatpush2.msra.mxu0 %v2326_v46  ;;  %3222 = vmatpush1.msra.mxu1 %v2730_v21  ;;  %v2225_v49 = vsel %vm11431_vm8, %v8899_v1, %v9024_v26  ;;  %vm11432_vm3 = vmmov %vm11431_vm8  ;;  %vm11435_vm8 = vcmask 424960  }
 0x460   : > { %3184 = vmatprep.subr.mxu0 %v2302_v30  ;;  %v2224_v61 = vsel %vm11432_vm3, %v9001_v25, %v8899_v1  ;;  %v2175_v25 = vsel %vm11435_vm8, %v8841_v9, %v8946_v16  ;;  %vm11437_vm3 = vmmov %vm11435_vm8  ;;  %vm11243_vm8 = vcmask 908288  }
 0x461   : > { %v9353_v19 = vpop.permute.xlu0 %2701  ;;  %3185 = vmatpush2.msra.mxu0 %v2301_v2  ;;  %v2698_v55 = vpop.permute.xlu1 %2697  ;;  %4605 = vrot.lane.b32.xlu1 %v9244_v32, %s11383_s9  ;;  %v2174_v39 = vsel %vm11437_vm3, %v8928_v53, %v8841_v9  ;;  %v9414_v9 = vld [vmem:[%s11399_s3] sm:$0xff]  ;;  %vm11241_vm3 = vcmask 7168  }
 0x462   : > { %v2705_v59 = vsel %vm11429_vm10, %v2698_v55, %v2700_v62  ;;  %3722 = vrot.lane.b32.xlu0 %v9258_v41, %s11424_s10  ;;  %3186 = vmatprep.subr.mxu0 %v2277_v23  ;;  %v2706_v13 = vsel %vm11430_vm14, %v2700_v62, %v9353_v19  ;;  %vm11433_vm10 = vcmask 416768  }
 0x463   : > { %3187 = vmatpush2.msra.mxu0 %v2276_v57  ;;  %3223 = vmatprep.subr.mxu1 %v2706_v13  ;;  %v2200_v22 = vsel %vm11433_vm10, %v8862_v4, %v8986_v38  ;;  %vm11434_vm14 = vmmov %vm11433_vm10  ;;  %vm11438_vm10 = vcmask 433152  }
 0x464   : > { %3188 = vmatprep.subr.mxu0 %v2251_v60  ;;  %3224 = vmatpush1.msra.mxu1 %v2705_v59  ;;  %v2199_v6 = vsel %vm11434_vm14, %v8966_v14, %v8862_v4  ;;  %v2150_v4 = vsel %vm11438_vm10, %v8820_v5, %v8908_v11  ;;  %vm11439_vm14 = vmmov %vm11438_vm10  ;;  %vm11440_vm10 = vcmask 15360  }
 0x465   : > { %v2675_v44 = vpop.permute.xlu0 %2674  ;;  %3189 = vmatpush2.msra.mxu0 %v2250_v7  ;;  %v9374_v35 = vpop.permute.xlu1 %2676  ;;  %4601 = vrot.lane.b32.xlu1 %v9255_v50, %s11383_s9  ;;  %v2149_v14 = vsel %vm11439_vm14, %v8890_v36, %v8820_v5  ;;  %vm11441_vm14 = vmmov %vm11440_vm10 }
 0x466   : > { %4603 = vrot.lane.b32.xlu0 %v9258_v41, %s11383_s9  ;;  %3190 = vmatprep.subr.mxu0 %v2225_v49  ;;  %v2681_v45 = vsel %vm11255_vm4, %v2675_v44, %v9374_v35  ;;  %s11436_s9 = smov 103  }
 0x467   : > { %3191 = vmatpush2.msra.mxu0 %v2224_v61  ;;  %3225 = vmatprep.subr.mxu1 %v2681_v45 }
 0x468   : > { %3192 = vmatprep.subr.mxu0 %v2200_v22 }
 0x469   : > { %v2673_v8 = vpop.permute.xlu0 %2672  ;;  %3193 = vmatpush2.msra.mxu0 %v2199_v6  ;;  %v2650_v1 = vpop.permute.xlu1 %2649  ;;  %3699 = vrot.lane.b32.xlu1 %v9244_v32, %s11436_s9 }
 0x46a   : > { %v2680_v62 = vsel %vm11255_vm4, %v2673_v8, %v2675_v44  ;;  %3720 = vrot.lane.b32.xlu0 %v9255_v50, %s11424_s10  ;;  %3194 = vmatprep.subr.mxu0 %v2175_v25  ;;  %s11176_s10 = smov 8  }
 0x46b   : > { %3195 = vmatpush2.msra.mxu0 %v2174_v39  ;;  %3226 = vmatpush1.msra.mxu1 %v2680_v62 }
 0x46c   : > { %3196 = vmatprep.subr.mxu0 %v2150_v4 }
 0x46d   : > { %v9416_v53 = vpop.permute.xlu0 %2651  ;;  %3197 = vmatpush2.msra.mxu0 %v2149_v14  ;;  %v2648_v29 = vpop.permute.xlu1 %2647  ;;  %4580 = vrot.lane.b32.xlu1 %v9244_v32, %s11176_s10 }
 0x46e   : > { %v2655_v46 = vsel %vm11254_vm13, %v2648_v29, %v2650_v1  ;;  %3697 = vrot.lane.b32.xlu0 %v9258_v41, %s11436_s9  ;;  %v2656_v36 = vsel %vm11254_vm13, %v2650_v1, %v9416_v53  ;;  %3346 = vmatprep.subr.mxu0 %v11307_v3  ;;  %v9484_v29 = vld [vmem:[%s11399_s3 + $0x10] sm:$0xff]  ;;  %s11203_s3 = smov 72  }
 0x46f   : > { %3227 = vmatprep.subr.mxu1 %v2656_v36  ;;  %3199 = vmatmul.mubr.f32.vlgmr.msra.gmra.mxu0 %v9414_v9 }
 0x470   : > { %3228 = vmatpush1.msra.mxu1 %v2655_v46  ;;  %6638 = vmatprep.mubr.msk.f32.mxu0 %vm11177_vm6, %v9156_v63 }
 0x471   : > { %v2624_v5 = vpop.permute.xlu0 %2623  ;;  %v9429_v21 = vpop.permute.xlu1 %2625  ;;  %4576 = vrot.lane.b32.xlu1 %v9255_v50, %s11176_s10 }
 0x472   : > { %4578 = vrot.lane.b32.xlu0 %v9258_v41, %s11176_s10  ;;  %v2631_v30 = vsel %vm11243_vm8, %v2624_v5, %v9429_v21  ;;  %s11182_s10 = smov 120  }
 0x473   : > { %3229 = vmatprep.subr.mxu1 %v2631_v30 }
 0x475   : > { %v2622_v2 = vpop.permute.xlu0 %2621  ;;  %v2598_v55 = vpop.permute.xlu1 %2597  ;;  %3673 = vrot.lane.b32.xlu1 %v9244_v32, %s11180_s6 }
 0x476   : > { %v2630_v63 = vsel %vm11243_vm8, %v2622_v2, %v2624_v5  ;;  %3695 = vrot.lane.b32.xlu0 %v9255_v50, %s11436_s9  ;;  %s11444_s9 = smov 120   ;;  %v2126_v5 = vsel %vm970_vm15, %v8873_v52, %v8806_v24 }
 0x477   : > { %3230 = vmatpush1.msra.mxu1 %v2630_v63 }
 0x479   : > { %v9442_v23 = vpop.permute.xlu0 %2599  ;;  %v2596_v57 = vpop.permute.xlu1 %2595  ;;  %4554 = vrot.lane.b32.xlu1 %v9244_v32, %s11178_s23 }
 0x47a   : > { %v2604_v59 = vsel %vm11241_vm3, %v2596_v57, %v2598_v55  ;;  %3671 = vrot.lane.b32.xlu0 %v9258_v41, %s11180_s6  ;;  %v2605_v13 = vsel %vm11241_vm3, %v2598_v55, %v9442_v23  ;;  %v2101_v55 = vsel %vm2098_vm0, %v8858_v20, %v8786_v17  ;;  %v2075_v57 = vsel %vm2072_vm5, %v8843_v47, %v8770_v40  ;;  %v11446_v17 = vld [vmem:[#allocation49_spill] sm:$0xff] }
 0x47b   : > { %3231 = vmatprep.subr.mxu1 %v2605_v13  ;;  %v11453_v13 = vld [vmem:[#allocation68_spill] sm:$0xff] }
 0x47c   : > { %3232 = vmatpush1.msra.mxu1 %v2604_v59 }
 0x47d   : > { %v2573_v60 = vpop.permute.xlu0 %2572  ;;  %v9451_v7 = vpop.permute.xlu1 %2574  ;;  %4550 = vrot.lane.b32.xlu1 %v9255_v50, %s11178_s23 }
 0x47e   : > { %4552 = vrot.lane.b32.xlu0 %v9258_v41, %s11178_s23  ;;  %v2579_v44 = vsel %vm11440_vm10, %v2573_v60, %v9451_v7  ;;  %vm11442_vm10 = vcmask 23552   ;;  %s11187_s23 = smov 123  }
 0x47f   : > { %3233 = vmatprep.subr.mxu1 %v2579_v44  ;;  %vm11443_vm6 = vmmov %vm11442_vm10 }
 0x481   : > { %v2571_v49 = vpop.permute.xlu0 %2570  ;;  %v2548_v61 = vpop.permute.xlu1 %2547  ;;  %3647 = vrot.lane.b32.xlu1 %v9244_v32, %s11182_s10 }
 0x482   : > { %v2578_v45 = vsel %vm11441_vm14, %v2571_v49, %v2573_v60  ;;  %3669 = vrot.lane.b32.xlu0 %v9255_v50, %s11180_s6  ;;  %vm2962_vm14 = vcmask 662528   ;;  %s11188_s6 = smov 122   ;;  %v11455_v49 = vld [vmem:[#allocation45_spill] sm:$0xff] }
 0x483   : > { %3234 = vmatpush1.msra.mxu1 %v2578_v45  ;;  %v11458_v45 = vld [vmem:[#allocation69_spill] sm:$0xff] }
 0x485   : > { %v9464_v22 = vpop.permute.xlu0 %2549  ;;  %v2546_v6 = vpop.permute.xlu1 %2545  ;;  %4529 = vrot.lane.b32.xlu1 %v9244_v32, %s11401_s5 }
 0x486   : > { %v2553_v8 = vsel %vm11442_vm10, %v2546_v6, %v2548_v61  ;;  %3645 = vrot.lane.b32.xlu0 %v9258_v41, %s11182_s10  ;;  %v2554_v1 = vsel %vm11443_vm6, %v2548_v61, %v9464_v22  ;;  %s11192_s10 = smov 121   ;;  %vm11445_vm6 = vcmask 56320   ;;  %vm11447_vm10 = vcmask 605184   ;;  %v11456_v61 = vld [vmem:[#allocation54_spill] sm:$0xff] }
 0x487   : > { %3235 = vmatprep.subr.mxu1 %v2554_v1  ;;  %v11462_v1 = vld [vmem:[#allocation43_spill] sm:$0xff] }
 0x488   : > { %3236 = vmatpush1.msra.mxu1 %v2553_v8 }
 0x489   : > { %v2957_v25 = vpop.permute.xlu0 %2956  ;;  %v9473_v39 = vpop.permute.xlu1 %2958  ;;  %4525 = vrot.lane.b32.xlu1 %v9255_v50, %s11401_s5 }
 0x48a   : > { %4527 = vrot.lane.b32.xlu0 %v9258_v41, %s11401_s5  ;;  %v2964_v62 = vsel %vm2962_vm14, %v2957_v25, %v9473_v39 }
 0x48b   : > { %3267 = vmatprep.subr.mxu1 %v2964_v62 }
 0x48d   : > { %v2955_v4 = vpop.permute.xlu0 %2954  ;;  %v2527_v14 = vpop.permute.xlu1 %2526  ;;  %3621 = vrot.lane.b32.xlu1 %v9244_v32, %s11192_s10 }
 0x48e   : > { %v2963_v46 = vsel %vm2962_vm14, %v2955_v4, %v2957_v25  ;;  %3643 = vrot.lane.b32.xlu0 %v9255_v50, %s11444_s9  ;;  %v2530_v36 = vsel %vm11251_vm1, %v9191_v18, %v2527_v14  ;;  %v11463_v25 = vld [vmem:[#allocation53_spill] sm:$0xff]  ;;  %v11465_v4 = vld [vmem:[#allocation70_spill] sm:$0xff] }
 0x48f   : > { %3268 = vmatpush2.msra.mxu1 %v2963_v46  ;;  %v11467_v46 = vld [vmem:[#allocation66_spill] sm:$0xff] }
 0x490   : > { %6990 = vmatprep.subr.mxu1 %v2530_v36  ;;  %3270 = vmatmul.mubr.f32.vlgmr.msra.gmra.mxu1 %v9484_v29 }
 0x491   : > { %v2502_v30 = vpop.permute.xlu0 %2501  ;;  %6991 = vmatpush3.msra.mxu1 %v2126_v5  ;;  %v2477_v2 = vpop.permute.xlu1 %2476  ;;  %4504 = vrot.lane.b32.xlu1 %v9244_v32, %s11373_s2 }
 0x492   : > { %3619 = vrot.lane.b32.xlu0 %v9258_v41, %s11192_s10  ;;  %v2505_v18 = vsel %vm11186_vm2, %v9213_v43, %v2502_v30  ;;  %3340 = vmatprep.mubr.f32.mxu1 %v9173_v58  ;;  %v2480_v24 = vsel %vm11194_vm11, %v9235_v37, %v2477_v2  ;;  %v2049_v37 = vsel %vm11447_vm10, %v8828_v0, %v11446_v17  ;;  %v11450_v0 = vld [vmem:[#allocation47_spill] sm:$0xff]  ;;  %vm11452_vm10 = vcmask 613376   ;;  %v11469_v30 = vld [vmem:[#allocation42_spill] sm:$0xff]  ;;  %v11470_v2 = vld [vmem:[#allocation52_spill] sm:$0xff] }
 0x493   : > { %6992 = vmatprep.subr.mxu1 %v2505_v18  ;;  %v11451_v58 = vld [vmem:[#allocation55_spill] sm:$0xff]  ;;  %vm11454_vm2 = vcmask 211968  }
 0x494   : > { %6993 = vmatpush3.msra.mxu1 %v2101_v55  ;;  %v2024_v59 = vsel %vm11452_vm10, %v11451_v58, %v11450_v0  ;;  %v2403_v60 = vsel %vm11454_vm2, %v9132_v51, %v11453_v13  ;;  %v11460_v51 = vld [vmem:[#allocation67_spill] sm:$0xff]  ;;  %vm11461_vm2 = vcmask 220160   ;;  %vm11464_vm10 = vcmask 629760   ;;  %v11485_v0 = vld [vmem:[#allocation50_spill] sm:$0xff] }
 0x495   : > { %v2935_v52 = vpop.permute.xlu0 %2934  ;;  %6994 = vmatprep.subr.mxu1 %v2480_v24  ;;  %v2451_v63 = vpop.permute.xlu1 %2450  ;;  %4500 = vrot.lane.b32.xlu1 %v9255_v50, %s11373_s2  ;;  %v2378_v8 = vsel %vm11461_vm2, %v9116_v31, %v11460_v51  ;;  %v1974_v62 = vsel %vm11464_vm10, %v11463_v25, %v11462_v1  ;;  %vm11471_vm2 = vcmask 637952   ;;  %v11472_v55 = vld [vmem:[#allocation71_spill] sm:$0xff]  ;;  %vm11473_vm10 = vcmask 703488   ;;  %v11496_v51 = vld [vmem:[#allocation46_spill] sm:$0xff]  ;;  %v11500_v1 = vld [vmem:[#allocation37_spill] sm:$0xff] }
 0x496   : > { %v2939_v43 = vsel %vm11185_vm9, %v9144_v48, %v2935_v52  ;;  %4502 = vrot.lane.b32.xlu0 %v9258_v41, %s11373_s2  ;;  %6995 = vmatpush3.msra.mxu1 %v2075_v57  ;;  %v2455_v20 = vsel %vm11445_vm6, %v9266_v28, %v2451_v63  ;;  %vm11448_vm9 = vcmask 678912   ;;  %vm11449_vm6 = vcmask 203776   ;;  %v11474_v52 = vld [vmem:[#allocation64_spill] sm:$0xff]  ;;  %v11477_v57 = vld [vmem:[#allocation51_spill] sm:$0xff] }
 0x497   : > { %6996 = vmatprep.subr.mxu1 %v2455_v20  ;;  %3347 = vmatpush1.msra.mxu0 %v2939_v43  ;;  %v1949_v18 = vsel %vm11471_vm2, %v11470_v2, %v11469_v30  ;;  %v11479_v20 = vld [vmem:[#allocation63_spill] sm:$0xff]  ;;  %vm11480_vm2 = vcmask 244736   ;;  %v11501_v25 = vld [vmem:[#allocation44_spill] sm:$0xff] }
 0x498   : > { %6997 = vmatpush3.msra.mxu1 %v2049_v37  ;;  %3348 = vmatprep.subr.mxu0 %v11307_v3  ;;  %v2303_v17 = vsel %vm11480_vm2, %v9068_v56, %v11479_v20  ;;  %v11481_v37 = vld [vmem:[#allocation72_spill] sm:$0xff]  ;;  %v11487_v56 = vld [vmem:[#allocation61_spill] sm:$0xff]  ;;  %v11488_v13 = vld [vmem:[#allocation39_spill] sm:$0xff]  ;;  %vm11490_vm2 = vcmask 801792  }
 0x499   : > { %v2909_v47 = vpop.permute.xlu0 %2908  ;;  %v2425_v40 = vpop.permute.xlu1 %2424  ;;  %3595 = vrot.lane.b32.xlu1 %v9244_v32, %s11188_s6 }
 0x49a   : > { %v2913_v48 = vsel %vm11448_vm9, %v9160_v42, %v2909_v47  ;;  %3617 = vrot.lane.b32.xlu0 %v9255_v50, %s11192_s10  ;;  %v2429_v28 = vsel %vm11449_vm6, %v9288_v34, %v2425_v40  ;;  %vm11457_vm9 = vcmask 621568   ;;  %vm11459_vm6 = vcmask 687104   ;;  %s11196_s10 = smov 48  }
 0x49b   : > { %6998 = vmatprep.subr.mxu1 %v2429_v28  ;;  %3349 = vmatpush1.msra.mxu0 %v2913_v48  ;;  %v1999_v34 = vsel %vm11457_vm9, %v11456_v61, %v11455_v49  ;;  %vm11466_vm9 = vcmask 695296   ;;  %v11484_v28 = vld [vmem:[#allocation40_spill] sm:$0xff] }
 0x49c   : > { %6999 = vmatpush3.msra.mxu1 %v2024_v59  ;;  %3350 = vmatprep.subr.mxu0 %v11307_v3  ;;  %v2278_v59 = vsel %vm11204_vm12, %v9054_v33, %v11487_v56  ;;  %v11493_v61 = vld [vmem:[#allocation60_spill] sm:$0xff] }
 0x49d   : > { %v2883_v42 = vpop.permute.xlu0 %2882  ;;  %7000 = vmatprep.subr.mxu1 %v2403_v60  ;;  %v2857_v44 = vpop.permute.xlu1 %2856  ;;  %4479 = vrot.lane.b32.xlu1 %v9244_v32, %s11371_s26  ;;  %v11489_v60 = vld [vmem:[#allocation48_spill] sm:$0xff] }
 0x49e   : > { %v2887_v6 = vsel %vm11459_vm6, %v11458_v45, %v2883_v42  ;;  %3593 = vrot.lane.b32.xlu0 %v9258_v41, %s11188_s6  ;;  %7001 = vmatpush3.msra.mxu1 %v1999_v34  ;;  %v2861_v14 = vsel %vm11466_vm9, %v11465_v4, %v2857_v44  ;;  %vm11468_vm6 = vcmask 228352   ;;  %vm11475_vm9 = vcmask 236544   ;;  %v11491_v42 = vld [vmem:[#allocation73_spill] sm:$0xff] }
 0x49f   : > { %3351 = vmatpush1.msra.mxu0 %v2887_v6  ;;  %7002 = vmatprep.subr.mxu1 %v2378_v8  ;;  %v2353_v36 = vsel %vm11468_vm6, %v9100_v15, %v11467_v46  ;;  %v2328_v63 = vsel %vm11475_vm9, %v9084_v12, %v11474_v52  ;;  %v11476_v15 = vld [vmem:[#allocation41_spill] sm:$0xff]  ;;  %vm11478_vm6 = vcmask 646144   ;;  %vm11483_vm9 = vcmask 859136   ;;  %v11495_v6 = vld [vmem:[#allocation38_spill] sm:$0xff] }
 0x4a0   : > { %7003 = vmatpush3.msra.mxu1 %v1974_v62  ;;  %3352 = vmatprep.subr.mxu0 %v11307_v3  ;;  %v1924_v43 = vsel %vm11478_vm6, %v11477_v57, %v11476_v15  ;;  %vm11486_vm6 = vcmask 793600   ;;  %v2252_v34 = vsel %vm11211_vm7, %v9038_v10, %v11493_v61  ;;  %v11498_v10 = vld [vmem:[#allocation59_spill] sm:$0xff]  ;;  %v11512_v52 = vld [vmem:[#allocation22_spill] sm:$0xff]  ;;  %v11514_v15 = vld [vmem:[#allocation56_spill] sm:$0xff] }
 0x4a1   : > { %v2831_v5 = vpop.permute.xlu0 %2830  ;;  %7004 = vmatprep.subr.mxu1 %v2353_v36  ;;  %3353 = vmatpush1.msra.mxu0 %v2861_v14  ;;  %v2805_v31 = vpop.permute.xlu1 %2804  ;;  %v1898_v58 = vsel %vm11486_vm6, %v11485_v0, %v11484_v28  ;;  %vm11497_vm6 = vcmask 809984   ;;  %v11504_v36 = vld [vmem:[#allocation58_spill] sm:$0xff] }
 0x4a2   : > { %v2835_v24 = vsel %vm11473_vm10, %v11472_v55, %v2831_v5  ;;  %4477 = vrot.lane.b32.xlu0 %v9258_v41, %s11371_s26  ;;  %7005 = vmatpush3.msra.mxu1 %v1949_v18  ;;  %vm11482_vm10 = vcmask 711680   ;;  %v1846_v8 = vsel %vm11497_vm6, %v11496_v51, %v11495_v6  ;;  %vm11505_vm6 = vcmask 416768  }
 0x4a3   : > { %3354 = vmatprep.subr.mxu0 %v11307_v3  ;;  %7006 = vmatprep.subr.mxu1 %v2328_v63  ;;  %v2809_v47 = vsel %vm11482_vm10, %v11481_v37, %v2805_v31  ;;  %vm11492_vm10 = vcmask 867328   ;;  %v2201_v5 = vsel %vm11505_vm6, %v8986_v38, %v11504_v36  ;;  %v11506_v31 = vld [vmem:[#allocation36_spill] sm:$0xff]  ;;  %vm11515_vm6 = vcmask 433152  }
 0x4a4   : > { %3355 = vmatpush1.msra.mxu0 %v2835_v24  ;;  %7007 = vmatpush3.msra.mxu1 %v1924_v43  ;;  %v11511_v24 = vld [vmem:[#allocation35_spill] sm:$0xff]  ;;  %v2151_v57 = vsel %vm11515_vm6, %v8908_v11, %v11514_v15  ;;  %v11516_v43 = vld [vmem:[#allocation33_spill] sm:$0xff] }
 0x4a5   : > { %3356 = vmatprep.subr.mxu0 %v11307_v3  ;;  %v2779_v40 = vpop.permute.xlu0 %2778  ;;  %7008 = vmatprep.subr.mxu1 %v2303_v17  ;;  %v2754_v12 = vpop.permute.xlu1 %2753 }
 0x4a6   : > { %v2783_v48 = vsel %vm11483_vm9, %v9274_v27, %v2779_v40  ;;  %3357 = vmatpush1.msra.mxu0 %v2809_v47  ;;  %3591 = vrot.lane.b32.xlu0 %v9255_v50, %s11188_s6  ;;  %v1872_v27 = vsel %vm11490_vm2, %v11489_v60, %v11488_v13  ;;  %v2757_v44 = vsel %vm11492_vm10, %v11491_v42, %v2754_v12  ;;  %vm11494_vm9 = vcmask 875520   ;;  %s11190_s6 = smov 125  }
 0x4a7   : > { %7009 = vmatpush3.msra.mxu1 %v1898_v58  ;;  %3358 = vmatprep.subr.mxu0 %v11307_v3  ;;  %vm11499_vm2 = vcmask 408576   ;;  %vm11502_vm10 = vcmask 818176  }
 0x4a8   : > { %7010 = vmatprep.subr.mxu1 %v2278_v59  ;;  %3359 = vmatpush1.msra.mxu0 %v2783_v48  ;;  %v1820_v62 = vsel %vm11502_vm10, %v11501_v25, %v11500_v1  ;;  %vm11510_vm10 = vcmask 424960  }
 0x4a9   : > { %7011 = vmatpush3.msra.mxu1 %v1872_v27  ;;  %3360 = vmatprep.subr.mxu0 %v11307_v3  ;;  %v2729_v49 = vpop.permute.xlu0 %2728  ;;  %v2704_v45 = vpop.permute.xlu1 %2703 }
 0x4aa   : > { %v2732_v33 = vsel %vm11494_vm9, %v9316_v54, %v2729_v49  ;;  %7012 = vmatprep.subr.mxu1 %v2252_v34  ;;  %3361 = vmatpush1.msra.mxu0 %v2757_v44  ;;  %v2226_v54 = vsel %vm11499_vm2, %v9024_v26, %v11498_v10  ;;  %vm11503_vm9 = vcmask 883712   ;;  %v11507_v26 = vld [vmem:[#allocation31_spill] sm:$0xff]  ;;  %vm11508_vm2 = vcmask 826368  }
 0x4ab   : > { %3567 = vrot.lane.b32.xlu0 %v9258_v41, %s11187_s23  ;;  %7013 = vmatpush3.msra.mxu1 %v1846_v8  ;;  %v2707_v46 = vsel %vm11503_vm9, %v9353_v19, %v2704_v45  ;;  %v1794_v30 = vsel %vm11508_vm2, %v11507_v26, %v11506_v31  ;;  %v11509_v19 = vld [vmem:[#allocation57_spill] sm:$0xff]  ;;  %vm11513_vm9 = vcmask 834560   ;;  %vm11518_vm2 = vcmask 842752  }
 0x4ac   : > { %3362 = vmatprep.subr.mxu0 %v11307_v3  ;;  %4475 = vrot.lane.b32.xlu1 %v9255_v50, %s11371_s26  ;;  %v2176_v38 = vsel %vm11510_vm10, %v8946_v16, %v11509_v19  ;;  %v11517_v16 = vld [vmem:[#allocation27_spill] sm:$0xff]  ;;  %vm11519_vm10 = vcmask 801792  }
 0x4ad   : > { %7014 = vmatprep.subr.mxu1 %v2226_v54  ;;  %3363 = vmatpush1.msra.mxu0 %v2732_v33  ;;  %v2679_v4 = vpop.permute.xlu0 %2678  ;;  %v2654_v14 = vpop.permute.xlu1 %2653  ;;  %v1742_v20 = vsel %vm11518_vm2, %v11517_v16, %v11516_v43  ;;  %vm11521_vm6 = vmmov %vm11519_vm10  ;;  %vm11522_vm2 = vcmask 809984   ;;  %v9790_v43 = vld [vmem:[%s7676_s24 + $0x78] sm:$0xff] }
 0x4ae   : > { %7015 = vmatpush3.msra.mxu1 %v1820_v62  ;;  %3364 = vmatprep.subr.mxu0 %v11307_v3  ;;  %v2682_v2 = vsel %vm11255_vm4, %v9374_v35, %v2679_v4  ;;  %v1768_v35 = vsel %vm11513_vm9, %v11512_v52, %v11511_v24  ;;  %v2657_v63 = vsel %vm11254_vm13, %v9416_v53, %v2654_v14  ;;  %vm11520_vm9 = vcmask 15360  }
 0x4af   : > { %7016 = vmatprep.subr.mxu1 %v2201_v5  ;;  %3365 = vmatpush1.msra.mxu0 %v2707_v46 }
 0x4b0   : > { %4452 = vrot.lane.b32.xlu0 %v9258_v41, %s11369_s0  ;;  %7017 = vmatpush3.msra.mxu1 %v1794_v30 }
 0x4b1   : > { %3366 = vmatprep.subr.mxu0 %v11307_v3  ;;  %3569 = vrot.lane.b32.xlu1 %v9244_v32, %s11187_s23  ;;  %v2628_v18 = vpop.permute.xlu0 %2627  ;;  %v2602_v55 = vpop.permute.xlu1 %2601 }
 0x4b2   : > { %7018 = vmatprep.subr.mxu1 %v2176_v38  ;;  %3367 = vmatpush1.msra.mxu0 %v2682_v2  ;;  %v2632_v17 = vsel %vm11243_vm8, %v9429_v21, %v2628_v18  ;;  %v2606_v21 = vsel %vm11241_vm3, %v9442_v23, %v2602_v55 }
 0x4b3   : > { %7019 = vmatpush3.msra.mxu1 %v1768_v35  ;;  %3368 = vmatprep.subr.mxu0 %v11307_v3 }
 0x4b4   : > { %7020 = vmatprep.subr.mxu1 %v2151_v57  ;;  %3369 = vmatpush1.msra.mxu0 %v2657_v63 }
 0x4b5   : > { %3565 = vrot.lane.b32.xlu0 %v9255_v50, %s11187_s23  ;;  %7021 = vmatpush3.msra.mxu1 %v1742_v20  ;;  %v3823_v53 = vpop.permute.xlu0 %3822  ;;  %v9651_v37 = vpop.permute.xlu1 %3824  ;;  %s11189_s23 = smov 124  }
 0x4b6   : > { %3370 = vmatprep.subr.mxu0 %v11307_v3  ;;  %4454 = vrot.lane.b32.xlu1 %v9244_v32, %s11369_s0  ;;  %v3829_v11 = vsel %vm11519_vm10, %v3823_v53, %v9651_v37  ;;  %vm11523_vm10 = vcmask 23552  }
 0x4b7   : > { %3371 = vmatpush1.msra.mxu0 %v2632_v17  ;;  %5718 = vmatprep.subr.mxu1 %v3829_v11 }
 0x4b8   : > { %3372 = vmatprep.subr.mxu0 %v11307_v3  ;;  %3341 = vmatmul.mubr.f32.vlgmr.msra.gmra.mxu1 %v9414_v9 }
 0x4b9   : > { %3373 = vmatpush1.msra.mxu0 %v2606_v21  ;;  %3541 = vrot.lane.b32.xlu0 %v9258_v41, %s11189_s23  ;;  %v2577_v47 = vpop.permute.xlu0 %2576  ;;  %v3821_v40 = vpop.permute.xlu1 %3820 }
 0x4ba   : > { %4450 = vrot.lane.b32.xlu1 %v9255_v50, %s11369_s0  ;;  %v2580_v12 = vsel %vm11520_vm9, %v9451_v7, %v2577_v47  ;;  %v3828_v48 = vsel %vm11521_vm6, %v3821_v40, %v3823_v53  ;;  %3374 = vmatprep.subr.mxu0 %v11307_v3  ;;  %vm11524_vm9 = vmmov %vm11522_vm2  ;;  %vm11525_vm6 = vcmask 818176   ;;  %s11226_s0 = smov 57  }
 0x4bb   : > { %3375 = vmatpush1.msra.mxu0 %v2580_v12  ;;  %5719 = vmatpush1.msra.mxu1 %v3828_v48 }
 0x4bc   : > { %3376 = vmatprep.subr.mxu0 %v11307_v3 }
 0x4bd   : > { %4427 = vrot.lane.b32.xlu0 %v9258_v41, %s11339_s18  ;;  %v3798_v9 = vpop.permute.xlu0 %3797  ;;  %v9673_v23 = vpop.permute.xlu1 %3799 }
 0x4be   : > { %3543 = vrot.lane.b32.xlu1 %v9244_v32, %s11189_s23  ;;  %v3804_v7 = vsel %vm11522_vm2, %v3798_v9, %v9673_v23  ;;  %vm11526_vm2 = vmmov %vm11525_vm6 }
 0x4bf   : > { %5720 = vmatprep.subr.mxu1 %v3804_v7 }
 0x4c1   : > { %3539 = vrot.lane.b32.xlu0 %v9255_v50, %s11189_s23  ;;  %v2552_v28 = vpop.permute.xlu0 %2551  ;;  %v3796_v0 = vpop.permute.xlu1 %3795  ;;  %s11191_s23 = smov 126  }
 0x4c2   : > { %4429 = vrot.lane.b32.xlu1 %v9244_v32, %s11339_s18  ;;  %v2555_v58 = vsel %vm11523_vm10, %v9464_v22, %v2552_v28  ;;  %v3803_v56 = vsel %vm11524_vm9, %v3796_v0, %v3798_v9  ;;  %vm11527_vm10 = vcmask 826368  }
 0x4c3   : > { %3377 = vmatpush1.msra.mxu0 %v2555_v58  ;;  %5721 = vmatpush1.msra.mxu1 %v3803_v56  ;;  %vm11528_vm9 = vmmov %vm11527_vm10 }
 0x4c4   : > { %3408 = vmatprep.subr.mxu0 %v11307_v3 }
 0x4c5   : > { %3515 = vrot.lane.b32.xlu0 %v9258_v41, %s11190_s6  ;;  %v3773_v59 = vpop.permute.xlu0 %3772  ;;  %v9689_v13 = vpop.permute.xlu1 %3774 }
 0x4c6   : > { %4425 = vrot.lane.b32.xlu1 %v9255_v50, %s11339_s18  ;;  %v3779_v60 = vsel %vm11525_vm6, %v3773_v59, %v9689_v13  ;;  %vm11529_vm6 = vcmask 834560   ;;  %s11578_s18 = sld [smem:[#allocation78_spill]] }
 0x4c7   : > { %5722 = vmatprep.subr.mxu1 %v3779_v60 }
 0x4c9   : > { %4402 = vrot.lane.b32.xlu0 %v9258_v41, %s11366_s1  ;;  %v2961_v22 = vpop.permute.xlu0 %2960  ;;  %v3771_v27 = vpop.permute.xlu1 %3770 }
 0x4ca   : > { %3517 = vrot.lane.b32.xlu1 %v9244_v32, %s11190_s6  ;;  %v2965_v42 = vsel %vm2962_vm14, %v9473_v39, %v2961_v22  ;;  %v3778_v44 = vsel %vm11526_vm2, %v3771_v27, %v3773_v59  ;;  %vm11530_vm2 = vcmask 56320  }
 0x4cb   : > { %3409 = vmatpush2.msra.mxu0 %v2965_v42  ;;  %5723 = vmatpush1.msra.mxu1 %v3778_v44 }
 0x4cc   : > { %3411 = vmatmul.mubr.f32.vlgmr.msra.gmra.mxu0 %v9484_v29 }
 0x4cd   : > { %3513 = vrot.lane.b32.xlu0 %v9255_v50, %s11190_s6  ;;  %v3748_v49 = vpop.permute.xlu0 %3747  ;;  %v9705_v61 = vpop.permute.xlu1 %3749  ;;  %s11198_s6 = smov 127  }
 0x4ce   : > { %4404 = vrot.lane.b32.xlu1 %v9244_v32, %s11366_s1  ;;  %v3754_v34 = vsel %vm11527_vm10, %v3748_v49, %v9705_v61  ;;  %vm11531_vm10 = vmmov %vm11529_vm6 }
 0x4cf   : > { %5724 = vmatprep.subr.mxu1 %v3754_v34 }
 0x4d1   : > { %3489 = vrot.lane.b32.xlu0 %v9258_v41, %s11191_s23  ;;  %v4629_v39 = vpop.permute.xlu0 %4628  ;;  %v9713_v45 = vpop.permute.xlu1 %4630 }
 0x4d2   : > { %4400 = vrot.lane.b32.xlu1 %v9255_v50, %s11366_s1  ;;  %v4635_v29 = vsel %vm11194_vm11, %v4629_v39, %v9713_v45  ;;  %s11572_s1 = smov 1  }
 0x4d3   : > { %5789 = vmatprep.subr.mxu0 %v4635_v29 }
 0x4d5   : > { %4377 = vrot.lane.b32.xlu0 %v9258_v41, %s11363_s27  ;;  %v3746_v33 = vpop.permute.xlu0 %3745  ;;  %v4627_v6 = vpop.permute.xlu1 %4626 }
 0x4d6   : > { %3491 = vrot.lane.b32.xlu1 %v9244_v32, %s11191_s23  ;;  %v3753_v51 = vsel %vm11528_vm9, %v3746_v33, %v3748_v49  ;;  %v4634_v8 = vsel %vm11194_vm11, %v4627_v6, %v4629_v39  ;;  %vm11532_vm9 = vmmov %vm11530_vm2  ;;  %vm3625_vm11 = vcmask 990208   ;;  %v9851_v6 = vld [vmem:[%s7676_s24 + $0x90] sm:$0xff] }
 0x4d7   : > { %5725 = vmatpush1.msra.mxu1 %v3753_v51  ;;  %5790 = vmatpush1.msra.mxu0 %v4634_v8 }
 0x4d9   : > { %3487 = vrot.lane.b32.xlu0 %v9255_v50, %s11191_s23  ;;  %v3723_v10 = vpop.permute.xlu0 %3722  ;;  %v9727_v54 = vpop.permute.xlu1 %3724  ;;  %s11197_s23 = smov 32  }
 0x4da   : > { %4379 = vrot.lane.b32.xlu1 %v9244_v32, %s11363_s27  ;;  %v3729_v1 = vsel %vm11529_vm6, %v3723_v10, %v9727_v54  ;;  %vm11533_vm6 = vcmask 842752  }
 0x4db   : > { %5726 = vmatprep.subr.mxu1 %v3729_v1 }
 0x4dd   : > { %3463 = vrot.lane.b32.xlu0 %v9258_v41, %s11198_s6  ;;  %v4604_v25 = vpop.permute.xlu0 %4603  ;;  %v9735_v62 = vpop.permute.xlu1 %4605 }
 0x4de   : > { %4375 = vrot.lane.b32.xlu1 %v9255_v50, %s11363_s27  ;;  %v4610_v4 = vsel %vm11530_vm2, %v4604_v25, %v9735_v62  ;;  %vm11534_vm2 = vcmask 64512   ;;  %s11217_s27 = smov 80  }
 0x4df   : > { %5791 = vmatprep.subr.mxu0 %v4610_v4 }
 0x4e1   : > { %4351 = vrot.lane.b32.xlu0 %v9258_v41, %s11197_s23  ;;  %v3721_v14 = vpop.permute.xlu0 %3720  ;;  %v4602_v46 = vpop.permute.xlu1 %4601  ;;  %v9754_v41 = vld [vmem:[%s7676_s24 + $0x80] sm:$0xff] }
 0x4e2   : > { %3465 = vrot.lane.b32.xlu1 %v9244_v32, %s11198_s6  ;;  %v3728_v36 = vsel %vm11531_vm10, %v3721_v14, %v3723_v10  ;;  %v4609_v5 = vsel %vm11532_vm9, %v4602_v46, %v4604_v25  ;;  %vm11535_vm10 = vmmov %vm11533_vm6 }
 0x4e3   : > { %5727 = vmatpush1.msra.mxu1 %v3728_v36  ;;  %5792 = vmatpush1.msra.mxu0 %v4609_v5  ;;  %vm11536_vm9 = vmmov %vm11534_vm2 }
 0x4e5   : > { %3461 = vrot.lane.b32.xlu0 %v9255_v50, %s11198_s6  ;;  %v3698_v31 = vpop.permute.xlu0 %3697  ;;  %v9749_v26 = vpop.permute.xlu1 %3699  ;;  %s11207_s6 = smov 56  }
 0x4e6   : > { %4353 = vrot.lane.b32.xlu1 %v9244_v32, %s11197_s23  ;;  %v3704_v30 = vsel %vm11533_vm6, %v3698_v31, %v9749_v26  ;;  %v9767_v32 = vld [vmem:[%s7676_s24 + $0x88] sm:$0xff]  ;;  %vm3677_vm6 = vcmask 850944  }
 0x4e7   : > { %5728 = vmatprep.subr.mxu1 %v3704_v30 }
 0x4e9   : > { %4325 = vrot.lane.b32.xlu0 %v9754_v41, %s11196_s10  ;;  %v4579_v2 = vpop.permute.xlu0 %4578  ;;  %v9760_v19 = vpop.permute.xlu1 %4580 }
 0x4ea   : > { %4349 = vrot.lane.b32.xlu1 %v9255_v50, %s11197_s23  ;;  %v4585_v38 = vsel %vm11534_vm2, %v4579_v2, %v9760_v19  ;;  %vm11193_vm2 = vcmask 195584   ;;  %s11199_s23 = smov 88  }
 0x4eb   : > { %5793 = vmatprep.subr.mxu0 %v4585_v38 }
 0x4ed   : > { %4323 = vrot.lane.b32.xlu0 %v9255_v50, %s11196_s10  ;;  %v3696_v18 = vpop.permute.xlu0 %3695  ;;  %v4577_v55 = vpop.permute.xlu1 %4576 }
 0x4ee   : > { %4327 = vrot.lane.b32.xlu1 %v9767_v32, %s11196_s10  ;;  %v3703_v24 = vsel %vm11535_vm10, %v3696_v18, %v3698_v31  ;;  %v4584_v52 = vsel %vm11536_vm9, %v4577_v55, %v4579_v2  ;;  %vm11195_vm10 = vcmask 982016   ;;  %vm11537_vm9 = vcmask 203776   ;;  %s11541_s10 = smov 55  }
 0x4ef   : > { %5729 = vmatpush1.msra.mxu1 %v3703_v24  ;;  %5794 = vmatpush1.msra.mxu0 %v4584_v52 }
 0x4f1   : > { %4227 = vrot.lane.b32.xlu0 %v9767_v32, %s11330_s22  ;;  %v3672_v35 = vpop.permute.xlu0 %3671  ;;  %v9777_v63 = vpop.permute.xlu1 %3673 }
 0x4f2   : > { %4225 = vrot.lane.b32.xlu1 %v9754_v41, %s11330_s22  ;;  %v3679_v50 = vsel %vm3677_vm6, %v3672_v35, %v9777_v63 }
 0x4f3   : > { %5730 = vmatprep.subr.mxu1 %v3679_v50 }
 0x4f5   : > { %4302 = vrot.lane.b32.xlu0 %v9767_v32, %s11360_s20  ;;  %v4553_v15 = vpop.permute.xlu0 %4552  ;;  %v9785_v57 = vpop.permute.xlu1 %4554 }
 0x4f6   : > { %4300 = vrot.lane.b32.xlu1 %v9754_v41, %s11360_s20  ;;  %v4560_v16 = vsel %vm11193_vm2, %v4553_v15, %v9785_v57 }
 0x4f7   : > { %5795 = vmatprep.subr.mxu0 %v4560_v16 }
 0x4f9   : > { %4298 = vrot.lane.b32.xlu0 %v9790_v43, %s11360_s20  ;;  %v3670_v20 = vpop.permute.xlu0 %3669  ;;  %v4551_v17 = vpop.permute.xlu1 %4550  ;;  %s11215_s20 = smov 112  }
 0x4fa   : > { %4223 = vrot.lane.b32.xlu1 %v9790_v43, %s11330_s22  ;;  %v3678_v53 = vsel %vm3677_vm6, %v3670_v20, %v3672_v35  ;;  %v4559_v11 = vsel %vm11193_vm2, %v4551_v17, %v4553_v15  ;;  %vm11538_vm2 = vmmov %vm11537_vm9 }
 0x4fb   : > { %5731 = vmatpush1.msra.mxu1 %v3678_v53  ;;  %5796 = vmatpush1.msra.mxu0 %v4559_v11 }
 0x4fd   : > { %4202 = vrot.lane.b32.xlu0 %v9767_v32, %s11329_s25  ;;  %v3646_v21 = vpop.permute.xlu0 %3645  ;;  %v9802_v47 = vpop.permute.xlu1 %3647 }
 0x4fe   : > { %4200 = vrot.lane.b32.xlu1 %v9754_v41, %s11329_s25  ;;  %v3653_v40 = vsel %vm11195_vm10, %v3646_v21, %v9802_v47 }
 0x4ff   : > { %5732 = vmatprep.subr.mxu1 %v3653_v40 }
 0x501   : > { %4277 = vrot.lane.b32.xlu0 %v9767_v32, %s11358_s16  ;;  %v4528_v12 = vpop.permute.xlu0 %4527  ;;  %v9810_v48 = vpop.permute.xlu1 %4529 }
 0x502   : > { %4275 = vrot.lane.b32.xlu1 %v9754_v41, %s11358_s16  ;;  %v4534_v9 = vsel %vm11537_vm9, %v4528_v12, %v9810_v48 }
 0x503   : > { %5797 = vmatprep.subr.mxu0 %v4534_v9 }
 0x505   : > { %4273 = vrot.lane.b32.xlu0 %v9790_v43, %s11358_s16  ;;  %v3644_v7 = vpop.permute.xlu0 %3643  ;;  %v4526_v28 = vpop.permute.xlu1 %4525  ;;  %s11568_s16 = smov 79  }
 0x506   : > { %4198 = vrot.lane.b32.xlu1 %v9790_v43, %s11329_s25  ;;  %v3652_v0 = vsel %vm11195_vm10, %v3644_v7, %v3646_v21  ;;  %v4533_v58 = vsel %vm11538_vm2, %v4526_v28, %v4528_v12  ;;  %vm11539_vm2 = vcmask 211968   ;;  %vm11200_vm10 = vcmask 998400  }
 0x507   : > { %5733 = vmatpush1.msra.mxu1 %v3652_v0  ;;  %5798 = vmatpush1.msra.mxu0 %v4533_v58  ;;  %vm11540_vm9 = vmmov %vm11539_vm2 }
 0x509   : > { %4177 = vrot.lane.b32.xlu0 %v9767_v32, %s11352_s28  ;;  %v3620_v56 = vpop.permute.xlu0 %3619  ;;  %v9824_v59 = vpop.permute.xlu1 %3621 }
 0x50a   : > { %4175 = vrot.lane.b32.xlu1 %v9754_v41, %s11352_s28  ;;  %v3627_v60 = vsel %vm3625_vm11, %v3620_v56, %v9824_v59 }
 0x50b   : > { %5734 = vmatprep.subr.mxu1 %v3627_v60 }
 0x50d   : > { %4252 = vrot.lane.b32.xlu0 %v9767_v32, %s11355_s19  ;;  %v4503_v22 = vpop.permute.xlu0 %4502  ;;  %v9832_v27 = vpop.permute.xlu1 %4504 }
 0x50e   : > { %4250 = vrot.lane.b32.xlu1 %v9754_v41, %s11355_s19  ;;  %v4509_v42 = vsel %vm11539_vm2, %v4503_v22, %v9832_v27  ;;  %vm11542_vm2 = vcmask 220160  }
 0x50f   : > { %5799 = vmatprep.subr.mxu0 %v4509_v42 }
 0x511   : > { %4248 = vrot.lane.b32.xlu0 %v9790_v43, %s11355_s19  ;;  %v3618_v44 = vpop.permute.xlu0 %3617  ;;  %v4501_v49 = vpop.permute.xlu1 %4500  ;;  %s11563_s19 = smov 78  }
 0x512   : > { %4173 = vrot.lane.b32.xlu1 %v9790_v43, %s11352_s28  ;;  %v3626_v34 = vsel %vm3625_vm11, %v3618_v44, %v3620_v56  ;;  %v4508_v39 = vsel %vm11540_vm9, %v4501_v49, %v4503_v22  ;;  %vm11543_vm9 = vmmov %vm11542_vm2 }
 0x513   : > { %5735 = vmatpush1.msra.mxu1 %v3626_v34  ;;  %5800 = vmatpush1.msra.mxu0 %v4508_v39 }
 0x515   : > { %4152 = vrot.lane.b32.xlu0 %v9767_v32, %s11541_s10  ;;  %v3594_v29 = vpop.permute.xlu0 %3593  ;;  %v9846_v33 = vpop.permute.xlu1 %3595 }
 0x516   : > { %4150 = vrot.lane.b32.xlu1 %v9754_v41, %s11541_s10  ;;  %v3601_v51 = vsel %vm11200_vm10, %v3594_v29, %v9846_v33 }
 0x517   : > { %5736 = vmatprep.subr.mxu1 %v3601_v51 }
 0x519   : > { %5012 = vrot.lane.b32.xlu0 %v9851_v6, %s11199_s23  ;;  %v4478_v8 = vpop.permute.xlu0 %4477  ;;  %v9857_v10 = vpop.permute.xlu1 %4479 }
 0x51a   : > { %5010 = vrot.lane.b32.xlu1 %v9767_v32, %s11199_s23  ;;  %v4484_v1 = vsel %vm11542_vm2, %v4478_v8, %v9857_v10  ;;  %vm11201_vm2 = vcmask 1006592  }
 0x51b   : > { %5801 = vmatprep.subr.mxu0 %v4484_v1 }
 0x51d   : > { %5008 = vrot.lane.b32.xlu0 %v9754_v41, %s11199_s23  ;;  %v3592_v25 = vpop.permute.xlu0 %3591  ;;  %s11544_s23 = smov 104  }
 0x51e   : > { %4148 = vrot.lane.b32.xlu1 %v9790_v43, %s11541_s10  ;;  %v3600_v4 = vsel %vm11200_vm10, %v3592_v25, %v3594_v29  ;;  %v4476_v14 = vpop.permute.xlu1 %4475 }
 0x51f   : > { %v4483_v46 = vsel %vm11543_vm9, %v4476_v14, %v4478_v8  ;;  %5737 = vmatpush1.msra.mxu1 %v3600_v4  ;;  %vm11546_vm9 = vcmask 228352  }
 0x520   : > { %5802 = vmatpush1.msra.mxu0 %v4483_v46  ;;  %vm11547_vm10 = vmmov %vm11546_vm9 }
 0x521   : > { %4126 = vrot.lane.b32.xlu0 %v9767_v32, %s11207_s6  ;;  %v3568_v36 = vpop.permute.xlu0 %3567 }
 0x522   : > { %4124 = vrot.lane.b32.xlu1 %v9754_v41, %s11207_s6 }
 0x523   : > { %v9873_v5 = vpop.permute.xlu1 %3569 }
 0x524   : > { %v3575_v31 = vsel %vm11201_vm2, %v3568_v36, %v9873_v5 }
 0x525   : > { %4987 = vrot.lane.b32.xlu0 %v9851_v6, %s11544_s23  ;;  %5738 = vmatprep.subr.mxu1 %v3575_v31  ;;  %v4453_v30 = vpop.permute.xlu0 %4452 }
 0x526   : > { %4985 = vrot.lane.b32.xlu1 %v9767_v32, %s11544_s23 }
 0x528   : > { %v9881_v2 = vpop.permute.xlu1 %4454 }
 0x529   : > { %11545 = vst [vmem:[#allocation49_spill] sm:$0xff] %v9881_v2  ;;  %4983 = vrot.lane.b32.xlu0 %v9754_v41, %s11544_s23  ;;  %v4459_v38 = vsel %vm11546_vm9, %v4453_v30, %v9881_v2  ;;  %v3566_v18 = vpop.permute.xlu0 %3565  ;;  %vm11202_vm9 = vcmask 1014784  }
 0x52a   : > { %4122 = vrot.lane.b32.xlu1 %v9790_v43, %s11207_s6  ;;  %5803 = vmatprep.subr.mxu0 %v4459_v38  ;;  %v3574_v55 = vsel %vm11201_vm2, %v3566_v18, %v3568_v36  ;;  %s11559_s6 = smov 77  }
 0x52b   : > { %5739 = vmatpush1.msra.mxu1 %v3574_v55 }
 0x52c   : > { %v4451_v24 = vpop.permute.xlu1 %4450 }
 0x52d   : > { %v4458_v52 = vsel %vm11547_vm10, %v4451_v24, %v4453_v30  ;;  %4101 = vrot.lane.b32.xlu0 %v9767_v32, %s11203_s3  ;;  %v3542_v35 = vpop.permute.xlu0 %3541  ;;  %vm11549_vm10 = vcmask 236544  }
 0x52e   : > { %4099 = vrot.lane.b32.xlu1 %v9754_v41, %s11203_s3  ;;  %5804 = vmatpush1.msra.mxu0 %v4458_v52  ;;  %vm11550_vm2 = vmmov %vm11549_vm10 }
 0x530   : > { %v9895_v50 = vpop.permute.xlu1 %3543 }
 0x531   : > { %4962 = vrot.lane.b32.xlu0 %v9851_v6, %s11410_s17  ;;  %v3549_v15 = vsel %vm11202_vm9, %v3542_v35, %v9895_v50  ;;  %v4428_v16 = vpop.permute.xlu0 %4427 }
 0x532   : > { %4960 = vrot.lane.b32.xlu1 %v9767_v32, %s11410_s17  ;;  %5740 = vmatprep.subr.mxu1 %v3549_v15 }
 0x534   : > { %v9903_v20 = vpop.permute.xlu1 %4429 }
 0x535   : > { %11548 = vst [vmem:[#allocation47_spill] sm:$0xff] %v9903_v20  ;;  %4958 = vrot.lane.b32.xlu0 %v9754_v41, %s11410_s17  ;;  %v4434_v17 = vsel %vm11549_vm10, %v4428_v16, %v9903_v20  ;;  %v3540_v53 = vpop.permute.xlu0 %3539  ;;  %vm3521_vm10 = vcmask 1022976  }
 0x536   : > { %4097 = vrot.lane.b32.xlu1 %v9790_v43, %s11203_s3  ;;  %5805 = vmatprep.subr.mxu0 %v4434_v17  ;;  %v3548_v11 = vsel %vm11202_vm9, %v3540_v53, %v3542_v35  ;;  %s11555_s3 = smov 75  }
 0x537   : > { %5741 = vmatpush1.msra.mxu1 %v3548_v11 }
 0x538   : > { %v4426_v21 = vpop.permute.xlu1 %4425 }
 0x539   : > { %v4433_v40 = vsel %vm11550_vm2, %v4426_v21, %v4428_v16  ;;  %4076 = vrot.lane.b32.xlu0 %v9767_v32, %s11350_s11  ;;  %v3516_v12 = vpop.permute.xlu0 %3515  ;;  %vm11552_vm2 = vcmask 244736  }
 0x53a   : > { %4074 = vrot.lane.b32.xlu1 %v9754_v41, %s11350_s11  ;;  %5806 = vmatpush1.msra.mxu0 %v4433_v40  ;;  %vm11553_vm9 = vmmov %vm11552_vm2 }
 0x53c   : > { %v9917_v9 = vpop.permute.xlu1 %3517 }
 0x53d   : > { %4937 = vrot.lane.b32.xlu0 %v9851_v6, %s11385_s13  ;;  %v3523_v7 = vsel %vm3521_vm10, %v3516_v12, %v9917_v9  ;;  %v4403_v28 = vpop.permute.xlu0 %4402 }
 0x53e   : > { %4935 = vrot.lane.b32.xlu1 %v9767_v32, %s11385_s13  ;;  %5742 = vmatprep.subr.mxu1 %v3523_v7 }
 0x540   : > { %v9925_v0 = vpop.permute.xlu1 %4404 }
 0x541   : > { %11551 = vst [vmem:[#allocation55_spill] sm:$0xff] %v9925_v0  ;;  %4933 = vrot.lane.b32.xlu0 %v9754_v41, %s11385_s13  ;;  %v4409_v58 = vsel %vm11552_vm2, %v4403_v28, %v9925_v0  ;;  %v3514_v56 = vpop.permute.xlu0 %3513  ;;  %vm11205_vm2 = vcmask 1031168  }
 0x542   : > { %4072 = vrot.lane.b32.xlu1 %v9790_v43, %s11350_s11  ;;  %5807 = vmatprep.subr.mxu0 %v4409_v58  ;;  %v3522_v60 = vsel %vm3521_vm10, %v3514_v56, %v3516_v12 }
 0x543   : > { %5743 = vmatpush1.msra.mxu1 %v3522_v60 }
 0x544   : > { %v4401_v22 = vpop.permute.xlu1 %4400 }
 0x545   : > { %v4408_v42 = vsel %vm11553_vm9, %v4401_v22, %v4403_v28  ;;  %4051 = vrot.lane.b32.xlu0 %v9767_v32, %s11348_s15  ;;  %v3490_v44 = vpop.permute.xlu0 %3489  ;;  %vm11219_vm9 = vcmask 1039360  }
 0x546   : > { %4049 = vrot.lane.b32.xlu1 %v9754_v41, %s11348_s15  ;;  %5808 = vmatpush1.msra.mxu0 %v4408_v42 }
 0x548   : > { %v9939_v49 = vpop.permute.xlu1 %3491 }
 0x549   : > { %4912 = vrot.lane.b32.xlu0 %v9851_v6, %s11387_s30  ;;  %v3497_v34 = vsel %vm11205_vm2, %v3490_v44, %v9939_v49  ;;  %v4378_v39 = vpop.permute.xlu0 %4377 }
 0x54a   : > { %4910 = vrot.lane.b32.xlu1 %v9767_v32, %s11387_s30  ;;  %5744 = vmatprep.subr.mxu1 %v3497_v34 }
 0x54c   : > { %v9947_v29 = vpop.permute.xlu1 %4379 }
 0x54d   : > { %11554 = vst [vmem:[#allocation68_spill] sm:$0xff] %v9947_v29  ;;  %4908 = vrot.lane.b32.xlu0 %v9754_v41, %s11387_s30  ;;  %v4384_v51 = vsel %vm11204_vm12, %v4378_v39, %v9947_v29  ;;  %v3488_v8 = vpop.permute.xlu0 %3487 }
 0x54e   : > { %4047 = vrot.lane.b32.xlu1 %v9790_v43, %s11348_s15  ;;  %5809 = vmatprep.subr.mxu0 %v4384_v51  ;;  %v3496_v1 = vsel %vm11205_vm2, %v3488_v8, %v3490_v44  ;;  %vm11209_vm2 = vcmask 392192  }
 0x54f   : > { %5745 = vmatpush1.msra.mxu1 %v3496_v1 }
 0x550   : > { %v4376_v25 = vpop.permute.xlu1 %4375 }
 0x551   : > { %v4383_v4 = vsel %vm11204_vm12, %v4376_v25, %v4378_v39  ;;  %4026 = vrot.lane.b32.xlu0 %v9767_v32, %s11555_s3  ;;  %v3464_v14 = vpop.permute.xlu0 %3463  ;;  %vm11206_vm12 = vcmask 261120  }
 0x552   : > { %4024 = vrot.lane.b32.xlu1 %v9754_v41, %s11555_s3  ;;  %5810 = vmatpush1.msra.mxu0 %v4383_v4 }
 0x554   : > { %v9961_v46 = vpop.permute.xlu1 %3465 }
 0x555   : > { %4887 = vrot.lane.b32.xlu0 %v9851_v6, %s11389_s29  ;;  %v3471_v36 = vsel %vm11219_vm9, %v3464_v14, %v9961_v46  ;;  %v4352_v31 = vpop.permute.xlu0 %4351 }
 0x556   : > { %4885 = vrot.lane.b32.xlu1 %v9767_v32, %s11389_s29  ;;  %5746 = vmatprep.subr.mxu1 %v3471_v36 }
 0x558   : > { %v9969_v30 = vpop.permute.xlu1 %4353 }
 0x559   : > { %11556 = vst [vmem:[#allocation45_spill] sm:$0xff] %v9969_v30  ;;  %4883 = vrot.lane.b32.xlu0 %v9754_v41, %s11389_s29  ;;  %v4359_v38 = vsel %vm11206_vm12, %v4352_v31, %v9969_v30  ;;  %v3462_v18 = vpop.permute.xlu0 %3461 }
 0x55a   : > { %4022 = vrot.lane.b32.xlu1 %v9790_v43, %s11555_s3  ;;  %5811 = vmatprep.subr.mxu0 %v4359_v38  ;;  %v3470_v55 = vsel %vm11219_vm9, %v3462_v18, %v3464_v14  ;;  %vm11575_vm9 = vcmask 859136  }
 0x55b   : > { %5747 = vmatpush1.msra.mxu1 %v3470_v55 }
 0x55c   : > { %v4350_v24 = vpop.permute.xlu1 %4349  ;;  %5748 = vmatprep.subr.mxu1 %v9754_v41 }
 0x55d   : > { %v4358_v52 = vsel %vm11206_vm12, %v4350_v24, %v4352_v31  ;;  %4001 = vrot.lane.b32.xlu0 %v9767_v32, %s11317_s14  ;;  %v4326_v35 = vpop.permute.xlu0 %4325  ;;  %5749 = vmatpush1.msra.mxu1 %v9790_v43  ;;  %vm11558_vm12 = vcmask 424960  }
 0x55e   : > { %3999 = vrot.lane.b32.xlu1 %v9754_v41, %s11317_s14  ;;  %5812 = vmatpush1.msra.mxu0 %v4358_v52 }
 0x560   : > { %v9985_v15 = vpop.permute.xlu1 %4327 }
 0x561   : > { %11557 = vst [vmem:[#allocation54_spill] sm:$0xff] %v9985_v15  ;;  %4862 = vrot.lane.b32.xlu0 %v9851_v6, %s11390_s21  ;;  %v4333_v16 = vsel %vm11209_vm2, %v4326_v35, %v9985_v15  ;;  %v4324_v17 = vpop.permute.xlu0 %4323 }
 0x562   : > { %4860 = vrot.lane.b32.xlu1 %v9767_v32, %s11390_s21  ;;  %5813 = vmatprep.subr.mxu0 %v4333_v16  ;;  %v4332_v53 = vsel %vm11209_vm2, %v4324_v17, %v4326_v35  ;;  %vm11561_vm2 = vmmov %vm11558_vm12 }
 0x563   : > { %5814 = vmatpush1.msra.mxu0 %v4332_v53 }
 0x564   : > { %v4226_v11 = vpop.permute.xlu1 %4225 }
 0x565   : > { %4858 = vrot.lane.b32.xlu0 %v9754_v41, %s11390_s21  ;;  %v9996_v21 = vpop.permute.xlu0 %4227 }
 0x566   : > { %3997 = vrot.lane.b32.xlu1 %v9790_v43, %s11317_s14  ;;  %v4232_v40 = vsel %vm11558_vm12, %v4226_v11, %v9996_v21  ;;  %vm11562_vm12 = vcmask 433152  }
 0x567   : > { %5750 = vmatprep.subr.mxu1 %v4232_v40 }
 0x568   : > { %v4301_v12 = vpop.permute.xlu1 %4300 }
 0x569   : > { %3976 = vrot.lane.b32.xlu0 %v9767_v32, %s11559_s6  ;;  %v10004_v7 = vpop.permute.xlu0 %4302 }
 0x56a   : > { %11560 = vst [vmem:[#allocation69_spill] sm:$0xff] %v10004_v7  ;;  %3974 = vrot.lane.b32.xlu1 %v9754_v41, %s11559_s6  ;;  %v4307_v28 = vsel %vm11211_vm7, %v4301_v12, %v10004_v7 }
 0x56b   : > { %5815 = vmatprep.subr.mxu0 %v4307_v28 }
 0x56c   : > { %v4224_v58 = vpop.permute.xlu1 %4223 }
 0x56d   : > { %v4231_v56 = vsel %vm11561_vm2, %v4224_v58, %v4226_v11  ;;  %4837 = vrot.lane.b32.xlu0 %v9851_v6, %s11392_s7  ;;  %v4299_v60 = vpop.permute.xlu0 %4298  ;;  %vm11565_vm2 = vcmask 408576  }
 0x56e   : > { %4835 = vrot.lane.b32.xlu1 %v9767_v32, %s11392_s7  ;;  %5751 = vmatpush2.msra.mxu1 %v4231_v56  ;;  %v4306_v22 = vsel %vm11211_vm7, %v4299_v60, %v4301_v12  ;;  %vm11566_vm7 = vmmov %vm11562_vm12 }
 0x56f   : > { %5816 = vmatpush1.msra.mxu0 %v4306_v22 }
 0x570   : > { %v4201_v42 = vpop.permute.xlu1 %4200 }
 0x571   : > { %4833 = vrot.lane.b32.xlu0 %v9754_v41, %s11392_s7  ;;  %v10018_v44 = vpop.permute.xlu0 %4202 }
 0x572   : > { %3972 = vrot.lane.b32.xlu1 %v9790_v43, %s11559_s6  ;;  %v4207_v34 = vsel %vm11562_vm12, %v4201_v42, %v10018_v44  ;;  %vm11567_vm12 = vmmov %vm11565_vm2 }
 0x573   : > { %5752 = vmatprep.subr.mxu1 %v4207_v34 }
 0x574   : > { %v4276_v39 = vpop.permute.xlu1 %4275 }
 0x575   : > { %3951 = vrot.lane.b32.xlu0 %v9767_v32, %s11563_s19  ;;  %v10026_v51 = vpop.permute.xlu0 %4277 }
 0x576   : > { %11564 = vst [vmem:[#allocation67_spill] sm:$0xff] %v10026_v51  ;;  %3949 = vrot.lane.b32.xlu1 %v9754_v41, %s11563_s19  ;;  %v4282_v8 = vsel %vm11565_vm2, %v4276_v39, %v10026_v51 }
 0x577   : > { %5817 = vmatprep.subr.mxu0 %v4282_v8 }
 0x578   : > { %v4199_v1 = vpop.permute.xlu1 %4198 }
 0x579   : > { %v4206_v25 = vsel %vm11566_vm7, %v4199_v1, %v4201_v42  ;;  %4812 = vrot.lane.b32.xlu0 %v9851_v6, %s11414_s12  ;;  %v4274_v4 = vpop.permute.xlu0 %4273  ;;  %vm11570_vm7 = vcmask 416768  }
 0x57a   : > { %4810 = vrot.lane.b32.xlu1 %v9767_v32, %s11414_s12  ;;  %5753 = vmatpush2.msra.mxu1 %v4206_v25  ;;  %v4281_v14 = vsel %vm11567_vm12, %v4274_v4, %v4276_v39  ;;  %vm11571_vm2 = vmmov %vm11570_vm7  ;;  %vm11220_vm12 = vcmask 719872  }
 0x57b   : > { %5818 = vmatpush1.msra.mxu0 %v4281_v14 }
 0x57c   : > { %v4176_v36 = vpop.permute.xlu1 %4175 }
 0x57d   : > { %4808 = vrot.lane.b32.xlu0 %v9754_v41, %s11414_s12  ;;  %v10040_v31 = vpop.permute.xlu0 %4177  ;;  %s11228_s12 = smov 58  }
 0x57e   : > { %3947 = vrot.lane.b32.xlu1 %v9790_v43, %s11563_s19  ;;  %v4182_v38 = vsel %vm970_vm15, %v4176_v36, %v10040_v31 }
 0x57f   : > { %5754 = vmatprep.subr.mxu1 %v4182_v38 }
 0x580   : > { %v4251_v18 = vpop.permute.xlu1 %4250 }
 0x581   : > { %3926 = vrot.lane.b32.xlu0 %v9767_v32, %s11568_s16  ;;  %v10048_v55 = vpop.permute.xlu0 %4252 }
 0x582   : > { %11569 = vst [vmem:[#allocation43_spill] sm:$0xff] %v10048_v55  ;;  %3924 = vrot.lane.b32.xlu1 %v9754_v41, %s11568_s16  ;;  %v4257_v24 = vsel %vm11570_vm7, %v4251_v18, %v10048_v55  ;;  %vm4130_vm7 = vcmask 457728  }
 0x583   : > { %5819 = vmatprep.subr.mxu0 %v4257_v24 }
 0x584   : > { %v4174_v52 = vpop.permute.xlu1 %4173 }
 0x585   : > { %v4181_v35 = vsel %vm970_vm15, %v4174_v52, %v4176_v36  ;;  %4786 = vrot.lane.b32.xlu0 %v9851_v6, %s11215_s20  ;;  %v4249_v16 = vpop.permute.xlu0 %4248 }
 0x586   : > { %4784 = vrot.lane.b32.xlu1 %v9767_v32, %s11215_s20  ;;  %5755 = vmatpush2.msra.mxu1 %v4181_v35  ;;  %v4256_v17 = vsel %vm11571_vm2, %v4249_v16, %v4251_v18  ;;  %vm11574_vm2 = vcmask 588800  }
 0x587   : > { %5820 = vmatpush1.msra.mxu0 %v4256_v17 }
 0x588   : > { %v4151_v53 = vpop.permute.xlu1 %4150 }
 0x589   : > { %4782 = vrot.lane.b32.xlu0 %v9754_v41, %s11215_s20  ;;  %v10062_v11 = vpop.permute.xlu0 %4152  ;;  %s11221_s20 = smov 96  }
 0x58a   : > { %3922 = vrot.lane.b32.xlu1 %v9790_v43, %s11568_s16  ;;  %v4157_v40 = vsel %vm2098_vm0, %v4151_v53, %v10062_v11 }
 0x58b   : > { %5756 = vmatprep.subr.mxu1 %v4157_v40 }
 0x58c   : > { %v5011_v12 = vpop.permute.xlu1 %5010 }
 0x58d   : > { %3900 = vrot.lane.b32.xlu0 %v9767_v32, %s11217_s27  ;;  %v10070_v28 = vpop.permute.xlu0 %5012 }
 0x58e   : > { %3898 = vrot.lane.b32.xlu1 %v9754_v41, %s11217_s27  ;;  %v5018_v58 = vsel %vm11220_vm12, %v5011_v12, %v10070_v28 }
 0x58f   : > { %5821 = vmatprep.subr.mxu0 %v5018_v58 }
 0x590   : > { %v4149_v56 = vpop.permute.xlu1 %4148 }
 0x591   : > { %v4156_v60 = vsel %vm2098_vm0, %v4149_v56, %v4151_v53  ;;  %3872 = vrot.lane.b32.xlu0 %v9754_v41, %s11221_s20  ;;  %v5009_v22 = vpop.permute.xlu0 %5008  ;;  %v10126_v56 = vld [vmem:[%s11578_s18 + $0x8] sm:$0xff] }
 0x592   : > { %3896 = vrot.lane.b32.xlu1 %v9790_v43, %s11217_s27  ;;  %5757 = vmatpush2.msra.mxu1 %v4156_v60  ;;  %v5017_v42 = vsel %vm11220_vm12, %v5009_v22, %v5011_v12  ;;  %s11573_s27 = smov 97   ;;  %vm11576_vm12 = vmmov %vm11574_vm2 }
 0x593   : > { %5822 = vmatpush2.msra.mxu0 %v5017_v42  ;;  %5782 = vmatprep.mubr.f32.mxu1 %v10126_v56 }
 0x594   : > { %v4125_v34 = vpop.permute.xlu1 %4124 }
 0x595   : > { %4753 = vrot.lane.b32.xlu0 %v9754_v41, %s11572_s1  ;;  %v10084_v39 = vpop.permute.xlu0 %4126 }
 0x596   : > { %3874 = vrot.lane.b32.xlu1 %v9767_v32, %s11221_s20  ;;  %v4132_v8 = vsel %vm4130_vm7, %v4125_v34, %v10084_v39 }
 0x597   : > { %5758 = vmatprep.subr.mxu1 %v4132_v8 }
 0x598   : > { %v4986_v1 = vpop.permute.xlu1 %4985 }
 0x599   : > { %3870 = vrot.lane.b32.xlu0 %v9790_v43, %s11221_s20  ;;  %v10092_v25 = vpop.permute.xlu0 %4987  ;;  %s11577_s20 = smov 3  }
 0x59a   : > { %4755 = vrot.lane.b32.xlu1 %v9767_v32, %s11572_s1  ;;  %v4992_v4 = vsel %vm3677_vm6, %v4986_v1, %v10092_v25 }
 0x59b   : > { %5823 = vmatprep.subr.mxu0 %v4992_v4 }
 0x59c   : > { %v4123_v14 = vpop.permute.xlu1 %4122 }
 0x59d   : > { %v4131_v36 = vsel %vm4130_vm7, %v4123_v14, %v4125_v34  ;;  %3847 = vrot.lane.b32.xlu0 %v9754_v41, %s11573_s27  ;;  %v4984_v38 = vpop.permute.xlu0 %4983 }
 0x59e   : > { %4751 = vrot.lane.b32.xlu1 %v9790_v43, %s11572_s1  ;;  %5759 = vmatpush2.msra.mxu1 %v4131_v36  ;;  %v4991_v18 = vsel %vm3677_vm6, %v4984_v38, %v4986_v1  ;;  %s11581_s1 = smov 4  }
 0x59f   : > { %5824 = vmatpush2.msra.mxu0 %v4991_v18 }
 0x5a0   : > { %v4100_v24 = vpop.permute.xlu1 %4099 }
 0x5a1   : > { %4728 = vrot.lane.b32.xlu0 %v9754_v41, %s11396_s4  ;;  %v10106_v52 = vpop.permute.xlu0 %4101 }
 0x5a2   : > { %3849 = vrot.lane.b32.xlu1 %v9767_v32, %s11573_s27  ;;  %v4106_v35 = vsel %vm11574_vm2, %v4100_v24, %v10106_v52  ;;  %vm11579_vm2 = vmmov %vm11575_vm9 }
 0x5a3   : > { %5760 = vmatprep.subr.mxu1 %v4106_v35 }
 0x5a4   : > { %v4961_v16 = vpop.permute.xlu1 %4960 }
 0x5a5   : > { %3845 = vrot.lane.b32.xlu0 %v9790_v43, %s11573_s27  ;;  %v10114_v17 = vpop.permute.xlu0 %4962 }
 0x5a6   : > { %4730 = vrot.lane.b32.xlu1 %v9767_v32, %s11396_s4  ;;  %v4967_v53 = vsel %vm11575_vm9, %v4961_v16, %v10114_v17  ;;  %vm11580_vm9 = vcmask 867328  }
 0x5a7   : > { %5825 = vmatprep.subr.mxu0 %v4967_v53 }
 0x5a8   : > { %v4098_v40 = vpop.permute.xlu1 %4097 }
 0x5a9   : > { %v4105_v12 = vsel %vm11576_vm12, %v4098_v40, %v4100_v24  ;;  %4703 = vrot.lane.b32.xlu0 %v9754_v41, %s11577_s20  ;;  %v4959_v58 = vpop.permute.xlu0 %4958  ;;  %vm11582_vm12 = vmmov %vm11580_vm9 }
 0x5aa   : > { %4726 = vrot.lane.b32.xlu1 %v9790_v43, %s11396_s4  ;;  %5761 = vmatpush2.msra.mxu1 %v4105_v12  ;;  %v4966_v60 = vsel %vm11579_vm2, %v4959_v58, %v4961_v16  ;;  %vm11583_vm2 = vcmask 605184  }
 0x5ab   : > { %5826 = vmatpush2.msra.mxu0 %v4966_v60 }
 0x5ac   : > { %v4075_v22 = vpop.permute.xlu1 %4074 }
 0x5ad   : > { %5418 = vrot.lane.b32.xlu0 %v9767_v32, %s11226_s0  ;;  %v10134_v42 = vpop.permute.xlu0 %4076 }
 0x5ae   : > { %4705 = vrot.lane.b32.xlu1 %v9767_v32, %s11577_s20  ;;  %v4081_v34 = vsel %vm2072_vm5, %v4075_v22, %v10134_v42 }
 0x5af   : > { %5762 = vmatprep.subr.mxu1 %v4081_v34 }
 0x5b0   : > { %v4936_v8 = vpop.permute.xlu1 %4935 }
 0x5b1   : > { %4701 = vrot.lane.b32.xlu0 %v9790_v43, %s11577_s20  ;;  %v10142_v1 = vpop.permute.xlu0 %4937  ;;  %s7492_s20 = smov 60  }
 0x5b2   : > { %5420 = vrot.lane.b32.xlu1 %v9851_v6, %s11226_s0  ;;  %v4942_v4 = vsel %vm11580_vm9, %v4936_v8, %v10142_v1  ;;  %vm11584_vm9 = vcmask 875520  }
 0x5b3   : > { %5827 = vmatprep.subr.mxu0 %v4942_v4 }
 0x5b4   : > { %v4073_v14 = vpop.permute.xlu1 %4072 }
 0x5b5   : > { %v4080_v36 = vsel %vm2072_vm5, %v4073_v14, %v4075_v22  ;;  %4678 = vrot.lane.b32.xlu0 %v9754_v41, %s11581_s1  ;;  %v4934_v38 = vpop.permute.xlu0 %4933 }
 0x5b6   : > { %5416 = vrot.lane.b32.xlu1 %v9754_v41, %s11226_s0  ;;  %5763 = vmatpush2.msra.mxu1 %v4080_v36  ;;  %v4941_v18 = vsel %vm11582_vm12, %v4934_v38, %v4936_v8  ;;  %vm11585_vm12 = vmmov %vm11583_vm2  ;;  %s11586_s0 = smov 5   ;;  %v10191_v38 = vld [vmem:[%s11578_s18 + $0x18] sm:$0xff] }
 0x5b7   : > { %5828 = vmatpush2.msra.mxu0 %v4941_v18  ;;  %5853 = vmatprep.mubr.f32.mxu0 %v10191_v38  ;;  %v10199_v18 = vld [vmem:[%s7676_s24 + $0x80] sm:$0xff] }
 0x5b8   : > { %v4050_v24 = vpop.permute.xlu1 %4049 }
 0x5b9   : > { %5392 = vrot.lane.b32.xlu0 %v9767_v32, %s11228_s12  ;;  %v10156_v35 = vpop.permute.xlu0 %4051 }
 0x5ba   : > { %4680 = vrot.lane.b32.xlu1 %v9767_v32, %s11581_s1  ;;  %v4056_v16 = vsel %vm11583_vm2, %v4050_v24, %v10156_v35  ;;  %vm11587_vm2 = vmmov %vm11584_vm9 }
 0x5bb   : > { %5764 = vmatprep.subr.mxu1 %v4056_v16 }
 0x5bc   : > { %v4911_v53 = vpop.permute.xlu1 %4910 }
 0x5bd   : > { %4676 = vrot.lane.b32.xlu0 %v9790_v43, %s11581_s1  ;;  %v10164_v40 = vpop.permute.xlu0 %4912  ;;  %s7491_s1 = smov 59  }
 0x5be   : > { %5394 = vrot.lane.b32.xlu1 %v9851_v6, %s11228_s12  ;;  %v4917_v12 = vsel %vm11584_vm9, %v4911_v53, %v10164_v40  ;;  %vm11588_vm9 = vcmask 613376  }
 0x5bf   : > { %5829 = vmatprep.subr.mxu0 %v4917_v12  ;;  %v10208_v12 = vld [vmem:[%s7676_s24 + $0x88] sm:$0xff] }
 0x5c0   : > { %v4048_v58 = vpop.permute.xlu1 %4047 }
 0x5c1   : > { %v4055_v60 = vsel %vm11585_vm12, %v4048_v58, %v4050_v24  ;;  %4653 = vrot.lane.b32.xlu0 %v9754_v41, %s11586_s0  ;;  %v4909_v22 = vpop.permute.xlu0 %4908  ;;  %vm11589_vm12 = vcmask 883712  }
 0x5c2   : > { %5390 = vrot.lane.b32.xlu1 %v9754_v41, %s11228_s12  ;;  %5765 = vmatpush2.msra.mxu1 %v4055_v60  ;;  %v4916_v34 = vsel %vm11587_vm2, %v4909_v22, %v4911_v53  ;;  %vm11590_vm2 = vmmov %vm11588_vm9  ;;  %s7493_s12 = smov 61  }
 0x5c3   : > { %5830 = vmatpush2.msra.mxu0 %v4916_v34 }
 0x5c4   : > { %v4025_v8 = vpop.permute.xlu1 %4024 }
 0x5c5   : > { %5366 = vrot.lane.b32.xlu0 %v9767_v32, %s7491_s1  ;;  %v10178_v4 = vpop.permute.xlu0 %4026 }
 0x5c6   : > { %4655 = vrot.lane.b32.xlu1 %v9767_v32, %s11586_s0  ;;  %v4031_v14 = vsel %vm11588_vm9, %v4025_v8, %v10178_v4  ;;  %vm11591_vm9 = vmmov %vm11589_vm12 }
 0x5c7   : > { %5766 = vmatprep.subr.mxu1 %v4031_v14 }
 0x5c8   : > { %v4886_v41 = vpop.permute.xlu1 %4885 }
 0x5c9   : > { %4651 = vrot.lane.b32.xlu0 %v9790_v43, %s11586_s0  ;;  %v10186_v36 = vpop.permute.xlu0 %4887 }
 0x5ca   : > { %5368 = vrot.lane.b32.xlu1 %v9851_v6, %s7491_s1  ;;  %v4892_v32 = vsel %vm11589_vm12, %v4886_v41, %v10186_v36  ;;  %vm11592_vm12 = vcmask 621568  }
 0x5cb   : > { %5831 = vmatprep.subr.mxu0 %v4892_v32 }
 0x5cc   : > { %v4023_v24 = vpop.permute.xlu1 %4022 }
 0x5cd   : > { %v4030_v43 = vsel %vm11590_vm2, %v4023_v24, %v4025_v8  ;;  %4229 = vrot.lane.b32.xlu0 %v9851_v6, %s11330_s22  ;;  %v4884_v16 = vpop.permute.xlu0 %4883  ;;  %s11593_s22 = smov 98   ;;  %vm11594_vm2 = vmmov %vm11592_vm12 }
 0x5ce   : > { %5364 = vrot.lane.b32.xlu1 %v10199_v18, %s7491_s1  ;;  %5767 = vmatpush2.msra.mxu1 %v4030_v43  ;;  %v4891_v53 = vsel %vm11591_vm9, %v4884_v16, %v4886_v41  ;;  %vm11596_vm9 = vcmask 629760  }
 0x5cf   : > { %5832 = vmatpush2.msra.mxu0 %v4891_v53 }
 0x5d0   : > { %v4000_v58 = vpop.permute.xlu1 %3999 }
 0x5d1   : > { %5342 = vrot.lane.b32.xlu0 %v9851_v6, %s7492_s20  ;;  %v10212_v60 = vpop.permute.xlu0 %4001 }
 0x5d2   : > { %5340 = vrot.lane.b32.xlu1 %v10208_v12, %s7492_s20  ;;  %v4006_v22 = vsel %vm11592_vm12, %v4000_v58, %v10212_v60  ;;  %vm11598_vm12 = vmmov %vm11596_vm9 }
 0x5d3   : > { %5768 = vmatprep.subr.mxu1 %v4006_v22 }
 0x5d4   : > { %v4861_v34 = vpop.permute.xlu1 %4860 }
 0x5d5   : > { %5338 = vrot.lane.b32.xlu0 %v10199_v18, %s7492_s20  ;;  %v10220_v8 = vpop.permute.xlu0 %4862 }
 0x5d6   : > { %3826 = vrot.lane.b32.xlu1 %v9851_v6, %s11593_s22  ;;  %v4867_v14 = vsel %vm11255_vm4, %v4861_v34, %v10220_v8  ;;  %s11595_s22 = smov 99  }
 0x5d7   : > { %5833 = vmatprep.subr.mxu0 %v4867_v14 }
 0x5d8   : > { %v3998_v41 = vpop.permute.xlu1 %3997 }
 0x5d9   : > { %v4005_v32 = vsel %vm11594_vm2, %v3998_v41, %v4000_v58  ;;  %5314 = vrot.lane.b32.xlu0 %v10208_v12, %s7493_s12  ;;  %v4859_v24 = vpop.permute.xlu0 %4858  ;;  %vm11599_vm2 = vcmask 637952  }
 0x5da   : > { %4204 = vrot.lane.b32.xlu1 %v9851_v6, %s11329_s25  ;;  %5769 = vmatpush2.msra.mxu1 %v4005_v32  ;;  %v4866_v43 = vsel %vm11255_vm4, %v4859_v24, %v4861_v34  ;;  %s11242_s25 = smov 62   ;;  %vm11633_vm4 = vcmask 801792  }
 0x5db   : > { %5834 = vmatpush2.msra.mxu0 %v4866_v43 }
 0x5dc   : > { %v3975_v16 = vpop.permute.xlu1 %3974 }
 0x5dd   : > { %3801 = vrot.lane.b32.xlu0 %v9851_v6, %s11595_s22  ;;  %v10234_v53 = vpop.permute.xlu0 %3976  ;;  %s11235_s22 = smov 64  }
 0x5de   : > { %5316 = vrot.lane.b32.xlu1 %v9851_v6, %s7493_s12  ;;  %v3981_v58 = vsel %vm11596_vm9, %v3975_v16, %v10234_v53  ;;  %vm11601_vm9 = vmmov %vm11599_vm2 }
 0x5df   : > { %5770 = vmatprep.subr.mxu1 %v3981_v58 }
 0x5e0   : > { %v4836_v22 = vpop.permute.xlu1 %4835 }
 0x5e1   : > { %4179 = vrot.lane.b32.xlu0 %v9851_v6, %s11352_s28  ;;  %v10242_v14 = vpop.permute.xlu0 %4837  ;;  %s11234_s28 = smov 63  }
 0x5e2   : > { %11597 = vst [vmem:[#allocation53_spill] sm:$0xff] %v10242_v14  ;;  %5312 = vrot.lane.b32.xlu1 %v10199_v18, %s7493_s12  ;;  %v4842_v34 = vsel %vm11254_vm13, %v4836_v22, %v10242_v14 }
 0x5e3   : > { %5835 = vmatprep.subr.mxu0 %v4842_v34 }
 0x5e4   : > { %v3973_v41 = vpop.permute.xlu1 %3972 }
 0x5e5   : > { %v3980_v32 = vsel %vm11598_vm12, %v3973_v41, %v3975_v16  ;;  %5290 = vrot.lane.b32.xlu0 %v9851_v6, %s11242_s25  ;;  %v4834_v24 = vpop.permute.xlu0 %4833  ;;  %vm11604_vm12 = vcmask 646144  }
 0x5e6   : > { %5288 = vrot.lane.b32.xlu1 %v10208_v12, %s11242_s25  ;;  %5771 = vmatpush2.msra.mxu1 %v3980_v32  ;;  %v4841_v43 = vsel %vm11254_vm13, %v4834_v24, %v4836_v22  ;;  %vm11632_vm13 = vcmask 424960  }
 0x5e7   : > { %5836 = vmatpush2.msra.mxu0 %v4841_v43 }
 0x5e8   : > { %v3950_v58 = vpop.permute.xlu1 %3949 }
 0x5e9   : > { %5286 = vrot.lane.b32.xlu0 %v10199_v18, %s11242_s25  ;;  %v10256_v34 = vpop.permute.xlu0 %3951  ;;  %s11625_s25 = smov 122  }
 0x5ea   : > { %3776 = vrot.lane.b32.xlu1 %v9851_v6, %s11416_s8  ;;  %v3956_v16 = vsel %vm11599_vm2, %v3950_v58, %v10256_v34  ;;  %s11602_s8 = smov 101   ;;  %vm11240_vm2 = vcmask 916480  }
 0x5eb   : > { %5772 = vmatprep.subr.mxu1 %v3956_v16 }
 0x5ec   : > { %v4811_v41 = vpop.permute.xlu1 %4810 }
 0x5ed   : > { %5262 = vrot.lane.b32.xlu0 %v10208_v12, %s11234_s28  ;;  %v10264_v22 = vpop.permute.xlu0 %4812 }
 0x5ee   : > { %11600 = vst [vmem:[#allocation70_spill] sm:$0xff] %v10264_v22  ;;  %4154 = vrot.lane.b32.xlu1 %v9851_v6, %s11541_s10  ;;  %v4817_v32 = vsel %vm11243_vm8, %v4811_v41, %v10264_v22  ;;  %s11603_s10 = smov 56  }
 0x5ef   : > { %5837 = vmatprep.subr.mxu0 %v4817_v32 }
 0x5f0   : > { %v3948_v24 = vpop.permute.xlu1 %3947 }
 0x5f1   : > { %v3955_v43 = vsel %vm11601_vm9, %v3948_v24, %v3950_v58  ;;  %3751 = vrot.lane.b32.xlu0 %v9851_v6, %s11602_s8  ;;  %v4809_v16 = vpop.permute.xlu0 %4808  ;;  %vm11606_vm9 = vmmov %vm11604_vm12  ;;  %s11607_s8 = smov 102  }
 0x5f2   : > { %5264 = vrot.lane.b32.xlu1 %v9851_v6, %s11234_s28  ;;  %5773 = vmatpush2.msra.mxu1 %v3955_v43  ;;  %v4816_v55 = vsel %vm11243_vm8, %v4809_v16, %v4811_v41  ;;  %v10293_v43 = vld [vmem:[%s7676_s24 + $0x90] sm:$0xff] }
 0x5f3   : > { %5838 = vmatpush2.msra.mxu0 %v4816_v55 }
 0x5f4   : > { %v3925_v51 = vpop.permute.xlu1 %3924 }
 0x5f5   : > { %4128 = vrot.lane.b32.xlu0 %v9851_v6, %s11603_s10  ;;  %v10278_v32 = vpop.permute.xlu0 %3926 }
 0x5f6   : > { %5260 = vrot.lane.b32.xlu1 %v10199_v18, %s11234_s28  ;;  %v3931_v58 = vsel %vm11604_vm12, %v3925_v51, %v10278_v32  ;;  %vm3904_vm12 = vcmask 654336   ;;  %s11608_s28 = smov 80  }
 0x5f7   : > { %5774 = vmatprep.subr.mxu1 %v3931_v58 }
 0x5f8   : > { %v4785_v24 = vpop.permute.xlu1 %4784 }
 0x5f9   : > { %5238 = vrot.lane.b32.xlu0 %v9851_v6, %s11235_s22  ;;  %v10286_v55 = vpop.permute.xlu0 %4786 }
 0x5fa   : > { %11605 = vst [vmem:[#allocation66_spill] sm:$0xff] %v10286_v55  ;;  %5236 = vrot.lane.b32.xlu1 %v10208_v12, %s11235_s22  ;;  %v4792_v41 = vsel %vm11240_vm2, %v4785_v24, %v10286_v55 }
 0x5fb   : > { %5839 = vmatprep.subr.mxu0 %v4792_v41 }
 0x5fc   : > { %v3923_v16 = vpop.permute.xlu1 %3922 }
 0x5fd   : > { %v3930_v58 = vsel %vm11606_vm9, %v3923_v16, %v3925_v51  ;;  %5234 = vrot.lane.b32.xlu0 %v10199_v18, %s11235_s22  ;;  %v4783_v7 = vpop.permute.xlu0 %4782  ;;  %s11609_s22 = smov 72   ;;  %vm3878_vm9 = vcmask 785408  }
 0x5fe   : > { %3726 = vrot.lane.b32.xlu1 %v10293_v43, %s11607_s8  ;;  %5775 = vmatpush2.msra.mxu1 %v3930_v58  ;;  %v4791_v6 = vsel %vm11240_vm2, %v4783_v7, %v4785_v24  ;;  %s11610_s8 = smov 103   ;;  %vm11614_vm2 = vcmask 793600  }
 0x5ff   : > { %5840 = vmatpush2.msra.mxu0 %v4791_v6 }
 0x600   : > { %v3899_v15 = vpop.permute.xlu1 %3898  ;;  %5841 = vmatprep.subr.mxu0 %v10208_v12 }
 0x601   : > { %5211 = vrot.lane.b32.xlu0 %v10208_v12, %s11608_s28  ;;  %v10304_v41 = vpop.permute.xlu0 %3900  ;;  %5842 = vmatpush2.msra.mxu0 %v10199_v18 }
 0x602   : > { %4103 = vrot.lane.b32.xlu1 %v10293_v43, %s11609_s22  ;;  %v3906_v51 = vsel %vm3904_vm12, %v3899_v15, %v10304_v41  ;;  %s11612_s22 = smov 81  }
 0x603   : > { %5776 = vmatprep.subr.mxu1 %v3906_v51 }
 0x604   : > { %v3897_v7 = vpop.permute.xlu1 %3896 }
 0x605   : > { %v3905_v24 = vsel %vm3904_vm12, %v3897_v7, %v3899_v15  ;;  %3701 = vrot.lane.b32.xlu0 %v10293_v43, %s11610_s8  ;;  %v3873_v16 = vpop.permute.xlu0 %3872  ;;  %s11630_s8 = smov 86  }
 0x606   : > { %5213 = vrot.lane.b32.xlu1 %v10293_v43, %s11608_s28  ;;  %5777 = vmatpush2.msra.mxu1 %v3905_v24 }
 0x608   : > { %v10316_v58 = vpop.permute.xlu1 %3874 }
 0x609   : > { %4078 = vrot.lane.b32.xlu0 %v10293_v43, %s11350_s11  ;;  %v3880_v6 = vsel %vm3878_vm9, %v3873_v16, %v10316_v58  ;;  %v4754_v51 = vpop.permute.xlu0 %4753  ;;  %s11613_s11 = smov 82  }
 0x60a   : > { %5209 = vrot.lane.b32.xlu1 %v10199_v18, %s11608_s28  ;;  %5778 = vmatprep.subr.mxu1 %v3880_v6 }
 0x60c   : > { %v10324_v15 = vpop.permute.xlu1 %4755 }
 0x60d   : > { %11611 = vst [vmem:[#allocation42_spill] sm:$0xff] %v10324_v15  ;;  %5188 = vrot.lane.b32.xlu0 %v10293_v43, %s11612_s22  ;;  %v4760_v7 = vsel %vm11241_vm3, %v4754_v51, %v10324_v15  ;;  %v3871_v24 = vpop.permute.xlu0 %3870 }
 0x60e   : > { %5186 = vrot.lane.b32.xlu1 %v10208_v12, %s11612_s22  ;;  %5843 = vmatprep.subr.mxu0 %v4760_v7  ;;  %v3879_v30 = vsel %vm3878_vm9, %v3871_v24, %v3873_v16  ;;  %v10355_v7 = vld [vmem:[%s11578_s18] sm:$0xff] }
 0x60f   : > { %5779 = vmatpush2.msra.mxu1 %v3879_v30 }
 0x610   : > { %v4752_v29 = vpop.permute.xlu1 %4751 }
 0x611   : > { %v4759_v0 = vsel %vm11241_vm3, %v4752_v29, %v4754_v51  ;;  %5184 = vrot.lane.b32.xlu0 %v10199_v18, %s11612_s22  ;;  %v3848_v6 = vpop.permute.xlu0 %3847  ;;  %vm11616_vm3 = vcmask 15360  }
 0x612   : > { %3675 = vrot.lane.b32.xlu1 %v10293_v43, %s11544_s23  ;;  %5844 = vmatpush2.msra.mxu0 %v4759_v0  ;;  %vm11617_vm8 = vmmov %vm11616_vm3 }
 0x614   : > { %v10338_v15 = vpop.permute.xlu1 %3849 }
 0x615   : > { %5161 = vrot.lane.b32.xlu0 %v10208_v12, %s11613_s11  ;;  %v3854_v16 = vsel %vm11614_vm2, %v3848_v6, %v10338_v15  ;;  %v4729_v30 = vpop.permute.xlu0 %4728 }
 0x616   : > { %4053 = vrot.lane.b32.xlu1 %v10293_v43, %s11348_s15  ;;  %5780 = vmatprep.subr.mxu1 %v3854_v16  ;;  %s11623_s15 = smov 84  }
 0x618   : > { %v10346_v29 = vpop.permute.xlu1 %4730 }
 0x619   : > { %11615 = vst [vmem:[#allocation52_spill] sm:$0xff] %v10346_v29  ;;  %3649 = vrot.lane.b32.xlu0 %v10293_v43, %s11444_s9  ;;  %v4735_v0 = vsel %vm11616_vm3, %v4729_v30, %v10346_v29  ;;  %v3846_v51 = vpop.permute.xlu0 %3845  ;;  %s11619_s9 = smov 83   ;;  %vm11620_vm3 = vcmask 23552  }
 0x61a   : > { %5163 = vrot.lane.b32.xlu1 %v10293_v43, %s11613_s11  ;;  %5845 = vmatprep.subr.mxu0 %v4735_v0  ;;  %v3853_v24 = vsel %vm11614_vm2, %v3846_v51, %v3848_v6  ;;  %vm11622_vm2 = vmmov %vm11620_vm3 }
 0x61b   : > { %5781 = vmatpush2.msra.mxu1 %v3853_v24 }
 0x61c   : > { %v4727_v16 = vpop.permute.xlu1 %4726  ;;  %5783 = vmatmul.mubr.f32.vlgmr.msra.gmra.mxu1 %v10355_v7 }
 0x61d   : > { %v4734_v55 = vsel %vm11617_vm8, %v4727_v16, %v4729_v30  ;;  %4028 = vrot.lane.b32.xlu0 %v10293_v43, %s11555_s3  ;;  %v4704_v29 = vpop.permute.xlu0 %4703  ;;  %vm5424_vm8 = vcmask 465920   ;;  %s11621_s3 = smov 121  }
 0x61e   : > { %5159 = vrot.lane.b32.xlu1 %v10199_v18, %s11613_s11  ;;  %5846 = vmatpush2.msra.mxu0 %v4734_v55 }
 0x620   : > { %v10366_v20 = vpop.permute.xlu1 %4705 }
 0x621   : > { %11618 = vst [vmem:[#allocation71_spill] sm:$0xff] %v10366_v20  ;;  %5138 = vrot.lane.b32.xlu0 %v10293_v43, %s11619_s9  ;;  %v4710_v6 = vsel %vm11620_vm3, %v4704_v29, %v10366_v20  ;;  %v5419_v0 = vpop.permute.xlu0 %5418  ;;  %vm5398_vm3 = vcmask 474112  }
 0x622   : > { %5136 = vrot.lane.b32.xlu1 %v10208_v12, %s11619_s9  ;;  %5847 = vmatprep.subr.mxu0 %v4710_v6 }
 0x624   : > { %v10374_v30 = vpop.permute.xlu1 %5420 }
 0x625   : > { %5134 = vrot.lane.b32.xlu0 %v10199_v18, %s11619_s9  ;;  %v5426_v55 = vsel %vm5424_vm8, %v5419_v0, %v10374_v30  ;;  %v4702_v51 = vpop.permute.xlu0 %4701 }
 0x626   : > { %3623 = vrot.lane.b32.xlu1 %v10293_v43, %s11621_s3  ;;  %5860 = vmatprep.subr.mxu1 %v5426_v55  ;;  %v4709_v24 = vsel %vm11622_vm2, %v4702_v51, %v4704_v29  ;;  %vm11628_vm2 = vcmask 39936   ;;  %s11638_s3 = smov 126  }
 0x627   : > { %5848 = vmatpush2.msra.mxu0 %v4709_v24 }
 0x628   : > { %v5417_v16 = vpop.permute.xlu1 %5416 }
 0x629   : > { %v5425_v6 = vsel %vm5424_vm8, %v5417_v16, %v5419_v0  ;;  %5111 = vrot.lane.b32.xlu0 %v10208_v12, %s11623_s15  ;;  %v4679_v20 = vpop.permute.xlu0 %4678 }
 0x62a   : > { %4003 = vrot.lane.b32.xlu1 %v10293_v43, %s11317_s14  ;;  %5861 = vmatpush1.msra.mxu1 %v5425_v6  ;;  %s11626_s14 = smov 85  }
 0x62c   : > { %v10388_v22 = vpop.permute.xlu1 %4680 }
 0x62d   : > { %11624 = vst [vmem:[#allocation64_spill] sm:$0xff] %v10388_v22  ;;  %3597 = vrot.lane.b32.xlu0 %v10293_v43, %s11625_s25  ;;  %v4685_v29 = vsel %vm11251_vm1, %v4679_v20, %v10388_v22  ;;  %v5393_v55 = vpop.permute.xlu0 %5392  ;;  %s11643_s25 = smov 88  }
 0x62e   : > { %5113 = vrot.lane.b32.xlu1 %v10293_v43, %s11623_s15  ;;  %5849 = vmatprep.subr.mxu0 %v4685_v29 }
 0x630   : > { %v10396_v0 = vpop.permute.xlu1 %5394 }
 0x631   : > { %3978 = vrot.lane.b32.xlu0 %v10293_v43, %s11559_s6  ;;  %v5400_v51 = vsel %vm5398_vm3, %v5393_v55, %v10396_v0  ;;  %v4677_v24 = vpop.permute.xlu0 %4676  ;;  %s11629_s6 = smov 123  }
 0x632   : > { %5109 = vrot.lane.b32.xlu1 %v10199_v18, %s11623_s15  ;;  %5862 = vmatprep.subr.mxu1 %v5400_v51  ;;  %v4684_v16 = vsel %vm11251_vm1, %v4677_v24, %v4679_v20  ;;  %vm5372_vm1 = vcmask 482304  }
 0x633   : > { %5850 = vmatpush2.msra.mxu0 %v4684_v16 }
 0x634   : > { %v5391_v6 = vpop.permute.xlu1 %5390 }
 0x635   : > { %v5399_v29 = vsel %vm5398_vm3, %v5391_v6, %v5393_v55  ;;  %5088 = vrot.lane.b32.xlu0 %v10293_v43, %s11626_s14  ;;  %v4654_v22 = vpop.permute.xlu0 %4653  ;;  %v10427_v6 = vld [vmem:[%s11578_s18 + $0x10] sm:$0xff] }
 0x636   : > { %5086 = vrot.lane.b32.xlu1 %v10208_v12, %s11626_s14  ;;  %5863 = vmatpush1.msra.mxu1 %v5399_v29 }
 0x638   : > { %v10410_v2 = vpop.permute.xlu1 %4655 }
 0x639   : > { %11627 = vst [vmem:[#allocation41_spill] sm:$0xff] %v10410_v2  ;;  %5084 = vrot.lane.b32.xlu0 %v10199_v18, %s11626_s14  ;;  %v4660_v20 = vsel %vm11628_vm2, %v4654_v22, %v10410_v2  ;;  %v5367_v51 = vpop.permute.xlu0 %5366 }
 0x63a   : > { %3571 = vrot.lane.b32.xlu1 %v10293_v43, %s11629_s6  ;;  %5851 = vmatprep.subr.mxu0 %v4660_v20  ;;  %s11631_s6 = smov 124  }
 0x63c   : > { %v10418_v55 = vpop.permute.xlu1 %5368 }
 0x63d   : > { %5061 = vrot.lane.b32.xlu0 %v10208_v12, %s11630_s8  ;;  %v5374_v24 = vsel %vm5372_vm1, %v5367_v51, %v10418_v55  ;;  %v4652_v16 = vpop.permute.xlu0 %4651 }
 0x63e   : > { %3953 = vrot.lane.b32.xlu1 %v10293_v43, %s11563_s19  ;;  %5864 = vmatprep.subr.mxu1 %v5374_v24  ;;  %v4659_v29 = vsel %vm11628_vm2, %v4652_v16, %v4654_v22  ;;  %vm5346_vm2 = vcmask 490496   ;;  %s11634_s19 = smov 87  }
 0x63f   : > { %5852 = vmatpush2.msra.mxu0 %v4659_v29 }
 0x640   : > { %v5365_v20 = vpop.permute.xlu1 %5364  ;;  %5854 = vmatmul.mubr.f32.vlgmr.msra.gmra.mxu0 %v10427_v6 }
 0x641   : > { %v5373_v2 = vsel %vm5372_vm1, %v5365_v20, %v5367_v51  ;;  %3545 = vrot.lane.b32.xlu0 %v10293_v43, %s11631_s6  ;;  %v4230_v14 = vpop.permute.xlu0 %4229  ;;  %5995 = vmatprep.mubr.f32.mxu0 %v10126_v56  ;;  %s11644_s6 = smov 6  }
 0x642   : > { %5063 = vrot.lane.b32.xlu1 %v10293_v43, %s11630_s8  ;;  %5865 = vmatpush1.msra.mxu1 %v5373_v2  ;;  %v4233_v24 = vsel %vm11632_vm13, %v9996_v21, %v4230_v14  ;;  %vm11635_vm13 = vcmask 433152  }
 0x643   : > { %7025 = vmatprep.subr.mxu0 %v4233_v24 }
 0x644   : > { %v5341_v22 = vpop.permute.xlu1 %5340 }
 0x645   : > { %3928 = vrot.lane.b32.xlu0 %v10293_v43, %s11568_s16  ;;  %v10443_v51 = vpop.permute.xlu0 %5342  ;;  %s11636_s16 = smov 125  }
 0x646   : > { %5059 = vrot.lane.b32.xlu1 %v10199_v18, %s11630_s8  ;;  %v5348_v56 = vsel %vm5346_vm2, %v5341_v22, %v10443_v51 }
 0x647   : > { %5866 = vmatprep.subr.mxu1 %v5348_v56 }
 0x648   : > { %v3827_v16 = vpop.permute.xlu1 %3826 }
 0x649   : > { %v3830_v2 = vsel %vm11633_vm4, %v9651_v37, %v3827_v16  ;;  %5038 = vrot.lane.b32.xlu0 %v10293_v43, %s11634_s19  ;;  %v5339_v21 = vpop.permute.xlu0 %5338  ;;  %vm11256_vm4 = vcmask 498688  }
 0x64a   : > { %5036 = vrot.lane.b32.xlu1 %v10208_v12, %s11634_s19  ;;  %7026 = vmatpush3.msra.mxu0 %v3830_v2  ;;  %v5347_v14 = vsel %vm5346_vm2, %v5339_v21, %v5341_v22  ;;  %v10478_v21 = vld [vmem:[%s11578_s18 + $0x28] sm:$0xff] }
 0x64b   : > { %5867 = vmatpush1.msra.mxu1 %v5347_v14 }
 0x64c   : > { %v4205_v29 = vpop.permute.xlu1 %4204 }
 0x64d   : > { %5034 = vrot.lane.b32.xlu0 %v10199_v18, %s11634_s19  ;;  %v4208_v20 = vsel %vm11635_vm13, %v10018_v44, %v4205_v29  ;;  %v5315_v24 = vpop.permute.xlu0 %5314  ;;  %vm11637_vm13 = vcmask 809984  }
 0x64e   : > { %3519 = vrot.lane.b32.xlu1 %v10293_v43, %s11636_s16  ;;  %7027 = vmatprep.subr.mxu0 %v4208_v20  ;;  %s11640_s16 = smov 96  }
 0x650   : > { %v10462_v37 = vpop.permute.xlu1 %5316 }
 0x651   : > { %5444 = vrot.lane.b32.xlu0 %v10208_v12, %s11603_s10  ;;  %v5322_v22 = vsel %vm11256_vm4, %v5315_v24, %v10462_v37  ;;  %v3802_v56 = vpop.permute.xlu0 %3801 }
 0x652   : > { %3902 = vrot.lane.b32.xlu1 %v10293_v43, %s11608_s28  ;;  %5868 = vmatprep.subr.mxu1 %v5322_v22  ;;  %v3805_v44 = vsel %vm11637_vm13, %v9673_v23, %v3802_v56  ;;  %vm5294_vm13 = vcmask 506880  }
 0x653   : > { %7028 = vmatpush3.msra.mxu0 %v3805_v44 }
 0x654   : > { %v5313_v16 = vpop.permute.xlu1 %5312 }
 0x655   : > { %v5321_v2 = vsel %vm11256_vm4, %v5313_v16, %v5315_v24  ;;  %3493 = vrot.lane.b32.xlu0 %v10293_v43, %s11638_s3  ;;  %v4180_v12 = vpop.permute.xlu0 %4179  ;;  %vm11639_vm4 = vcmask 64512   ;;  %v10495_v24 = vld [vmem:[%s7676_s24 + $0x98] sm:$0xff]  ;;  %s11642_s3 = smov 127  }
 0x656   : > { %5446 = vrot.lane.b32.xlu1 %v10293_v43, %s11603_s10  ;;  %5869 = vmatpush1.msra.mxu1 %v5321_v2  ;;  %v4183_v23 = vsel %vm970_vm15, %v10040_v31, %v4180_v12  ;;  %vm11641_vm15 = vcmask 818176  }
 0x657   : > { %7029 = vmatprep.subr.mxu0 %v4183_v23  ;;  %6964 = vmatprep.mubr.msk.f32.mxu1 %vm11639_vm4, %v10478_v21  ;;  %vm11257_vm4 = vcmask 515072  }
 0x658   : > { %v5289_v14 = vpop.permute.xlu1 %5288 }
 0x659   : > { %3876 = vrot.lane.b32.xlu0 %v10293_v43, %s11640_s16  ;;  %v10488_v29 = vpop.permute.xlu0 %5290  ;;  %s11645_s16 = smov 7  }
 0x65a   : > { %5442 = vrot.lane.b32.xlu1 %v10199_v18, %s11603_s10  ;;  %v5296_v20 = vsel %vm5294_vm13, %v5289_v14, %v10488_v29 }
 0x65b   : > { %5870 = vmatprep.subr.mxu1 %v5296_v20 }
 0x65c   : > { %v3777_v31 = vpop.permute.xlu1 %3776 }
 0x65d   : > { %v3780_v22 = vsel %vm11641_vm15, %v9689_v13, %v3777_v31  ;;  %3467 = vrot.lane.b32.xlu0 %v10293_v43, %s11642_s3  ;;  %v5287_v56 = vpop.permute.xlu0 %5286  ;;  %vm5242_vm15 = vcmask 523264   ;;  %s11651_s3 = smov 24  }
 0x65e   : > { %5014 = vrot.lane.b32.xlu1 %v10495_v24, %s11643_s25  ;;  %7030 = vmatpush3.msra.mxu0 %v3780_v22  ;;  %v5295_v18 = vsel %vm5294_vm13, %v5287_v56, %v5289_v14  ;;  %s11685_s25 = smov 50  }
 0x65f   : > { %5871 = vmatpush1.msra.mxu1 %v5295_v18 }
 0x660   : > { %v4155_v44 = vpop.permute.xlu1 %4154 }
 0x661   : > { %3851 = vrot.lane.b32.xlu0 %v10293_v43, %s11573_s27  ;;  %v4158_v16 = vsel %vm2098_vm0, %v10062_v11, %v4155_v44  ;;  %v5263_v2 = vpop.permute.xlu0 %5262  ;;  %vm11646_vm0 = vcmask 826368   ;;  %s11647_s27 = smov 8  }
 0x662   : > { %4632 = vrot.lane.b32.xlu1 %v10293_v43, %s11644_s6  ;;  %7031 = vmatprep.subr.mxu0 %v4158_v16  ;;  %s11686_s6 = smov 51  }
 0x664   : > { %v10510_v13 = vpop.permute.xlu1 %5264 }
 0x665   : > { %4607 = vrot.lane.b32.xlu0 %v10293_v43, %s11645_s16  ;;  %v5270_v12 = vsel %vm11257_vm4, %v5263_v2, %v10510_v13  ;;  %v3752_v23 = vpop.permute.xlu0 %3751 }
 0x666   : > { %4989 = vrot.lane.b32.xlu1 %v10495_v24, %s11544_s23  ;;  %5872 = vmatprep.subr.mxu1 %v5270_v12  ;;  %v3755_v11 = vsel %vm11646_vm0, %v9705_v61, %v3752_v23  ;;  %s11648_s23 = smov 57   ;;  %vm11649_vm0 = vcmask 834560  }
 0x667   : > { %7032 = vmatpush3.msra.mxu0 %v3755_v11 }
 0x668   : > { %v5261_v14 = vpop.permute.xlu1 %5260 }
 0x669   : > { %v5269_v20 = vsel %vm11257_vm4, %v5261_v14, %v5263_v2  ;;  %4582 = vrot.lane.b32.xlu0 %v10293_v43, %s11647_s27  ;;  %v4129_v31 = vpop.permute.xlu0 %4128  ;;  %vm11652_vm4 = vcmask 588800   ;;  %s11756_s27 = sld [smem:[#allocation80_spill]] }
 0x66a   : > { %4964 = vrot.lane.b32.xlu1 %v10495_v24, %s11410_s17  ;;  %5873 = vmatpush1.msra.mxu1 %v5269_v20  ;;  %v4133_v22 = vsel %vm4130_vm7, %v10084_v39, %v4129_v31  ;;  %s11650_s17 = smov 58  }
 0x66b   : > { %7033 = vmatprep.subr.mxu0 %v4133_v22 }
 0x66c   : > { %v5237_v56 = vpop.permute.xlu1 %5236 }
 0x66d   : > { %4939 = vrot.lane.b32.xlu0 %v10495_v24, %s11385_s13  ;;  %v10529_v61 = vpop.permute.xlu0 %5238  ;;  %s11659_s13 = smov 111  }
 0x66e   : > { %5422 = vrot.lane.b32.xlu1 %v10495_v24, %s11648_s23  ;;  %v5244_v18 = vsel %vm5242_vm15, %v5237_v56, %v10529_v61 }
 0x66f   : > { %5874 = vmatprep.subr.mxu1 %v5244_v18 }
 0x670   : > { %v3727_v44 = vpop.permute.xlu1 %3726 }
 0x671   : > { %v3730_v16 = vsel %vm11649_vm0, %v9727_v54, %v3727_v44  ;;  %5396 = vrot.lane.b32.xlu0 %v10495_v24, %s11650_s17  ;;  %v5235_v39 = vpop.permute.xlu0 %5234  ;;  %vm11658_vm0 = vcmask 670720  }
 0x672   : > { %4556 = vrot.lane.b32.xlu1 %v10293_v43, %s11651_s3  ;;  %7034 = vmatpush3.msra.mxu0 %v3730_v16  ;;  %v5243_v2 = vsel %vm5242_vm15, %v5235_v39, %v5237_v56 }
 0x673   : > { %5875 = vmatpush1.msra.mxu1 %v5243_v2 }
 0x674   : > { %v4104_v12 = vpop.permute.xlu1 %4103 }
 0x675   : > { %4531 = vrot.lane.b32.xlu0 %v10293_v43, %s11401_s5  ;;  %v4107_v23 = vsel %vm11652_vm4, %v10106_v52, %v4104_v12  ;;  %v5212_v11 = vpop.permute.xlu0 %5211  ;;  %vm11653_vm4 = vcmask 842752   ;;  %s11666_s5 = smov 30  }
 0x676   : > { %4914 = vrot.lane.b32.xlu1 %v10495_v24, %s11387_s30  ;;  %7035 = vmatprep.subr.mxu0 %v4107_v23  ;;  %s11656_s30 = smov 28  }
 0x678   : > { %v10548_v54 = vpop.permute.xlu1 %5213 }
 0x679   : > { %4889 = vrot.lane.b32.xlu0 %v10495_v24, %s11389_s29  ;;  %v5218_v14 = vsel %vm3904_vm12, %v5212_v11, %v10548_v54  ;;  %v3702_v20 = vpop.permute.xlu0 %3701  ;;  %s11663_s29 = smov 63  }
 0x67a   : > { %5370 = vrot.lane.b32.xlu1 %v10495_v24, %s7491_s1  ;;  %5876 = vmatprep.subr.mxu1 %v5218_v14  ;;  %v3705_v52 = vsel %vm11653_vm4, %v9749_v26, %v3702_v20  ;;  %vm11660_vm4 = vcmask 982016   ;;  %s11668_s1 = smov 31  }
 0x67b   : > { %7036 = vmatpush3.msra.mxu0 %v3705_v52 }
 0x67c   : > { %v5210_v31 = vpop.permute.xlu1 %5209 }
 0x67d   : > { %v5217_v22 = vsel %vm3904_vm12, %v5210_v31, %v5212_v11  ;;  %5344 = vrot.lane.b32.xlu0 %v10495_v24, %s7492_s20  ;;  %v4079_v56 = vpop.permute.xlu0 %4078  ;;  %s11670_s20 = smov 32  }
 0x67e   : > { %4506 = vrot.lane.b32.xlu1 %v10293_v43, %s11373_s2  ;;  %5877 = vmatpush1.msra.mxu1 %v5217_v22  ;;  %v4082_v18 = vsel %vm2072_vm5, %v10134_v42, %v4079_v56  ;;  %s11654_s2 = smov 62   ;;  %vm11655_vm5 = vcmask 605184  }
 0x67f   : > { %7037 = vmatprep.subr.mxu0 %v4082_v18 }
 0x680   : > { %v5187_v44 = vpop.permute.xlu1 %5186 }
 0x681   : > { %4481 = vrot.lane.b32.xlu0 %v10293_v43, %s11371_s26  ;;  %v10567_v26 = vpop.permute.xlu0 %5188  ;;  %s11665_s26 = smov 64  }
 0x682   : > { %4864 = vrot.lane.b32.xlu1 %v10495_v24, %s11390_s21  ;;  %v5193_v16 = vsel %vm2962_vm14, %v5187_v44, %v10567_v26  ;;  %s11662_s21 = smov 112  }
 0x683   : > { %5878 = vmatprep.subr.mxu1 %v5193_v16 }
 0x684   : > { %v3676_v39 = vpop.permute.xlu1 %3675 }
 0x685   : > { %v3680_v2 = vsel %vm3677_vm6, %v9777_v63, %v3676_v39  ;;  %4839 = vrot.lane.b32.xlu0 %v10495_v24, %s11392_s7  ;;  %v5185_v42 = vpop.permute.xlu0 %5184  ;;  %s11657_s7 = smov 29  }
 0x686   : > { %5318 = vrot.lane.b32.xlu1 %v10495_v24, %s7493_s12  ;;  %7038 = vmatpush3.msra.mxu0 %v3680_v2  ;;  %v5192_v12 = vsel %vm2962_vm14, %v5185_v42, %v5187_v44  ;;  %s11672_s12 = smov 1  }
 0x687   : > { %5879 = vmatpush1.msra.mxu1 %v5192_v12 }
 0x688   : > { %v4054_v23 = vpop.permute.xlu1 %4053 }
 0x689   : > { %5292 = vrot.lane.b32.xlu0 %v10495_v24, %s11654_s2  ;;  %v4057_v11 = vsel %vm11655_vm5, %v10156_v35, %v4054_v23  ;;  %v5162_v14 = vpop.permute.xlu0 %5161  ;;  %vm11661_vm5 = vmmov %vm11658_vm0  ;;  %s11758_s2 = sld [smem:[#allocation81_spill]] }
 0x68a   : > { %4456 = vrot.lane.b32.xlu1 %v10293_v43, %s11656_s30  ;;  %7039 = vmatprep.subr.mxu0 %v4057_v11 }
 0x68c   : > { %v10586_v63 = vpop.permute.xlu1 %5163 }
 0x68d   : > { %4431 = vrot.lane.b32.xlu0 %v10293_v43, %s11657_s7  ;;  %v5168_v20 = vsel %vm11658_vm0, %v5162_v14, %v10586_v63  ;;  %v3650_v52 = vpop.permute.xlu0 %3649  ;;  %vm11664_vm0 = vcmask 613376  }
 0x68e   : > { %4814 = vrot.lane.b32.xlu1 %v10495_v24, %s11659_s13  ;;  %5880 = vmatprep.subr.mxu1 %v5168_v20  ;;  %v3654_v35 = vsel %vm11660_vm4, %v9802_v47, %v3650_v52  ;;  %vm11667_vm4 = vcmask 678912  }
 0x68f   : > { %7040 = vmatpush3.msra.mxu0 %v3654_v35 }
 0x690   : > { %v5160_v31 = vpop.permute.xlu1 %5159 }
 0x691   : > { %v5167_v22 = vsel %vm11661_vm5, %v5160_v31, %v5162_v14  ;;  %4788 = vrot.lane.b32.xlu0 %v10495_v24, %s11662_s21  ;;  %v4029_v56 = vpop.permute.xlu0 %4028  ;;  %vm11669_vm5 = vmmov %vm11667_vm4 }
 0x692   : > { %5266 = vrot.lane.b32.xlu1 %v10495_v24, %s11663_s29  ;;  %5881 = vmatpush1.msra.mxu1 %v5167_v22  ;;  %v4032_v18 = vsel %vm11664_vm0, %v10178_v4, %v4029_v56  ;;  %vm11671_vm0 = vcmask 621568   ;;  %s11769_s29 = sld [smem:[#allocation21_spill]] }
 0x693   : > { %7041 = vmatprep.subr.mxu0 %v4032_v18 }
 0x694   : > { %v5137_v44 = vpop.permute.xlu1 %5136 }
 0x695   : > { %5240 = vrot.lane.b32.xlu0 %v10495_v24, %s11665_s26  ;;  %v10605_v47 = vpop.permute.xlu0 %5138  ;;  %s11770_s26 = sld [smem:[#allocation16_spill]] }
 0x696   : > { %4406 = vrot.lane.b32.xlu1 %v10293_v43, %s11666_s5  ;;  %v5143_v16 = vsel %vm11667_vm4, %v5137_v44, %v10605_v47  ;;  %vm11674_vm4 = vcmask 998400  }
 0x697   : > { %5882 = vmatprep.subr.mxu1 %v5143_v16 }
 0x698   : > { %v3624_v39 = vpop.permute.xlu1 %3623  ;;  %s7119_s5 = smul.u32 96, %s11769_s29 }
 0x699   : > { %v3628_v2 = vsel %vm3625_vm11, %v9824_v59, %v3624_v39  ;;  %5215 = vrot.lane.b32.xlu0 %v10495_v24, %s11608_s28  ;;  %v5135_v4 = vpop.permute.xlu0 %5134  ;;  %vm11673_vm11 = vcmask 687104   ;;  %s11678_s28 = smov 49  }
 0x69a   : > { %4381 = vrot.lane.b32.xlu1 %v10293_v43, %s11668_s1  ;;  %7042 = vmatpush3.msra.mxu0 %v3628_v2  ;;  %v5142_v42 = vsel %vm11669_vm5, %v5135_v4, %v5137_v44  ;;  %vm11675_vm5 = vmmov %vm11673_vm11  ;;  %s363_s1 = scalar_lea.vmem [#allocation8], %s7119_s5 }
 0x69b   : > { %5883 = vmatpush1.msra.mxu1 %v5142_v42 }
 0x69c   : > { %v4004_v12 = vpop.permute.xlu1 %4003 }
 0x69d   : > { %4355 = vrot.lane.b32.xlu0 %v10293_v43, %s11670_s20  ;;  %v4007_v23 = vsel %vm11671_vm0, %v10212_v60, %v4004_v12  ;;  %v5112_v11 = vpop.permute.xlu0 %5111  ;;  %vm11677_vm0 = vcmask 629760   ;;  %s7120_s20 = smul.u32 1536, %s11770_s26 }
 0x69e   : > { %4757 = vrot.lane.b32.xlu1 %v10293_v43, %s11672_s12  ;;  %7043 = vmatprep.subr.mxu0 %v4007_v23  ;;  %s6243_s12 = sshll.u32 %s363_s1, 4  ;;  %s10913_s12 = int_to_ptr.vmem [resolvable:$true] %s6243_s12 }
 0x6a0   : > { %v10624_v59 = vpop.permute.xlu1 %5113 }
 0x6a1   : > { %4732 = vrot.lane.b32.xlu0 %v10293_v43, %s11396_s4  ;;  %v5118_v14 = vsel %vm11673_vm11, %v5112_v11, %v10624_v59  ;;  %v3598_v20 = vpop.permute.xlu0 %3597  ;;  %s11676_s4 = smov 48   ;;  %vm11680_vm11 = vcmask 695296  }
 0x6a2   : > { %5190 = vrot.lane.b32.xlu1 %v10495_v24, %s11612_s22  ;;  %5884 = vmatprep.subr.mxu1 %v5118_v14  ;;  %v3602_v60 = vsel %vm11674_vm4, %v9846_v33, %v3598_v20  ;;  %s11679_s22 = smov 3   ;;  %vm11681_vm4 = vcmask 1006592  }
 0x6a3   : > { %7044 = vmatpush3.msra.mxu0 %v3602_v60  ;;  %v10675_v60 = vpop.f32.mrf.mxu0 }
 0x6a4   : > { %v5110_v52 = vpop.permute.xlu1 %5109 }
 0x6a5   : > { %v5117_v35 = vsel %vm11675_vm5, %v5110_v52, %v5112_v11  ;;  %5165 = vrot.lane.b32.xlu0 %v10495_v24, %s11613_s11  ;;  %v3979_v31 = vpop.permute.xlu0 %3978  ;;  %s11682_s11 = smov 4   ;;  %vm11683_vm5 = vmmov %vm11680_vm11 }
 0x6a6   : > { %4329 = vrot.lane.b32.xlu1 %v10293_v43, %s11676_s4  ;;  %5885 = vmatpush1.msra.mxu1 %v5117_v35  ;;  %v3982_v22 = vsel %vm11677_vm0, %v10234_v53, %v3979_v31  ;;  %vm11684_vm0 = vcmask 637952   ;;  %v10685_v35 = vpop.f32.mrf.mxu0  ;;  %s11777_s4 = sld [smem:[#allocation19_spill]] }
 0x6a7   : > { %7045 = vmatprep.subr.mxu0 %v3982_v22 }
 0x6a8   : > { %v5087_v56 = vpop.permute.xlu1 %5086 }
 0x6a9   : > { %4304 = vrot.lane.b32.xlu0 %v10293_v43, %s11678_s28  ;;  %v10643_v33 = vpop.permute.xlu0 %5088 }
 0x6aa   : > { %4707 = vrot.lane.b32.xlu1 %v10293_v43, %s11679_s22  ;;  %v5093_v18 = vsel %vm11680_vm11, %v5087_v56, %v10643_v33  ;;  %vm11687_vm11 = vcmask 703488  }
 0x6ab   : > { %5886 = vmatprep.subr.mxu1 %v5093_v18 }
 0x6ac   : > { %v3572_v44 = vpop.permute.xlu1 %3571  ;;  %p11780_p1 = scmp.ne.s32.totalorder %s11777_s4, 0 }
 0x6ad   : > { %v3576_v16 = vsel %vm11681_vm4, %v9873_v5, %v3572_v44  ;;  %4682 = vrot.lane.b32.xlu0 %v10293_v43, %s11682_s11  ;;  %v5085_v53 = vpop.permute.xlu0 %5084  ;;  %vm11688_vm4 = vcmask 1014784   ;;  %s11778_s11 = sld [smem:[#allocation83_spill]] }
 0x6ae   : > { %5140 = vrot.lane.b32.xlu1 %v10495_v24, %s11619_s9  ;;  %7046 = vmatpush3.msra.mxu0 %v3576_v16  ;;  %v5092_v39 = vsel %vm11683_vm5, %v5085_v53, %v5087_v56  ;;  %vm11689_vm5 = vmmov %vm11687_vm11  ;;  %v10697_v56 = vpop.f32.mrf.mxu0  ;;  %s7344_s9 = scalar_lea.vmem %s10913_s12, 1536 }
 0x6af   : > { %5887 = vmatpush1.msra.mxu1 %v5092_v39  ;;  %p7345_p12 = scmp.ne.s32.totalorder %s10913_s12, %s7344_s9 }
 0x6b0   : > { %v3954_v2 = vpop.permute.xlu1 %3953  ;;  %v3414_v16 = vpop.f32.mrf.mxu0 }
 0x6b1   : > { %5115 = vrot.lane.b32.xlu0 %v10495_v24, %s11623_s15  ;;  %v3957_v4 = vsel %vm11684_vm0, %v10256_v34, %v3954_v2  ;;  %v5062_v42 = vpop.permute.xlu0 %5061  ;;  %vm11690_vm0 = vcmask 646144   ;;  %s11691_s15 = sld [smem:[#allocation79_spill]]  ;;  %p7346_p7 = pnand %p7345_p12, %p11780_p1 }
 0x6b2   : > { %4279 = vrot.lane.b32.xlu1 %v10293_v43, %s11685_s25  ;;  %7047 = vmatprep.subr.mxu0 %v3957_v4 }
 0x6b3   : > { %s11779_s25 = smov %s11778_s11  ;;  %p7347_p8 = pneg %p7346_p7 }
 0x6b4   : > { %v10662_v5 = vpop.permute.xlu1 %5063 }
 0x6b5   : > { %4254 = vrot.lane.b32.xlu0 %v10293_v43, %s11686_s6  ;;  %v5068_v12 = vsel %vm11687_vm11, %v5062_v42, %v10662_v5  ;;  %v3546_v23 = vpop.permute.xlu0 %3545  ;;  %vm11692_vm11 = vcmask 711680   ;;  %s10911_s6 = scalar_lea.hbm %s11778_s11, %s7120_s20 }
 0x6b6   : > { %4657 = vrot.lane.b32.xlu1 %v10293_v43, %s11586_s0  ;;  %5888 = vmatprep.subr.mxu1 %v5068_v12  ;;  %v3550_v34 = vsel %vm11688_vm4, %v9895_v50, %v3546_v23  ;;  %vm11693_vm4 = vmmov %vm11692_vm11  ;;  %s6230_s0 = scalar_lea.sflag [#allocation5], %s11769_s29 }
 0x6b7   : > { %7048 = vmatpush3.msra.mxu0 %v3550_v34  ;;  %v6636_v31 = vld [vmem:[%s11691_s15 + $0x10] sm:$0xff] }
 0x6b8   : > { %v5060_v11 = vpop.permute.xlu1 %5059 }
 0x6b9   : > { %v5067_v14 = vsel %vm11689_vm5, %v5060_v11, %v5062_v42  ;;  %5065 = vrot.lane.b32.xlu0 %v10495_v24, %s11630_s8  ;;  %v3929_v20 = vpop.permute.xlu0 %3928  ;;  %v10713_v11 = vld [vmem:[%s11578_s18 + $0x20] sm:$0xff]  ;;  %vm11695_vm5 = vcmask 719872  }
 0x6ba   : > { %5090 = vrot.lane.b32.xlu1 %v10495_v24, %s11626_s14  ;;  %5889 = vmatpush1.msra.mxu1 %v5067_v14  ;;  %v3932_v43 = vsel %vm11690_vm0, %v10278_v32, %v3929_v20  ;;  %v6963_v32 = vld [vmem:[%s11691_s15 + $0x18] sm:$0xff]  ;;  %vm11696_vm0 = vcmask 1039360   ;;  %s7500_s15 = smov [#allocation8]  }
 0x6bb   : > { %7049 = vmatprep.subr.mxu0 %v3932_v43  ;;  %s7348_s14 = sshll.u32 %s7500_s15, 4  ;;  %s7349_s14 = int_to_ptr.vmem [resolvable:$false] %s7348_s14 }
 0x6bc   : > { %v5037_v52 = vpop.permute.xlu1 %5036  ;;  %s7350_s8 = scalar_lea.vmem %s7349_s14, 3072  ;;  %p7351_p9 = scmp.lt.s32.totalorder %s10913_s12, %s7349_s14 }
 0x6bd   : > { %5448 = vrot.lane.b32.xlu0 %v10495_v24, %s11603_s10  ;;  %v10683_v50 = vpop.permute.xlu0 %5038  ;;  %p7352_p10 = scmp.lt.s32.totalorder %s7350_s8, %s7344_s9 }
 0x6be   : > { %5040 = vrot.lane.b32.xlu1 %v10495_v24, %s11634_s19  ;;  %v5043_v22 = vsel %vm11692_vm11, %v5037_v52, %v10683_v50  ;;  %vm11697_vm11 = vcmask 48128  }
 0x6bf   : > { %5890 = vmatprep.subr.mxu1 %v5043_v22  ;;  %p7353_p2 = por %p7352_p10, %p7351_p9 }
 0x6c0   : > { %v3520_v18 = vpop.permute.xlu1 %3519 }
 0x6c1   : > { %v3524_v44 = vsel %vm3521_vm10, %v9917_v9, %v3520_v18  ;;  %3127 = vperm.xlu0 %7263, %v6636_v31   ;;  %v5035_v24 = vpop.permute.xlu0 %5034  ;;  %vm11694_vm10 = vcmask 1031168   ;;  %v6643_v18 = vld [vmem:[%s7676_s24 + $0x88] sm:$0xff]  ;;  %p7354_p0 = pnand %p7353_p2, %p7347_p8 }
 0x6c2   : > { %7050 = vmatpush3.msra.mxu0 %v3524_v44  ;;  %v5042_v53 = vsel %vm11693_vm4, %v5035_v24, %v5037_v52  ;;  %5712 = vperm.xlu1 %7264, %v6963_v32   ;;  %vm11699_vm4 = vcmask 56320  }
 0x6c3   : > { %5891 = vmatpush1.msra.mxu1 %v5042_v53 }
 0x6c4   : > { %v3903_v39 = vpop.permute.xlu1 %3902 }
 0x6c5   : > { %v3907_v2 = vsel %vm3904_vm12, %v10304_v41, %v3903_v39  ;;  %v5445_v4 = vpop.permute.xlu0 %5444 }
 0x6c6   : > { %7051 = vmatprep.subr.mxu0 %v3907_v2 }
 0x6c8   : > { %v10704_v42 = vpop.permute.xlu1 %5446 }
 0x6c9   : > { %v5451_v12 = vsel %vm4130_vm7, %v5445_v4, %v10704_v42  ;;  %v3494_v9 = vpop.permute.xlu0 %3493 }
 0x6ca   : > { %5922 = vmatprep.subr.mxu1 %v5451_v12  ;;  %v3498_v23 = vsel %vm11694_vm10, %v9939_v49, %v3494_v9  ;;  %vm11700_vm10 = vcmask 64512  }
 0x6cb   : > { %7052 = vmatpush3.msra.mxu0 %v3498_v23 }
 0x6cc   : > { %v5443_v34 = vpop.permute.xlu1 %5442 }
 0x6cd   : > { %v5450_v41 = vsel %vm4130_vm7, %v5443_v34, %v5445_v4  ;;  %v3877_v14 = vpop.permute.xlu0 %3876 }
 0x6ce   : > { %5923 = vmatpush2.msra.mxu1 %v5450_v41  ;;  %v3881_v20 = vsel %vm3878_vm9, %v10316_v58, %v3877_v14  ;;  %vm11698_vm9 = vcmask 793600  }
 0x6cf   : > { %7053 = vmatprep.subr.mxu0 %v3881_v20  ;;  %5925 = vmatmul.mubr.f32.vlgmr.msra.gmra.mxu1 %v10713_v11 }
 0x6d0   : > { %v5015_v43 = vpop.permute.xlu1 %5014  ;;  %6065 = vmatprep.mubr.f32.mxu1 %v10191_v38 }
 0x6d1   : > { %v5019_v49 = vsel %vm11695_vm5, %v10070_v28, %v5015_v43  ;;  %v3468_v52 = vpop.permute.xlu0 %3467  ;;  %vm11701_vm5 = vcmask 859136  }
 0x6d2   : > { %7060 = vmatprep.subr.mxu1 %v5019_v49  ;;  %v3472_v31 = vsel %vm11696_vm0, %v9961_v46, %v3468_v52  ;;  %vm11703_vm0 = vcmask 867328  }
 0x6d3   : > { %7054 = vmatpush3.msra.mxu0 %v3472_v31 }
 0x6d4   : > { %v4633_v22 = vpop.permute.xlu1 %4632 }
 0x6d5   : > { %v4636_v32 = vsel %vm11697_vm11, %v9713_v45, %v4633_v22  ;;  %v3852_v58 = vpop.permute.xlu0 %3851  ;;  %vm11704_vm11 = vcmask 195584  }
 0x6d6   : > { %7061 = vmatpush3.msra.mxu1 %v4636_v32  ;;  %v3855_v44 = vsel %vm11698_vm9, %v10338_v15, %v3852_v58  ;;  %vm11706_vm9 = vcmask 203776   ;;  %v11716_v58 = vld [vmem:[#allocation70_spill] sm:$0xff] }
 0x6d7   : > { %7055 = vmatprep.subr.mxu0 %v3855_v44 }
 0x6d8   : > { %v4990_v38 = vpop.permute.xlu1 %4989  ;;  %7056 = vmatpush3.msra.mxu0 %v6643_v18 }
 0x6d9   : > { %v4993_v28 = vsel %vm3677_vm6, %v10092_v25, %v4990_v38  ;;  %v4608_v24 = vpop.permute.xlu0 %4607  ;;  %6071 = vmatprep.subr.mxu0 %v11307_v3  ;;  %5996 = vmatmul.mubr.f32.vlgmr.msra.gmra.mxu0 %v10355_v7  ;;  %vm11702_vm6 = vmmov %vm11700_vm10  ;;  %v11718_v38 = vld [vmem:[#allocation47_spill] sm:$0xff] }
 0x6da   : > { %7062 = vmatprep.subr.mxu1 %v4993_v28  ;;  %v4611_v45 = vsel %vm11699_vm4, %v9735_v62, %v4608_v24  ;;  %6965 = vmatprep.mubr.msk.f32.mxu0 %vm11700_vm10, %v10478_v21  ;;  %vm11708_vm4 = vcmask 211968   ;;  %vm11710_vm10 = vcmask 220160  }
 0x6db   : > { %7063 = vmatpush3.msra.mxu1 %v4611_v45 }
 0x6dc   : > { %v4965_v46 = vpop.permute.xlu1 %4964 }
 0x6dd   : > { %v4968_v15 = vsel %vm11701_vm5, %v10114_v17, %v4965_v46  ;;  %v4583_v16 = vpop.permute.xlu0 %4582  ;;  %vm11711_vm5 = vcmask 498688  }
 0x6de   : > { %7064 = vmatprep.subr.mxu1 %v4968_v15  ;;  %v4586_v25 = vsel %vm11702_vm6, %v9760_v19, %v4583_v16  ;;  %vm11715_vm6 = vcmask 228352  }
 0x6df   : > { %7065 = vmatpush3.msra.mxu1 %v4586_v25  ;;  %v6854_v25 = vld [vmem:[%s7676_s24 + $0x90] sm:$0xff] }
 0x6e0   : > { %v5423_v53 = vpop.permute.xlu1 %5422 }
 0x6e1   : > { %v5427_v7 = vsel %vm5424_vm8, %v10374_v30, %v5423_v53  ;;  %v4940_v39 = vpop.permute.xlu0 %4939  ;;  %vm11705_vm8 = vcmask 875520   ;;  %v11723_v53 = vld [vmem:[#allocation55_spill] sm:$0xff] }
 0x6e2   : > { %6072 = vmatpush1.msra.mxu0 %v5427_v7  ;;  %v4943_v62 = vsel %vm11703_vm0, %v10142_v1, %v4940_v39  ;;  %vm11717_vm0 = vcmask 908288  }
 0x6e3   : > { %7066 = vmatprep.subr.mxu1 %v4943_v62  ;;  %6073 = vmatprep.subr.mxu0 %v11307_v3 }
 0x6e4   : > { %v4557_v21 = vpop.permute.xlu1 %4556 }
 0x6e5   : > { %v4561_v17 = vsel %vm11704_vm11, %v9785_v57, %v4557_v21  ;;  %v5397_v2 = vpop.permute.xlu0 %5396  ;;  %vm11719_vm11 = vcmask 236544   ;;  %v11725_v21 = vld [vmem:[#allocation68_spill] sm:$0xff] }
 0x6e6   : > { %7067 = vmatpush3.msra.mxu1 %v4561_v17  ;;  %v5401_v19 = vsel %vm5398_vm3, %v10396_v0, %v5397_v2  ;;  %vm11707_vm3 = vcmask 883712  }
 0x6e7   : > { %6074 = vmatpush1.msra.mxu0 %v5401_v19 }
 0x6e8   : > { %v4915_v4 = vpop.permute.xlu1 %4914  ;;  %6075 = vmatprep.subr.mxu0 %v11307_v3 }
 0x6e9   : > { %v4918_v30 = vsel %vm11705_vm8, %v10164_v40, %v4915_v4  ;;  %v4532_v1 = vpop.permute.xlu0 %4531  ;;  %vm11720_vm8 = vcmask 515072  }
 0x6ea   : > { %7068 = vmatprep.subr.mxu1 %v4918_v30  ;;  %v4535_v12 = vsel %vm11706_vm9, %v9810_v48, %v4532_v1  ;;  %vm11724_vm9 = vcmask 244736   ;;  %v11727_v30 = vld [vmem:[#allocation42_spill] sm:$0xff] }
 0x6eb   : > { %7069 = vmatpush3.msra.mxu1 %v4535_v12  ;;  %v11729_v12 = vld [vmem:[#allocation45_spill] sm:$0xff] }
 0x6ec   : > { %v5371_v9 = vpop.permute.xlu1 %5370 }
 0x6ed   : > { %v5375_v57 = vsel %vm5372_vm1, %v10418_v55, %v5371_v9  ;;  %v4890_v23 = vpop.permute.xlu0 %4889  ;;  %vm11709_vm1 = vcmask 891904  }
 0x6ee   : > { %6076 = vmatpush1.msra.mxu0 %v5375_v57  ;;  %v4893_v0 = vsel %vm11707_vm3, %v10186_v36, %v4890_v23  ;;  %vm11726_vm3 = vcmask 252928  }
 0x6ef   : > { %7070 = vmatprep.subr.mxu1 %v4893_v0  ;;  %6077 = vmatprep.subr.mxu0 %v11307_v3 }
 0x6f0   : > { %v4507_v34 = vpop.permute.xlu1 %4506 }
 0x6f1   : > { %v4510_v40 = vsel %vm11708_vm4, %v9832_v27, %v4507_v34  ;;  %v5345_v41 = vpop.permute.xlu0 %5344  ;;  %vm11728_vm4 = vcmask 7168  }
 0x6f2   : > { %7071 = vmatpush3.msra.mxu1 %v4510_v40  ;;  %v5349_v48 = vsel %vm5346_vm2, %v10443_v51, %v5345_v41  ;;  %v11712_v51 = vld [vmem:[#allocation53_spill] sm:$0xff]  ;;  %vm11713_vm2 = vcmask 900096   ;;  %v11733_v41 = vld [vmem:[#allocation54_spill] sm:$0xff] }
 0x6f3   : > { %6078 = vmatpush1.msra.mxu0 %v5349_v48 }
 0x6f4   : > { %v4865_v14 = vpop.permute.xlu1 %4864  ;;  %6079 = vmatprep.subr.mxu0 %v11307_v3 }
 0x6f5   : > { %v4868_v55 = vsel %vm11709_vm1, %v10220_v8, %v4865_v14  ;;  %v4482_v36 = vpop.permute.xlu0 %4481  ;;  %v11714_v8 = vld [vmem:[#allocation49_spill] sm:$0xff]  ;;  %vm11734_vm1 = vcmask 392192  }
 0x6f6   : > { %7072 = vmatprep.subr.mxu1 %v4868_v55  ;;  %v4485_v20 = vsel %vm11710_vm10, %v9857_v10, %v4482_v36  ;;  %vm11735_vm10 = vcmask 670720  }
 0x6f7   : > { %7073 = vmatpush3.msra.mxu1 %v4485_v20 }
 0x6f8   : > { %v5319_v43 = vpop.permute.xlu1 %5318 }
 0x6f9   : > { %v5323_v27 = vsel %vm11711_vm5, %v10462_v37, %v5319_v43  ;;  %v4840_v49 = vpop.permute.xlu0 %4839  ;;  %vm11739_vm5 = vcmask 400384  }
 0x6fa   : > { %6080 = vmatpush1.msra.mxu0 %v5323_v27  ;;  %v4843_v52 = vsel %vm11713_vm2, %v11712_v51, %v4840_v49  ;;  %v11738_v27 = vld [vmem:[#allocation69_spill] sm:$0xff]  ;;  %vm11740_vm2 = vcmask 678912  }
 0x6fb   : > { %7074 = vmatprep.subr.mxu1 %v4843_v52  ;;  %6081 = vmatprep.subr.mxu0 %v11307_v3 }
 0x6fc   : > { %v4457_v31 = vpop.permute.xlu1 %4456 }
 0x6fd   : > { %v4460_v22 = vsel %vm11715_vm6, %v11714_v8, %v4457_v31  ;;  %v5293_v32 = vpop.permute.xlu0 %5292  ;;  %vm11742_vm6 = vcmask 31744  }
 0x6fe   : > { %7075 = vmatpush3.msra.mxu1 %v4460_v22  ;;  %v5297_v10 = vsel %vm5294_vm13, %v10488_v29, %v5293_v32  ;;  %v11721_v29 = vld [vmem:[#allocation66_spill] sm:$0xff]  ;;  %vm11722_vm13 = vcmask 916480   ;;  %v11743_v32 = vld [vmem:[#allocation67_spill] sm:$0xff] }
 0x6ff   : > { %6082 = vmatpush1.msra.mxu0 %v5297_v10 }
 0x700   : > { %v4815_v37 = vpop.permute.xlu1 %4814  ;;  %6083 = vmatprep.subr.mxu0 %v11307_v3 }
 0x701   : > { %v4818_v18 = vsel %vm11717_vm0, %v11716_v58, %v4815_v37  ;;  %v4432_v44 = vpop.permute.xlu0 %4431  ;;  %vm11744_vm0 = vcmask 408576  }
 0x702   : > { %7076 = vmatprep.subr.mxu1 %v4818_v18  ;;  %v4435_v28 = vsel %vm11719_vm11, %v11718_v38, %v4432_v44  ;;  %vm11745_vm11 = vcmask 687104  }
 0x703   : > { %7077 = vmatpush3.msra.mxu1 %v4435_v28  ;;  %v11748_v28 = vld [vmem:[#allocation43_spill] sm:$0xff] }
 0x704   : > { %v5267_v24 = vpop.permute.xlu1 %5266 }
 0x705   : > { %v5271_v45 = vsel %vm11720_vm8, %v10510_v13, %v5267_v24  ;;  %v4789_v46 = vpop.permute.xlu0 %4788  ;;  %vm11747_vm8 = vcmask 39936  }
 0x706   : > { %6084 = vmatpush1.msra.mxu0 %v5271_v45  ;;  %v4793_v15 = vsel %vm11722_vm13, %v11721_v29, %v4789_v46  ;;  %vm11749_vm13 = vcmask 416768   ;;  %v3271_v45 = vpop.f32.mrf.mxu1 }
 0x707   : > { %7078 = vmatprep.subr.mxu1 %v4793_v15  ;;  %6085 = vmatprep.subr.mxu0 %v11307_v3 }
 0x708   : > { %v4407_v16 = vpop.permute.xlu1 %4406 }
 0x709   : > { %v4410_v7 = vsel %vm11724_vm9, %v11723_v53, %v4407_v16  ;;  %v5241_v39 = vpop.permute.xlu0 %5240  ;;  %vm11750_vm9 = vcmask 695296   ;;  %v3273_v16 = vpop.f32.mrf.mxu1 }
 0x70a   : > { %7079 = vmatpush3.msra.mxu1 %v4410_v7  ;;  %v5245_v62 = vsel %vm5242_vm15, %v10529_v61, %v5241_v39  ;;  %vm11730_vm15 = vcmask 261120  }
 0x70b   : > { %7080 = vmatprep.subr.mxu1 %v6854_v25  ;;  %6086 = vmatpush1.msra.mxu0 %v5245_v62 }
 0x70c   : > { %v4382_v13 = vpop.permute.xlu1 %4381  ;;  %6087 = vmatprep.subr.mxu0 %v11307_v3 }
 0x70d   : > { %v4385_v17 = vsel %vm11726_vm3, %v11725_v21, %v4382_v13  ;;  %v5216_v2 = vpop.permute.xlu0 %5215  ;;  %vm11751_vm3 = vcmask 703488  }
 0x70e   : > { %7081 = vmatpush3.msra.mxu1 %v4385_v17  ;;  %v5219_v19 = vsel %vm3904_vm12, %v10548_v54, %v5216_v2  ;;  %v11731_v54 = vld [vmem:[#allocation52_spill] sm:$0xff]  ;;  %vm11732_vm12 = vcmask 15360  }
 0x70f   : > { %6088 = vmatpush1.msra.mxu0 %v5219_v19  ;;  %v11753_v19 = vld [vmem:[#allocation29_spill] sm:$0xff] }
 0x710   : > { %v4758_v4 = vpop.permute.xlu1 %4757  ;;  %6089 = vmatprep.subr.mxu0 %v11307_v3 }
 0x711   : > { %v4761_v61 = vsel %vm11728_vm4, %v11727_v30, %v4758_v4  ;;  %v4356_v1 = vpop.permute.xlu0 %4355  ;;  %vm11752_vm4 = vcmask 711680   ;;  %v11754_v4 = vld [vmem:[#allocation26_spill] sm:$0xff]  ;;  %v11755_v30 = vld [vmem:[#allocation24_spill] sm:$0xff] }
 0x712   : > { %7082 = vmatprep.subr.mxu1 %v4761_v61  ;;  %v4360_v9 = vsel %vm11730_vm15, %v11729_v12, %v4356_v1 }
 0x713   : > { %7083 = vmatpush3.msra.mxu1 %v4360_v9 }
 0x714   : > { %v5191_v57 = vpop.permute.xlu1 %5190 }
 0x715   : > { %v5194_v23 = vsel %vm2962_vm14, %v10567_v26, %v5191_v57  ;;  %v4733_v0 = vpop.permute.xlu0 %4732  ;;  %v11736_v26 = vld [vmem:[#allocation71_spill] sm:$0xff]  ;;  %vm11737_vm14 = vcmask 23552  }
 0x716   : > { %6090 = vmatpush1.msra.mxu0 %v5194_v23  ;;  %v4736_v34 = vsel %vm11732_vm12, %v11731_v54, %v4733_v0 }
 0x717   : > { %7084 = vmatprep.subr.mxu1 %v4736_v34  ;;  %6091 = vmatprep.subr.mxu0 %v11307_v3  ;;  %v5855_v34 = vpop.f32.mrf.mxu0 }
 0x718   : > { %v4330_v40 = vpop.permute.xlu1 %4329 }
 0x719   : > { %v4334_v48 = vsel %vm11734_vm1, %v11733_v41, %v4330_v40  ;;  %v5166_v14 = vpop.permute.xlu0 %5165 }
 0x71a   : > { %7085 = vmatpush3.msra.mxu1 %v4334_v48  ;;  %v5169_v55 = vsel %vm11735_vm10, %v10586_v63, %v5166_v14  ;;  %v11741_v63 = vld [vmem:[#allocation64_spill] sm:$0xff]  ;;  %v5857_v48 = vpop.f32.mrf.mxu0  ;;  %vm11764_vm10 = vcmask 7168  }
 0x71b   : > { %6092 = vmatpush1.msra.mxu0 %v5169_v55 }
 0x71c   : > { %v4708_v36 = vpop.permute.xlu1 %4707  ;;  %6093 = vmatprep.subr.mxu0 %v11307_v3 }
 0x71d   : > { %v4711_v20 = vsel %vm11737_vm14, %v11736_v26, %v4708_v36  ;;  %v4305_v43 = vpop.permute.xlu0 %4304 }
 0x71e   : > { %7086 = vmatprep.subr.mxu1 %v4711_v20  ;;  %v4308_v49 = vsel %vm11739_vm5, %v11738_v27, %v4305_v43  ;;  %vm11766_vm5 = vcmask 23552  }
 0x71f   : > { %7087 = vmatpush3.msra.mxu1 %v4308_v49 }
 0x720   : > { %v5141_v51 = vpop.permute.xlu1 %5140 }
 0x721   : > { %v5144_v52 = vsel %vm11740_vm2, %v10605_v47, %v5141_v51  ;;  %v4683_v31 = vpop.permute.xlu0 %4682  ;;  %v11746_v47 = vld [vmem:[#allocation41_spill] sm:$0xff]  ;;  %vm11767_vm2 = vmmov %vm11742_vm6 }
 0x722   : > { %6094 = vmatpush1.msra.mxu0 %v5144_v52  ;;  %v4686_v8 = vsel %vm11742_vm6, %v11741_v63, %v4683_v31  ;;  %vm11768_vm6 = vmmov %vm11767_vm2 }
 0x723   : > { %7088 = vmatprep.subr.mxu1 %v4686_v8  ;;  %6095 = vmatprep.subr.mxu0 %v11307_v3 }
 0x724   : > { %v4280_v22 = vpop.permute.xlu1 %4279 }
 0x725   : > { %v4283_v10 = vsel %vm11744_vm0, %v11743_v32, %v4280_v22  ;;  %v5116_v37 = vpop.permute.xlu0 %5115 }
 0x726   : > { %7089 = vmatpush3.msra.mxu1 %v4283_v10  ;;  %v5119_v58 = vsel %vm11745_vm11, %v10624_v59, %v5116_v37 }
 0x727   : > { %6096 = vmatpush1.msra.mxu0 %v5119_v58 }
 0x728   : > { %v4658_v18 = vpop.permute.xlu1 %4657  ;;  %6097 = vmatprep.subr.mxu0 %v11307_v3 }
 0x729   : > { %v4661_v44 = vsel %vm11747_vm8, %v11746_v47, %v4658_v18  ;;  %v4255_v38 = vpop.permute.xlu0 %4254 }
 0x72a   : > { %7090 = vmatprep.subr.mxu1 %v4661_v44  ;;  %v4258_v24 = vsel %vm11749_vm13, %v11748_v28, %v4255_v38 }
 0x72b   : > { %7091 = vmatpush3.msra.mxu1 %v4258_v24 }
 0x72c   : > { %v5091_v46 = vpop.permute.xlu1 %5090  ;;  %6066 = vmatmul.mubr.f32.vlgmr.msra.gmra.mxu1 %v10427_v6 }
 0x72d   : > { %v5094_v59 = vsel %vm11750_vm9, %v10643_v33, %v5091_v46  ;;  %v5066_v29 = vpop.permute.xlu0 %5065  ;;  %v7022_v33 = vpop.f32.mrf.mxu1 }
 0x72e   : > { %6098 = vmatpush1.msra.mxu0 %v5094_v59  ;;  %v5069_v15 = vsel %vm11751_vm3, %v10662_v5, %v5066_v29 }
 0x72f   : > { %6099 = vmatprep.subr.mxu0 %v11307_v3  ;;  %v7023_v5 = vpop.f32.mrf.mxu1 }
 0x730   : > { %v5041_v25 = vpop.permute.xlu1 %5040  ;;  %6100 = vmatpush1.msra.mxu0 %v5069_v15  ;;  %v7024_v39 = vadd.f32 %v7023_v5, %v7022_v33  ;;  %v6640_v15 = vld [vmem:[%s11758_s2 + $0x10] sm:$0xff] }
 0x731   : > { %v5044_v53 = vsel %vm11752_vm4, %v10683_v50, %v5041_v25  ;;  %6101 = vmatprep.subr.mxu0 %v11307_v3  ;;  %v5449_v7 = vpop.permute.xlu0 %5448  ;;  %v5784_v0 = vpop.f32.mrf.mxu1 }
 0x732   : > { %v5452_v6 = vsel %vm4130_vm7, %v10704_v42, %v5449_v7  ;;  %6102 = vmatpush1.msra.mxu0 %v5044_v53  ;;  %vm11757_vm7 = vmmov %vm11732_vm12  ;;  %v6966_v7 = vld [vmem:[%s11756_s27 + $0x18] sm:$0xff] }
 0x733   : > { %6133 = vmatprep.subr.mxu0 %v11307_v3  ;;  %v5786_v40 = vpop.f32.mrf.mxu1  ;;  %vm11759_vm15 = vmmov %vm11757_vm7 }
 0x734   : > { %6134 = vmatpush2.msra.mxu0 %v5452_v6  ;;  %vm11760_vm12 = vmmov %vm11757_vm7 }
 0x735   : > { %6136 = vmatmul.mubr.f32.vlgmr.msra.gmra.mxu0 %v10713_v11  ;;  %vm11761_vm1 = vmmov %vm11757_vm7 }
 0x736   : > { %vm11765_vm14 = vmmov %vm11761_vm1 }
 0x73c   : > { %v3128_v62 = vpop.permute.xlu0 %3127 }
 0x73d   : > { %v3201_v13 = vadd.f32 %v10675_v60, %v3128_v62  ;;  %v3203_v50 = vadd.f32 %v10685_v35, %v3128_v62  ;;  %v3343_v21 = vadd.f32 %v7024_v39, %v3128_v62  ;;  %v5713_v35 = vpop.permute.xlu1 %5712 }
 0x73e   : > { %v5785_v26 = vadd.f32 %v5784_v0, %v5713_v35  ;;  %v5787_v20 = vadd.f32 %v5786_v40, %v5713_v35 }
 0x73f   : > { %v10846_v17 = vadd.f32 %v3271_v45, %v3201_v13  ;;  %v10848_v2 = vadd.f32 %v3273_v16, %v3203_v50  ;;  %v10851_v42 = vadd.f32 %v10697_v56, %v3343_v21  ;;  %v6639_v56 = vld [vmem:[%s11756_s27 + $0x10] sm:$0xff] }
 0x740   : > { %v5858_v51 = vadd.f32 %v5857_v48, %v5787_v20  ;;  %v5856_v52 = vadd.f32 %v5855_v34, %v5785_v26 }
 0x741   : > { %v3416_v3 = vmul.f32 %v10846_v17, %v11753_v19  ;;  %v3417_v11 = vmul.f32 %v10848_v2, %v11754_v4  ;;  %v3418_v61 = vmul.f32 %v10851_v42, %v11755_v30 }
 0x743   : > { %v3419_v60 = vadd.f32 %v3417_v11, %v3416_v3 }
 0x745   : > { %v3420_v1 = vadd.f32 %v3419_v60, %v3418_v61 }
 0x747   : > { %3421 = vadd.xlane.f32.xlu1 %v3420_v1  ;;  %v11762_v1 = vld [vmem:[#allocation65_spill] sm:$0xff] }
 0x78f   : > { %v5926_v14 = vpop.f32.mrf.mxu1 }
 0x790   : > { %v10863_v32 = vadd.f32 %v5926_v14, %v5856_v52 }
 0x791   : > { %v5928_v43 = vpop.f32.mrf.mxu1 }
 0x792   : > { %v10865_v10 = vadd.f32 %v5928_v43, %v5858_v51  ;;  %v6141_v47 = vmul.f32 %v10863_v32, %v11753_v19 }
 0x794   : > { %v6142_v44 = vmul.f32 %v10865_v10, %v11754_v4  ;;  %v6967_v4 = vld [vmem:[%s11758_s2 + $0x18] sm:$0xff] }
 0x796   : > { %v6144_v59 = vadd.f32 %v6142_v44, %v6141_v47 }
 0x799   : > { %v7057_v36 = vpop.f32.mrf.mxu0 }
 0x79b   : > { %v7058_v49 = vpop.f32.mrf.mxu0 }
 0x79c   : > { %v7059_v63 = vadd.f32 %v7058_v49, %v7057_v36 }
 0x79e   : > { %v5998_v58 = vadd.f32 %v7059_v63, %v5713_v35  ;;  %v1717_v35 = vsub.f32 0.0, %v11762_v1 }
 0x7d0   : > { %v3422_v12 = vpop.xlane.xlu1 %3421 }
 0x7d1   : > { %v3423_v9 = vmul.f32 0.00390625, %v3422_v12 }
 0x7d3   : > { %v3426_v57 = vmul.f32 %v6639_v56, %v3423_v9  ;;  %v11763_v9 = vld [vmem:[#allocation62_spill] sm:$0xff] }
 0x7d4   : > { %v818_v56 = vsub.f32 0.0, %v11763_v9 }
 0x7d5   : > { %v3427_v23 = vsel %vm11757_vm7, %v3426_v57, 0.0  ;;  %v1718_v57 = vmul.f32 1.442695, %v1717_v35 }
 0x7d6   : > { %v3428_v54 = vrot.slane %v3427_v23, 4  ;;  %v819_v0 = vmul.f32 1.442695, %v818_v56 }
 0x7d7   : > { %7268 = vpow2.f32 %v1718_v57 }
 0x7d8   : > { %v3429_v41 = vadd.f32 %v3428_v54, %v3427_v23 }
 0x7da   : > { %v3430_v55 = vrot.slane %v3429_v41, 2 }
 0x7dc   : > { %v3431_v27 = vadd.f32 %v3430_v55, %v3429_v41 }
 0x7de   : > { %v3432_v22 = vrot.slane %v3431_v27, 1 }
 0x7e0   : > { %v3433_v18 = vadd.f32 %v3432_v22, %v3431_v27 }
 0x7e2   : > { %v3434_v46 = vmax.f32 %v3433_v18, 0.0 }
 0x7e4   : > { %v3437_v25 = vmul.f32 %v6640_v15, %v3434_v46  ;;  %v7269_v41 = vpop.eup %7268 }
 0x7e5   : > { %v1720_v55 = vadd.f32 1.0, %v7269_v41 }
 0x7e6   : > { %v3438_v53 = vsel %vm11759_vm15, %v3437_v25, 0.0  ;;  %v11771_v25 = vld [vmem:[#allocation25_spill] sm:$0xff] }
 0x7ec   : > { %v7092_v31 = vpop.f32.mrf.mxu1 }
 0x7ee   : > { %v7093_v8 = vpop.f32.mrf.mxu1 }
 0x7ef   : > { %v7094_v37 = vadd.f32 %v7093_v8, %v7092_v31 }
 0x7f1   : > { %v6068_v38 = vadd.f32 %v7094_v37, %v5998_v58 }
 0x7f5   : > { %v6137_v28 = vpop.f32.mrf.mxu0 }
 0x7f6   : > { %v10871_v24 = vadd.f32 %v6137_v28, %v6068_v38  ;;  %v7497_v38 = vmov 1  }
 0x7f7   : > { %v6139_v45 = vpop.f32.mrf.mxu0  ;;  %7265 = vset.pattern.permute.xlu1 %v7497_v38 }
 0x7f8   : > { %v6143_v29 = vmul.f32 %v10871_v24, %v11755_v30 }
 0x7fa   : > { %v6145_v16 = vadd.f32 %v6144_v59, %v6143_v29  ;;  %v7498_v59 = vmov 2   ;;  %v7499_v29 = vmov 3  }
 0x7fc   : > { %6146 = vadd.xlane.f32.xlu0 %v6145_v16 }
 0x800   : > { %3439 = vadd.xlane.f32.xlu0 %v3438_v53 }
 0x885   : > { %v6147_v6 = vpop.xlane.xlu0 %6146 }
 0x886   : > { %v6148_v33 = vmul.f32 0.00390625, %v6147_v6 }
 0x888   : > { %v6151_v5 = vmul.f32 %v6966_v7, %v6148_v33  ;;  %v11772_v7 = vld [vmem:[#allocation32_spill] sm:$0xff]  ;;  %v11773_v33 = vld [vmem:[#allocation34_spill] sm:$0xff] }
 0x889   : > { %v3440_v60 = vpop.xlane.xlu0 %3439 }
 0x88a   : > { %v6152_v39 = vsel %vm11760_vm12, %v6151_v5, 0.0  ;;  %v3441_v12 = vsub.f32 0.0, %v3440_v60 }
 0x88b   : > { %v6153_v62 = vrot.slane %v6152_v39, 4 }
 0x88c   : > { %v3442_v23 = vmul.f32 1.442695, %v3441_v12 }
 0x88d   : > { %v6154_v13 = vadd.f32 %v6153_v62, %v6152_v39  ;;  %v11774_v39 = vld [vmem:[#allocation28_spill] sm:$0xff] }
 0x88e   : > { %7270 = vpow2.f32 %v3442_v23 }
 0x88f   : > { %v6155_v50 = vrot.slane %v6154_v13, 2  ;;  %7272 = vpow2.f32 %v819_v0 }
 0x891   : > { %v6156_v21 = vadd.f32 %v6155_v50, %v6154_v13  ;;  %v11775_v13 = vld [vmem:[#allocation30_spill] sm:$0xff] }
 0x893   : > { %v6157_v19 = vrot.slane %v6156_v21, 1 }
 0x895   : > { %v6158_v3 = vadd.f32 %v6157_v19, %v6156_v21  ;;  %v11776_v21 = vld [vmem:[#allocation23_spill] sm:$0xff] }
 0x897   : > { %v6159_v11 = vmax.f32 %v6158_v3, 0.0 }
 0x899   : > { %v6162_v30 = vmul.f32 %v6967_v4, %v6159_v11 }
 0x89b   : > { %v6163_v61 = vsel %vm11761_vm1, %v6162_v30, 0.0  ;;  %v7271_v48 = vpop.eup %7270 }
 0x89c   : > { %6164 = vadd.xlane.f32.xlu1 %v6163_v61  ;;  %v7273_v14 = vpop.eup %7272  ;;  %v3444_v36 = vadd.f32 1.0, %v7271_v48 }
 0x89d   : > { %v821_v26 = vadd.f32 1.0, %v7273_v14 }
 0x925   : > { %v6165_v54 = vpop.xlane.xlu1 %6164 }
 0x926   : > { %v6166_v34 = vsub.f32 0.0, %v6165_v54 }
 0x928   : > { %v6167_v40 = vmul.f32 1.442695, %v6166_v34 }
 0x92a   : > { %7274 = vpow2.f32 %v6167_v40 }
 0x92b   : > { %7276 = vrcp.f32 %v1720_v55 }
 0x92c   : > { %7278 = vrcp.f32 %v3444_v36 }
 0x92d   : > { %7280 = vrcp.f32 %v821_v26 }
 0x937   : > { %v7275_v20 = vpop.eup %7274 }
 0x938   : > { %v6169_v43 = vadd.f32 1.0, %v7275_v20  ;;  %v7277_v27 = vpop.eup %7276 }
 0x939   : > { %v7279_v49 = vpop.eup %7278 }
 0x93a   : > { %7282 = vrcp.f32 %v6169_v43  ;;  %v7281_v51 = vpop.eup %7280 }
 0x93b   : > { %v6171_v52 = vsel %vm11764_vm10, %v7281_v51, %v7277_v27 }
 0x93c   : > { %v6172_v63 = vsel %vm11765_vm14, %v6171_v52, %v7279_v49 }
 0x947   : > { %v7283_v31 = vpop.eup %7282 }
 0x948   : > { %v6173_v8 = vsel %vm11766_vm5, %v6172_v63, %v7283_v31 }
 0x949   : > { %v6174_v22 = vsel %vm11767_vm2, %v6173_v8, -inf }
 0x94a   : > { %6175 = vmax.xlane.f32.xlu0 %v6174_v22 }
 0x9d3   : > { %v6176_v37 = vpop.xlane.xlu0 %6175 }
 0x9d4   : > { %v6177_v58 = vsub.f32 %v6173_v8, %v6176_v37 }
 0x9d6   : > { %v6178_v18 = vmul.f32 1.442695, %v6177_v58 }
 0x9d8   : > { %7284 = vpow2.f32 %v6178_v18 }
 0x9e5   : > { %v7285_v47 = vpop.eup %7284 }
 0x9e6   : > { %v6180_v44 = vsel %vm11768_vm6, %v7285_v47, 0.0 }
 0x9e7   : > { %6181 = vadd.xlane.f32.xlu1 %v6180_v44 }
 0xa70   : > { %v6182_v28 = vpop.xlane.xlu1 %6181 }
 0xa71   : > { %7286 = vrcp.f32 %v6182_v28 }
 0xa7e   : > { %v7287_v45 = vpop.eup %7286 }
 0xa7f   : > { %v6184_v46 = vmul.f32 %v7287_v45, %v7285_v47 }
 0xa81   : > { %6197 = vperm.xlu1 %7265, %v6184_v46   ;;  %6187 = vperm.xlu0 %7263, %v6184_v46  }
 0xa85   : > { %7266 = vset.pattern.permute.xlu1 %v7498_v59  ;;  %7267 = vset.pattern.permute.xlu0 %v7499_v29 }
 0xa86   : > { %6208 = vperm.xlu1 %7266, %v6184_v46   ;;  %6219 = vperm.xlu0 %7267, %v6184_v46  }
 0xafc   : > { %v6198_v15 = vpop.permute.xlu1 %6197  ;;  %v6188_v16 = vpop.permute.xlu0 %6187 }
 0xafd   : > { %v6200_v53 = vmul.f32 %v6198_v15, %v11771_v25  ;;  %v6201_v6 = vmul.f32 %v6198_v15, %v11772_v7  ;;  %v6202_v5 = vmul.f32 %v6198_v15, %v11773_v33  ;;  %v6190_v62 = vmul.f32 %v6188_v16, %v11774_v39 }
 0xafe   : > { %v6191_v50 = vmul.f32 %v6188_v16, %v11775_v13  ;;  %v6192_v19 = vmul.f32 %v6188_v16, %v11776_v21 }
 0xaff   : > { %6968 = vst [vmem:[%s363_s1 + $0x18] sm:$0xff] %v6200_v53  ;;  %6969 = vst [vmem:[%s363_s1 + $0x20] sm:$0xff] %v6201_v6 }
 0xb00   : > { %6970 = vst [vmem:[%s363_s1 + $0x28] sm:$0xff] %v6202_v5  ;;  %6193 = vst [vmem:[%s363_s1] sm:$0xff] %v6190_v62 }
 0xb01   : > { %6194 = vst [vmem:[%s363_s1 + $0x8] sm:$0xff] %v6191_v50  ;;  %6195 = vst [vmem:[%s363_s1 + $0x10] sm:$0xff] %v6192_v19  ;;  %v6209_v3 = vpop.permute.xlu1 %6208  ;;  %v6220_v4 = vpop.permute.xlu0 %6219 }
 0xb02   : > { %v6211_v11 = vmul.f32 %v6209_v3, %v10846_v17  ;;  %v6212_v30 = vmul.f32 %v6209_v3, %v10848_v2  ;;  %v6213_v61 = vmul.f32 %v6209_v3, %v10851_v42  ;;  %v6222_v60 = vmul.f32 %v6220_v4, %v10863_v32 }
 0xb03   : > { %v6223_v1 = vmul.f32 %v6220_v4, %v10865_v10  ;;  %v6224_v35 = vmul.f32 %v6220_v4, %v10871_v24 }
 0xb04   : > { %6971 = vst [vmem:[%s363_s1 + $0x30] sm:$0xff] %v6211_v11  ;;  %6972 = vst [vmem:[%s363_s1 + $0x38] sm:$0xff] %v6212_v30 }
 0xb05   : > { %6973 = vst [vmem:[%s363_s1 + $0x40] sm:$0xff] %v6213_v61  ;;  %6974 = vst [vmem:[%s363_s1 + $0x48] sm:$0xff] %v6222_v60 }
 0xb06   : > { %6975 = vst [vmem:[%s363_s1 + $0x50] sm:$0xff] %v6223_v1  ;;  %6976 = vst [vmem:[%s363_s1 + $0x58] sm:$0xff] %v6224_v35 }
 0xb07   : > { %7357 = shalt.err (!%p7354_p0)
}
 0xb08   : > { %s7358_s10 = scalar_lea.hbm %s10911_s6, 1536  ;;  %s7362_s16 = scalar_lea.hbm %s11779_s25, 3072 }
 0xb09   : > { %p7359_p4 = scmp.ne.s32.totalorder %s10911_s6, %s7358_s10  ;;  %p7363_p6 = scmp.lt.s32.totalorder %s10911_s6, %s11779_s25 }
 0xb0a   : > { %p7364_p13 = scmp.lt.s32.totalorder %s7362_s16, %s7358_s10 }
 0xb0b   : > { %p7360_p11 = pnand %p7359_p4, %p11780_p1 }
 0xb0c   : > { %p7365_p3 = por %p7364_p13, %p7363_p6 }
 0xb0d   : > { %p7361_p5 = pneg %p7360_p11 }
 0xb0f   : > { %p7366_p12 = pnand %p7365_p3, %p7361_p5 }
 0xb11   : > { %7369 = shalt.err (!%p7366_p12)
}
 0xb12   : > { %s7501_s17 = smov 384  }
 0xb13   : > { %7127 = dma.vmem_to_hbm [thread:$0]  (%p11780_p1), %s10913_s12, 1536, %s10911_s6, %s6230_s0, %s7501_s17, %s7501_s17, %s11651_s3  }
 0xb14 PF: > { %s11781_s2 = sld [smem:[#allocation12_spill]] }
 0xb15   : > { %s11782_s30 = sld [smem:[#allocation20_spill]] }
 0xb16   : > { %s11783_s7 = sld [smem:[#allocation15_spill]] }
 0xb1a   : > { %s6258_s13 = sand.u32 1, %s11781_s2  }
 0xb1b   : > { %p11784_p7 = scmp.ne.s32.totalorder %s11782_s30, 0  ;;  %s6259_s21 = scalar_lea.sflag [#allocation5], %s6258_s13 }
 0xb1c   : > { %p11785_p8 = scmp.ge.s32.totalorder %s11783_s7, 2 }
 0xb1e   : > { %p7138_p9 = pnand %p11785_p8, %p11784_p7 }
 0xb20   : > { %p7139_p10 = pneg %p7138_p9 }
 0xb22   : > { %7395 = dma.done.wait (%p7139_p10), %s6259_s21, 1536  }
 0xb23   : > { %7397 = vsyncadd (%p7139_p10), %s6259_s21, 4294965760  ;;  %s11786_s12 = sld [smem:[#allocation17_spill]] }
 0xb24   : > { %s11787_s30 = sld [smem:[#allocation13_spill]] }
 0xb25   : > { %s11788_s10 = sld [smem:[#allocation14_spill]] }
 0xb26   : > { %s11789_s11 = sld [smem:[#allocation18_spill]] }
 0xb29   : > { %p23_p2 = scmp.ge.s32.totalorder %s11786_s12, 4  }
 0xb2b   :  { %25 = sbr.rel (!%p23_p2) target bundleno = 17 (0x11), region = 120 }
 0xb30   :  { %6264 = vsyncpa [#allocation4], 1 }
 0xb31   :  { %6266 = vsyncpa [#allocation4 + $0x1], 1 }
 0xb32   :  { %6267 = vsyncpa [#allocation7], 1 }
 0xb33   :  { %6268 = vsyncpa [#allocation5], 1 }
 0xb34   :  { %6270 = vsyncpa [#allocation5 + $0x1], 1 }

</bundles_post_ra>
